<compile_context>
chip_gen: v6e
topology: v6e:2x2x1
jax: 0.10.0
libtpu: 0.0.40
codegen_flags: <defaults>
</compile_context>

<pallas_src>
import functools

import numpy as np
import jax
import jax.numpy as jnp
from jax.experimental import pallas as pl
from jax.experimental.pallas import tpu as pltpu

_EPS = 1e-5
_NEG_SLOPE = 0.2
_STRIDES = (1, 1, 2, 1, 2, 1)          # MiniResNet block strides

# per-block input / output resolution indices (0 = full, 1 = /2, 2 = /4)
_RINS, _ROUTS = [], []
_r = 0
for _s in _STRIDES:
    _RINS.append(_r)
    if _s == 2:
        _r += 1
    _ROUTS.append(_r)


# ------------------------------ in-kernel helpers ---------------------------

def _leaky(y):
    return jnp.where(y > 0, y, _NEG_SLOPE * y)


def _bn_leaky(z, g_ref, b_ref, m, *, act):
    """Training-mode BatchNorm over the M columns (biased batch stats), one
    pass with the scale/shift folded into a single multiply-add; optional
    LeakyReLU(0.2).  z: (C', M) f32;  g_ref / b_ref: (C', 1) refs."""
    inv_m = 1.0 / float(m)
    mu = jnp.sum(z, axis=1, keepdims=True) * inv_m
    var = jnp.maximum(jnp.sum(z * z, axis=1, keepdims=True) * inv_m - mu * mu, 0.0)
    scale = g_ref[...] * jax.lax.rsqrt(var + _EPS)
    shift = b_ref[...] - mu * scale
    y = z * scale + shift
    return _leaky(y) if act else y


def _conv3x3_taps(pad_ref, w_ref, mask_ref, *, m, width, cout):
    """3x3 / stride-1 / pad-1 conv on a channel-major flattened activation.

    pad_ref  : Ref (Cin, m + 2*(width+1)); interior [P, P+m) holds the image in
               (n, h, w) row-major flat order, margins are zero.
    w_ref    : Ref (9*cout, Cin); tap t = 3*di + dj occupies rows
               [t*cout, (t+1)*cout) laid out as W_t[co, ci].
    mask_ref : Ref (9, m); per-tap 0/1 mask killing flat-index wraparound
               across image rows / batch images.
    Returns the (cout, m) f32 pre-BN conv output.
    """
    pad = width + 1
    acc = jnp.zeros((cout, m), jnp.float32)
    for t in range(9):
        di, dj = t // 3, t % 3
        off = pad + (di - 1) * width + (dj - 1)
        xs = pad_ref[:, off:off + m]                       # (Cin, m)
        if t != 4:                                         # centre tap: all-ones mask
            xs = xs * mask_ref[t:t + 1, :]
        wt = w_ref[t * cout:(t + 1) * cout, :]             # (cout, Cin)
        acc = acc + jnp.dot(wt, xs, preferred_element_type=jnp.float32)
    return acc


# ------------------------------ host-side constants --------------------------

def _tap_masks(n, h, w):
    """(9, n*h*w) 0/1 masks: 1 where tap (di,dj) reads a valid in-image pixel."""
    out = np.zeros((9, n * h * w), np.float32)
    hh, ww = np.arange(h), np.arange(w)
    for t in range(9):
        di, dj = t // 3, t % 3
        hv = (hh + di - 1 >= 0) & (hh + di - 1 < h)
        wv = (ww + dj - 1 >= 0) & (ww + dj - 1 < w)
        mk = (hv[:, None] & wv[None, :]).astype(np.float32).reshape(-1)
        out[t] = np.tile(mk, n)
    return out


def _subsample_matrix(n, h, w):
    """(n*h*w, n*(h//2)*(w//2)) 0/1 selector picking even (h, w) positions."""
    ho, wo = h // 2, w // 2
    s = np.zeros((n * h * w, n * ho * wo), np.float32)
    for nn in range(n):
        for i in range(ho):
            for j in range(wo):
                s[nn * h * w + (2 * i) * w + 2 * j,
                  nn * ho * wo + i * wo + j] = 1.0
    return s


# ------------------------------ parameters -----------------------------------

def init_mini_resnet_params(key, c):
    """Parameters for MiniResNet(inchannel=c, outchannel=c).

    Conv biases are omitted on purpose: a per-channel constant added before a
    training-mode BatchNorm is exactly cancelled by its mean subtraction.
    """
    # TODO(synk): inchannel != outchannel first-block variant (1x1 stride-1
    # shortcut) is not implemented; MiniResNet's default uses equal channels.
    params = []
    std = 1.0 / np.sqrt(9.0 * c)
    for stride in _STRIDES:
        key, kc, ks, kg1, kb1, kw2, kg2, kb2 = jax.random.split(key, 8)
        wc = std * jax.random.normal(kc, (9, c, c), jnp.float32)          # conv1
        if stride == 1:
            w1, c1 = wc.reshape(9 * c, c), c
        else:  # fuse conv1 with the 3x3 stride-2 shortcut along Cout
            wsc = std * jax.random.normal(ks, (9, c, c), jnp.float32)
            w1, c1 = jnp.concatenate([wc, wsc], axis=1).reshape(9 * 2 * c, c), 2 * c
        params.append(dict(
            w1=w1,
            g1=1.0 + 0.1 * jax.random.normal(kg1, (c1, 1), jnp.float32),
            beta1=0.1 * jax.random.normal(kb1, (c1, 1), jnp.float32),
            w2=(std * jax.random.normal(kw2, (9, c, c), jnp.float32)).reshape(9 * c, c),
            g2=1.0 + 0.1 * jax.random.normal(kg2, (c, 1), jnp.float32),
            beta2=0.1 * jax.random.normal(kb2, (c, 1), jnp.float32)))
    return params


# ------------------------------ fused forward --------------------------------

def mini_resnet_forward(x_nchw, params):
    n, c, h, w = x_nchw.shape
    assert h % 4 == 0 and w % 4 == 0, "two stride-2 blocks need H, W % 4 == 0"
    assert len(params) == 6

    res = [(h, w), (h // 2, w // 2), (h // 4, w // 4)]     # the 3 resolutions
    ms = [n * hh * ww for hh, ww in res]                   # flattened sizes
    pads = [ww + 1 for hh, ww in res]                      # flat margin widths

    # glue: channel-major flattening + zero margins for block 1's conv taps
    x2d = jnp.transpose(x_nchw, (1, 0, 2, 3)).reshape(c, ms[0])
    xpad = jnp.pad(x2d, ((0, 0), (pads[0], pads[0])))

    masks = [jnp.asarray(_tap_masks(n, hh, ww)) for hh, ww in res]
    subs = [jnp.asarray(_subsample_matrix(n, *res[0])),
            jnp.asarray(_subsample_matrix(n, *res[1]))]

    operands = [xpad] + masks + subs
    for p in params:
        operands += [p["w1"], p["g1"], p["beta1"], p["w2"], p["g2"], p["beta2"]]

    def kernel(*refs):
        xin_ref = refs[0]
        mask_refs = refs[1:4]
        sub_refs = refs[4:6]
        blk = [refs[6 + 6 * b: 12 + 6 * b] for b in range(6)]
        o_ref = refs[42]
        scratch = refs[43:]            # [a16, b16, a8, b8, a4, b4] padded bufs

        # zero the padded scratch once: interiors get overwritten per block,
        # margins stay zero (they provide the conv zero-padding).
        for s_ref in scratch:
            s_ref[...] = jnp.zeros(s_ref.shape, jnp.float32)

        cur = xin_ref[:, pads[0]:pads[0] + ms[0]]          # current act (C, M)
        cur_pad = xin_ref                                  # padded ref holding it

        for b, stride in enumerate(_STRIDES):
            rin, rout = _RINS[b], _ROUTS[b]
            wi, wo = res[rin][1], res[rout][1]
            mi, mo = ms[rin], ms[rout]
            w1_ref, g1_ref, b1_ref, w2_ref, g2_ref, b2_ref = blk[b]

            if stride == 1:
                # conv1 (CxC, stride 1) + BN + LeakyReLU; identity shortcut
                z1 = _conv3x3_taps(cur_pad, w1_ref, mask_refs[rin],
                                   m=mi, width=wi, cout=c)
                y1 = _bn_leaky(z1, g1_ref, b1_ref, mi, act=True)
                shortcut = cur
            else:
                # fused [conv1 | 3x3 shortcut] at full res, exact 2x subsample
                # (stride-2 conv == stride-1 conv sampled at even positions),
                # joint per-channel BN, LeakyReLU on the conv1 half only.
                zf = _conv3x3_taps(cur_pad, w1_ref, mask_refs[rin],
                                   m=mi, width=wi, cout=2 * c)
                zs = jnp.dot(zf, sub_refs[rout - 1][...],
                             preferred_element_type=jnp.float32)
                zs = _bn_leaky(zs, g1_ref, b1_ref, mo, act=False)
                y1 = _leaky(zs[:c, :])
                shortcut = zs[c:, :]

            # stage y1 in the padded buffer of the output resolution
            y1_pad = scratch[2 * rout + 1]
            y1_pad[:, pads[rout]:pads[rout] + mo] = y1

            # conv2 (stride 1) + BN, residual add, final LeakyReLU
            z2 = _conv3x3_taps(y1_pad, w2_ref, mask_refs[rout],
                               m=mo, width=wo, cout=c)
            z2 = _bn_leaky(z2, g2_ref, b2_ref, mo, act=False)
            cur = _leaky(z2 + shortcut)

            if b < 5:                                      # stage for next block
                nxt = scratch[2 * rout]
                nxt[:, pads[rout]:pads[rout] + mo] = cur
                cur_pad = nxt
            else:
                o_ref[...] = cur

    vmem = functools.partial(pl.BlockSpec, memory_space=pltpu.MemorySpace.VMEM)
    scratch_shapes = [pltpu.VMEM((c, ms[r] + 2 * pads[r]), jnp.float32)
                      for r in range(3) for _ in range(2)]

    flops = 0
    for b, s in enumerate(_STRIDES):
        mi, mo = ms[_RINS[b]], ms[_ROUTS[b]]
        c1 = c if s == 1 else 2 * c
        flops += 2 * 9 * c * c1 * mi + 2 * 9 * c * c * mo
        if s == 2:
            flops += 2 * c1 * mi * mo
    bytes_accessed = int(sum(int(np.prod(op.shape)) for op in operands) * 4
                         + c * ms[2] * 4)

    out2d = pl.pallas_call(
        kernel,
        out_shape=jax.ShapeDtypeStruct((c, ms[2]), jnp.float32),
        in_specs=[vmem() for _ in operands],
        out_specs=vmem(),
        scratch_shapes=scratch_shapes,
        compiler_params=pltpu.CompilerParams(vmem_limit_bytes=32 * 1024 * 1024),
        cost_estimate=pl.CostEstimate(flops=int(flops), transcendentals=64,
                                      bytes_accessed=bytes_accessed),
    )(*operands)

    out = out2d.reshape(c, n, res[2][0], res[2][1])
    return jnp.transpose(out, (1, 0, 2, 3))                # back to NCHW


# ------------------------------ pure-JAX reference ---------------------------

def reference_forward(x_nchw, params):
    """lax.conv based reference with identical math, used for verification."""
    n, c, h, w = x_nchw.shape

    def conv3x3(x, wflat, cout, stride):
        wk = jnp.transpose(wflat.reshape(3, 3, cout, c), (2, 3, 0, 1))  # OIHW
        return jax.lax.conv_general_dilated(
            x, wk, window_strides=(stride, stride), padding=((1, 1), (1, 1)),
            dimension_numbers=("NCHW", "OIHW", "NCHW"),
            precision=jax.lax.Precision.HIGHEST)

    def bn(y, g, b):
        mu = jnp.mean(y, axis=(0, 2, 3), keepdims=True)
        var = jnp.mean(jnp.square(y - mu), axis=(0, 2, 3), keepdims=True)
        return ((y - mu) * jax.lax.rsqrt(var + _EPS) * g.reshape(1, -1, 1, 1)
                + b.reshape(1, -1, 1, 1))

    def leaky(y):
        return jnp.where(y > 0, y, _NEG_SLOPE * y)

    cur = x_nchw
    for p, stride in zip(params, _STRIDES):
        if stride == 1:
            y1 = leaky(bn(conv3x3(cur, p["w1"], c, 1), p["g1"], p["beta1"]))
            shortcut = cur
        else:
            z = bn(conv3x3(cur, p["w1"], 2 * c, 2), p["g1"], p["beta1"])
            y1 = leaky(z[:, :c])
            shortcut = z[:, c:]
        y2 = bn(conv3x3(y1, p["w2"], c, 1), p["g2"], p["beta2"])
        cur = leaky(y2 + shortcut)
    return cur


# ----------------------------------- main ------------------------------------

if __name__ == "__main__":
    key = jax.random.PRNGKey(0)
    kx, kp = jax.random.split(key)

    N, C, H, W = 2, 4, 16, 16          # MiniResNet(inchannel=4, outchannel=4)
    x = jax.random.normal(kx, (N, C, H, W), jnp.float32)
    params = init_mini_resnet_params(kp, C)

    fwd = jax.jit(lambda inp: mini_resnet_forward(inp, params))
    out = jax.block_until_ready(fwd(x))

    # two stride-2 blocks downsample 16 -> 8 -> 4
    assert out.shape == (N, C, H // 4, W // 4), out.shape
    assert bool(jnp.all(jnp.isfinite(out)))

    # verify against a pure-JAX implementation of the same module.
    # Tolerance is loose only to cover possible bf16 MXU passes in either the
    # XLA conv or the in-kernel dots across 12 stacked conv+BN layers.
    ref = reference_forward(x, params)
    np.testing.assert_allclose(np.asarray(out), np.asarray(ref),
                               rtol=5e-2, atol=5e-2)

    print("KERNEL_OK")
</pallas_src>

<mosaic_0001>
module attributes {stable_mosaic.version = 11 : i64} {
  func.func @kernel(%arg0: memref<4x546xf32, #tpu.memory_space<vmem>>, %arg1: memref<9x512xf32, #tpu.memory_space<vmem>>, %arg2: memref<9x128xf32, #tpu.memory_space<vmem>>, %arg3: memref<9x32xf32, #tpu.memory_space<vmem>>, %arg4: memref<512x128xf32, #tpu.memory_space<vmem>>, %arg5: memref<128x32xf32, #tpu.memory_space<vmem>>, %arg6: memref<36x4xf32, #tpu.memory_space<vmem>>, %arg7: memref<4x1xf32, #tpu.memory_space<vmem>>, %arg8: memref<4x1xf32, #tpu.memory_space<vmem>>, %arg9: memref<36x4xf32, #tpu.memory_space<vmem>>, %arg10: memref<4x1xf32, #tpu.memory_space<vmem>>, %arg11: memref<4x1xf32, #tpu.memory_space<vmem>>, %arg12: memref<36x4xf32, #tpu.memory_space<vmem>>, %arg13: memref<4x1xf32, #tpu.memory_space<vmem>>, %arg14: memref<4x1xf32, #tpu.memory_space<vmem>>, %arg15: memref<36x4xf32, #tpu.memory_space<vmem>>, %arg16: memref<4x1xf32, #tpu.memory_space<vmem>>, %arg17: memref<4x1xf32, #tpu.memory_space<vmem>>, %arg18: memref<72x4xf32, #tpu.memory_space<vmem>>, %arg19: memref<8x1xf32, #tpu.memory_space<vmem>>, %arg20: memref<8x1xf32, #tpu.memory_space<vmem>>, %arg21: memref<36x4xf32, #tpu.memory_space<vmem>>, %arg22: memref<4x1xf32, #tpu.memory_space<vmem>>, %arg23: memref<4x1xf32, #tpu.memory_space<vmem>>, %arg24: memref<36x4xf32, #tpu.memory_space<vmem>>, %arg25: memref<4x1xf32, #tpu.memory_space<vmem>>, %arg26: memref<4x1xf32, #tpu.memory_space<vmem>>, %arg27: memref<36x4xf32, #tpu.memory_space<vmem>>, %arg28: memref<4x1xf32, #tpu.memory_space<vmem>>, %arg29: memref<4x1xf32, #tpu.memory_space<vmem>>, %arg30: memref<72x4xf32, #tpu.memory_space<vmem>>, %arg31: memref<8x1xf32, #tpu.memory_space<vmem>>, %arg32: memref<8x1xf32, #tpu.memory_space<vmem>>, %arg33: memref<36x4xf32, #tpu.memory_space<vmem>>, %arg34: memref<4x1xf32, #tpu.memory_space<vmem>>, %arg35: memref<4x1xf32, #tpu.memory_space<vmem>>, %arg36: memref<36x4xf32, #tpu.memory_space<vmem>>, %arg37: memref<4x1xf32, #tpu.memory_space<vmem>>, %arg38: memref<4x1xf32, #tpu.memory_space<vmem>>, %arg39: memref<36x4xf32, #tpu.memory_space<vmem>>, %arg40: memref<4x1xf32, #tpu.memory_space<vmem>>, %arg41: memref<4x1xf32, #tpu.memory_space<vmem>>, %arg42: memref<4x32xf32, #tpu.memory_space<vmem>>, %arg43: memref<4x546xf32, #tpu.memory_space<vmem>>, %arg44: memref<4x546xf32, #tpu.memory_space<vmem>>, %arg45: memref<4x146xf32, #tpu.memory_space<vmem>>, %arg46: memref<4x146xf32, #tpu.memory_space<vmem>>, %arg47: memref<4x42xf32, #tpu.memory_space<vmem>>, %arg48: memref<4x42xf32, #tpu.memory_space<vmem>>) attributes {dimension_semantics = [], scalar_prefetch = 0 : i64, scratch_operands = 6 : i64, tpu.core_type = #tpu.core_type<tc>} {
    %cst = arith.constant 0.000000e+00 : f32
    %0 = vector.broadcast %cst : f32 to vector<4x546xf32>
    %c0 = arith.constant 0 : index
    %c0_0 = arith.constant 0 : index
    %1 = vector.load %arg43[%c0, %c0_0] : memref<4x546xf32, #tpu.memory_space<vmem>>, vector<4x546xf32>
    tpu.vector_store %arg43[%c0, %c0_0], %0 {strides = array<i32>} : memref<4x546xf32, #tpu.memory_space<vmem>>, vector<4x546xf32>,
    %cst_1 = arith.constant 0.000000e+00 : f32
    %2 = vector.broadcast %cst_1 : f32 to vector<4x546xf32>
    %c0_2 = arith.constant 0 : index
    %c0_3 = arith.constant 0 : index
    %3 = vector.load %arg44[%c0_2, %c0_3] : memref<4x546xf32, #tpu.memory_space<vmem>>, vector<4x546xf32>
    tpu.vector_store %arg44[%c0_2, %c0_3], %2 {strides = array<i32>} : memref<4x546xf32, #tpu.memory_space<vmem>>, vector<4x546xf32>,
    %cst_4 = arith.constant 0.000000e+00 : f32
    %4 = vector.broadcast %cst_4 : f32 to vector<4x146xf32>
    %c0_5 = arith.constant 0 : index
    %c0_6 = arith.constant 0 : index
    %5 = vector.load %arg45[%c0_5, %c0_6] : memref<4x146xf32, #tpu.memory_space<vmem>>, vector<4x146xf32>
    tpu.vector_store %arg45[%c0_5, %c0_6], %4 {strides = array<i32>} : memref<4x146xf32, #tpu.memory_space<vmem>>, vector<4x146xf32>,
    %cst_7 = arith.constant 0.000000e+00 : f32
    %6 = vector.broadcast %cst_7 : f32 to vector<4x146xf32>
    %c0_8 = arith.constant 0 : index
    %c0_9 = arith.constant 0 : index
    %7 = vector.load %arg46[%c0_8, %c0_9] : memref<4x146xf32, #tpu.memory_space<vmem>>, vector<4x146xf32>
    tpu.vector_store %arg46[%c0_8, %c0_9], %6 {strides = array<i32>} : memref<4x146xf32, #tpu.memory_space<vmem>>, vector<4x146xf32>,
    %cst_10 = arith.constant 0.000000e+00 : f32
    %8 = vector.broadcast %cst_10 : f32 to vector<4x42xf32>
    %c0_11 = arith.constant 0 : index
    %c0_12 = arith.constant 0 : index
    %9 = vector.load %arg47[%c0_11, %c0_12] : memref<4x42xf32, #tpu.memory_space<vmem>>, vector<4x42xf32>
    tpu.vector_store %arg47[%c0_11, %c0_12], %8 {strides = array<i32>} : memref<4x42xf32, #tpu.memory_space<vmem>>, vector<4x42xf32>,
    %cst_13 = arith.constant 0.000000e+00 : f32
    %10 = vector.broadcast %cst_13 : f32 to vector<4x42xf32>
    %c0_14 = arith.constant 0 : index
    %c0_15 = arith.constant 0 : index
    %11 = vector.load %arg48[%c0_14, %c0_15] : memref<4x42xf32, #tpu.memory_space<vmem>>, vector<4x42xf32>
    tpu.vector_store %arg48[%c0_14, %c0_15], %10 {strides = array<i32>} : memref<4x42xf32, #tpu.memory_space<vmem>>, vector<4x42xf32>,
    %c0_16 = arith.constant 0 : index
    %c17 = arith.constant 17 : index
    %12 = vector.load %arg0[%c0_16, %c17] : memref<4x546xf32, #tpu.memory_space<vmem>>, vector<4x512xf32>
    %cst_17 = arith.constant 0.000000e+00 : f32
    %13 = vector.broadcast %cst_17 : f32 to vector<4x512xf32>
    %c0_18 = arith.constant 0 : index
    %c0_19 = arith.constant 0 : index
    %14 = vector.load %arg0[%c0_18, %c0_19] : memref<4x546xf32, #tpu.memory_space<vmem>>, vector<4x512xf32>
    %c0_20 = arith.constant 0 : index
    %c0_21 = arith.constant 0 : index
    %15 = vector.load %arg1[%c0_20, %c0_21] : memref<9x512xf32, #tpu.memory_space<vmem>>, vector<1x512xf32>
    %16 = vector.broadcast %15 : vector<1x512xf32> to vector<4x512xf32>
    %17 = arith.mulf %14, %16 : vector<4x512xf32>
    %c0_22 = arith.constant 0 : index
    %c0_23 = arith.constant 0 : index
    %18 = vector.load %arg6[%c0_22, %c0_23] : memref<36x4xf32, #tpu.memory_space<vmem>>, vector<4x4xf32>
    %cst_24 = arith.constant dense<0.000000e+00> : vector<4x512xf32>
    %19 = tpu.matmul %18, %17, %cst_24 {dimension_numbers = #tpu.dot_dimension_numbers<[1], [0], [0], [1], [0, 0, 1, 1], [], []>} : vector<4x4xf32>, vector<4x512xf32>, vector<4x512xf32> -> vector<4x512xf32>
    %20 = arith.addf %13, %19 : vector<4x512xf32>
    %c0_25 = arith.constant 0 : index
    %c1 = arith.constant 1 : index
    %21 = vector.load %arg0[%c0_25, %c1] : memref<4x546xf32, #tpu.memory_space<vmem>>, vector<4x512xf32>
    %c1_26 = arith.constant 1 : index
    %c0_27 = arith.constant 0 : index
    %22 = vector.load %arg1[%c1_26, %c0_27] : memref<9x512xf32, #tpu.memory_space<vmem>>, vector<1x512xf32>
    %23 = vector.broadcast %22 : vector<1x512xf32> to vector<4x512xf32>
    %24 = arith.mulf %21, %23 : vector<4x512xf32>
    %c4 = arith.constant 4 : index
    %c0_28 = arith.constant 0 : index
    %25 = vector.load %arg6[%c4, %c0_28] : memref<36x4xf32, #tpu.memory_space<vmem>>, vector<4x4xf32>
    %cst_29 = arith.constant dense<0.000000e+00> : vector<4x512xf32>
    %26 = tpu.matmul %25, %24, %cst_29 {dimension_numbers = #tpu.dot_dimension_numbers<[1], [0], [0], [1], [0, 0, 1, 1], [], []>} : vector<4x4xf32>, vector<4x512xf32>, vector<4x512xf32> -> vector<4x512xf32>
    %27 = arith.addf %20, %26 : vector<4x512xf32>
    %c0_30 = arith.constant 0 : index
    %c2 = arith.constant 2 : index
    %28 = vector.load %arg0[%c0_30, %c2] : memref<4x546xf32, #tpu.memory_space<vmem>>, vector<4x512xf32>
    %c2_31 = arith.constant 2 : index
    %c0_32 = arith.constant 0 : index
    %29 = vector.load %arg1[%c2_31, %c0_32] : memref<9x512xf32, #tpu.memory_space<vmem>>, vector<1x512xf32>
    %30 = vector.broadcast %29 : vector<1x512xf32> to vector<4x512xf32>
    %31 = arith.mulf %28, %30 : vector<4x512xf32>
    %c8 = arith.constant 8 : index
    %c0_33 = arith.constant 0 : index
    %32 = vector.load %arg6[%c8, %c0_33] : memref<36x4xf32, #tpu.memory_space<vmem>>, vector<4x4xf32>
    %cst_34 = arith.constant dense<0.000000e+00> : vector<4x512xf32>
    %33 = tpu.matmul %32, %31, %cst_34 {dimension_numbers = #tpu.dot_dimension_numbers<[1], [0], [0], [1], [0, 0, 1, 1], [], []>} : vector<4x4xf32>, vector<4x512xf32>, vector<4x512xf32> -> vector<4x512xf32>
    %34 = arith.addf %27, %33 : vector<4x512xf32>
    %c0_35 = arith.constant 0 : index
    %c16 = arith.constant 16 : index
    %35 = vector.load %arg0[%c0_35, %c16] : memref<4x546xf32, #tpu.memory_space<vmem>>, vector<4x512xf32>
    %c3 = arith.constant 3 : index
    %c0_36 = arith.constant 0 : index
    %36 = vector.load %arg1[%c3, %c0_36] : memref<9x512xf32, #tpu.memory_space<vmem>>, vector<1x512xf32>
    %37 = vector.broadcast %36 : vector<1x512xf32> to vector<4x512xf32>
    %38 = arith.mulf %35, %37 : vector<4x512xf32>
    %c12 = arith.constant 12 : index
    %c0_37 = arith.constant 0 : index
    %39 = vector.load %arg6[%c12, %c0_37] : memref<36x4xf32, #tpu.memory_space<vmem>>, vector<4x4xf32>
    %cst_38 = arith.constant dense<0.000000e+00> : vector<4x512xf32>
    %40 = tpu.matmul %39, %38, %cst_38 {dimension_numbers = #tpu.dot_dimension_numbers<[1], [0], [0], [1], [0, 0, 1, 1], [], []>} : vector<4x4xf32>, vector<4x512xf32>, vector<4x512xf32> -> vector<4x512xf32>
    %41 = arith.addf %34, %40 : vector<4x512xf32>
    %c0_39 = arith.constant 0 : index
    %c17_40 = arith.constant 17 : index
    %42 = vector.load %arg0[%c0_39, %c17_40] : memref<4x546xf32, #tpu.memory_space<vmem>>, vector<4x512xf32>
    %c16_41 = arith.constant 16 : index
    %c0_42 = arith.constant 0 : index
    %43 = vector.load %arg6[%c16_41, %c0_42] : memref<36x4xf32, #tpu.memory_space<vmem>>, vector<4x4xf32>
    %cst_43 = arith.constant dense<0.000000e+00> : vector<4x512xf32>
    %44 = tpu.matmul %43, %42, %cst_43 {dimension_numbers = #tpu.dot_dimension_numbers<[1], [0], [0], [1], [0, 0, 1, 1], [], []>} : vector<4x4xf32>, vector<4x512xf32>, vector<4x512xf32> -> vector<4x512xf32>
    %45 = arith.addf %41, %44 : vector<4x512xf32>
    %c0_44 = arith.constant 0 : index
    %c18 = arith.constant 18 : index
    %46 = vector.load %arg0[%c0_44, %c18] : memref<4x546xf32, #tpu.memory_space<vmem>>, vector<4x512xf32>
    %c5 = arith.constant 5 : index
    %c0_45 = arith.constant 0 : index
    %47 = vector.load %arg1[%c5, %c0_45] : memref<9x512xf32, #tpu.memory_space<vmem>>, vector<1x512xf32>
    %48 = vector.broadcast %47 : vector<1x512xf32> to vector<4x512xf32>
    %49 = arith.mulf %46, %48 : vector<4x512xf32>
    %c20 = arith.constant 20 : index
    %c0_46 = arith.constant 0 : index
    %50 = vector.load %arg6[%c20, %c0_46] : memref<36x4xf32, #tpu.memory_space<vmem>>, vector<4x4xf32>
    %cst_47 = arith.constant dense<0.000000e+00> : vector<4x512xf32>
    %51 = tpu.matmul %50, %49, %cst_47 {dimension_numbers = #tpu.dot_dimension_numbers<[1], [0], [0], [1], [0, 0, 1, 1], [], []>} : vector<4x4xf32>, vector<4x512xf32>, vector<4x512xf32> -> vector<4x512xf32>
    %52 = arith.addf %45, %51 : vector<4x512xf32>
    %c0_48 = arith.constant 0 : index
    %c32 = arith.constant 32 : index
    %53 = vector.load %arg0[%c0_48, %c32] : memref<4x546xf32, #tpu.memory_space<vmem>>, vector<4x512xf32>
    %c6 = arith.constant 6 : index
    %c0_49 = arith.constant 0 : index
    %54 = vector.load %arg1[%c6, %c0_49] : memref<9x512xf32, #tpu.memory_space<vmem>>, vector<1x512xf32>
    %55 = vector.broadcast %54 : vector<1x512xf32> to vector<4x512xf32>
    %56 = arith.mulf %53, %55 : vector<4x512xf32>
    %c24 = arith.constant 24 : index
    %c0_50 = arith.constant 0 : index
    %57 = vector.load %arg6[%c24, %c0_50] : memref<36x4xf32, #tpu.memory_space<vmem>>, vector<4x4xf32>
    %cst_51 = arith.constant dense<0.000000e+00> : vector<4x512xf32>
    %58 = tpu.matmul %57, %56, %cst_51 {dimension_numbers = #tpu.dot_dimension_numbers<[1], [0], [0], [1], [0, 0, 1, 1], [], []>} : vector<4x4xf32>, vector<4x512xf32>, vector<4x512xf32> -> vector<4x512xf32>
    %59 = arith.addf %52, %58 : vector<4x512xf32>
    %c0_52 = arith.constant 0 : index
    %c33 = arith.constant 33 : index
    %60 = vector.load %arg0[%c0_52, %c33] : memref<4x546xf32, #tpu.memory_space<vmem>>, vector<4x512xf32>
    %c7 = arith.constant 7 : index
    %c0_53 = arith.constant 0 : index
    %61 = vector.load %arg1[%c7, %c0_53] : memref<9x512xf32, #tpu.memory_space<vmem>>, vector<1x512xf32>
    %62 = vector.broadcast %61 : vector<1x512xf32> to vector<4x512xf32>
    %63 = arith.mulf %60, %62 : vector<4x512xf32>
    %c28 = arith.constant 28 : index
    %c0_54 = arith.constant 0 : index
    %64 = vector.load %arg6[%c28, %c0_54] : memref<36x4xf32, #tpu.memory_space<vmem>>, vector<4x4xf32>
    %cst_55 = arith.constant dense<0.000000e+00> : vector<4x512xf32>
    %65 = tpu.matmul %64, %63, %cst_55 {dimension_numbers = #tpu.dot_dimension_numbers<[1], [0], [0], [1], [0, 0, 1, 1], [], []>} : vector<4x4xf32>, vector<4x512xf32>, vector<4x512xf32> -> vector<4x512xf32>
    %66 = arith.addf %59, %65 : vector<4x512xf32>
    %c0_56 = arith.constant 0 : index
    %c34 = arith.constant 34 : index
    %67 = vector.load %arg0[%c0_56, %c34] : memref<4x546xf32, #tpu.memory_space<vmem>>, vector<4x512xf32>
    %c8_57 = arith.constant 8 : index
    %c0_58 = arith.constant 0 : index
    %68 = vector.load %arg1[%c8_57, %c0_58] : memref<9x512xf32, #tpu.memory_space<vmem>>, vector<1x512xf32>
    %69 = vector.broadcast %68 : vector<1x512xf32> to vector<4x512xf32>
    %70 = arith.mulf %67, %69 : vector<4x512xf32>
    %c32_59 = arith.constant 32 : index
    %c0_60 = arith.constant 0 : index
    %71 = vector.load %arg6[%c32_59, %c0_60] : memref<36x4xf32, #tpu.memory_space<vmem>>, vector<4x4xf32>
    %cst_61 = arith.constant dense<0.000000e+00> : vector<4x512xf32>
    %72 = tpu.matmul %71, %70, %cst_61 {dimension_numbers = #tpu.dot_dimension_numbers<[1], [0], [0], [1], [0, 0, 1, 1], [], []>} : vector<4x4xf32>, vector<4x512xf32>, vector<4x512xf32> -> vector<4x512xf32>
    %73 = arith.addf %66, %72 : vector<4x512xf32>
    %cst_62 = arith.constant dense<0.000000e+00> : vector<4xf32>
    %74 = vector.multi_reduction <add>, %73, %cst_62 [1] : vector<4x512xf32> to vector<4xf32>
    %75 = vector.shape_cast %74 : vector<4xf32> to vector<4x1xf32>
    %cst_63 = arith.constant 0.001953125 : f32
    %76 = vector.broadcast %cst_63 : f32 to vector<4x1xf32>
    %77 = arith.mulf %75, %76 : vector<4x1xf32>
    %78 = arith.mulf %73, %73 : vector<4x512xf32>
    %cst_64 = arith.constant dense<0.000000e+00> : vector<4xf32>
    %79 = vector.multi_reduction <add>, %78, %cst_64 [1] : vector<4x512xf32> to vector<4xf32>
    %80 = vector.shape_cast %79 : vector<4xf32> to vector<4x1xf32>
    %cst_65 = arith.constant 0.001953125 : f32
    %81 = vector.broadcast %cst_65 : f32 to vector<4x1xf32>
    %82 = arith.mulf %80, %81 : vector<4x1xf32>
    %83 = arith.mulf %77, %77 : vector<4x1xf32>
    %84 = arith.subf %82, %83 : vector<4x1xf32>
    %cst_66 = arith.constant 0.000000e+00 : f32
    %85 = vector.broadcast %cst_66 : f32 to vector<4x1xf32>
    %86 = arith.maximumf %84, %85 : vector<4x1xf32>
    %c0_67 = arith.constant 0 : index
    %c0_68 = arith.constant 0 : index
    %87 = vector.load %arg7[%c0_67, %c0_68] : memref<4x1xf32, #tpu.memory_space<vmem>>, vector<4x1xf32>
    %cst_69 = arith.constant 9.99999974E-6 : f32
    %88 = vector.broadcast %cst_69 : f32 to vector<4x1xf32>
    %89 = arith.addf %86, %88 : vector<4x1xf32>
    %90 = math.rsqrt %89 : vector<4x1xf32>
    %91 = arith.mulf %87, %90 : vector<4x1xf32>
    %c0_70 = arith.constant 0 : index
    %c0_71 = arith.constant 0 : index
    %92 = vector.load %arg8[%c0_70, %c0_71] : memref<4x1xf32, #tpu.memory_space<vmem>>, vector<4x1xf32>
    %93 = arith.mulf %77, %91 : vector<4x1xf32>
    %94 = arith.subf %92, %93 : vector<4x1xf32>
    %95 = vector.broadcast %91 : vector<4x1xf32> to vector<4x512xf32>
    %96 = arith.mulf %73, %95 : vector<4x512xf32>
    %97 = vector.broadcast %94 : vector<4x1xf32> to vector<4x512xf32>
    %98 = arith.addf %96, %97 : vector<4x512xf32>
    %cst_72 = arith.constant 0.000000e+00 : f32
    %99 = vector.broadcast %cst_72 : f32 to vector<4x512xf32>
    %100 = arith.cmpf ogt, %98, %99 : vector<4x512xf32>
    %cst_73 = arith.constant 2.000000e-01 : f32
    %101 = vector.broadcast %cst_73 : f32 to vector<4x512xf32>
    %102 = arith.mulf %101, %98 : vector<4x512xf32>
    %103 = arith.select %100, %98, %102 : vector<4x512xi1>, vector<4x512xf32>
    %c0_74 = arith.constant 0 : index
    %c17_75 = arith.constant 17 : index
    %104 = vector.load %arg44[%c0_74, %c17_75] : memref<4x546xf32, #tpu.memory_space<vmem>>, vector<4x512xf32>
    tpu.vector_store %arg44[%c0_74, %c17_75], %103 {strides = array<i32>} : memref<4x546xf32, #tpu.memory_space<vmem>>, vector<4x512xf32>,
    %cst_76 = arith.constant 0.000000e+00 : f32
    %105 = vector.broadcast %cst_76 : f32 to vector<4x512xf32>
    %c0_77 = arith.constant 0 : index
    %c0_78 = arith.constant 0 : index
    %106 = vector.load %arg44[%c0_77, %c0_78] : memref<4x546xf32, #tpu.memory_space<vmem>>, vector<4x512xf32>
    %c0_79 = arith.constant 0 : index
    %c0_80 = arith.constant 0 : index
    %107 = vector.load %arg1[%c0_79, %c0_80] : memref<9x512xf32, #tpu.memory_space<vmem>>, vector<1x512xf32>
    %108 = vector.broadcast %107 : vector<1x512xf32> to vector<4x512xf32>
    %109 = arith.mulf %106, %108 : vector<4x512xf32>
    %c0_81 = arith.constant 0 : index
    %c0_82 = arith.constant 0 : index
    %110 = vector.load %arg9[%c0_81, %c0_82] : memref<36x4xf32, #tpu.memory_space<vmem>>, vector<4x4xf32>
    %cst_83 = arith.constant dense<0.000000e+00> : vector<4x512xf32>
    %111 = tpu.matmul %110, %109, %cst_83 {dimension_numbers = #tpu.dot_dimension_numbers<[1], [0], [0], [1], [0, 0, 1, 1], [], []>} : vector<4x4xf32>, vector<4x512xf32>, vector<4x512xf32> -> vector<4x512xf32>
    %112 = arith.addf %105, %111 : vector<4x512xf32>
    %c0_84 = arith.constant 0 : index
    %c1_85 = arith.constant 1 : index
    %113 = vector.load %arg44[%c0_84, %c1_85] : memref<4x546xf32, #tpu.memory_space<vmem>>, vector<4x512xf32>
    %c1_86 = arith.constant 1 : index
    %c0_87 = arith.constant 0 : index
    %114 = vector.load %arg1[%c1_86, %c0_87] : memref<9x512xf32, #tpu.memory_space<vmem>>, vector<1x512xf32>
    %115 = vector.broadcast %114 : vector<1x512xf32> to vector<4x512xf32>
    %116 = arith.mulf %113, %115 : vector<4x512xf32>
    %c4_88 = arith.constant 4 : index
    %c0_89 = arith.constant 0 : index
    %117 = vector.load %arg9[%c4_88, %c0_89] : memref<36x4xf32, #tpu.memory_space<vmem>>, vector<4x4xf32>
    %cst_90 = arith.constant dense<0.000000e+00> : vector<4x512xf32>
    %118 = tpu.matmul %117, %116, %cst_90 {dimension_numbers = #tpu.dot_dimension_numbers<[1], [0], [0], [1], [0, 0, 1, 1], [], []>} : vector<4x4xf32>, vector<4x512xf32>, vector<4x512xf32> -> vector<4x512xf32>
    %119 = arith.addf %112, %118 : vector<4x512xf32>
    %c0_91 = arith.constant 0 : index
    %c2_92 = arith.constant 2 : index
    %120 = vector.load %arg44[%c0_91, %c2_92] : memref<4x546xf32, #tpu.memory_space<vmem>>, vector<4x512xf32>
    %c2_93 = arith.constant 2 : index
    %c0_94 = arith.constant 0 : index
    %121 = vector.load %arg1[%c2_93, %c0_94] : memref<9x512xf32, #tpu.memory_space<vmem>>, vector<1x512xf32>
    %122 = vector.broadcast %121 : vector<1x512xf32> to vector<4x512xf32>
    %123 = arith.mulf %120, %122 : vector<4x512xf32>
    %c8_95 = arith.constant 8 : index
    %c0_96 = arith.constant 0 : index
    %124 = vector.load %arg9[%c8_95, %c0_96] : memref<36x4xf32, #tpu.memory_space<vmem>>, vector<4x4xf32>
    %cst_97 = arith.constant dense<0.000000e+00> : vector<4x512xf32>
    %125 = tpu.matmul %124, %123, %cst_97 {dimension_numbers = #tpu.dot_dimension_numbers<[1], [0], [0], [1], [0, 0, 1, 1], [], []>} : vector<4x4xf32>, vector<4x512xf32>, vector<4x512xf32> -> vector<4x512xf32>
    %126 = arith.addf %119, %125 : vector<4x512xf32>
    %c0_98 = arith.constant 0 : index
    %c16_99 = arith.constant 16 : index
    %127 = vector.load %arg44[%c0_98, %c16_99] : memref<4x546xf32, #tpu.memory_space<vmem>>, vector<4x512xf32>
    %c3_100 = arith.constant 3 : index
    %c0_101 = arith.constant 0 : index
    %128 = vector.load %arg1[%c3_100, %c0_101] : memref<9x512xf32, #tpu.memory_space<vmem>>, vector<1x512xf32>
    %129 = vector.broadcast %128 : vector<1x512xf32> to vector<4x512xf32>
    %130 = arith.mulf %127, %129 : vector<4x512xf32>
    %c12_102 = arith.constant 12 : index
    %c0_103 = arith.constant 0 : index
    %131 = vector.load %arg9[%c12_102, %c0_103] : memref<36x4xf32, #tpu.memory_space<vmem>>, vector<4x4xf32>
    %cst_104 = arith.constant dense<0.000000e+00> : vector<4x512xf32>
    %132 = tpu.matmul %131, %130, %cst_104 {dimension_numbers = #tpu.dot_dimension_numbers<[1], [0], [0], [1], [0, 0, 1, 1], [], []>} : vector<4x4xf32>, vector<4x512xf32>, vector<4x512xf32> -> vector<4x512xf32>
    %133 = arith.addf %126, %132 : vector<4x512xf32>
    %c0_105 = arith.constant 0 : index
    %c17_106 = arith.constant 17 : index
    %134 = vector.load %arg44[%c0_105, %c17_106] : memref<4x546xf32, #tpu.memory_space<vmem>>, vector<4x512xf32>
    %c16_107 = arith.constant 16 : index
    %c0_108 = arith.constant 0 : index
    %135 = vector.load %arg9[%c16_107, %c0_108] : memref<36x4xf32, #tpu.memory_space<vmem>>, vector<4x4xf32>
    %cst_109 = arith.constant dense<0.000000e+00> : vector<4x512xf32>
    %136 = tpu.matmul %135, %134, %cst_109 {dimension_numbers = #tpu.dot_dimension_numbers<[1], [0], [0], [1], [0, 0, 1, 1], [], []>} : vector<4x4xf32>, vector<4x512xf32>, vector<4x512xf32> -> vector<4x512xf32>
    %137 = arith.addf %133, %136 : vector<4x512xf32>
    %c0_110 = arith.constant 0 : index
    %c18_111 = arith.constant 18 : index
    %138 = vector.load %arg44[%c0_110, %c18_111] : memref<4x546xf32, #tpu.memory_space<vmem>>, vector<4x512xf32>
    %c5_112 = arith.constant 5 : index
    %c0_113 = arith.constant 0 : index
    %139 = vector.load %arg1[%c5_112, %c0_113] : memref<9x512xf32, #tpu.memory_space<vmem>>, vector<1x512xf32>
    %140 = vector.broadcast %139 : vector<1x512xf32> to vector<4x512xf32>
    %141 = arith.mulf %138, %140 : vector<4x512xf32>
    %c20_114 = arith.constant 20 : index
    %c0_115 = arith.constant 0 : index
    %142 = vector.load %arg9[%c20_114, %c0_115] : memref<36x4xf32, #tpu.memory_space<vmem>>, vector<4x4xf32>
    %cst_116 = arith.constant dense<0.000000e+00> : vector<4x512xf32>
    %143 = tpu.matmul %142, %141, %cst_116 {dimension_numbers = #tpu.dot_dimension_numbers<[1], [0], [0], [1], [0, 0, 1, 1], [], []>} : vector<4x4xf32>, vector<4x512xf32>, vector<4x512xf32> -> vector<4x512xf32>
    %144 = arith.addf %137, %143 : vector<4x512xf32>
    %c0_117 = arith.constant 0 : index
    %c32_118 = arith.constant 32 : index
    %145 = vector.load %arg44[%c0_117, %c32_118] : memref<4x546xf32, #tpu.memory_space<vmem>>, vector<4x512xf32>
    %c6_119 = arith.constant 6 : index
    %c0_120 = arith.constant 0 : index
    %146 = vector.load %arg1[%c6_119, %c0_120] : memref<9x512xf32, #tpu.memory_space<vmem>>, vector<1x512xf32>
    %147 = vector.broadcast %146 : vector<1x512xf32> to vector<4x512xf32>
    %148 = arith.mulf %145, %147 : vector<4x512xf32>
    %c24_121 = arith.constant 24 : index
    %c0_122 = arith.constant 0 : index
    %149 = vector.load %arg9[%c24_121, %c0_122] : memref<36x4xf32, #tpu.memory_space<vmem>>, vector<4x4xf32>
    %cst_123 = arith.constant dense<0.000000e+00> : vector<4x512xf32>
    %150 = tpu.matmul %149, %148, %cst_123 {dimension_numbers = #tpu.dot_dimension_numbers<[1], [0], [0], [1], [0, 0, 1, 1], [], []>} : vector<4x4xf32>, vector<4x512xf32>, vector<4x512xf32> -> vector<4x512xf32>
    %151 = arith.addf %144, %150 : vector<4x512xf32>
    %c0_124 = arith.constant 0 : index
    %c33_125 = arith.constant 33 : index
    %152 = vector.load %arg44[%c0_124, %c33_125] : memref<4x546xf32, #tpu.memory_space<vmem>>, vector<4x512xf32>
    %c7_126 = arith.constant 7 : index
    %c0_127 = arith.constant 0 : index
    %153 = vector.load %arg1[%c7_126, %c0_127] : memref<9x512xf32, #tpu.memory_space<vmem>>, vector<1x512xf32>
    %154 = vector.broadcast %153 : vector<1x512xf32> to vector<4x512xf32>
    %155 = arith.mulf %152, %154 : vector<4x512xf32>
    %c28_128 = arith.constant 28 : index
    %c0_129 = arith.constant 0 : index
    %156 = vector.load %arg9[%c28_128, %c0_129] : memref<36x4xf32, #tpu.memory_space<vmem>>, vector<4x4xf32>
    %cst_130 = arith.constant dense<0.000000e+00> : vector<4x512xf32>
    %157 = tpu.matmul %156, %155, %cst_130 {dimension_numbers = #tpu.dot_dimension_numbers<[1], [0], [0], [1], [0, 0, 1, 1], [], []>} : vector<4x4xf32>, vector<4x512xf32>, vector<4x512xf32> -> vector<4x512xf32>
    %158 = arith.addf %151, %157 : vector<4x512xf32>
    %c0_131 = arith.constant 0 : index
    %c34_132 = arith.constant 34 : index
    %159 = vector.load %arg44[%c0_131, %c34_132] : memref<4x546xf32, #tpu.memory_space<vmem>>, vector<4x512xf32>
    %c8_133 = arith.constant 8 : index
    %c0_134 = arith.constant 0 : index
    %160 = vector.load %arg1[%c8_133, %c0_134] : memref<9x512xf32, #tpu.memory_space<vmem>>, vector<1x512xf32>
    %161 = vector.broadcast %160 : vector<1x512xf32> to vector<4x512xf32>
    %162 = arith.mulf %159, %161 : vector<4x512xf32>
    %c32_135 = arith.constant 32 : index
    %c0_136 = arith.constant 0 : index
    %163 = vector.load %arg9[%c32_135, %c0_136] : memref<36x4xf32, #tpu.memory_space<vmem>>, vector<4x4xf32>
    %cst_137 = arith.constant dense<0.000000e+00> : vector<4x512xf32>
    %164 = tpu.matmul %163, %162, %cst_137 {dimension_numbers = #tpu.dot_dimension_numbers<[1], [0], [0], [1], [0, 0, 1, 1], [], []>} : vector<4x4xf32>, vector<4x512xf32>, vector<4x512xf32> -> vector<4x512xf32>
    %165 = arith.addf %158, %164 : vector<4x512xf32>
    %cst_138 = arith.constant dense<0.000000e+00> : vector<4xf32>
    %166 = vector.multi_reduction <add>, %165, %cst_138 [1] : vector<4x512xf32> to vector<4xf32>
    %167 = vector.shape_cast %166 : vector<4xf32> to vector<4x1xf32>
    %cst_139 = arith.constant 0.001953125 : f32
    %168 = vector.broadcast %cst_139 : f32 to vector<4x1xf32>
    %169 = arith.mulf %167, %168 : vector<4x1xf32>
    %170 = arith.mulf %165, %165 : vector<4x512xf32>
    %cst_140 = arith.constant dense<0.000000e+00> : vector<4xf32>
    %171 = vector.multi_reduction <add>, %170, %cst_140 [1] : vector<4x512xf32> to vector<4xf32>
    %172 = vector.shape_cast %171 : vector<4xf32> to vector<4x1xf32>
    %cst_141 = arith.constant 0.001953125 : f32
    %173 = vector.broadcast %cst_141 : f32 to vector<4x1xf32>
    %174 = arith.mulf %172, %173 : vector<4x1xf32>
    %175 = arith.mulf %169, %169 : vector<4x1xf32>
    %176 = arith.subf %174, %175 : vector<4x1xf32>
    %cst_142 = arith.constant 0.000000e+00 : f32
    %177 = vector.broadcast %cst_142 : f32 to vector<4x1xf32>
    %178 = arith.maximumf %176, %177 : vector<4x1xf32>
    %c0_143 = arith.constant 0 : index
    %c0_144 = arith.constant 0 : index
    %179 = vector.load %arg10[%c0_143, %c0_144] : memref<4x1xf32, #tpu.memory_space<vmem>>, vector<4x1xf32>
    %cst_145 = arith.constant 9.99999974E-6 : f32
    %180 = vector.broadcast %cst_145 : f32 to vector<4x1xf32>
    %181 = arith.addf %178, %180 : vector<4x1xf32>
    %182 = math.rsqrt %181 : vector<4x1xf32>
    %183 = arith.mulf %179, %182 : vector<4x1xf32>
    %c0_146 = arith.constant 0 : index
    %c0_147 = arith.constant 0 : index
    %184 = vector.load %arg11[%c0_146, %c0_147] : memref<4x1xf32, #tpu.memory_space<vmem>>, vector<4x1xf32>
    %185 = arith.mulf %169, %183 : vector<4x1xf32>
    %186 = arith.subf %184, %185 : vector<4x1xf32>
    %187 = vector.broadcast %183 : vector<4x1xf32> to vector<4x512xf32>
    %188 = arith.mulf %165, %187 : vector<4x512xf32>
    %189 = vector.broadcast %186 : vector<4x1xf32> to vector<4x512xf32>
    %190 = arith.addf %188, %189 : vector<4x512xf32>
    %191 = arith.addf %190, %12 : vector<4x512xf32>
    %cst_148 = arith.constant 0.000000e+00 : f32
    %192 = vector.broadcast %cst_148 : f32 to vector<4x512xf32>
    %193 = arith.cmpf ogt, %191, %192 : vector<4x512xf32>
    %cst_149 = arith.constant 2.000000e-01 : f32
    %194 = vector.broadcast %cst_149 : f32 to vector<4x512xf32>
    %195 = arith.mulf %194, %191 : vector<4x512xf32>
    %196 = arith.select %193, %191, %195 : vector<4x512xi1>, vector<4x512xf32>
    %c0_150 = arith.constant 0 : index
    %c17_151 = arith.constant 17 : index
    %197 = vector.load %arg43[%c0_150, %c17_151] : memref<4x546xf32, #tpu.memory_space<vmem>>, vector<4x512xf32>
    tpu.vector_store %arg43[%c0_150, %c17_151], %196 {strides = array<i32>} : memref<4x546xf32, #tpu.memory_space<vmem>>, vector<4x512xf32>,
    %cst_152 = arith.constant 0.000000e+00 : f32
    %198 = vector.broadcast %cst_152 : f32 to vector<4x512xf32>
    %c0_153 = arith.constant 0 : index
    %c0_154 = arith.constant 0 : index
    %199 = vector.load %arg43[%c0_153, %c0_154] : memref<4x546xf32, #tpu.memory_space<vmem>>, vector<4x512xf32>
    %c0_155 = arith.constant 0 : index
    %c0_156 = arith.constant 0 : index
    %200 = vector.load %arg1[%c0_155, %c0_156] : memref<9x512xf32, #tpu.memory_space<vmem>>, vector<1x512xf32>
    %201 = vector.broadcast %200 : vector<1x512xf32> to vector<4x512xf32>
    %202 = arith.mulf %199, %201 : vector<4x512xf32>
    %c0_157 = arith.constant 0 : index
    %c0_158 = arith.constant 0 : index
    %203 = vector.load %arg12[%c0_157, %c0_158] : memref<36x4xf32, #tpu.memory_space<vmem>>, vector<4x4xf32>
    %cst_159 = arith.constant dense<0.000000e+00> : vector<4x512xf32>
    %204 = tpu.matmul %203, %202, %cst_159 {dimension_numbers = #tpu.dot_dimension_numbers<[1], [0], [0], [1], [0, 0, 1, 1], [], []>} : vector<4x4xf32>, vector<4x512xf32>, vector<4x512xf32> -> vector<4x512xf32>
    %205 = arith.addf %198, %204 : vector<4x512xf32>
    %c0_160 = arith.constant 0 : index
    %c1_161 = arith.constant 1 : index
    %206 = vector.load %arg43[%c0_160, %c1_161] : memref<4x546xf32, #tpu.memory_space<vmem>>, vector<4x512xf32>
    %c1_162 = arith.constant 1 : index
    %c0_163 = arith.constant 0 : index
    %207 = vector.load %arg1[%c1_162, %c0_163] : memref<9x512xf32, #tpu.memory_space<vmem>>, vector<1x512xf32>
    %208 = vector.broadcast %207 : vector<1x512xf32> to vector<4x512xf32>
    %209 = arith.mulf %206, %208 : vector<4x512xf32>
    %c4_164 = arith.constant 4 : index
    %c0_165 = arith.constant 0 : index
    %210 = vector.load %arg12[%c4_164, %c0_165] : memref<36x4xf32, #tpu.memory_space<vmem>>, vector<4x4xf32>
    %cst_166 = arith.constant dense<0.000000e+00> : vector<4x512xf32>
    %211 = tpu.matmul %210, %209, %cst_166 {dimension_numbers = #tpu.dot_dimension_numbers<[1], [0], [0], [1], [0, 0, 1, 1], [], []>} : vector<4x4xf32>, vector<4x512xf32>, vector<4x512xf32> -> vector<4x512xf32>
    %212 = arith.addf %205, %211 : vector<4x512xf32>
    %c0_167 = arith.constant 0 : index
    %c2_168 = arith.constant 2 : index
    %213 = vector.load %arg43[%c0_167, %c2_168] : memref<4x546xf32, #tpu.memory_space<vmem>>, vector<4x512xf32>
    %c2_169 = arith.constant 2 : index
    %c0_170 = arith.constant 0 : index
    %214 = vector.load %arg1[%c2_169, %c0_170] : memref<9x512xf32, #tpu.memory_space<vmem>>, vector<1x512xf32>
    %215 = vector.broadcast %214 : vector<1x512xf32> to vector<4x512xf32>
    %216 = arith.mulf %213, %215 : vector<4x512xf32>
    %c8_171 = arith.constant 8 : index
    %c0_172 = arith.constant 0 : index
    %217 = vector.load %arg12[%c8_171, %c0_172] : memref<36x4xf32, #tpu.memory_space<vmem>>, vector<4x4xf32>
    %cst_173 = arith.constant dense<0.000000e+00> : vector<4x512xf32>
    %218 = tpu.matmul %217, %216, %cst_173 {dimension_numbers = #tpu.dot_dimension_numbers<[1], [0], [0], [1], [0, 0, 1, 1], [], []>} : vector<4x4xf32>, vector<4x512xf32>, vector<4x512xf32> -> vector<4x512xf32>
    %219 = arith.addf %212, %218 : vector<4x512xf32>
    %c0_174 = arith.constant 0 : index
    %c16_175 = arith.constant 16 : index
    %220 = vector.load %arg43[%c0_174, %c16_175] : memref<4x546xf32, #tpu.memory_space<vmem>>, vector<4x512xf32>
    %c3_176 = arith.constant 3 : index
    %c0_177 = arith.constant 0 : index
    %221 = vector.load %arg1[%c3_176, %c0_177] : memref<9x512xf32, #tpu.memory_space<vmem>>, vector<1x512xf32>
    %222 = vector.broadcast %221 : vector<1x512xf32> to vector<4x512xf32>
    %223 = arith.mulf %220, %222 : vector<4x512xf32>
    %c12_178 = arith.constant 12 : index
    %c0_179 = arith.constant 0 : index
    %224 = vector.load %arg12[%c12_178, %c0_179] : memref<36x4xf32, #tpu.memory_space<vmem>>, vector<4x4xf32>
    %cst_180 = arith.constant dense<0.000000e+00> : vector<4x512xf32>
    %225 = tpu.matmul %224, %223, %cst_180 {dimension_numbers = #tpu.dot_dimension_numbers<[1], [0], [0], [1], [0, 0, 1, 1], [], []>} : vector<4x4xf32>, vector<4x512xf32>, vector<4x512xf32> -> vector<4x512xf32>
    %226 = arith.addf %219, %225 : vector<4x512xf32>
    %c0_181 = arith.constant 0 : index
    %c17_182 = arith.constant 17 : index
    %227 = vector.load %arg43[%c0_181, %c17_182] : memref<4x546xf32, #tpu.memory_space<vmem>>, vector<4x512xf32>
    %c16_183 = arith.constant 16 : index
    %c0_184 = arith.constant 0 : index
    %228 = vector.load %arg12[%c16_183, %c0_184] : memref<36x4xf32, #tpu.memory_space<vmem>>, vector<4x4xf32>
    %cst_185 = arith.constant dense<0.000000e+00> : vector<4x512xf32>
    %229 = tpu.matmul %228, %227, %cst_185 {dimension_numbers = #tpu.dot_dimension_numbers<[1], [0], [0], [1], [0, 0, 1, 1], [], []>} : vector<4x4xf32>, vector<4x512xf32>, vector<4x512xf32> -> vector<4x512xf32>
    %230 = arith.addf %226, %229 : vector<4x512xf32>
    %c0_186 = arith.constant 0 : index
    %c18_187 = arith.constant 18 : index
    %231 = vector.load %arg43[%c0_186, %c18_187] : memref<4x546xf32, #tpu.memory_space<vmem>>, vector<4x512xf32>
    %c5_188 = arith.constant 5 : index
    %c0_189 = arith.constant 0 : index
    %232 = vector.load %arg1[%c5_188, %c0_189] : memref<9x512xf32, #tpu.memory_space<vmem>>, vector<1x512xf32>
    %233 = vector.broadcast %232 : vector<1x512xf32> to vector<4x512xf32>
    %234 = arith.mulf %231, %233 : vector<4x512xf32>
    %c20_190 = arith.constant 20 : index
    %c0_191 = arith.constant 0 : index
    %235 = vector.load %arg12[%c20_190, %c0_191] : memref<36x4xf32, #tpu.memory_space<vmem>>, vector<4x4xf32>
    %cst_192 = arith.constant dense<0.000000e+00> : vector<4x512xf32>
    %236 = tpu.matmul %235, %234, %cst_192 {dimension_numbers = #tpu.dot_dimension_numbers<[1], [0], [0], [1], [0, 0, 1, 1], [], []>} : vector<4x4xf32>, vector<4x512xf32>, vector<4x512xf32> -> vector<4x512xf32>
    %237 = arith.addf %230, %236 : vector<4x512xf32>
    %c0_193 = arith.constant 0 : index
    %c32_194 = arith.constant 32 : index
    %238 = vector.load %arg43[%c0_193, %c32_194] : memref<4x546xf32, #tpu.memory_space<vmem>>, vector<4x512xf32>
    %c6_195 = arith.constant 6 : index
    %c0_196 = arith.constant 0 : index
    %239 = vector.load %arg1[%c6_195, %c0_196] : memref<9x512xf32, #tpu.memory_space<vmem>>, vector<1x512xf32>
    %240 = vector.broadcast %239 : vector<1x512xf32> to vector<4x512xf32>
    %241 = arith.mulf %238, %240 : vector<4x512xf32>
    %c24_197 = arith.constant 24 : index
    %c0_198 = arith.constant 0 : index
    %242 = vector.load %arg12[%c24_197, %c0_198] : memref<36x4xf32, #tpu.memory_space<vmem>>, vector<4x4xf32>
    %cst_199 = arith.constant dense<0.000000e+00> : vector<4x512xf32>
    %243 = tpu.matmul %242, %241, %cst_199 {dimension_numbers = #tpu.dot_dimension_numbers<[1], [0], [0], [1], [0, 0, 1, 1], [], []>} : vector<4x4xf32>, vector<4x512xf32>, vector<4x512xf32> -> vector<4x512xf32>
    %244 = arith.addf %237, %243 : vector<4x512xf32>
    %c0_200 = arith.constant 0 : index
    %c33_201 = arith.constant 33 : index
    %245 = vector.load %arg43[%c0_200, %c33_201] : memref<4x546xf32, #tpu.memory_space<vmem>>, vector<4x512xf32>
    %c7_202 = arith.constant 7 : index
    %c0_203 = arith.constant 0 : index
    %246 = vector.load %arg1[%c7_202, %c0_203] : memref<9x512xf32, #tpu.memory_space<vmem>>, vector<1x512xf32>
    %247 = vector.broadcast %246 : vector<1x512xf32> to vector<4x512xf32>
    %248 = arith.mulf %245, %247 : vector<4x512xf32>
    %c28_204 = arith.constant 28 : index
    %c0_205 = arith.constant 0 : index
    %249 = vector.load %arg12[%c28_204, %c0_205] : memref<36x4xf32, #tpu.memory_space<vmem>>, vector<4x4xf32>
    %cst_206 = arith.constant dense<0.000000e+00> : vector<4x512xf32>
    %250 = tpu.matmul %249, %248, %cst_206 {dimension_numbers = #tpu.dot_dimension_numbers<[1], [0], [0], [1], [0, 0, 1, 1], [], []>} : vector<4x4xf32>, vector<4x512xf32>, vector<4x512xf32> -> vector<4x512xf32>
    %251 = arith.addf %244, %250 : vector<4x512xf32>
    %c0_207 = arith.constant 0 : index
    %c34_208 = arith.constant 34 : index
    %252 = vector.load %arg43[%c0_207, %c34_208] : memref<4x546xf32, #tpu.memory_space<vmem>>, vector<4x512xf32>
    %c8_209 = arith.constant 8 : index
    %c0_210 = arith.constant 0 : index
    %253 = vector.load %arg1[%c8_209, %c0_210] : memref<9x512xf32, #tpu.memory_space<vmem>>, vector<1x512xf32>
    %254 = vector.broadcast %253 : vector<1x512xf32> to vector<4x512xf32>
    %255 = arith.mulf %252, %254 : vector<4x512xf32>
    %c32_211 = arith.constant 32 : index
    %c0_212 = arith.constant 0 : index
    %256 = vector.load %arg12[%c32_211, %c0_212] : memref<36x4xf32, #tpu.memory_space<vmem>>, vector<4x4xf32>
    %cst_213 = arith.constant dense<0.000000e+00> : vector<4x512xf32>
    %257 = tpu.matmul %256, %255, %cst_213 {dimension_numbers = #tpu.dot_dimension_numbers<[1], [0], [0], [1], [0, 0, 1, 1], [], []>} : vector<4x4xf32>, vector<4x512xf32>, vector<4x512xf32> -> vector<4x512xf32>
    %258 = arith.addf %251, %257 : vector<4x512xf32>
    %cst_214 = arith.constant dense<0.000000e+00> : vector<4xf32>
    %259 = vector.multi_reduction <add>, %258, %cst_214 [1] : vector<4x512xf32> to vector<4xf32>
    %260 = vector.shape_cast %259 : vector<4xf32> to vector<4x1xf32>
    %cst_215 = arith.constant 0.001953125 : f32
    %261 = vector.broadcast %cst_215 : f32 to vector<4x1xf32>
    %262 = arith.mulf %260, %261 : vector<4x1xf32>
    %263 = arith.mulf %258, %258 : vector<4x512xf32>
    %cst_216 = arith.constant dense<0.000000e+00> : vector<4xf32>
    %264 = vector.multi_reduction <add>, %263, %cst_216 [1] : vector<4x512xf32> to vector<4xf32>
    %265 = vector.shape_cast %264 : vector<4xf32> to vector<4x1xf32>
    %cst_217 = arith.constant 0.001953125 : f32
    %266 = vector.broadcast %cst_217 : f32 to vector<4x1xf32>
    %267 = arith.mulf %265, %266 : vector<4x1xf32>
    %268 = arith.mulf %262, %262 : vector<4x1xf32>
    %269 = arith.subf %267, %268 : vector<4x1xf32>
    %cst_218 = arith.constant 0.000000e+00 : f32
    %270 = vector.broadcast %cst_218 : f32 to vector<4x1xf32>
    %271 = arith.maximumf %269, %270 : vector<4x1xf32>
    %c0_219 = arith.constant 0 : index
    %c0_220 = arith.constant 0 : index
    %272 = vector.load %arg13[%c0_219, %c0_220] : memref<4x1xf32, #tpu.memory_space<vmem>>, vector<4x1xf32>
    %cst_221 = arith.constant 9.99999974E-6 : f32
    %273 = vector.broadcast %cst_221 : f32 to vector<4x1xf32>
    %274 = arith.addf %271, %273 : vector<4x1xf32>
    %275 = math.rsqrt %274 : vector<4x1xf32>
    %276 = arith.mulf %272, %275 : vector<4x1xf32>
    %c0_222 = arith.constant 0 : index
    %c0_223 = arith.constant 0 : index
    %277 = vector.load %arg14[%c0_222, %c0_223] : memref<4x1xf32, #tpu.memory_space<vmem>>, vector<4x1xf32>
    %278 = arith.mulf %262, %276 : vector<4x1xf32>
    %279 = arith.subf %277, %278 : vector<4x1xf32>
    %280 = vector.broadcast %276 : vector<4x1xf32> to vector<4x512xf32>
    %281 = arith.mulf %258, %280 : vector<4x512xf32>
    %282 = vector.broadcast %279 : vector<4x1xf32> to vector<4x512xf32>
    %283 = arith.addf %281, %282 : vector<4x512xf32>
    %cst_224 = arith.constant 0.000000e+00 : f32
    %284 = vector.broadcast %cst_224 : f32 to vector<4x512xf32>
    %285 = arith.cmpf ogt, %283, %284 : vector<4x512xf32>
    %cst_225 = arith.constant 2.000000e-01 : f32
    %286 = vector.broadcast %cst_225 : f32 to vector<4x512xf32>
    %287 = arith.mulf %286, %283 : vector<4x512xf32>
    %288 = arith.select %285, %283, %287 : vector<4x512xi1>, vector<4x512xf32>
    %c0_226 = arith.constant 0 : index
    %c17_227 = arith.constant 17 : index
    %289 = vector.load %arg44[%c0_226, %c17_227] : memref<4x546xf32, #tpu.memory_space<vmem>>, vector<4x512xf32>
    tpu.vector_store %arg44[%c0_226, %c17_227], %288 {strides = array<i32>} : memref<4x546xf32, #tpu.memory_space<vmem>>, vector<4x512xf32>,
    %cst_228 = arith.constant 0.000000e+00 : f32
    %290 = vector.broadcast %cst_228 : f32 to vector<4x512xf32>
    %c0_229 = arith.constant 0 : index
    %c0_230 = arith.constant 0 : index
    %291 = vector.load %arg44[%c0_229, %c0_230] : memref<4x546xf32, #tpu.memory_space<vmem>>, vector<4x512xf32>
    %c0_231 = arith.constant 0 : index
    %c0_232 = arith.constant 0 : index
    %292 = vector.load %arg1[%c0_231, %c0_232] : memref<9x512xf32, #tpu.memory_space<vmem>>, vector<1x512xf32>
    %293 = vector.broadcast %292 : vector<1x512xf32> to vector<4x512xf32>
    %294 = arith.mulf %291, %293 : vector<4x512xf32>
    %c0_233 = arith.constant 0 : index
    %c0_234 = arith.constant 0 : index
    %295 = vector.load %arg15[%c0_233, %c0_234] : memref<36x4xf32, #tpu.memory_space<vmem>>, vector<4x4xf32>
    %cst_235 = arith.constant dense<0.000000e+00> : vector<4x512xf32>
    %296 = tpu.matmul %295, %294, %cst_235 {dimension_numbers = #tpu.dot_dimension_numbers<[1], [0], [0], [1], [0, 0, 1, 1], [], []>} : vector<4x4xf32>, vector<4x512xf32>, vector<4x512xf32> -> vector<4x512xf32>
    %297 = arith.addf %290, %296 : vector<4x512xf32>
    %c0_236 = arith.constant 0 : index
    %c1_237 = arith.constant 1 : index
    %298 = vector.load %arg44[%c0_236, %c1_237] : memref<4x546xf32, #tpu.memory_space<vmem>>, vector<4x512xf32>
    %c1_238 = arith.constant 1 : index
    %c0_239 = arith.constant 0 : index
    %299 = vector.load %arg1[%c1_238, %c0_239] : memref<9x512xf32, #tpu.memory_space<vmem>>, vector<1x512xf32>
    %300 = vector.broadcast %299 : vector<1x512xf32> to vector<4x512xf32>
    %301 = arith.mulf %298, %300 : vector<4x512xf32>
    %c4_240 = arith.constant 4 : index
    %c0_241 = arith.constant 0 : index
    %302 = vector.load %arg15[%c4_240, %c0_241] : memref<36x4xf32, #tpu.memory_space<vmem>>, vector<4x4xf32>
    %cst_242 = arith.constant dense<0.000000e+00> : vector<4x512xf32>
    %303 = tpu.matmul %302, %301, %cst_242 {dimension_numbers = #tpu.dot_dimension_numbers<[1], [0], [0], [1], [0, 0, 1, 1], [], []>} : vector<4x4xf32>, vector<4x512xf32>, vector<4x512xf32> -> vector<4x512xf32>
    %304 = arith.addf %297, %303 : vector<4x512xf32>
    %c0_243 = arith.constant 0 : index
    %c2_244 = arith.constant 2 : index
    %305 = vector.load %arg44[%c0_243, %c2_244] : memref<4x546xf32, #tpu.memory_space<vmem>>, vector<4x512xf32>
    %c2_245 = arith.constant 2 : index
    %c0_246 = arith.constant 0 : index
    %306 = vector.load %arg1[%c2_245, %c0_246] : memref<9x512xf32, #tpu.memory_space<vmem>>, vector<1x512xf32>
    %307 = vector.broadcast %306 : vector<1x512xf32> to vector<4x512xf32>
    %308 = arith.mulf %305, %307 : vector<4x512xf32>
    %c8_247 = arith.constant 8 : index
    %c0_248 = arith.constant 0 : index
    %309 = vector.load %arg15[%c8_247, %c0_248] : memref<36x4xf32, #tpu.memory_space<vmem>>, vector<4x4xf32>
    %cst_249 = arith.constant dense<0.000000e+00> : vector<4x512xf32>
    %310 = tpu.matmul %309, %308, %cst_249 {dimension_numbers = #tpu.dot_dimension_numbers<[1], [0], [0], [1], [0, 0, 1, 1], [], []>} : vector<4x4xf32>, vector<4x512xf32>, vector<4x512xf32> -> vector<4x512xf32>
    %311 = arith.addf %304, %310 : vector<4x512xf32>
    %c0_250 = arith.constant 0 : index
    %c16_251 = arith.constant 16 : index
    %312 = vector.load %arg44[%c0_250, %c16_251] : memref<4x546xf32, #tpu.memory_space<vmem>>, vector<4x512xf32>
    %c3_252 = arith.constant 3 : index
    %c0_253 = arith.constant 0 : index
    %313 = vector.load %arg1[%c3_252, %c0_253] : memref<9x512xf32, #tpu.memory_space<vmem>>, vector<1x512xf32>
    %314 = vector.broadcast %313 : vector<1x512xf32> to vector<4x512xf32>
    %315 = arith.mulf %312, %314 : vector<4x512xf32>
    %c12_254 = arith.constant 12 : index
    %c0_255 = arith.constant 0 : index
    %316 = vector.load %arg15[%c12_254, %c0_255] : memref<36x4xf32, #tpu.memory_space<vmem>>, vector<4x4xf32>
    %cst_256 = arith.constant dense<0.000000e+00> : vector<4x512xf32>
    %317 = tpu.matmul %316, %315, %cst_256 {dimension_numbers = #tpu.dot_dimension_numbers<[1], [0], [0], [1], [0, 0, 1, 1], [], []>} : vector<4x4xf32>, vector<4x512xf32>, vector<4x512xf32> -> vector<4x512xf32>
    %318 = arith.addf %311, %317 : vector<4x512xf32>
    %c0_257 = arith.constant 0 : index
    %c17_258 = arith.constant 17 : index
    %319 = vector.load %arg44[%c0_257, %c17_258] : memref<4x546xf32, #tpu.memory_space<vmem>>, vector<4x512xf32>
    %c16_259 = arith.constant 16 : index
    %c0_260 = arith.constant 0 : index
    %320 = vector.load %arg15[%c16_259, %c0_260] : memref<36x4xf32, #tpu.memory_space<vmem>>, vector<4x4xf32>
    %cst_261 = arith.constant dense<0.000000e+00> : vector<4x512xf32>
    %321 = tpu.matmul %320, %319, %cst_261 {dimension_numbers = #tpu.dot_dimension_numbers<[1], [0], [0], [1], [0, 0, 1, 1], [], []>} : vector<4x4xf32>, vector<4x512xf32>, vector<4x512xf32> -> vector<4x512xf32>
    %322 = arith.addf %318, %321 : vector<4x512xf32>
    %c0_262 = arith.constant 0 : index
    %c18_263 = arith.constant 18 : index
    %323 = vector.load %arg44[%c0_262, %c18_263] : memref<4x546xf32, #tpu.memory_space<vmem>>, vector<4x512xf32>
    %c5_264 = arith.constant 5 : index
    %c0_265 = arith.constant 0 : index
    %324 = vector.load %arg1[%c5_264, %c0_265] : memref<9x512xf32, #tpu.memory_space<vmem>>, vector<1x512xf32>
    %325 = vector.broadcast %324 : vector<1x512xf32> to vector<4x512xf32>
    %326 = arith.mulf %323, %325 : vector<4x512xf32>
    %c20_266 = arith.constant 20 : index
    %c0_267 = arith.constant 0 : index
    %327 = vector.load %arg15[%c20_266, %c0_267] : memref<36x4xf32, #tpu.memory_space<vmem>>, vector<4x4xf32>
    %cst_268 = arith.constant dense<0.000000e+00> : vector<4x512xf32>
    %328 = tpu.matmul %327, %326, %cst_268 {dimension_numbers = #tpu.dot_dimension_numbers<[1], [0], [0], [1], [0, 0, 1, 1], [], []>} : vector<4x4xf32>, vector<4x512xf32>, vector<4x512xf32> -> vector<4x512xf32>
    %329 = arith.addf %322, %328 : vector<4x512xf32>
    %c0_269 = arith.constant 0 : index
    %c32_270 = arith.constant 32 : index
    %330 = vector.load %arg44[%c0_269, %c32_270] : memref<4x546xf32, #tpu.memory_space<vmem>>, vector<4x512xf32>
    %c6_271 = arith.constant 6 : index
    %c0_272 = arith.constant 0 : index
    %331 = vector.load %arg1[%c6_271, %c0_272] : memref<9x512xf32, #tpu.memory_space<vmem>>, vector<1x512xf32>
    %332 = vector.broadcast %331 : vector<1x512xf32> to vector<4x512xf32>
    %333 = arith.mulf %330, %332 : vector<4x512xf32>
    %c24_273 = arith.constant 24 : index
    %c0_274 = arith.constant 0 : index
    %334 = vector.load %arg15[%c24_273, %c0_274] : memref<36x4xf32, #tpu.memory_space<vmem>>, vector<4x4xf32>
    %cst_275 = arith.constant dense<0.000000e+00> : vector<4x512xf32>
    %335 = tpu.matmul %334, %333, %cst_275 {dimension_numbers = #tpu.dot_dimension_numbers<[1], [0], [0], [1], [0, 0, 1, 1], [], []>} : vector<4x4xf32>, vector<4x512xf32>, vector<4x512xf32> -> vector<4x512xf32>
    %336 = arith.addf %329, %335 : vector<4x512xf32>
    %c0_276 = arith.constant 0 : index
    %c33_277 = arith.constant 33 : index
    %337 = vector.load %arg44[%c0_276, %c33_277] : memref<4x546xf32, #tpu.memory_space<vmem>>, vector<4x512xf32>
    %c7_278 = arith.constant 7 : index
    %c0_279 = arith.constant 0 : index
    %338 = vector.load %arg1[%c7_278, %c0_279] : memref<9x512xf32, #tpu.memory_space<vmem>>, vector<1x512xf32>
    %339 = vector.broadcast %338 : vector<1x512xf32> to vector<4x512xf32>
    %340 = arith.mulf %337, %339 : vector<4x512xf32>
    %c28_280 = arith.constant 28 : index
    %c0_281 = arith.constant 0 : index
    %341 = vector.load %arg15[%c28_280, %c0_281] : memref<36x4xf32, #tpu.memory_space<vmem>>, vector<4x4xf32>
    %cst_282 = arith.constant dense<0.000000e+00> : vector<4x512xf32>
    %342 = tpu.matmul %341, %340, %cst_282 {dimension_numbers = #tpu.dot_dimension_numbers<[1], [0], [0], [1], [0, 0, 1, 1], [], []>} : vector<4x4xf32>, vector<4x512xf32>, vector<4x512xf32> -> vector<4x512xf32>
    %343 = arith.addf %336, %342 : vector<4x512xf32>
    %c0_283 = arith.constant 0 : index
    %c34_284 = arith.constant 34 : index
    %344 = vector.load %arg44[%c0_283, %c34_284] : memref<4x546xf32, #tpu.memory_space<vmem>>, vector<4x512xf32>
    %c8_285 = arith.constant 8 : index
    %c0_286 = arith.constant 0 : index
    %345 = vector.load %arg1[%c8_285, %c0_286] : memref<9x512xf32, #tpu.memory_space<vmem>>, vector<1x512xf32>
    %346 = vector.broadcast %345 : vector<1x512xf32> to vector<4x512xf32>
    %347 = arith.mulf %344, %346 : vector<4x512xf32>
    %c32_287 = arith.constant 32 : index
    %c0_288 = arith.constant 0 : index
    %348 = vector.load %arg15[%c32_287, %c0_288] : memref<36x4xf32, #tpu.memory_space<vmem>>, vector<4x4xf32>
    %cst_289 = arith.constant dense<0.000000e+00> : vector<4x512xf32>
    %349 = tpu.matmul %348, %347, %cst_289 {dimension_numbers = #tpu.dot_dimension_numbers<[1], [0], [0], [1], [0, 0, 1, 1], [], []>} : vector<4x4xf32>, vector<4x512xf32>, vector<4x512xf32> -> vector<4x512xf32>
    %350 = arith.addf %343, %349 : vector<4x512xf32>
    %cst_290 = arith.constant dense<0.000000e+00> : vector<4xf32>
    %351 = vector.multi_reduction <add>, %350, %cst_290 [1] : vector<4x512xf32> to vector<4xf32>
    %352 = vector.shape_cast %351 : vector<4xf32> to vector<4x1xf32>
    %cst_291 = arith.constant 0.001953125 : f32
    %353 = vector.broadcast %cst_291 : f32 to vector<4x1xf32>
    %354 = arith.mulf %352, %353 : vector<4x1xf32>
    %355 = arith.mulf %350, %350 : vector<4x512xf32>
    %cst_292 = arith.constant dense<0.000000e+00> : vector<4xf32>
    %356 = vector.multi_reduction <add>, %355, %cst_292 [1] : vector<4x512xf32> to vector<4xf32>
    %357 = vector.shape_cast %356 : vector<4xf32> to vector<4x1xf32>
    %cst_293 = arith.constant 0.001953125 : f32
    %358 = vector.broadcast %cst_293 : f32 to vector<4x1xf32>
    %359 = arith.mulf %357, %358 : vector<4x1xf32>
    %360 = arith.mulf %354, %354 : vector<4x1xf32>
    %361 = arith.subf %359, %360 : vector<4x1xf32>
    %cst_294 = arith.constant 0.000000e+00 : f32
    %362 = vector.broadcast %cst_294 : f32 to vector<4x1xf32>
    %363 = arith.maximumf %361, %362 : vector<4x1xf32>
    %c0_295 = arith.constant 0 : index
    %c0_296 = arith.constant 0 : index
    %364 = vector.load %arg16[%c0_295, %c0_296] : memref<4x1xf32, #tpu.memory_space<vmem>>, vector<4x1xf32>
    %cst_297 = arith.constant 9.99999974E-6 : f32
    %365 = vector.broadcast %cst_297 : f32 to vector<4x1xf32>
    %366 = arith.addf %363, %365 : vector<4x1xf32>
    %367 = math.rsqrt %366 : vector<4x1xf32>
    %368 = arith.mulf %364, %367 : vector<4x1xf32>
    %c0_298 = arith.constant 0 : index
    %c0_299 = arith.constant 0 : index
    %369 = vector.load %arg17[%c0_298, %c0_299] : memref<4x1xf32, #tpu.memory_space<vmem>>, vector<4x1xf32>
    %370 = arith.mulf %354, %368 : vector<4x1xf32>
    %371 = arith.subf %369, %370 : vector<4x1xf32>
    %372 = vector.broadcast %368 : vector<4x1xf32> to vector<4x512xf32>
    %373 = arith.mulf %350, %372 : vector<4x512xf32>
    %374 = vector.broadcast %371 : vector<4x1xf32> to vector<4x512xf32>
    %375 = arith.addf %373, %374 : vector<4x512xf32>
    %376 = arith.addf %375, %196 : vector<4x512xf32>
    %cst_300 = arith.constant 0.000000e+00 : f32
    %377 = vector.broadcast %cst_300 : f32 to vector<4x512xf32>
    %378 = arith.cmpf ogt, %376, %377 : vector<4x512xf32>
    %cst_301 = arith.constant 2.000000e-01 : f32
    %379 = vector.broadcast %cst_301 : f32 to vector<4x512xf32>
    %380 = arith.mulf %379, %376 : vector<4x512xf32>
    %381 = arith.select %378, %376, %380 : vector<4x512xi1>, vector<4x512xf32>
    %c0_302 = arith.constant 0 : index
    %c17_303 = arith.constant 17 : index
    %382 = vector.load %arg43[%c0_302, %c17_303] : memref<4x546xf32, #tpu.memory_space<vmem>>, vector<4x512xf32>
    tpu.vector_store %arg43[%c0_302, %c17_303], %381 {strides = array<i32>} : memref<4x546xf32, #tpu.memory_space<vmem>>, vector<4x512xf32>,
    %cst_304 = arith.constant 0.000000e+00 : f32
    %383 = vector.broadcast %cst_304 : f32 to vector<8x512xf32>
    %c0_305 = arith.constant 0 : index
    %c0_306 = arith.constant 0 : index
    %384 = vector.load %arg43[%c0_305, %c0_306] : memref<4x546xf32, #tpu.memory_space<vmem>>, vector<4x512xf32>
    %c0_307 = arith.constant 0 : index
    %c0_308 = arith.constant 0 : index
    %385 = vector.load %arg1[%c0_307, %c0_308] : memref<9x512xf32, #tpu.memory_space<vmem>>, vector<1x512xf32>
    %386 = vector.broadcast %385 : vector<1x512xf32> to vector<4x512xf32>
    %387 = arith.mulf %384, %386 : vector<4x512xf32>
    %c0_309 = arith.constant 0 : index
    %c0_310 = arith.constant 0 : index
    %388 = vector.load %arg18[%c0_309, %c0_310] : memref<72x4xf32, #tpu.memory_space<vmem>>, vector<8x4xf32>
    %cst_311 = arith.constant dense<0.000000e+00> : vector<8x512xf32>
    %389 = tpu.matmul %388, %387, %cst_311 {dimension_numbers = #tpu.dot_dimension_numbers<[1], [0], [0], [1], [0, 0, 1, 1], [], []>} : vector<8x4xf32>, vector<4x512xf32>, vector<8x512xf32> -> vector<8x512xf32>
    %390 = arith.addf %383, %389 : vector<8x512xf32>
    %c0_312 = arith.constant 0 : index
    %c1_313 = arith.constant 1 : index
    %391 = vector.load %arg43[%c0_312, %c1_313] : memref<4x546xf32, #tpu.memory_space<vmem>>, vector<4x512xf32>
    %c1_314 = arith.constant 1 : index
    %c0_315 = arith.constant 0 : index
    %392 = vector.load %arg1[%c1_314, %c0_315] : memref<9x512xf32, #tpu.memory_space<vmem>>, vector<1x512xf32>
    %393 = vector.broadcast %392 : vector<1x512xf32> to vector<4x512xf32>
    %394 = arith.mulf %391, %393 : vector<4x512xf32>
    %c8_316 = arith.constant 8 : index
    %c0_317 = arith.constant 0 : index
    %395 = vector.load %arg18[%c8_316, %c0_317] : memref<72x4xf32, #tpu.memory_space<vmem>>, vector<8x4xf32>
    %cst_318 = arith.constant dense<0.000000e+00> : vector<8x512xf32>
    %396 = tpu.matmul %395, %394, %cst_318 {dimension_numbers = #tpu.dot_dimension_numbers<[1], [0], [0], [1], [0, 0, 1, 1], [], []>} : vector<8x4xf32>, vector<4x512xf32>, vector<8x512xf32> -> vector<8x512xf32>
    %397 = arith.addf %390, %396 : vector<8x512xf32>
    %c0_319 = arith.constant 0 : index
    %c2_320 = arith.constant 2 : index
    %398 = vector.load %arg43[%c0_319, %c2_320] : memref<4x546xf32, #tpu.memory_space<vmem>>, vector<4x512xf32>
    %c2_321 = arith.constant 2 : index
    %c0_322 = arith.constant 0 : index
    %399 = vector.load %arg1[%c2_321, %c0_322] : memref<9x512xf32, #tpu.memory_space<vmem>>, vector<1x512xf32>
    %400 = vector.broadcast %399 : vector<1x512xf32> to vector<4x512xf32>
    %401 = arith.mulf %398, %400 : vector<4x512xf32>
    %c16_323 = arith.constant 16 : index
    %c0_324 = arith.constant 0 : index
    %402 = vector.load %arg18[%c16_323, %c0_324] : memref<72x4xf32, #tpu.memory_space<vmem>>, vector<8x4xf32>
    %cst_325 = arith.constant dense<0.000000e+00> : vector<8x512xf32>
    %403 = tpu.matmul %402, %401, %cst_325 {dimension_numbers = #tpu.dot_dimension_numbers<[1], [0], [0], [1], [0, 0, 1, 1], [], []>} : vector<8x4xf32>, vector<4x512xf32>, vector<8x512xf32> -> vector<8x512xf32>
    %404 = arith.addf %397, %403 : vector<8x512xf32>
    %c0_326 = arith.constant 0 : index
    %c16_327 = arith.constant 16 : index
    %405 = vector.load %arg43[%c0_326, %c16_327] : memref<4x546xf32, #tpu.memory_space<vmem>>, vector<4x512xf32>
    %c3_328 = arith.constant 3 : index
    %c0_329 = arith.constant 0 : index
    %406 = vector.load %arg1[%c3_328, %c0_329] : memref<9x512xf32, #tpu.memory_space<vmem>>, vector<1x512xf32>
    %407 = vector.broadcast %406 : vector<1x512xf32> to vector<4x512xf32>
    %408 = arith.mulf %405, %407 : vector<4x512xf32>
    %c24_330 = arith.constant 24 : index
    %c0_331 = arith.constant 0 : index
    %409 = vector.load %arg18[%c24_330, %c0_331] : memref<72x4xf32, #tpu.memory_space<vmem>>, vector<8x4xf32>
    %cst_332 = arith.constant dense<0.000000e+00> : vector<8x512xf32>
    %410 = tpu.matmul %409, %408, %cst_332 {dimension_numbers = #tpu.dot_dimension_numbers<[1], [0], [0], [1], [0, 0, 1, 1], [], []>} : vector<8x4xf32>, vector<4x512xf32>, vector<8x512xf32> -> vector<8x512xf32>
    %411 = arith.addf %404, %410 : vector<8x512xf32>
    %c0_333 = arith.constant 0 : index
    %c17_334 = arith.constant 17 : index
    %412 = vector.load %arg43[%c0_333, %c17_334] : memref<4x546xf32, #tpu.memory_space<vmem>>, vector<4x512xf32>
    %c32_335 = arith.constant 32 : index
    %c0_336 = arith.constant 0 : index
    %413 = vector.load %arg18[%c32_335, %c0_336] : memref<72x4xf32, #tpu.memory_space<vmem>>, vector<8x4xf32>
    %cst_337 = arith.constant dense<0.000000e+00> : vector<8x512xf32>
    %414 = tpu.matmul %413, %412, %cst_337 {dimension_numbers = #tpu.dot_dimension_numbers<[1], [0], [0], [1], [0, 0, 1, 1], [], []>} : vector<8x4xf32>, vector<4x512xf32>, vector<8x512xf32> -> vector<8x512xf32>
    %415 = arith.addf %411, %414 : vector<8x512xf32>
    %c0_338 = arith.constant 0 : index
    %c18_339 = arith.constant 18 : index
    %416 = vector.load %arg43[%c0_338, %c18_339] : memref<4x546xf32, #tpu.memory_space<vmem>>, vector<4x512xf32>
    %c5_340 = arith.constant 5 : index
    %c0_341 = arith.constant 0 : index
    %417 = vector.load %arg1[%c5_340, %c0_341] : memref<9x512xf32, #tpu.memory_space<vmem>>, vector<1x512xf32>
    %418 = vector.broadcast %417 : vector<1x512xf32> to vector<4x512xf32>
    %419 = arith.mulf %416, %418 : vector<4x512xf32>
    %c40 = arith.constant 40 : index
    %c0_342 = arith.constant 0 : index
    %420 = vector.load %arg18[%c40, %c0_342] : memref<72x4xf32, #tpu.memory_space<vmem>>, vector<8x4xf32>
    %cst_343 = arith.constant dense<0.000000e+00> : vector<8x512xf32>
    %421 = tpu.matmul %420, %419, %cst_343 {dimension_numbers = #tpu.dot_dimension_numbers<[1], [0], [0], [1], [0, 0, 1, 1], [], []>} : vector<8x4xf32>, vector<4x512xf32>, vector<8x512xf32> -> vector<8x512xf32>
    %422 = arith.addf %415, %421 : vector<8x512xf32>
    %c0_344 = arith.constant 0 : index
    %c32_345 = arith.constant 32 : index
    %423 = vector.load %arg43[%c0_344, %c32_345] : memref<4x546xf32, #tpu.memory_space<vmem>>, vector<4x512xf32>
    %c6_346 = arith.constant 6 : index
    %c0_347 = arith.constant 0 : index
    %424 = vector.load %arg1[%c6_346, %c0_347] : memref<9x512xf32, #tpu.memory_space<vmem>>, vector<1x512xf32>
    %425 = vector.broadcast %424 : vector<1x512xf32> to vector<4x512xf32>
    %426 = arith.mulf %423, %425 : vector<4x512xf32>
    %c48 = arith.constant 48 : index
    %c0_348 = arith.constant 0 : index
    %427 = vector.load %arg18[%c48, %c0_348] : memref<72x4xf32, #tpu.memory_space<vmem>>, vector<8x4xf32>
    %cst_349 = arith.constant dense<0.000000e+00> : vector<8x512xf32>
    %428 = tpu.matmul %427, %426, %cst_349 {dimension_numbers = #tpu.dot_dimension_numbers<[1], [0], [0], [1], [0, 0, 1, 1], [], []>} : vector<8x4xf32>, vector<4x512xf32>, vector<8x512xf32> -> vector<8x512xf32>
    %429 = arith.addf %422, %428 : vector<8x512xf32>
    %c0_350 = arith.constant 0 : index
    %c33_351 = arith.constant 33 : index
    %430 = vector.load %arg43[%c0_350, %c33_351] : memref<4x546xf32, #tpu.memory_space<vmem>>, vector<4x512xf32>
    %c7_352 = arith.constant 7 : index
    %c0_353 = arith.constant 0 : index
    %431 = vector.load %arg1[%c7_352, %c0_353] : memref<9x512xf32, #tpu.memory_space<vmem>>, vector<1x512xf32>
    %432 = vector.broadcast %431 : vector<1x512xf32> to vector<4x512xf32>
    %433 = arith.mulf %430, %432 : vector<4x512xf32>
    %c56 = arith.constant 56 : index
    %c0_354 = arith.constant 0 : index
    %434 = vector.load %arg18[%c56, %c0_354] : memref<72x4xf32, #tpu.memory_space<vmem>>, vector<8x4xf32>
    %cst_355 = arith.constant dense<0.000000e+00> : vector<8x512xf32>
    %435 = tpu.matmul %434, %433, %cst_355 {dimension_numbers = #tpu.dot_dimension_numbers<[1], [0], [0], [1], [0, 0, 1, 1], [], []>} : vector<8x4xf32>, vector<4x512xf32>, vector<8x512xf32> -> vector<8x512xf32>
    %436 = arith.addf %429, %435 : vector<8x512xf32>
    %c0_356 = arith.constant 0 : index
    %c34_357 = arith.constant 34 : index
    %437 = vector.load %arg43[%c0_356, %c34_357] : memref<4x546xf32, #tpu.memory_space<vmem>>, vector<4x512xf32>
    %c8_358 = arith.constant 8 : index
    %c0_359 = arith.constant 0 : index
    %438 = vector.load %arg1[%c8_358, %c0_359] : memref<9x512xf32, #tpu.memory_space<vmem>>, vector<1x512xf32>
    %439 = vector.broadcast %438 : vector<1x512xf32> to vector<4x512xf32>
    %440 = arith.mulf %437, %439 : vector<4x512xf32>
    %c64 = arith.constant 64 : index
    %c0_360 = arith.constant 0 : index
    %441 = vector.load %arg18[%c64, %c0_360] : memref<72x4xf32, #tpu.memory_space<vmem>>, vector<8x4xf32>
    %cst_361 = arith.constant dense<0.000000e+00> : vector<8x512xf32>
    %442 = tpu.matmul %441, %440, %cst_361 {dimension_numbers = #tpu.dot_dimension_numbers<[1], [0], [0], [1], [0, 0, 1, 1], [], []>} : vector<8x4xf32>, vector<4x512xf32>, vector<8x512xf32> -> vector<8x512xf32>
    %443 = arith.addf %436, %442 : vector<8x512xf32>
    %c0_362 = arith.constant 0 : index
    %c0_363 = arith.constant 0 : index
    %444 = vector.load %arg4[%c0_362, %c0_363] : memref<512x128xf32, #tpu.memory_space<vmem>>, vector<512x128xf32>
    %cst_364 = arith.constant dense<0.000000e+00> : vector<8x128xf32>
    %445 = tpu.matmul %443, %444, %cst_364 {dimension_numbers = #tpu.dot_dimension_numbers<[1], [0], [0], [1], [0, 0, 1, 1], [], []>} : vector<8x512xf32>, vector<512x128xf32>, vector<8x128xf32> -> vector<8x128xf32>
    %cst_365 = arith.constant dense<0.000000e+00> : vector<8xf32>
    %446 = vector.multi_reduction <add>, %445, %cst_365 [1] : vector<8x128xf32> to vector<8xf32>
    %447 = vector.shape_cast %446 : vector<8xf32> to vector<8x1xf32>
    %cst_366 = arith.constant 7.812500e-03 : f32
    %448 = vector.broadcast %cst_366 : f32 to vector<8x1xf32>
    %449 = arith.mulf %447, %448 : vector<8x1xf32>
    %450 = arith.mulf %445, %445 : vector<8x128xf32>
    %cst_367 = arith.constant dense<0.000000e+00> : vector<8xf32>
    %451 = vector.multi_reduction <add>, %450, %cst_367 [1] : vector<8x128xf32> to vector<8xf32>
    %452 = vector.shape_cast %451 : vector<8xf32> to vector<8x1xf32>
    %cst_368 = arith.constant 7.812500e-03 : f32
    %453 = vector.broadcast %cst_368 : f32 to vector<8x1xf32>
    %454 = arith.mulf %452, %453 : vector<8x1xf32>
    %455 = arith.mulf %449, %449 : vector<8x1xf32>
    %456 = arith.subf %454, %455 : vector<8x1xf32>
    %cst_369 = arith.constant 0.000000e+00 : f32
    %457 = vector.broadcast %cst_369 : f32 to vector<8x1xf32>
    %458 = arith.maximumf %456, %457 : vector<8x1xf32>
    %c0_370 = arith.constant 0 : index
    %c0_371 = arith.constant 0 : index
    %459 = vector.load %arg19[%c0_370, %c0_371] : memref<8x1xf32, #tpu.memory_space<vmem>>, vector<8x1xf32>
    %cst_372 = arith.constant 9.99999974E-6 : f32
    %460 = vector.broadcast %cst_372 : f32 to vector<8x1xf32>
    %461 = arith.addf %458, %460 : vector<8x1xf32>
    %462 = math.rsqrt %461 : vector<8x1xf32>
    %463 = arith.mulf %459, %462 : vector<8x1xf32>
    %c0_373 = arith.constant 0 : index
    %c0_374 = arith.constant 0 : index
    %464 = vector.load %arg20[%c0_373, %c0_374] : memref<8x1xf32, #tpu.memory_space<vmem>>, vector<8x1xf32>
    %465 = arith.mulf %449, %463 : vector<8x1xf32>
    %466 = arith.subf %464, %465 : vector<8x1xf32>
    %467 = vector.broadcast %463 : vector<8x1xf32> to vector<8x128xf32>
    %468 = arith.mulf %445, %467 : vector<8x128xf32>
    %469 = vector.broadcast %466 : vector<8x1xf32> to vector<8x128xf32>
    %470 = arith.addf %468, %469 : vector<8x128xf32>
    %471 = vector.extract_strided_slice %470 {offsets = [0, 0], sizes = [4, 128], strides = [1, 1]} : vector<8x128xf32> to vector<4x128xf32>
    %cst_375 = arith.constant 0.000000e+00 : f32
    %472 = vector.broadcast %cst_375 : f32 to vector<4x128xf32>
    %473 = arith.cmpf ogt, %471, %472 : vector<4x128xf32>
    %cst_376 = arith.constant 2.000000e-01 : f32
    %474 = vector.broadcast %cst_376 : f32 to vector<4x128xf32>
    %475 = arith.mulf %474, %471 : vector<4x128xf32>
    %476 = arith.select %473, %471, %475 : vector<4x128xi1>, vector<4x128xf32>
    %477 = vector.extract_strided_slice %470 {offsets = [4, 0], sizes = [4, 128], strides = [1, 1]} : vector<8x128xf32> to vector<4x128xf32>
    %c0_377 = arith.constant 0 : index
    %c9 = arith.constant 9 : index
    %478 = vector.load %arg46[%c0_377, %c9] : memref<4x146xf32, #tpu.memory_space<vmem>>, vector<4x128xf32>
    tpu.vector_store %arg46[%c0_377, %c9], %476 {strides = array<i32>} : memref<4x146xf32, #tpu.memory_space<vmem>>, vector<4x128xf32>,
    %cst_378 = arith.constant 0.000000e+00 : f32
    %479 = vector.broadcast %cst_378 : f32 to vector<4x128xf32>
    %c0_379 = arith.constant 0 : index
    %c0_380 = arith.constant 0 : index
    %480 = vector.load %arg46[%c0_379, %c0_380] : memref<4x146xf32, #tpu.memory_space<vmem>>, vector<4x128xf32>
    %c0_381 = arith.constant 0 : index
    %c0_382 = arith.constant 0 : index
    %481 = vector.load %arg2[%c0_381, %c0_382] : memref<9x128xf32, #tpu.memory_space<vmem>>, vector<1x128xf32>
    %482 = vector.broadcast %481 : vector<1x128xf32> to vector<4x128xf32>
    %483 = arith.mulf %480, %482 : vector<4x128xf32>
    %c0_383 = arith.constant 0 : index
    %c0_384 = arith.constant 0 : index
    %484 = vector.load %arg21[%c0_383, %c0_384] : memref<36x4xf32, #tpu.memory_space<vmem>>, vector<4x4xf32>
    %cst_385 = arith.constant dense<0.000000e+00> : vector<4x128xf32>
    %485 = tpu.matmul %484, %483, %cst_385 {dimension_numbers = #tpu.dot_dimension_numbers<[1], [0], [0], [1], [0, 0, 1, 1], [], []>} : vector<4x4xf32>, vector<4x128xf32>, vector<4x128xf32> -> vector<4x128xf32>
    %486 = arith.addf %479, %485 : vector<4x128xf32>
    %c0_386 = arith.constant 0 : index
    %c1_387 = arith.constant 1 : index
    %487 = vector.load %arg46[%c0_386, %c1_387] : memref<4x146xf32, #tpu.memory_space<vmem>>, vector<4x128xf32>
    %c1_388 = arith.constant 1 : index
    %c0_389 = arith.constant 0 : index
    %488 = vector.load %arg2[%c1_388, %c0_389] : memref<9x128xf32, #tpu.memory_space<vmem>>, vector<1x128xf32>
    %489 = vector.broadcast %488 : vector<1x128xf32> to vector<4x128xf32>
    %490 = arith.mulf %487, %489 : vector<4x128xf32>
    %c4_390 = arith.constant 4 : index
    %c0_391 = arith.constant 0 : index
    %491 = vector.load %arg21[%c4_390, %c0_391] : memref<36x4xf32, #tpu.memory_space<vmem>>, vector<4x4xf32>
    %cst_392 = arith.constant dense<0.000000e+00> : vector<4x128xf32>
    %492 = tpu.matmul %491, %490, %cst_392 {dimension_numbers = #tpu.dot_dimension_numbers<[1], [0], [0], [1], [0, 0, 1, 1], [], []>} : vector<4x4xf32>, vector<4x128xf32>, vector<4x128xf32> -> vector<4x128xf32>
    %493 = arith.addf %486, %492 : vector<4x128xf32>
    %c0_393 = arith.constant 0 : index
    %c2_394 = arith.constant 2 : index
    %494 = vector.load %arg46[%c0_393, %c2_394] : memref<4x146xf32, #tpu.memory_space<vmem>>, vector<4x128xf32>
    %c2_395 = arith.constant 2 : index
    %c0_396 = arith.constant 0 : index
    %495 = vector.load %arg2[%c2_395, %c0_396] : memref<9x128xf32, #tpu.memory_space<vmem>>, vector<1x128xf32>
    %496 = vector.broadcast %495 : vector<1x128xf32> to vector<4x128xf32>
    %497 = arith.mulf %494, %496 : vector<4x128xf32>
    %c8_397 = arith.constant 8 : index
    %c0_398 = arith.constant 0 : index
    %498 = vector.load %arg21[%c8_397, %c0_398] : memref<36x4xf32, #tpu.memory_space<vmem>>, vector<4x4xf32>
    %cst_399 = arith.constant dense<0.000000e+00> : vector<4x128xf32>
    %499 = tpu.matmul %498, %497, %cst_399 {dimension_numbers = #tpu.dot_dimension_numbers<[1], [0], [0], [1], [0, 0, 1, 1], [], []>} : vector<4x4xf32>, vector<4x128xf32>, vector<4x128xf32> -> vector<4x128xf32>
    %500 = arith.addf %493, %499 : vector<4x128xf32>
    %c0_400 = arith.constant 0 : index
    %c8_401 = arith.constant 8 : index
    %501 = vector.load %arg46[%c0_400, %c8_401] : memref<4x146xf32, #tpu.memory_space<vmem>>, vector<4x128xf32>
    %c3_402 = arith.constant 3 : index
    %c0_403 = arith.constant 0 : index
    %502 = vector.load %arg2[%c3_402, %c0_403] : memref<9x128xf32, #tpu.memory_space<vmem>>, vector<1x128xf32>
    %503 = vector.broadcast %502 : vector<1x128xf32> to vector<4x128xf32>
    %504 = arith.mulf %501, %503 : vector<4x128xf32>
    %c12_404 = arith.constant 12 : index
    %c0_405 = arith.constant 0 : index
    %505 = vector.load %arg21[%c12_404, %c0_405] : memref<36x4xf32, #tpu.memory_space<vmem>>, vector<4x4xf32>
    %cst_406 = arith.constant dense<0.000000e+00> : vector<4x128xf32>
    %506 = tpu.matmul %505, %504, %cst_406 {dimension_numbers = #tpu.dot_dimension_numbers<[1], [0], [0], [1], [0, 0, 1, 1], [], []>} : vector<4x4xf32>, vector<4x128xf32>, vector<4x128xf32> -> vector<4x128xf32>
    %507 = arith.addf %500, %506 : vector<4x128xf32>
    %c0_407 = arith.constant 0 : index
    %c9_408 = arith.constant 9 : index
    %508 = vector.load %arg46[%c0_407, %c9_408] : memref<4x146xf32, #tpu.memory_space<vmem>>, vector<4x128xf32>
    %c16_409 = arith.constant 16 : index
    %c0_410 = arith.constant 0 : index
    %509 = vector.load %arg21[%c16_409, %c0_410] : memref<36x4xf32, #tpu.memory_space<vmem>>, vector<4x4xf32>
    %cst_411 = arith.constant dense<0.000000e+00> : vector<4x128xf32>
    %510 = tpu.matmul %509, %508, %cst_411 {dimension_numbers = #tpu.dot_dimension_numbers<[1], [0], [0], [1], [0, 0, 1, 1], [], []>} : vector<4x4xf32>, vector<4x128xf32>, vector<4x128xf32> -> vector<4x128xf32>
    %511 = arith.addf %507, %510 : vector<4x128xf32>
    %c0_412 = arith.constant 0 : index
    %c10 = arith.constant 10 : index
    %512 = vector.load %arg46[%c0_412, %c10] : memref<4x146xf32, #tpu.memory_space<vmem>>, vector<4x128xf32>
    %c5_413 = arith.constant 5 : index
    %c0_414 = arith.constant 0 : index
    %513 = vector.load %arg2[%c5_413, %c0_414] : memref<9x128xf32, #tpu.memory_space<vmem>>, vector<1x128xf32>
    %514 = vector.broadcast %513 : vector<1x128xf32> to vector<4x128xf32>
    %515 = arith.mulf %512, %514 : vector<4x128xf32>
    %c20_415 = arith.constant 20 : index
    %c0_416 = arith.constant 0 : index
    %516 = vector.load %arg21[%c20_415, %c0_416] : memref<36x4xf32, #tpu.memory_space<vmem>>, vector<4x4xf32>
    %cst_417 = arith.constant dense<0.000000e+00> : vector<4x128xf32>
    %517 = tpu.matmul %516, %515, %cst_417 {dimension_numbers = #tpu.dot_dimension_numbers<[1], [0], [0], [1], [0, 0, 1, 1], [], []>} : vector<4x4xf32>, vector<4x128xf32>, vector<4x128xf32> -> vector<4x128xf32>
    %518 = arith.addf %511, %517 : vector<4x128xf32>
    %c0_418 = arith.constant 0 : index
    %c16_419 = arith.constant 16 : index
    %519 = vector.load %arg46[%c0_418, %c16_419] : memref<4x146xf32, #tpu.memory_space<vmem>>, vector<4x128xf32>
    %c6_420 = arith.constant 6 : index
    %c0_421 = arith.constant 0 : index
    %520 = vector.load %arg2[%c6_420, %c0_421] : memref<9x128xf32, #tpu.memory_space<vmem>>, vector<1x128xf32>
    %521 = vector.broadcast %520 : vector<1x128xf32> to vector<4x128xf32>
    %522 = arith.mulf %519, %521 : vector<4x128xf32>
    %c24_422 = arith.constant 24 : index
    %c0_423 = arith.constant 0 : index
    %523 = vector.load %arg21[%c24_422, %c0_423] : memref<36x4xf32, #tpu.memory_space<vmem>>, vector<4x4xf32>
    %cst_424 = arith.constant dense<0.000000e+00> : vector<4x128xf32>
    %524 = tpu.matmul %523, %522, %cst_424 {dimension_numbers = #tpu.dot_dimension_numbers<[1], [0], [0], [1], [0, 0, 1, 1], [], []>} : vector<4x4xf32>, vector<4x128xf32>, vector<4x128xf32> -> vector<4x128xf32>
    %525 = arith.addf %518, %524 : vector<4x128xf32>
    %c0_425 = arith.constant 0 : index
    %c17_426 = arith.constant 17 : index
    %526 = vector.load %arg46[%c0_425, %c17_426] : memref<4x146xf32, #tpu.memory_space<vmem>>, vector<4x128xf32>
    %c7_427 = arith.constant 7 : index
    %c0_428 = arith.constant 0 : index
    %527 = vector.load %arg2[%c7_427, %c0_428] : memref<9x128xf32, #tpu.memory_space<vmem>>, vector<1x128xf32>
    %528 = vector.broadcast %527 : vector<1x128xf32> to vector<4x128xf32>
    %529 = arith.mulf %526, %528 : vector<4x128xf32>
    %c28_429 = arith.constant 28 : index
    %c0_430 = arith.constant 0 : index
    %530 = vector.load %arg21[%c28_429, %c0_430] : memref<36x4xf32, #tpu.memory_space<vmem>>, vector<4x4xf32>
    %cst_431 = arith.constant dense<0.000000e+00> : vector<4x128xf32>
    %531 = tpu.matmul %530, %529, %cst_431 {dimension_numbers = #tpu.dot_dimension_numbers<[1], [0], [0], [1], [0, 0, 1, 1], [], []>} : vector<4x4xf32>, vector<4x128xf32>, vector<4x128xf32> -> vector<4x128xf32>
    %532 = arith.addf %525, %531 : vector<4x128xf32>
    %c0_432 = arith.constant 0 : index
    %c18_433 = arith.constant 18 : index
    %533 = vector.load %arg46[%c0_432, %c18_433] : memref<4x146xf32, #tpu.memory_space<vmem>>, vector<4x128xf32>
    %c8_434 = arith.constant 8 : index
    %c0_435 = arith.constant 0 : index
    %534 = vector.load %arg2[%c8_434, %c0_435] : memref<9x128xf32, #tpu.memory_space<vmem>>, vector<1x128xf32>
    %535 = vector.broadcast %534 : vector<1x128xf32> to vector<4x128xf32>
    %536 = arith.mulf %533, %535 : vector<4x128xf32>
    %c32_436 = arith.constant 32 : index
    %c0_437 = arith.constant 0 : index
    %537 = vector.load %arg21[%c32_436, %c0_437] : memref<36x4xf32, #tpu.memory_space<vmem>>, vector<4x4xf32>
    %cst_438 = arith.constant dense<0.000000e+00> : vector<4x128xf32>
    %538 = tpu.matmul %537, %536, %cst_438 {dimension_numbers = #tpu.dot_dimension_numbers<[1], [0], [0], [1], [0, 0, 1, 1], [], []>} : vector<4x4xf32>, vector<4x128xf32>, vector<4x128xf32> -> vector<4x128xf32>
    %539 = arith.addf %532, %538 : vector<4x128xf32>
    %cst_439 = arith.constant dense<0.000000e+00> : vector<4xf32>
    %540 = vector.multi_reduction <add>, %539, %cst_439 [1] : vector<4x128xf32> to vector<4xf32>
    %541 = vector.shape_cast %540 : vector<4xf32> to vector<4x1xf32>
    %cst_440 = arith.constant 7.812500e-03 : f32
    %542 = vector.broadcast %cst_440 : f32 to vector<4x1xf32>
    %543 = arith.mulf %541, %542 : vector<4x1xf32>
    %544 = arith.mulf %539, %539 : vector<4x128xf32>
    %cst_441 = arith.constant dense<0.000000e+00> : vector<4xf32>
    %545 = vector.multi_reduction <add>, %544, %cst_441 [1] : vector<4x128xf32> to vector<4xf32>
    %546 = vector.shape_cast %545 : vector<4xf32> to vector<4x1xf32>
    %cst_442 = arith.constant 7.812500e-03 : f32
    %547 = vector.broadcast %cst_442 : f32 to vector<4x1xf32>
    %548 = arith.mulf %546, %547 : vector<4x1xf32>
    %549 = arith.mulf %543, %543 : vector<4x1xf32>
    %550 = arith.subf %548, %549 : vector<4x1xf32>
    %cst_443 = arith.constant 0.000000e+00 : f32
    %551 = vector.broadcast %cst_443 : f32 to vector<4x1xf32>
    %552 = arith.maximumf %550, %551 : vector<4x1xf32>
    %c0_444 = arith.constant 0 : index
    %c0_445 = arith.constant 0 : index
    %553 = vector.load %arg22[%c0_444, %c0_445] : memref<4x1xf32, #tpu.memory_space<vmem>>, vector<4x1xf32>
    %cst_446 = arith.constant 9.99999974E-6 : f32
    %554 = vector.broadcast %cst_446 : f32 to vector<4x1xf32>
    %555 = arith.addf %552, %554 : vector<4x1xf32>
    %556 = math.rsqrt %555 : vector<4x1xf32>
    %557 = arith.mulf %553, %556 : vector<4x1xf32>
    %c0_447 = arith.constant 0 : index
    %c0_448 = arith.constant 0 : index
    %558 = vector.load %arg23[%c0_447, %c0_448] : memref<4x1xf32, #tpu.memory_space<vmem>>, vector<4x1xf32>
    %559 = arith.mulf %543, %557 : vector<4x1xf32>
    %560 = arith.subf %558, %559 : vector<4x1xf32>
    %561 = vector.broadcast %557 : vector<4x1xf32> to vector<4x128xf32>
    %562 = arith.mulf %539, %561 : vector<4x128xf32>
    %563 = vector.broadcast %560 : vector<4x1xf32> to vector<4x128xf32>
    %564 = arith.addf %562, %563 : vector<4x128xf32>
    %565 = arith.addf %564, %477 : vector<4x128xf32>
    %cst_449 = arith.constant 0.000000e+00 : f32
    %566 = vector.broadcast %cst_449 : f32 to vector<4x128xf32>
    %567 = arith.cmpf ogt, %565, %566 : vector<4x128xf32>
    %cst_450 = arith.constant 2.000000e-01 : f32
    %568 = vector.broadcast %cst_450 : f32 to vector<4x128xf32>
    %569 = arith.mulf %568, %565 : vector<4x128xf32>
    %570 = arith.select %567, %565, %569 : vector<4x128xi1>, vector<4x128xf32>
    %c0_451 = arith.constant 0 : index
    %c9_452 = arith.constant 9 : index
    %571 = vector.load %arg45[%c0_451, %c9_452] : memref<4x146xf32, #tpu.memory_space<vmem>>, vector<4x128xf32>
    tpu.vector_store %arg45[%c0_451, %c9_452], %570 {strides = array<i32>} : memref<4x146xf32, #tpu.memory_space<vmem>>, vector<4x128xf32>,
    %cst_453 = arith.constant 0.000000e+00 : f32
    %572 = vector.broadcast %cst_453 : f32 to vector<4x128xf32>
    %c0_454 = arith.constant 0 : index
    %c0_455 = arith.constant 0 : index
    %573 = vector.load %arg45[%c0_454, %c0_455] : memref<4x146xf32, #tpu.memory_space<vmem>>, vector<4x128xf32>
    %c0_456 = arith.constant 0 : index
    %c0_457 = arith.constant 0 : index
    %574 = vector.load %arg2[%c0_456, %c0_457] : memref<9x128xf32, #tpu.memory_space<vmem>>, vector<1x128xf32>
    %575 = vector.broadcast %574 : vector<1x128xf32> to vector<4x128xf32>
    %576 = arith.mulf %573, %575 : vector<4x128xf32>
    %c0_458 = arith.constant 0 : index
    %c0_459 = arith.constant 0 : index
    %577 = vector.load %arg24[%c0_458, %c0_459] : memref<36x4xf32, #tpu.memory_space<vmem>>, vector<4x4xf32>
    %cst_460 = arith.constant dense<0.000000e+00> : vector<4x128xf32>
    %578 = tpu.matmul %577, %576, %cst_460 {dimension_numbers = #tpu.dot_dimension_numbers<[1], [0], [0], [1], [0, 0, 1, 1], [], []>} : vector<4x4xf32>, vector<4x128xf32>, vector<4x128xf32> -> vector<4x128xf32>
    %579 = arith.addf %572, %578 : vector<4x128xf32>
    %c0_461 = arith.constant 0 : index
    %c1_462 = arith.constant 1 : index
    %580 = vector.load %arg45[%c0_461, %c1_462] : memref<4x146xf32, #tpu.memory_space<vmem>>, vector<4x128xf32>
    %c1_463 = arith.constant 1 : index
    %c0_464 = arith.constant 0 : index
    %581 = vector.load %arg2[%c1_463, %c0_464] : memref<9x128xf32, #tpu.memory_space<vmem>>, vector<1x128xf32>
    %582 = vector.broadcast %581 : vector<1x128xf32> to vector<4x128xf32>
    %583 = arith.mulf %580, %582 : vector<4x128xf32>
    %c4_465 = arith.constant 4 : index
    %c0_466 = arith.constant 0 : index
    %584 = vector.load %arg24[%c4_465, %c0_466] : memref<36x4xf32, #tpu.memory_space<vmem>>, vector<4x4xf32>
    %cst_467 = arith.constant dense<0.000000e+00> : vector<4x128xf32>
    %585 = tpu.matmul %584, %583, %cst_467 {dimension_numbers = #tpu.dot_dimension_numbers<[1], [0], [0], [1], [0, 0, 1, 1], [], []>} : vector<4x4xf32>, vector<4x128xf32>, vector<4x128xf32> -> vector<4x128xf32>
    %586 = arith.addf %579, %585 : vector<4x128xf32>
    %c0_468 = arith.constant 0 : index
    %c2_469 = arith.constant 2 : index
    %587 = vector.load %arg45[%c0_468, %c2_469] : memref<4x146xf32, #tpu.memory_space<vmem>>, vector<4x128xf32>
    %c2_470 = arith.constant 2 : index
    %c0_471 = arith.constant 0 : index
    %588 = vector.load %arg2[%c2_470, %c0_471] : memref<9x128xf32, #tpu.memory_space<vmem>>, vector<1x128xf32>
    %589 = vector.broadcast %588 : vector<1x128xf32> to vector<4x128xf32>
    %590 = arith.mulf %587, %589 : vector<4x128xf32>
    %c8_472 = arith.constant 8 : index
    %c0_473 = arith.constant 0 : index
    %591 = vector.load %arg24[%c8_472, %c0_473] : memref<36x4xf32, #tpu.memory_space<vmem>>, vector<4x4xf32>
    %cst_474 = arith.constant dense<0.000000e+00> : vector<4x128xf32>
    %592 = tpu.matmul %591, %590, %cst_474 {dimension_numbers = #tpu.dot_dimension_numbers<[1], [0], [0], [1], [0, 0, 1, 1], [], []>} : vector<4x4xf32>, vector<4x128xf32>, vector<4x128xf32> -> vector<4x128xf32>
    %593 = arith.addf %586, %592 : vector<4x128xf32>
    %c0_475 = arith.constant 0 : index
    %c8_476 = arith.constant 8 : index
    %594 = vector.load %arg45[%c0_475, %c8_476] : memref<4x146xf32, #tpu.memory_space<vmem>>, vector<4x128xf32>
    %c3_477 = arith.constant 3 : index
    %c0_478 = arith.constant 0 : index
    %595 = vector.load %arg2[%c3_477, %c0_478] : memref<9x128xf32, #tpu.memory_space<vmem>>, vector<1x128xf32>
    %596 = vector.broadcast %595 : vector<1x128xf32> to vector<4x128xf32>
    %597 = arith.mulf %594, %596 : vector<4x128xf32>
    %c12_479 = arith.constant 12 : index
    %c0_480 = arith.constant 0 : index
    %598 = vector.load %arg24[%c12_479, %c0_480] : memref<36x4xf32, #tpu.memory_space<vmem>>, vector<4x4xf32>
    %cst_481 = arith.constant dense<0.000000e+00> : vector<4x128xf32>
    %599 = tpu.matmul %598, %597, %cst_481 {dimension_numbers = #tpu.dot_dimension_numbers<[1], [0], [0], [1], [0, 0, 1, 1], [], []>} : vector<4x4xf32>, vector<4x128xf32>, vector<4x128xf32> -> vector<4x128xf32>
    %600 = arith.addf %593, %599 : vector<4x128xf32>
    %c0_482 = arith.constant 0 : index
    %c9_483 = arith.constant 9 : index
    %601 = vector.load %arg45[%c0_482, %c9_483] : memref<4x146xf32, #tpu.memory_space<vmem>>, vector<4x128xf32>
    %c16_484 = arith.constant 16 : index
    %c0_485 = arith.constant 0 : index
    %602 = vector.load %arg24[%c16_484, %c0_485] : memref<36x4xf32, #tpu.memory_space<vmem>>, vector<4x4xf32>
    %cst_486 = arith.constant dense<0.000000e+00> : vector<4x128xf32>
    %603 = tpu.matmul %602, %601, %cst_486 {dimension_numbers = #tpu.dot_dimension_numbers<[1], [0], [0], [1], [0, 0, 1, 1], [], []>} : vector<4x4xf32>, vector<4x128xf32>, vector<4x128xf32> -> vector<4x128xf32>
    %604 = arith.addf %600, %603 : vector<4x128xf32>
    %c0_487 = arith.constant 0 : index
    %c10_488 = arith.constant 10 : index
    %605 = vector.load %arg45[%c0_487, %c10_488] : memref<4x146xf32, #tpu.memory_space<vmem>>, vector<4x128xf32>
    %c5_489 = arith.constant 5 : index
    %c0_490 = arith.constant 0 : index
    %606 = vector.load %arg2[%c5_489, %c0_490] : memref<9x128xf32, #tpu.memory_space<vmem>>, vector<1x128xf32>
    %607 = vector.broadcast %606 : vector<1x128xf32> to vector<4x128xf32>
    %608 = arith.mulf %605, %607 : vector<4x128xf32>
    %c20_491 = arith.constant 20 : index
    %c0_492 = arith.constant 0 : index
    %609 = vector.load %arg24[%c20_491, %c0_492] : memref<36x4xf32, #tpu.memory_space<vmem>>, vector<4x4xf32>
    %cst_493 = arith.constant dense<0.000000e+00> : vector<4x128xf32>
    %610 = tpu.matmul %609, %608, %cst_493 {dimension_numbers = #tpu.dot_dimension_numbers<[1], [0], [0], [1], [0, 0, 1, 1], [], []>} : vector<4x4xf32>, vector<4x128xf32>, vector<4x128xf32> -> vector<4x128xf32>
    %611 = arith.addf %604, %610 : vector<4x128xf32>
    %c0_494 = arith.constant 0 : index
    %c16_495 = arith.constant 16 : index
    %612 = vector.load %arg45[%c0_494, %c16_495] : memref<4x146xf32, #tpu.memory_space<vmem>>, vector<4x128xf32>
    %c6_496 = arith.constant 6 : index
    %c0_497 = arith.constant 0 : index
    %613 = vector.load %arg2[%c6_496, %c0_497] : memref<9x128xf32, #tpu.memory_space<vmem>>, vector<1x128xf32>
    %614 = vector.broadcast %613 : vector<1x128xf32> to vector<4x128xf32>
    %615 = arith.mulf %612, %614 : vector<4x128xf32>
    %c24_498 = arith.constant 24 : index
    %c0_499 = arith.constant 0 : index
    %616 = vector.load %arg24[%c24_498, %c0_499] : memref<36x4xf32, #tpu.memory_space<vmem>>, vector<4x4xf32>
    %cst_500 = arith.constant dense<0.000000e+00> : vector<4x128xf32>
    %617 = tpu.matmul %616, %615, %cst_500 {dimension_numbers = #tpu.dot_dimension_numbers<[1], [0], [0], [1], [0, 0, 1, 1], [], []>} : vector<4x4xf32>, vector<4x128xf32>, vector<4x128xf32> -> vector<4x128xf32>
    %618 = arith.addf %611, %617 : vector<4x128xf32>
    %c0_501 = arith.constant 0 : index
    %c17_502 = arith.constant 17 : index
    %619 = vector.load %arg45[%c0_501, %c17_502] : memref<4x146xf32, #tpu.memory_space<vmem>>, vector<4x128xf32>
    %c7_503 = arith.constant 7 : index
    %c0_504 = arith.constant 0 : index
    %620 = vector.load %arg2[%c7_503, %c0_504] : memref<9x128xf32, #tpu.memory_space<vmem>>, vector<1x128xf32>
    %621 = vector.broadcast %620 : vector<1x128xf32> to vector<4x128xf32>
    %622 = arith.mulf %619, %621 : vector<4x128xf32>
    %c28_505 = arith.constant 28 : index
    %c0_506 = arith.constant 0 : index
    %623 = vector.load %arg24[%c28_505, %c0_506] : memref<36x4xf32, #tpu.memory_space<vmem>>, vector<4x4xf32>
    %cst_507 = arith.constant dense<0.000000e+00> : vector<4x128xf32>
    %624 = tpu.matmul %623, %622, %cst_507 {dimension_numbers = #tpu.dot_dimension_numbers<[1], [0], [0], [1], [0, 0, 1, 1], [], []>} : vector<4x4xf32>, vector<4x128xf32>, vector<4x128xf32> -> vector<4x128xf32>
    %625 = arith.addf %618, %624 : vector<4x128xf32>
    %c0_508 = arith.constant 0 : index
    %c18_509 = arith.constant 18 : index
    %626 = vector.load %arg45[%c0_508, %c18_509] : memref<4x146xf32, #tpu.memory_space<vmem>>, vector<4x128xf32>
    %c8_510 = arith.constant 8 : index
    %c0_511 = arith.constant 0 : index
    %627 = vector.load %arg2[%c8_510, %c0_511] : memref<9x128xf32, #tpu.memory_space<vmem>>, vector<1x128xf32>
    %628 = vector.broadcast %627 : vector<1x128xf32> to vector<4x128xf32>
    %629 = arith.mulf %626, %628 : vector<4x128xf32>
    %c32_512 = arith.constant 32 : index
    %c0_513 = arith.constant 0 : index
    %630 = vector.load %arg24[%c32_512, %c0_513] : memref<36x4xf32, #tpu.memory_space<vmem>>, vector<4x4xf32>
    %cst_514 = arith.constant dense<0.000000e+00> : vector<4x128xf32>
    %631 = tpu.matmul %630, %629, %cst_514 {dimension_numbers = #tpu.dot_dimension_numbers<[1], [0], [0], [1], [0, 0, 1, 1], [], []>} : vector<4x4xf32>, vector<4x128xf32>, vector<4x128xf32> -> vector<4x128xf32>
    %632 = arith.addf %625, %631 : vector<4x128xf32>
    %cst_515 = arith.constant dense<0.000000e+00> : vector<4xf32>
    %633 = vector.multi_reduction <add>, %632, %cst_515 [1] : vector<4x128xf32> to vector<4xf32>
    %634 = vector.shape_cast %633 : vector<4xf32> to vector<4x1xf32>
    %cst_516 = arith.constant 7.812500e-03 : f32
    %635 = vector.broadcast %cst_516 : f32 to vector<4x1xf32>
    %636 = arith.mulf %634, %635 : vector<4x1xf32>
    %637 = arith.mulf %632, %632 : vector<4x128xf32>
    %cst_517 = arith.constant dense<0.000000e+00> : vector<4xf32>
    %638 = vector.multi_reduction <add>, %637, %cst_517 [1] : vector<4x128xf32> to vector<4xf32>
    %639 = vector.shape_cast %638 : vector<4xf32> to vector<4x1xf32>
    %cst_518 = arith.constant 7.812500e-03 : f32
    %640 = vector.broadcast %cst_518 : f32 to vector<4x1xf32>
    %641 = arith.mulf %639, %640 : vector<4x1xf32>
    %642 = arith.mulf %636, %636 : vector<4x1xf32>
    %643 = arith.subf %641, %642 : vector<4x1xf32>
    %cst_519 = arith.constant 0.000000e+00 : f32
    %644 = vector.broadcast %cst_519 : f32 to vector<4x1xf32>
    %645 = arith.maximumf %643, %644 : vector<4x1xf32>
    %c0_520 = arith.constant 0 : index
    %c0_521 = arith.constant 0 : index
    %646 = vector.load %arg25[%c0_520, %c0_521] : memref<4x1xf32, #tpu.memory_space<vmem>>, vector<4x1xf32>
    %cst_522 = arith.constant 9.99999974E-6 : f32
    %647 = vector.broadcast %cst_522 : f32 to vector<4x1xf32>
    %648 = arith.addf %645, %647 : vector<4x1xf32>
    %649 = math.rsqrt %648 : vector<4x1xf32>
    %650 = arith.mulf %646, %649 : vector<4x1xf32>
    %c0_523 = arith.constant 0 : index
    %c0_524 = arith.constant 0 : index
    %651 = vector.load %arg26[%c0_523, %c0_524] : memref<4x1xf32, #tpu.memory_space<vmem>>, vector<4x1xf32>
    %652 = arith.mulf %636, %650 : vector<4x1xf32>
    %653 = arith.subf %651, %652 : vector<4x1xf32>
    %654 = vector.broadcast %650 : vector<4x1xf32> to vector<4x128xf32>
    %655 = arith.mulf %632, %654 : vector<4x128xf32>
    %656 = vector.broadcast %653 : vector<4x1xf32> to vector<4x128xf32>
    %657 = arith.addf %655, %656 : vector<4x128xf32>
    %cst_525 = arith.constant 0.000000e+00 : f32
    %658 = vector.broadcast %cst_525 : f32 to vector<4x128xf32>
    %659 = arith.cmpf ogt, %657, %658 : vector<4x128xf32>
    %cst_526 = arith.constant 2.000000e-01 : f32
    %660 = vector.broadcast %cst_526 : f32 to vector<4x128xf32>
    %661 = arith.mulf %660, %657 : vector<4x128xf32>
    %662 = arith.select %659, %657, %661 : vector<4x128xi1>, vector<4x128xf32>
    %c0_527 = arith.constant 0 : index
    %c9_528 = arith.constant 9 : index
    %663 = vector.load %arg46[%c0_527, %c9_528] : memref<4x146xf32, #tpu.memory_space<vmem>>, vector<4x128xf32>
    tpu.vector_store %arg46[%c0_527, %c9_528], %662 {strides = array<i32>} : memref<4x146xf32, #tpu.memory_space<vmem>>, vector<4x128xf32>,
    %cst_529 = arith.constant 0.000000e+00 : f32
    %664 = vector.broadcast %cst_529 : f32 to vector<4x128xf32>
    %c0_530 = arith.constant 0 : index
    %c0_531 = arith.constant 0 : index
    %665 = vector.load %arg46[%c0_530, %c0_531] : memref<4x146xf32, #tpu.memory_space<vmem>>, vector<4x128xf32>
    %c0_532 = arith.constant 0 : index
    %c0_533 = arith.constant 0 : index
    %666 = vector.load %arg2[%c0_532, %c0_533] : memref<9x128xf32, #tpu.memory_space<vmem>>, vector<1x128xf32>
    %667 = vector.broadcast %666 : vector<1x128xf32> to vector<4x128xf32>
    %668 = arith.mulf %665, %667 : vector<4x128xf32>
    %c0_534 = arith.constant 0 : index
    %c0_535 = arith.constant 0 : index
    %669 = vector.load %arg27[%c0_534, %c0_535] : memref<36x4xf32, #tpu.memory_space<vmem>>, vector<4x4xf32>
    %cst_536 = arith.constant dense<0.000000e+00> : vector<4x128xf32>
    %670 = tpu.matmul %669, %668, %cst_536 {dimension_numbers = #tpu.dot_dimension_numbers<[1], [0], [0], [1], [0, 0, 1, 1], [], []>} : vector<4x4xf32>, vector<4x128xf32>, vector<4x128xf32> -> vector<4x128xf32>
    %671 = arith.addf %664, %670 : vector<4x128xf32>
    %c0_537 = arith.constant 0 : index
    %c1_538 = arith.constant 1 : index
    %672 = vector.load %arg46[%c0_537, %c1_538] : memref<4x146xf32, #tpu.memory_space<vmem>>, vector<4x128xf32>
    %c1_539 = arith.constant 1 : index
    %c0_540 = arith.constant 0 : index
    %673 = vector.load %arg2[%c1_539, %c0_540] : memref<9x128xf32, #tpu.memory_space<vmem>>, vector<1x128xf32>
    %674 = vector.broadcast %673 : vector<1x128xf32> to vector<4x128xf32>
    %675 = arith.mulf %672, %674 : vector<4x128xf32>
    %c4_541 = arith.constant 4 : index
    %c0_542 = arith.constant 0 : index
    %676 = vector.load %arg27[%c4_541, %c0_542] : memref<36x4xf32, #tpu.memory_space<vmem>>, vector<4x4xf32>
    %cst_543 = arith.constant dense<0.000000e+00> : vector<4x128xf32>
    %677 = tpu.matmul %676, %675, %cst_543 {dimension_numbers = #tpu.dot_dimension_numbers<[1], [0], [0], [1], [0, 0, 1, 1], [], []>} : vector<4x4xf32>, vector<4x128xf32>, vector<4x128xf32> -> vector<4x128xf32>
    %678 = arith.addf %671, %677 : vector<4x128xf32>
    %c0_544 = arith.constant 0 : index
    %c2_545 = arith.constant 2 : index
    %679 = vector.load %arg46[%c0_544, %c2_545] : memref<4x146xf32, #tpu.memory_space<vmem>>, vector<4x128xf32>
    %c2_546 = arith.constant 2 : index
    %c0_547 = arith.constant 0 : index
    %680 = vector.load %arg2[%c2_546, %c0_547] : memref<9x128xf32, #tpu.memory_space<vmem>>, vector<1x128xf32>
    %681 = vector.broadcast %680 : vector<1x128xf32> to vector<4x128xf32>
    %682 = arith.mulf %679, %681 : vector<4x128xf32>
    %c8_548 = arith.constant 8 : index
    %c0_549 = arith.constant 0 : index
    %683 = vector.load %arg27[%c8_548, %c0_549] : memref<36x4xf32, #tpu.memory_space<vmem>>, vector<4x4xf32>
    %cst_550 = arith.constant dense<0.000000e+00> : vector<4x128xf32>
    %684 = tpu.matmul %683, %682, %cst_550 {dimension_numbers = #tpu.dot_dimension_numbers<[1], [0], [0], [1], [0, 0, 1, 1], [], []>} : vector<4x4xf32>, vector<4x128xf32>, vector<4x128xf32> -> vector<4x128xf32>
    %685 = arith.addf %678, %684 : vector<4x128xf32>
    %c0_551 = arith.constant 0 : index
    %c8_552 = arith.constant 8 : index
    %686 = vector.load %arg46[%c0_551, %c8_552] : memref<4x146xf32, #tpu.memory_space<vmem>>, vector<4x128xf32>
    %c3_553 = arith.constant 3 : index
    %c0_554 = arith.constant 0 : index
    %687 = vector.load %arg2[%c3_553, %c0_554] : memref<9x128xf32, #tpu.memory_space<vmem>>, vector<1x128xf32>
    %688 = vector.broadcast %687 : vector<1x128xf32> to vector<4x128xf32>
    %689 = arith.mulf %686, %688 : vector<4x128xf32>
    %c12_555 = arith.constant 12 : index
    %c0_556 = arith.constant 0 : index
    %690 = vector.load %arg27[%c12_555, %c0_556] : memref<36x4xf32, #tpu.memory_space<vmem>>, vector<4x4xf32>
    %cst_557 = arith.constant dense<0.000000e+00> : vector<4x128xf32>
    %691 = tpu.matmul %690, %689, %cst_557 {dimension_numbers = #tpu.dot_dimension_numbers<[1], [0], [0], [1], [0, 0, 1, 1], [], []>} : vector<4x4xf32>, vector<4x128xf32>, vector<4x128xf32> -> vector<4x128xf32>
    %692 = arith.addf %685, %691 : vector<4x128xf32>
    %c0_558 = arith.constant 0 : index
    %c9_559 = arith.constant 9 : index
    %693 = vector.load %arg46[%c0_558, %c9_559] : memref<4x146xf32, #tpu.memory_space<vmem>>, vector<4x128xf32>
    %c16_560 = arith.constant 16 : index
    %c0_561 = arith.constant 0 : index
    %694 = vector.load %arg27[%c16_560, %c0_561] : memref<36x4xf32, #tpu.memory_space<vmem>>, vector<4x4xf32>
    %cst_562 = arith.constant dense<0.000000e+00> : vector<4x128xf32>
    %695 = tpu.matmul %694, %693, %cst_562 {dimension_numbers = #tpu.dot_dimension_numbers<[1], [0], [0], [1], [0, 0, 1, 1], [], []>} : vector<4x4xf32>, vector<4x128xf32>, vector<4x128xf32> -> vector<4x128xf32>
    %696 = arith.addf %692, %695 : vector<4x128xf32>
    %c0_563 = arith.constant 0 : index
    %c10_564 = arith.constant 10 : index
    %697 = vector.load %arg46[%c0_563, %c10_564] : memref<4x146xf32, #tpu.memory_space<vmem>>, vector<4x128xf32>
    %c5_565 = arith.constant 5 : index
    %c0_566 = arith.constant 0 : index
    %698 = vector.load %arg2[%c5_565, %c0_566] : memref<9x128xf32, #tpu.memory_space<vmem>>, vector<1x128xf32>
    %699 = vector.broadcast %698 : vector<1x128xf32> to vector<4x128xf32>
    %700 = arith.mulf %697, %699 : vector<4x128xf32>
    %c20_567 = arith.constant 20 : index
    %c0_568 = arith.constant 0 : index
    %701 = vector.load %arg27[%c20_567, %c0_568] : memref<36x4xf32, #tpu.memory_space<vmem>>, vector<4x4xf32>
    %cst_569 = arith.constant dense<0.000000e+00> : vector<4x128xf32>
    %702 = tpu.matmul %701, %700, %cst_569 {dimension_numbers = #tpu.dot_dimension_numbers<[1], [0], [0], [1], [0, 0, 1, 1], [], []>} : vector<4x4xf32>, vector<4x128xf32>, vector<4x128xf32> -> vector<4x128xf32>
    %703 = arith.addf %696, %702 : vector<4x128xf32>
    %c0_570 = arith.constant 0 : index
    %c16_571 = arith.constant 16 : index
    %704 = vector.load %arg46[%c0_570, %c16_571] : memref<4x146xf32, #tpu.memory_space<vmem>>, vector<4x128xf32>
    %c6_572 = arith.constant 6 : index
    %c0_573 = arith.constant 0 : index
    %705 = vector.load %arg2[%c6_572, %c0_573] : memref<9x128xf32, #tpu.memory_space<vmem>>, vector<1x128xf32>
    %706 = vector.broadcast %705 : vector<1x128xf32> to vector<4x128xf32>
    %707 = arith.mulf %704, %706 : vector<4x128xf32>
    %c24_574 = arith.constant 24 : index
    %c0_575 = arith.constant 0 : index
    %708 = vector.load %arg27[%c24_574, %c0_575] : memref<36x4xf32, #tpu.memory_space<vmem>>, vector<4x4xf32>
    %cst_576 = arith.constant dense<0.000000e+00> : vector<4x128xf32>
    %709 = tpu.matmul %708, %707, %cst_576 {dimension_numbers = #tpu.dot_dimension_numbers<[1], [0], [0], [1], [0, 0, 1, 1], [], []>} : vector<4x4xf32>, vector<4x128xf32>, vector<4x128xf32> -> vector<4x128xf32>
    %710 = arith.addf %703, %709 : vector<4x128xf32>
    %c0_577 = arith.constant 0 : index
    %c17_578 = arith.constant 17 : index
    %711 = vector.load %arg46[%c0_577, %c17_578] : memref<4x146xf32, #tpu.memory_space<vmem>>, vector<4x128xf32>
    %c7_579 = arith.constant 7 : index
    %c0_580 = arith.constant 0 : index
    %712 = vector.load %arg2[%c7_579, %c0_580] : memref<9x128xf32, #tpu.memory_space<vmem>>, vector<1x128xf32>
    %713 = vector.broadcast %712 : vector<1x128xf32> to vector<4x128xf32>
    %714 = arith.mulf %711, %713 : vector<4x128xf32>
    %c28_581 = arith.constant 28 : index
    %c0_582 = arith.constant 0 : index
    %715 = vector.load %arg27[%c28_581, %c0_582] : memref<36x4xf32, #tpu.memory_space<vmem>>, vector<4x4xf32>
    %cst_583 = arith.constant dense<0.000000e+00> : vector<4x128xf32>
    %716 = tpu.matmul %715, %714, %cst_583 {dimension_numbers = #tpu.dot_dimension_numbers<[1], [0], [0], [1], [0, 0, 1, 1], [], []>} : vector<4x4xf32>, vector<4x128xf32>, vector<4x128xf32> -> vector<4x128xf32>
    %717 = arith.addf %710, %716 : vector<4x128xf32>
    %c0_584 = arith.constant 0 : index
    %c18_585 = arith.constant 18 : index
    %718 = vector.load %arg46[%c0_584, %c18_585] : memref<4x146xf32, #tpu.memory_space<vmem>>, vector<4x128xf32>
    %c8_586 = arith.constant 8 : index
    %c0_587 = arith.constant 0 : index
    %719 = vector.load %arg2[%c8_586, %c0_587] : memref<9x128xf32, #tpu.memory_space<vmem>>, vector<1x128xf32>
    %720 = vector.broadcast %719 : vector<1x128xf32> to vector<4x128xf32>
    %721 = arith.mulf %718, %720 : vector<4x128xf32>
    %c32_588 = arith.constant 32 : index
    %c0_589 = arith.constant 0 : index
    %722 = vector.load %arg27[%c32_588, %c0_589] : memref<36x4xf32, #tpu.memory_space<vmem>>, vector<4x4xf32>
    %cst_590 = arith.constant dense<0.000000e+00> : vector<4x128xf32>
    %723 = tpu.matmul %722, %721, %cst_590 {dimension_numbers = #tpu.dot_dimension_numbers<[1], [0], [0], [1], [0, 0, 1, 1], [], []>} : vector<4x4xf32>, vector<4x128xf32>, vector<4x128xf32> -> vector<4x128xf32>
    %724 = arith.addf %717, %723 : vector<4x128xf32>
    %cst_591 = arith.constant dense<0.000000e+00> : vector<4xf32>
    %725 = vector.multi_reduction <add>, %724, %cst_591 [1] : vector<4x128xf32> to vector<4xf32>
    %726 = vector.shape_cast %725 : vector<4xf32> to vector<4x1xf32>
    %cst_592 = arith.constant 7.812500e-03 : f32
    %727 = vector.broadcast %cst_592 : f32 to vector<4x1xf32>
    %728 = arith.mulf %726, %727 : vector<4x1xf32>
    %729 = arith.mulf %724, %724 : vector<4x128xf32>
    %cst_593 = arith.constant dense<0.000000e+00> : vector<4xf32>
    %730 = vector.multi_reduction <add>, %729, %cst_593 [1] : vector<4x128xf32> to vector<4xf32>
    %731 = vector.shape_cast %730 : vector<4xf32> to vector<4x1xf32>
    %cst_594 = arith.constant 7.812500e-03 : f32
    %732 = vector.broadcast %cst_594 : f32 to vector<4x1xf32>
    %733 = arith.mulf %731, %732 : vector<4x1xf32>
    %734 = arith.mulf %728, %728 : vector<4x1xf32>
    %735 = arith.subf %733, %734 : vector<4x1xf32>
    %cst_595 = arith.constant 0.000000e+00 : f32
    %736 = vector.broadcast %cst_595 : f32 to vector<4x1xf32>
    %737 = arith.maximumf %735, %736 : vector<4x1xf32>
    %c0_596 = arith.constant 0 : index
    %c0_597 = arith.constant 0 : index
    %738 = vector.load %arg28[%c0_596, %c0_597] : memref<4x1xf32, #tpu.memory_space<vmem>>, vector<4x1xf32>
    %cst_598 = arith.constant 9.99999974E-6 : f32
    %739 = vector.broadcast %cst_598 : f32 to vector<4x1xf32>
    %740 = arith.addf %737, %739 : vector<4x1xf32>
    %741 = math.rsqrt %740 : vector<4x1xf32>
    %742 = arith.mulf %738, %741 : vector<4x1xf32>
    %c0_599 = arith.constant 0 : index
    %c0_600 = arith.constant 0 : index
    %743 = vector.load %arg29[%c0_599, %c0_600] : memref<4x1xf32, #tpu.memory_space<vmem>>, vector<4x1xf32>
    %744 = arith.mulf %728, %742 : vector<4x1xf32>
    %745 = arith.subf %743, %744 : vector<4x1xf32>
    %746 = vector.broadcast %742 : vector<4x1xf32> to vector<4x128xf32>
    %747 = arith.mulf %724, %746 : vector<4x128xf32>
    %748 = vector.broadcast %745 : vector<4x1xf32> to vector<4x128xf32>
    %749 = arith.addf %747, %748 : vector<4x128xf32>
    %750 = arith.addf %749, %570 : vector<4x128xf32>
    %cst_601 = arith.constant 0.000000e+00 : f32
    %751 = vector.broadcast %cst_601 : f32 to vector<4x128xf32>
    %752 = arith.cmpf ogt, %750, %751 : vector<4x128xf32>
    %cst_602 = arith.constant 2.000000e-01 : f32
    %753 = vector.broadcast %cst_602 : f32 to vector<4x128xf32>
    %754 = arith.mulf %753, %750 : vector<4x128xf32>
    %755 = arith.select %752, %750, %754 : vector<4x128xi1>, vector<4x128xf32>
    %c0_603 = arith.constant 0 : index
    %c9_604 = arith.constant 9 : index
    %756 = vector.load %arg45[%c0_603, %c9_604] : memref<4x146xf32, #tpu.memory_space<vmem>>, vector<4x128xf32>
    tpu.vector_store %arg45[%c0_603, %c9_604], %755 {strides = array<i32>} : memref<4x146xf32, #tpu.memory_space<vmem>>, vector<4x128xf32>,
    %cst_605 = arith.constant 0.000000e+00 : f32
    %757 = vector.broadcast %cst_605 : f32 to vector<8x128xf32>
    %c0_606 = arith.constant 0 : index
    %c0_607 = arith.constant 0 : index
    %758 = vector.load %arg45[%c0_606, %c0_607] : memref<4x146xf32, #tpu.memory_space<vmem>>, vector<4x128xf32>
    %c0_608 = arith.constant 0 : index
    %c0_609 = arith.constant 0 : index
    %759 = vector.load %arg2[%c0_608, %c0_609] : memref<9x128xf32, #tpu.memory_space<vmem>>, vector<1x128xf32>
    %760 = vector.broadcast %759 : vector<1x128xf32> to vector<4x128xf32>
    %761 = arith.mulf %758, %760 : vector<4x128xf32>
    %c0_610 = arith.constant 0 : index
    %c0_611 = arith.constant 0 : index
    %762 = vector.load %arg30[%c0_610, %c0_611] : memref<72x4xf32, #tpu.memory_space<vmem>>, vector<8x4xf32>
    %cst_612 = arith.constant dense<0.000000e+00> : vector<8x128xf32>
    %763 = tpu.matmul %762, %761, %cst_612 {dimension_numbers = #tpu.dot_dimension_numbers<[1], [0], [0], [1], [0, 0, 1, 1], [], []>} : vector<8x4xf32>, vector<4x128xf32>, vector<8x128xf32> -> vector<8x128xf32>
    %764 = arith.addf %757, %763 : vector<8x128xf32>
    %c0_613 = arith.constant 0 : index
    %c1_614 = arith.constant 1 : index
    %765 = vector.load %arg45[%c0_613, %c1_614] : memref<4x146xf32, #tpu.memory_space<vmem>>, vector<4x128xf32>
    %c1_615 = arith.constant 1 : index
    %c0_616 = arith.constant 0 : index
    %766 = vector.load %arg2[%c1_615, %c0_616] : memref<9x128xf32, #tpu.memory_space<vmem>>, vector<1x128xf32>
    %767 = vector.broadcast %766 : vector<1x128xf32> to vector<4x128xf32>
    %768 = arith.mulf %765, %767 : vector<4x128xf32>
    %c8_617 = arith.constant 8 : index
    %c0_618 = arith.constant 0 : index
    %769 = vector.load %arg30[%c8_617, %c0_618] : memref<72x4xf32, #tpu.memory_space<vmem>>, vector<8x4xf32>
    %cst_619 = arith.constant dense<0.000000e+00> : vector<8x128xf32>
    %770 = tpu.matmul %769, %768, %cst_619 {dimension_numbers = #tpu.dot_dimension_numbers<[1], [0], [0], [1], [0, 0, 1, 1], [], []>} : vector<8x4xf32>, vector<4x128xf32>, vector<8x128xf32> -> vector<8x128xf32>
    %771 = arith.addf %764, %770 : vector<8x128xf32>
    %c0_620 = arith.constant 0 : index
    %c2_621 = arith.constant 2 : index
    %772 = vector.load %arg45[%c0_620, %c2_621] : memref<4x146xf32, #tpu.memory_space<vmem>>, vector<4x128xf32>
    %c2_622 = arith.constant 2 : index
    %c0_623 = arith.constant 0 : index
    %773 = vector.load %arg2[%c2_622, %c0_623] : memref<9x128xf32, #tpu.memory_space<vmem>>, vector<1x128xf32>
    %774 = vector.broadcast %773 : vector<1x128xf32> to vector<4x128xf32>
    %775 = arith.mulf %772, %774 : vector<4x128xf32>
    %c16_624 = arith.constant 16 : index
    %c0_625 = arith.constant 0 : index
    %776 = vector.load %arg30[%c16_624, %c0_625] : memref<72x4xf32, #tpu.memory_space<vmem>>, vector<8x4xf32>
    %cst_626 = arith.constant dense<0.000000e+00> : vector<8x128xf32>
    %777 = tpu.matmul %776, %775, %cst_626 {dimension_numbers = #tpu.dot_dimension_numbers<[1], [0], [0], [1], [0, 0, 1, 1], [], []>} : vector<8x4xf32>, vector<4x128xf32>, vector<8x128xf32> -> vector<8x128xf32>
    %778 = arith.addf %771, %777 : vector<8x128xf32>
    %c0_627 = arith.constant 0 : index
    %c8_628 = arith.constant 8 : index
    %779 = vector.load %arg45[%c0_627, %c8_628] : memref<4x146xf32, #tpu.memory_space<vmem>>, vector<4x128xf32>
    %c3_629 = arith.constant 3 : index
    %c0_630 = arith.constant 0 : index
    %780 = vector.load %arg2[%c3_629, %c0_630] : memref<9x128xf32, #tpu.memory_space<vmem>>, vector<1x128xf32>
    %781 = vector.broadcast %780 : vector<1x128xf32> to vector<4x128xf32>
    %782 = arith.mulf %779, %781 : vector<4x128xf32>
    %c24_631 = arith.constant 24 : index
    %c0_632 = arith.constant 0 : index
    %783 = vector.load %arg30[%c24_631, %c0_632] : memref<72x4xf32, #tpu.memory_space<vmem>>, vector<8x4xf32>
    %cst_633 = arith.constant dense<0.000000e+00> : vector<8x128xf32>
    %784 = tpu.matmul %783, %782, %cst_633 {dimension_numbers = #tpu.dot_dimension_numbers<[1], [0], [0], [1], [0, 0, 1, 1], [], []>} : vector<8x4xf32>, vector<4x128xf32>, vector<8x128xf32> -> vector<8x128xf32>
    %785 = arith.addf %778, %784 : vector<8x128xf32>
    %c0_634 = arith.constant 0 : index
    %c9_635 = arith.constant 9 : index
    %786 = vector.load %arg45[%c0_634, %c9_635] : memref<4x146xf32, #tpu.memory_space<vmem>>, vector<4x128xf32>
    %c32_636 = arith.constant 32 : index
    %c0_637 = arith.constant 0 : index
    %787 = vector.load %arg30[%c32_636, %c0_637] : memref<72x4xf32, #tpu.memory_space<vmem>>, vector<8x4xf32>
    %cst_638 = arith.constant dense<0.000000e+00> : vector<8x128xf32>
    %788 = tpu.matmul %787, %786, %cst_638 {dimension_numbers = #tpu.dot_dimension_numbers<[1], [0], [0], [1], [0, 0, 1, 1], [], []>} : vector<8x4xf32>, vector<4x128xf32>, vector<8x128xf32> -> vector<8x128xf32>
    %789 = arith.addf %785, %788 : vector<8x128xf32>
    %c0_639 = arith.constant 0 : index
    %c10_640 = arith.constant 10 : index
    %790 = vector.load %arg45[%c0_639, %c10_640] : memref<4x146xf32, #tpu.memory_space<vmem>>, vector<4x128xf32>
    %c5_641 = arith.constant 5 : index
    %c0_642 = arith.constant 0 : index
    %791 = vector.load %arg2[%c5_641, %c0_642] : memref<9x128xf32, #tpu.memory_space<vmem>>, vector<1x128xf32>
    %792 = vector.broadcast %791 : vector<1x128xf32> to vector<4x128xf32>
    %793 = arith.mulf %790, %792 : vector<4x128xf32>
    %c40_643 = arith.constant 40 : index
    %c0_644 = arith.constant 0 : index
    %794 = vector.load %arg30[%c40_643, %c0_644] : memref<72x4xf32, #tpu.memory_space<vmem>>, vector<8x4xf32>
    %cst_645 = arith.constant dense<0.000000e+00> : vector<8x128xf32>
    %795 = tpu.matmul %794, %793, %cst_645 {dimension_numbers = #tpu.dot_dimension_numbers<[1], [0], [0], [1], [0, 0, 1, 1], [], []>} : vector<8x4xf32>, vector<4x128xf32>, vector<8x128xf32> -> vector<8x128xf32>
    %796 = arith.addf %789, %795 : vector<8x128xf32>
    %c0_646 = arith.constant 0 : index
    %c16_647 = arith.constant 16 : index
    %797 = vector.load %arg45[%c0_646, %c16_647] : memref<4x146xf32, #tpu.memory_space<vmem>>, vector<4x128xf32>
    %c6_648 = arith.constant 6 : index
    %c0_649 = arith.constant 0 : index
    %798 = vector.load %arg2[%c6_648, %c0_649] : memref<9x128xf32, #tpu.memory_space<vmem>>, vector<1x128xf32>
    %799 = vector.broadcast %798 : vector<1x128xf32> to vector<4x128xf32>
    %800 = arith.mulf %797, %799 : vector<4x128xf32>
    %c48_650 = arith.constant 48 : index
    %c0_651 = arith.constant 0 : index
    %801 = vector.load %arg30[%c48_650, %c0_651] : memref<72x4xf32, #tpu.memory_space<vmem>>, vector<8x4xf32>
    %cst_652 = arith.constant dense<0.000000e+00> : vector<8x128xf32>
    %802 = tpu.matmul %801, %800, %cst_652 {dimension_numbers = #tpu.dot_dimension_numbers<[1], [0], [0], [1], [0, 0, 1, 1], [], []>} : vector<8x4xf32>, vector<4x128xf32>, vector<8x128xf32> -> vector<8x128xf32>
    %803 = arith.addf %796, %802 : vector<8x128xf32>
    %c0_653 = arith.constant 0 : index
    %c17_654 = arith.constant 17 : index
    %804 = vector.load %arg45[%c0_653, %c17_654] : memref<4x146xf32, #tpu.memory_space<vmem>>, vector<4x128xf32>
    %c7_655 = arith.constant 7 : index
    %c0_656 = arith.constant 0 : index
    %805 = vector.load %arg2[%c7_655, %c0_656] : memref<9x128xf32, #tpu.memory_space<vmem>>, vector<1x128xf32>
    %806 = vector.broadcast %805 : vector<1x128xf32> to vector<4x128xf32>
    %807 = arith.mulf %804, %806 : vector<4x128xf32>
    %c56_657 = arith.constant 56 : index
    %c0_658 = arith.constant 0 : index
    %808 = vector.load %arg30[%c56_657, %c0_658] : memref<72x4xf32, #tpu.memory_space<vmem>>, vector<8x4xf32>
    %cst_659 = arith.constant dense<0.000000e+00> : vector<8x128xf32>
    %809 = tpu.matmul %808, %807, %cst_659 {dimension_numbers = #tpu.dot_dimension_numbers<[1], [0], [0], [1], [0, 0, 1, 1], [], []>} : vector<8x4xf32>, vector<4x128xf32>, vector<8x128xf32> -> vector<8x128xf32>
    %810 = arith.addf %803, %809 : vector<8x128xf32>
    %c0_660 = arith.constant 0 : index
    %c18_661 = arith.constant 18 : index
    %811 = vector.load %arg45[%c0_660, %c18_661] : memref<4x146xf32, #tpu.memory_space<vmem>>, vector<4x128xf32>
    %c8_662 = arith.constant 8 : index
    %c0_663 = arith.constant 0 : index
    %812 = vector.load %arg2[%c8_662, %c0_663] : memref<9x128xf32, #tpu.memory_space<vmem>>, vector<1x128xf32>
    %813 = vector.broadcast %812 : vector<1x128xf32> to vector<4x128xf32>
    %814 = arith.mulf %811, %813 : vector<4x128xf32>
    %c64_664 = arith.constant 64 : index
    %c0_665 = arith.constant 0 : index
    %815 = vector.load %arg30[%c64_664, %c0_665] : memref<72x4xf32, #tpu.memory_space<vmem>>, vector<8x4xf32>
    %cst_666 = arith.constant dense<0.000000e+00> : vector<8x128xf32>
    %816 = tpu.matmul %815, %814, %cst_666 {dimension_numbers = #tpu.dot_dimension_numbers<[1], [0], [0], [1], [0, 0, 1, 1], [], []>} : vector<8x4xf32>, vector<4x128xf32>, vector<8x128xf32> -> vector<8x128xf32>
    %817 = arith.addf %810, %816 : vector<8x128xf32>
    %c0_667 = arith.constant 0 : index
    %c0_668 = arith.constant 0 : index
    %818 = vector.load %arg5[%c0_667, %c0_668] : memref<128x32xf32, #tpu.memory_space<vmem>>, vector<128x32xf32>
    %cst_669 = arith.constant dense<0.000000e+00> : vector<8x32xf32>
    %819 = tpu.matmul %817, %818, %cst_669 {dimension_numbers = #tpu.dot_dimension_numbers<[1], [0], [0], [1], [0, 0, 1, 1], [], []>} : vector<8x128xf32>, vector<128x32xf32>, vector<8x32xf32> -> vector<8x32xf32>
    %cst_670 = arith.constant dense<0.000000e+00> : vector<8xf32>
    %820 = vector.multi_reduction <add>, %819, %cst_670 [1] : vector<8x32xf32> to vector<8xf32>
    %821 = vector.shape_cast %820 : vector<8xf32> to vector<8x1xf32>
    %cst_671 = arith.constant 3.125000e-02 : f32
    %822 = vector.broadcast %cst_671 : f32 to vector<8x1xf32>
    %823 = arith.mulf %821, %822 : vector<8x1xf32>
    %824 = arith.mulf %819, %819 : vector<8x32xf32>
    %cst_672 = arith.constant dense<0.000000e+00> : vector<8xf32>
    %825 = vector.multi_reduction <add>, %824, %cst_672 [1] : vector<8x32xf32> to vector<8xf32>
    %826 = vector.shape_cast %825 : vector<8xf32> to vector<8x1xf32>
    %cst_673 = arith.constant 3.125000e-02 : f32
    %827 = vector.broadcast %cst_673 : f32 to vector<8x1xf32>
    %828 = arith.mulf %826, %827 : vector<8x1xf32>
    %829 = arith.mulf %823, %823 : vector<8x1xf32>
    %830 = arith.subf %828, %829 : vector<8x1xf32>
    %cst_674 = arith.constant 0.000000e+00 : f32
    %831 = vector.broadcast %cst_674 : f32 to vector<8x1xf32>
    %832 = arith.maximumf %830, %831 : vector<8x1xf32>
    %c0_675 = arith.constant 0 : index
    %c0_676 = arith.constant 0 : index
    %833 = vector.load %arg31[%c0_675, %c0_676] : memref<8x1xf32, #tpu.memory_space<vmem>>, vector<8x1xf32>
    %cst_677 = arith.constant 9.99999974E-6 : f32
    %834 = vector.broadcast %cst_677 : f32 to vector<8x1xf32>
    %835 = arith.addf %832, %834 : vector<8x1xf32>
    %836 = math.rsqrt %835 : vector<8x1xf32>
    %837 = arith.mulf %833, %836 : vector<8x1xf32>
    %c0_678 = arith.constant 0 : index
    %c0_679 = arith.constant 0 : index
    %838 = vector.load %arg32[%c0_678, %c0_679] : memref<8x1xf32, #tpu.memory_space<vmem>>, vector<8x1xf32>
    %839 = arith.mulf %823, %837 : vector<8x1xf32>
    %840 = arith.subf %838, %839 : vector<8x1xf32>
    %841 = vector.broadcast %837 : vector<8x1xf32> to vector<8x32xf32>
    %842 = arith.mulf %819, %841 : vector<8x32xf32>
    %843 = vector.broadcast %840 : vector<8x1xf32> to vector<8x32xf32>
    %844 = arith.addf %842, %843 : vector<8x32xf32>
    %845 = vector.extract_strided_slice %844 {offsets = [0, 0], sizes = [4, 32], strides = [1, 1]} : vector<8x32xf32> to vector<4x32xf32>
    %cst_680 = arith.constant 0.000000e+00 : f32
    %846 = vector.broadcast %cst_680 : f32 to vector<4x32xf32>
    %847 = arith.cmpf ogt, %845, %846 : vector<4x32xf32>
    %cst_681 = arith.constant 2.000000e-01 : f32
    %848 = vector.broadcast %cst_681 : f32 to vector<4x32xf32>
    %849 = arith.mulf %848, %845 : vector<4x32xf32>
    %850 = arith.select %847, %845, %849 : vector<4x32xi1>, vector<4x32xf32>
    %851 = vector.extract_strided_slice %844 {offsets = [4, 0], sizes = [4, 32], strides = [1, 1]} : vector<8x32xf32> to vector<4x32xf32>
    %c0_682 = arith.constant 0 : index
    %c5_683 = arith.constant 5 : index
    %852 = vector.load %arg48[%c0_682, %c5_683] : memref<4x42xf32, #tpu.memory_space<vmem>>, vector<4x32xf32>
    tpu.vector_store %arg48[%c0_682, %c5_683], %850 {strides = array<i32>} : memref<4x42xf32, #tpu.memory_space<vmem>>, vector<4x32xf32>,
    %cst_684 = arith.constant 0.000000e+00 : f32
    %853 = vector.broadcast %cst_684 : f32 to vector<4x32xf32>
    %c0_685 = arith.constant 0 : index
    %c0_686 = arith.constant 0 : index
    %854 = vector.load %arg48[%c0_685, %c0_686] : memref<4x42xf32, #tpu.memory_space<vmem>>, vector<4x32xf32>
    %c0_687 = arith.constant 0 : index
    %c0_688 = arith.constant 0 : index
    %855 = vector.load %arg3[%c0_687, %c0_688] : memref<9x32xf32, #tpu.memory_space<vmem>>, vector<1x32xf32>
    %856 = vector.broadcast %855 : vector<1x32xf32> to vector<4x32xf32>
    %857 = arith.mulf %854, %856 : vector<4x32xf32>
    %c0_689 = arith.constant 0 : index
    %c0_690 = arith.constant 0 : index
    %858 = vector.load %arg33[%c0_689, %c0_690] : memref<36x4xf32, #tpu.memory_space<vmem>>, vector<4x4xf32>
    %cst_691 = arith.constant dense<0.000000e+00> : vector<4x32xf32>
    %859 = tpu.matmul %858, %857, %cst_691 {dimension_numbers = #tpu.dot_dimension_numbers<[1], [0], [0], [1], [0, 0, 1, 1], [], []>} : vector<4x4xf32>, vector<4x32xf32>, vector<4x32xf32> -> vector<4x32xf32>
    %860 = arith.addf %853, %859 : vector<4x32xf32>
    %c0_692 = arith.constant 0 : index
    %c1_693 = arith.constant 1 : index
    %861 = vector.load %arg48[%c0_692, %c1_693] : memref<4x42xf32, #tpu.memory_space<vmem>>, vector<4x32xf32>
    %c1_694 = arith.constant 1 : index
    %c0_695 = arith.constant 0 : index
    %862 = vector.load %arg3[%c1_694, %c0_695] : memref<9x32xf32, #tpu.memory_space<vmem>>, vector<1x32xf32>
    %863 = vector.broadcast %862 : vector<1x32xf32> to vector<4x32xf32>
    %864 = arith.mulf %861, %863 : vector<4x32xf32>
    %c4_696 = arith.constant 4 : index
    %c0_697 = arith.constant 0 : index
    %865 = vector.load %arg33[%c4_696, %c0_697] : memref<36x4xf32, #tpu.memory_space<vmem>>, vector<4x4xf32>
    %cst_698 = arith.constant dense<0.000000e+00> : vector<4x32xf32>
    %866 = tpu.matmul %865, %864, %cst_698 {dimension_numbers = #tpu.dot_dimension_numbers<[1], [0], [0], [1], [0, 0, 1, 1], [], []>} : vector<4x4xf32>, vector<4x32xf32>, vector<4x32xf32> -> vector<4x32xf32>
    %867 = arith.addf %860, %866 : vector<4x32xf32>
    %c0_699 = arith.constant 0 : index
    %c2_700 = arith.constant 2 : index
    %868 = vector.load %arg48[%c0_699, %c2_700] : memref<4x42xf32, #tpu.memory_space<vmem>>, vector<4x32xf32>
    %c2_701 = arith.constant 2 : index
    %c0_702 = arith.constant 0 : index
    %869 = vector.load %arg3[%c2_701, %c0_702] : memref<9x32xf32, #tpu.memory_space<vmem>>, vector<1x32xf32>
    %870 = vector.broadcast %869 : vector<1x32xf32> to vector<4x32xf32>
    %871 = arith.mulf %868, %870 : vector<4x32xf32>
    %c8_703 = arith.constant 8 : index
    %c0_704 = arith.constant 0 : index
    %872 = vector.load %arg33[%c8_703, %c0_704] : memref<36x4xf32, #tpu.memory_space<vmem>>, vector<4x4xf32>
    %cst_705 = arith.constant dense<0.000000e+00> : vector<4x32xf32>
    %873 = tpu.matmul %872, %871, %cst_705 {dimension_numbers = #tpu.dot_dimension_numbers<[1], [0], [0], [1], [0, 0, 1, 1], [], []>} : vector<4x4xf32>, vector<4x32xf32>, vector<4x32xf32> -> vector<4x32xf32>
    %874 = arith.addf %867, %873 : vector<4x32xf32>
    %c0_706 = arith.constant 0 : index
    %c4_707 = arith.constant 4 : index
    %875 = vector.load %arg48[%c0_706, %c4_707] : memref<4x42xf32, #tpu.memory_space<vmem>>, vector<4x32xf32>
    %c3_708 = arith.constant 3 : index
    %c0_709 = arith.constant 0 : index
    %876 = vector.load %arg3[%c3_708, %c0_709] : memref<9x32xf32, #tpu.memory_space<vmem>>, vector<1x32xf32>
    %877 = vector.broadcast %876 : vector<1x32xf32> to vector<4x32xf32>
    %878 = arith.mulf %875, %877 : vector<4x32xf32>
    %c12_710 = arith.constant 12 : index
    %c0_711 = arith.constant 0 : index
    %879 = vector.load %arg33[%c12_710, %c0_711] : memref<36x4xf32, #tpu.memory_space<vmem>>, vector<4x4xf32>
    %cst_712 = arith.constant dense<0.000000e+00> : vector<4x32xf32>
    %880 = tpu.matmul %879, %878, %cst_712 {dimension_numbers = #tpu.dot_dimension_numbers<[1], [0], [0], [1], [0, 0, 1, 1], [], []>} : vector<4x4xf32>, vector<4x32xf32>, vector<4x32xf32> -> vector<4x32xf32>
    %881 = arith.addf %874, %880 : vector<4x32xf32>
    %c0_713 = arith.constant 0 : index
    %c5_714 = arith.constant 5 : index
    %882 = vector.load %arg48[%c0_713, %c5_714] : memref<4x42xf32, #tpu.memory_space<vmem>>, vector<4x32xf32>
    %c16_715 = arith.constant 16 : index
    %c0_716 = arith.constant 0 : index
    %883 = vector.load %arg33[%c16_715, %c0_716] : memref<36x4xf32, #tpu.memory_space<vmem>>, vector<4x4xf32>
    %cst_717 = arith.constant dense<0.000000e+00> : vector<4x32xf32>
    %884 = tpu.matmul %883, %882, %cst_717 {dimension_numbers = #tpu.dot_dimension_numbers<[1], [0], [0], [1], [0, 0, 1, 1], [], []>} : vector<4x4xf32>, vector<4x32xf32>, vector<4x32xf32> -> vector<4x32xf32>
    %885 = arith.addf %881, %884 : vector<4x32xf32>
    %c0_718 = arith.constant 0 : index
    %c6_719 = arith.constant 6 : index
    %886 = vector.load %arg48[%c0_718, %c6_719] : memref<4x42xf32, #tpu.memory_space<vmem>>, vector<4x32xf32>
    %c5_720 = arith.constant 5 : index
    %c0_721 = arith.constant 0 : index
    %887 = vector.load %arg3[%c5_720, %c0_721] : memref<9x32xf32, #tpu.memory_space<vmem>>, vector<1x32xf32>
    %888 = vector.broadcast %887 : vector<1x32xf32> to vector<4x32xf32>
    %889 = arith.mulf %886, %888 : vector<4x32xf32>
    %c20_722 = arith.constant 20 : index
    %c0_723 = arith.constant 0 : index
    %890 = vector.load %arg33[%c20_722, %c0_723] : memref<36x4xf32, #tpu.memory_space<vmem>>, vector<4x4xf32>
    %cst_724 = arith.constant dense<0.000000e+00> : vector<4x32xf32>
    %891 = tpu.matmul %890, %889, %cst_724 {dimension_numbers = #tpu.dot_dimension_numbers<[1], [0], [0], [1], [0, 0, 1, 1], [], []>} : vector<4x4xf32>, vector<4x32xf32>, vector<4x32xf32> -> vector<4x32xf32>
    %892 = arith.addf %885, %891 : vector<4x32xf32>
    %c0_725 = arith.constant 0 : index
    %c8_726 = arith.constant 8 : index
    %893 = vector.load %arg48[%c0_725, %c8_726] : memref<4x42xf32, #tpu.memory_space<vmem>>, vector<4x32xf32>
    %c6_727 = arith.constant 6 : index
    %c0_728 = arith.constant 0 : index
    %894 = vector.load %arg3[%c6_727, %c0_728] : memref<9x32xf32, #tpu.memory_space<vmem>>, vector<1x32xf32>
    %895 = vector.broadcast %894 : vector<1x32xf32> to vector<4x32xf32>
    %896 = arith.mulf %893, %895 : vector<4x32xf32>
    %c24_729 = arith.constant 24 : index
    %c0_730 = arith.constant 0 : index
    %897 = vector.load %arg33[%c24_729, %c0_730] : memref<36x4xf32, #tpu.memory_space<vmem>>, vector<4x4xf32>
    %cst_731 = arith.constant dense<0.000000e+00> : vector<4x32xf32>
    %898 = tpu.matmul %897, %896, %cst_731 {dimension_numbers = #tpu.dot_dimension_numbers<[1], [0], [0], [1], [0, 0, 1, 1], [], []>} : vector<4x4xf32>, vector<4x32xf32>, vector<4x32xf32> -> vector<4x32xf32>
    %899 = arith.addf %892, %898 : vector<4x32xf32>
    %c0_732 = arith.constant 0 : index
    %c9_733 = arith.constant 9 : index
    %900 = vector.load %arg48[%c0_732, %c9_733] : memref<4x42xf32, #tpu.memory_space<vmem>>, vector<4x32xf32>
    %c7_734 = arith.constant 7 : index
    %c0_735 = arith.constant 0 : index
    %901 = vector.load %arg3[%c7_734, %c0_735] : memref<9x32xf32, #tpu.memory_space<vmem>>, vector<1x32xf32>
    %902 = vector.broadcast %901 : vector<1x32xf32> to vector<4x32xf32>
    %903 = arith.mulf %900, %902 : vector<4x32xf32>
    %c28_736 = arith.constant 28 : index
    %c0_737 = arith.constant 0 : index
    %904 = vector.load %arg33[%c28_736, %c0_737] : memref<36x4xf32, #tpu.memory_space<vmem>>, vector<4x4xf32>
    %cst_738 = arith.constant dense<0.000000e+00> : vector<4x32xf32>
    %905 = tpu.matmul %904, %903, %cst_738 {dimension_numbers = #tpu.dot_dimension_numbers<[1], [0], [0], [1], [0, 0, 1, 1], [], []>} : vector<4x4xf32>, vector<4x32xf32>, vector<4x32xf32> -> vector<4x32xf32>
    %906 = arith.addf %899, %905 : vector<4x32xf32>
    %c0_739 = arith.constant 0 : index
    %c10_740 = arith.constant 10 : index
    %907 = vector.load %arg48[%c0_739, %c10_740] : memref<4x42xf32, #tpu.memory_space<vmem>>, vector<4x32xf32>
    %c8_741 = arith.constant 8 : index
    %c0_742 = arith.constant 0 : index
    %908 = vector.load %arg3[%c8_741, %c0_742] : memref<9x32xf32, #tpu.memory_space<vmem>>, vector<1x32xf32>
    %909 = vector.broadcast %908 : vector<1x32xf32> to vector<4x32xf32>
    %910 = arith.mulf %907, %909 : vector<4x32xf32>
    %c32_743 = arith.constant 32 : index
    %c0_744 = arith.constant 0 : index
    %911 = vector.load %arg33[%c32_743, %c0_744] : memref<36x4xf32, #tpu.memory_space<vmem>>, vector<4x4xf32>
    %cst_745 = arith.constant dense<0.000000e+00> : vector<4x32xf32>
    %912 = tpu.matmul %911, %910, %cst_745 {dimension_numbers = #tpu.dot_dimension_numbers<[1], [0], [0], [1], [0, 0, 1, 1], [], []>} : vector<4x4xf32>, vector<4x32xf32>, vector<4x32xf32> -> vector<4x32xf32>
    %913 = arith.addf %906, %912 : vector<4x32xf32>
    %cst_746 = arith.constant dense<0.000000e+00> : vector<4xf32>
    %914 = vector.multi_reduction <add>, %913, %cst_746 [1] : vector<4x32xf32> to vector<4xf32>
    %915 = vector.shape_cast %914 : vector<4xf32> to vector<4x1xf32>
    %cst_747 = arith.constant 3.125000e-02 : f32
    %916 = vector.broadcast %cst_747 : f32 to vector<4x1xf32>
    %917 = arith.mulf %915, %916 : vector<4x1xf32>
    %918 = arith.mulf %913, %913 : vector<4x32xf32>
    %cst_748 = arith.constant dense<0.000000e+00> : vector<4xf32>
    %919 = vector.multi_reduction <add>, %918, %cst_748 [1] : vector<4x32xf32> to vector<4xf32>
    %920 = vector.shape_cast %919 : vector<4xf32> to vector<4x1xf32>
    %cst_749 = arith.constant 3.125000e-02 : f32
    %921 = vector.broadcast %cst_749 : f32 to vector<4x1xf32>
    %922 = arith.mulf %920, %921 : vector<4x1xf32>
    %923 = arith.mulf %917, %917 : vector<4x1xf32>
    %924 = arith.subf %922, %923 : vector<4x1xf32>
    %cst_750 = arith.constant 0.000000e+00 : f32
    %925 = vector.broadcast %cst_750 : f32 to vector<4x1xf32>
    %926 = arith.maximumf %924, %925 : vector<4x1xf32>
    %c0_751 = arith.constant 0 : index
    %c0_752 = arith.constant 0 : index
    %927 = vector.load %arg34[%c0_751, %c0_752] : memref<4x1xf32, #tpu.memory_space<vmem>>, vector<4x1xf32>
    %cst_753 = arith.constant 9.99999974E-6 : f32
    %928 = vector.broadcast %cst_753 : f32 to vector<4x1xf32>
    %929 = arith.addf %926, %928 : vector<4x1xf32>
    %930 = math.rsqrt %929 : vector<4x1xf32>
    %931 = arith.mulf %927, %930 : vector<4x1xf32>
    %c0_754 = arith.constant 0 : index
    %c0_755 = arith.constant 0 : index
    %932 = vector.load %arg35[%c0_754, %c0_755] : memref<4x1xf32, #tpu.memory_space<vmem>>, vector<4x1xf32>
    %933 = arith.mulf %917, %931 : vector<4x1xf32>
    %934 = arith.subf %932, %933 : vector<4x1xf32>
    %935 = vector.broadcast %931 : vector<4x1xf32> to vector<4x32xf32>
    %936 = arith.mulf %913, %935 : vector<4x32xf32>
    %937 = vector.broadcast %934 : vector<4x1xf32> to vector<4x32xf32>
    %938 = arith.addf %936, %937 : vector<4x32xf32>
    %939 = arith.addf %938, %851 : vector<4x32xf32>
    %cst_756 = arith.constant 0.000000e+00 : f32
    %940 = vector.broadcast %cst_756 : f32 to vector<4x32xf32>
    %941 = arith.cmpf ogt, %939, %940 : vector<4x32xf32>
    %cst_757 = arith.constant 2.000000e-01 : f32
    %942 = vector.broadcast %cst_757 : f32 to vector<4x32xf32>
    %943 = arith.mulf %942, %939 : vector<4x32xf32>
    %944 = arith.select %941, %939, %943 : vector<4x32xi1>, vector<4x32xf32>
    %c0_758 = arith.constant 0 : index
    %c5_759 = arith.constant 5 : index
    %945 = vector.load %arg47[%c0_758, %c5_759] : memref<4x42xf32, #tpu.memory_space<vmem>>, vector<4x32xf32>
    tpu.vector_store %arg47[%c0_758, %c5_759], %944 {strides = array<i32>} : memref<4x42xf32, #tpu.memory_space<vmem>>, vector<4x32xf32>,
    %cst_760 = arith.constant 0.000000e+00 : f32
    %946 = vector.broadcast %cst_760 : f32 to vector<4x32xf32>
    %c0_761 = arith.constant 0 : index
    %c0_762 = arith.constant 0 : index
    %947 = vector.load %arg47[%c0_761, %c0_762] : memref<4x42xf32, #tpu.memory_space<vmem>>, vector<4x32xf32>
    %c0_763 = arith.constant 0 : index
    %c0_764 = arith.constant 0 : index
    %948 = vector.load %arg3[%c0_763, %c0_764] : memref<9x32xf32, #tpu.memory_space<vmem>>, vector<1x32xf32>
    %949 = vector.broadcast %948 : vector<1x32xf32> to vector<4x32xf32>
    %950 = arith.mulf %947, %949 : vector<4x32xf32>
    %c0_765 = arith.constant 0 : index
    %c0_766 = arith.constant 0 : index
    %951 = vector.load %arg36[%c0_765, %c0_766] : memref<36x4xf32, #tpu.memory_space<vmem>>, vector<4x4xf32>
    %cst_767 = arith.constant dense<0.000000e+00> : vector<4x32xf32>
    %952 = tpu.matmul %951, %950, %cst_767 {dimension_numbers = #tpu.dot_dimension_numbers<[1], [0], [0], [1], [0, 0, 1, 1], [], []>} : vector<4x4xf32>, vector<4x32xf32>, vector<4x32xf32> -> vector<4x32xf32>
    %953 = arith.addf %946, %952 : vector<4x32xf32>
    %c0_768 = arith.constant 0 : index
    %c1_769 = arith.constant 1 : index
    %954 = vector.load %arg47[%c0_768, %c1_769] : memref<4x42xf32, #tpu.memory_space<vmem>>, vector<4x32xf32>
    %c1_770 = arith.constant 1 : index
    %c0_771 = arith.constant 0 : index
    %955 = vector.load %arg3[%c1_770, %c0_771] : memref<9x32xf32, #tpu.memory_space<vmem>>, vector<1x32xf32>
    %956 = vector.broadcast %955 : vector<1x32xf32> to vector<4x32xf32>
    %957 = arith.mulf %954, %956 : vector<4x32xf32>
    %c4_772 = arith.constant 4 : index
    %c0_773 = arith.constant 0 : index
    %958 = vector.load %arg36[%c4_772, %c0_773] : memref<36x4xf32, #tpu.memory_space<vmem>>, vector<4x4xf32>
    %cst_774 = arith.constant dense<0.000000e+00> : vector<4x32xf32>
    %959 = tpu.matmul %958, %957, %cst_774 {dimension_numbers = #tpu.dot_dimension_numbers<[1], [0], [0], [1], [0, 0, 1, 1], [], []>} : vector<4x4xf32>, vector<4x32xf32>, vector<4x32xf32> -> vector<4x32xf32>
    %960 = arith.addf %953, %959 : vector<4x32xf32>
    %c0_775 = arith.constant 0 : index
    %c2_776 = arith.constant 2 : index
    %961 = vector.load %arg47[%c0_775, %c2_776] : memref<4x42xf32, #tpu.memory_space<vmem>>, vector<4x32xf32>
    %c2_777 = arith.constant 2 : index
    %c0_778 = arith.constant 0 : index
    %962 = vector.load %arg3[%c2_777, %c0_778] : memref<9x32xf32, #tpu.memory_space<vmem>>, vector<1x32xf32>
    %963 = vector.broadcast %962 : vector<1x32xf32> to vector<4x32xf32>
    %964 = arith.mulf %961, %963 : vector<4x32xf32>
    %c8_779 = arith.constant 8 : index
    %c0_780 = arith.constant 0 : index
    %965 = vector.load %arg36[%c8_779, %c0_780] : memref<36x4xf32, #tpu.memory_space<vmem>>, vector<4x4xf32>
    %cst_781 = arith.constant dense<0.000000e+00> : vector<4x32xf32>
    %966 = tpu.matmul %965, %964, %cst_781 {dimension_numbers = #tpu.dot_dimension_numbers<[1], [0], [0], [1], [0, 0, 1, 1], [], []>} : vector<4x4xf32>, vector<4x32xf32>, vector<4x32xf32> -> vector<4x32xf32>
    %967 = arith.addf %960, %966 : vector<4x32xf32>
    %c0_782 = arith.constant 0 : index
    %c4_783 = arith.constant 4 : index
    %968 = vector.load %arg47[%c0_782, %c4_783] : memref<4x42xf32, #tpu.memory_space<vmem>>, vector<4x32xf32>
    %c3_784 = arith.constant 3 : index
    %c0_785 = arith.constant 0 : index
    %969 = vector.load %arg3[%c3_784, %c0_785] : memref<9x32xf32, #tpu.memory_space<vmem>>, vector<1x32xf32>
    %970 = vector.broadcast %969 : vector<1x32xf32> to vector<4x32xf32>
    %971 = arith.mulf %968, %970 : vector<4x32xf32>
    %c12_786 = arith.constant 12 : index
    %c0_787 = arith.constant 0 : index
    %972 = vector.load %arg36[%c12_786, %c0_787] : memref<36x4xf32, #tpu.memory_space<vmem>>, vector<4x4xf32>
    %cst_788 = arith.constant dense<0.000000e+00> : vector<4x32xf32>
    %973 = tpu.matmul %972, %971, %cst_788 {dimension_numbers = #tpu.dot_dimension_numbers<[1], [0], [0], [1], [0, 0, 1, 1], [], []>} : vector<4x4xf32>, vector<4x32xf32>, vector<4x32xf32> -> vector<4x32xf32>
    %974 = arith.addf %967, %973 : vector<4x32xf32>
    %c0_789 = arith.constant 0 : index
    %c5_790 = arith.constant 5 : index
    %975 = vector.load %arg47[%c0_789, %c5_790] : memref<4x42xf32, #tpu.memory_space<vmem>>, vector<4x32xf32>
    %c16_791 = arith.constant 16 : index
    %c0_792 = arith.constant 0 : index
    %976 = vector.load %arg36[%c16_791, %c0_792] : memref<36x4xf32, #tpu.memory_space<vmem>>, vector<4x4xf32>
    %cst_793 = arith.constant dense<0.000000e+00> : vector<4x32xf32>
    %977 = tpu.matmul %976, %975, %cst_793 {dimension_numbers = #tpu.dot_dimension_numbers<[1], [0], [0], [1], [0, 0, 1, 1], [], []>} : vector<4x4xf32>, vector<4x32xf32>, vector<4x32xf32> -> vector<4x32xf32>
    %978 = arith.addf %974, %977 : vector<4x32xf32>
    %c0_794 = arith.constant 0 : index
    %c6_795 = arith.constant 6 : index
    %979 = vector.load %arg47[%c0_794, %c6_795] : memref<4x42xf32, #tpu.memory_space<vmem>>, vector<4x32xf32>
    %c5_796 = arith.constant 5 : index
    %c0_797 = arith.constant 0 : index
    %980 = vector.load %arg3[%c5_796, %c0_797] : memref<9x32xf32, #tpu.memory_space<vmem>>, vector<1x32xf32>
    %981 = vector.broadcast %980 : vector<1x32xf32> to vector<4x32xf32>
    %982 = arith.mulf %979, %981 : vector<4x32xf32>
    %c20_798 = arith.constant 20 : index
    %c0_799 = arith.constant 0 : index
    %983 = vector.load %arg36[%c20_798, %c0_799] : memref<36x4xf32, #tpu.memory_space<vmem>>, vector<4x4xf32>
    %cst_800 = arith.constant dense<0.000000e+00> : vector<4x32xf32>
    %984 = tpu.matmul %983, %982, %cst_800 {dimension_numbers = #tpu.dot_dimension_numbers<[1], [0], [0], [1], [0, 0, 1, 1], [], []>} : vector<4x4xf32>, vector<4x32xf32>, vector<4x32xf32> -> vector<4x32xf32>
    %985 = arith.addf %978, %984 : vector<4x32xf32>
    %c0_801 = arith.constant 0 : index
    %c8_802 = arith.constant 8 : index
    %986 = vector.load %arg47[%c0_801, %c8_802] : memref<4x42xf32, #tpu.memory_space<vmem>>, vector<4x32xf32>
    %c6_803 = arith.constant 6 : index
    %c0_804 = arith.constant 0 : index
    %987 = vector.load %arg3[%c6_803, %c0_804] : memref<9x32xf32, #tpu.memory_space<vmem>>, vector<1x32xf32>
    %988 = vector.broadcast %987 : vector<1x32xf32> to vector<4x32xf32>
    %989 = arith.mulf %986, %988 : vector<4x32xf32>
    %c24_805 = arith.constant 24 : index
    %c0_806 = arith.constant 0 : index
    %990 = vector.load %arg36[%c24_805, %c0_806] : memref<36x4xf32, #tpu.memory_space<vmem>>, vector<4x4xf32>
    %cst_807 = arith.constant dense<0.000000e+00> : vector<4x32xf32>
    %991 = tpu.matmul %990, %989, %cst_807 {dimension_numbers = #tpu.dot_dimension_numbers<[1], [0], [0], [1], [0, 0, 1, 1], [], []>} : vector<4x4xf32>, vector<4x32xf32>, vector<4x32xf32> -> vector<4x32xf32>
    %992 = arith.addf %985, %991 : vector<4x32xf32>
    %c0_808 = arith.constant 0 : index
    %c9_809 = arith.constant 9 : index
    %993 = vector.load %arg47[%c0_808, %c9_809] : memref<4x42xf32, #tpu.memory_space<vmem>>, vector<4x32xf32>
    %c7_810 = arith.constant 7 : index
    %c0_811 = arith.constant 0 : index
    %994 = vector.load %arg3[%c7_810, %c0_811] : memref<9x32xf32, #tpu.memory_space<vmem>>, vector<1x32xf32>
    %995 = vector.broadcast %994 : vector<1x32xf32> to vector<4x32xf32>
    %996 = arith.mulf %993, %995 : vector<4x32xf32>
    %c28_812 = arith.constant 28 : index
    %c0_813 = arith.constant 0 : index
    %997 = vector.load %arg36[%c28_812, %c0_813] : memref<36x4xf32, #tpu.memory_space<vmem>>, vector<4x4xf32>
    %cst_814 = arith.constant dense<0.000000e+00> : vector<4x32xf32>
    %998 = tpu.matmul %997, %996, %cst_814 {dimension_numbers = #tpu.dot_dimension_numbers<[1], [0], [0], [1], [0, 0, 1, 1], [], []>} : vector<4x4xf32>, vector<4x32xf32>, vector<4x32xf32> -> vector<4x32xf32>
    %999 = arith.addf %992, %998 : vector<4x32xf32>
    %c0_815 = arith.constant 0 : index
    %c10_816 = arith.constant 10 : index
    %1000 = vector.load %arg47[%c0_815, %c10_816] : memref<4x42xf32, #tpu.memory_space<vmem>>, vector<4x32xf32>
    %c8_817 = arith.constant 8 : index
    %c0_818 = arith.constant 0 : index
    %1001 = vector.load %arg3[%c8_817, %c0_818] : memref<9x32xf32, #tpu.memory_space<vmem>>, vector<1x32xf32>
    %1002 = vector.broadcast %1001 : vector<1x32xf32> to vector<4x32xf32>
    %1003 = arith.mulf %1000, %1002 : vector<4x32xf32>
    %c32_819 = arith.constant 32 : index
    %c0_820 = arith.constant 0 : index
    %1004 = vector.load %arg36[%c32_819, %c0_820] : memref<36x4xf32, #tpu.memory_space<vmem>>, vector<4x4xf32>
    %cst_821 = arith.constant dense<0.000000e+00> : vector<4x32xf32>
    %1005 = tpu.matmul %1004, %1003, %cst_821 {dimension_numbers = #tpu.dot_dimension_numbers<[1], [0], [0], [1], [0, 0, 1, 1], [], []>} : vector<4x4xf32>, vector<4x32xf32>, vector<4x32xf32> -> vector<4x32xf32>
    %1006 = arith.addf %999, %1005 : vector<4x32xf32>
    %cst_822 = arith.constant dense<0.000000e+00> : vector<4xf32>
    %1007 = vector.multi_reduction <add>, %1006, %cst_822 [1] : vector<4x32xf32> to vector<4xf32>
    %1008 = vector.shape_cast %1007 : vector<4xf32> to vector<4x1xf32>
    %cst_823 = arith.constant 3.125000e-02 : f32
    %1009 = vector.broadcast %cst_823 : f32 to vector<4x1xf32>
    %1010 = arith.mulf %1008, %1009 : vector<4x1xf32>
    %1011 = arith.mulf %1006, %1006 : vector<4x32xf32>
    %cst_824 = arith.constant dense<0.000000e+00> : vector<4xf32>
    %1012 = vector.multi_reduction <add>, %1011, %cst_824 [1] : vector<4x32xf32> to vector<4xf32>
    %1013 = vector.shape_cast %1012 : vector<4xf32> to vector<4x1xf32>
    %cst_825 = arith.constant 3.125000e-02 : f32
    %1014 = vector.broadcast %cst_825 : f32 to vector<4x1xf32>
    %1015 = arith.mulf %1013, %1014 : vector<4x1xf32>
    %1016 = arith.mulf %1010, %1010 : vector<4x1xf32>
    %1017 = arith.subf %1015, %1016 : vector<4x1xf32>
    %cst_826 = arith.constant 0.000000e+00 : f32
    %1018 = vector.broadcast %cst_826 : f32 to vector<4x1xf32>
    %1019 = arith.maximumf %1017, %1018 : vector<4x1xf32>
    %c0_827 = arith.constant 0 : index
    %c0_828 = arith.constant 0 : index
    %1020 = vector.load %arg37[%c0_827, %c0_828] : memref<4x1xf32, #tpu.memory_space<vmem>>, vector<4x1xf32>
    %cst_829 = arith.constant 9.99999974E-6 : f32
    %1021 = vector.broadcast %cst_829 : f32 to vector<4x1xf32>
    %1022 = arith.addf %1019, %1021 : vector<4x1xf32>
    %1023 = math.rsqrt %1022 : vector<4x1xf32>
    %1024 = arith.mulf %1020, %1023 : vector<4x1xf32>
    %c0_830 = arith.constant 0 : index
    %c0_831 = arith.constant 0 : index
    %1025 = vector.load %arg38[%c0_830, %c0_831] : memref<4x1xf32, #tpu.memory_space<vmem>>, vector<4x1xf32>
    %1026 = arith.mulf %1010, %1024 : vector<4x1xf32>
    %1027 = arith.subf %1025, %1026 : vector<4x1xf32>
    %1028 = vector.broadcast %1024 : vector<4x1xf32> to vector<4x32xf32>
    %1029 = arith.mulf %1006, %1028 : vector<4x32xf32>
    %1030 = vector.broadcast %1027 : vector<4x1xf32> to vector<4x32xf32>
    %1031 = arith.addf %1029, %1030 : vector<4x32xf32>
    %cst_832 = arith.constant 0.000000e+00 : f32
    %1032 = vector.broadcast %cst_832 : f32 to vector<4x32xf32>
    %1033 = arith.cmpf ogt, %1031, %1032 : vector<4x32xf32>
    %cst_833 = arith.constant 2.000000e-01 : f32
    %1034 = vector.broadcast %cst_833 : f32 to vector<4x32xf32>
    %1035 = arith.mulf %1034, %1031 : vector<4x32xf32>
    %1036 = arith.select %1033, %1031, %1035 : vector<4x32xi1>, vector<4x32xf32>
    %c0_834 = arith.constant 0 : index
    %c5_835 = arith.constant 5 : index
    %1037 = vector.load %arg48[%c0_834, %c5_835] : memref<4x42xf32, #tpu.memory_space<vmem>>, vector<4x32xf32>
    tpu.vector_store %arg48[%c0_834, %c5_835], %1036 {strides = array<i32>} : memref<4x42xf32, #tpu.memory_space<vmem>>, vector<4x32xf32>,
    %cst_836 = arith.constant 0.000000e+00 : f32
    %1038 = vector.broadcast %cst_836 : f32 to vector<4x32xf32>
    %c0_837 = arith.constant 0 : index
    %c0_838 = arith.constant 0 : index
    %1039 = vector.load %arg48[%c0_837, %c0_838] : memref<4x42xf32, #tpu.memory_space<vmem>>, vector<4x32xf32>
    %c0_839 = arith.constant 0 : index
    %c0_840 = arith.constant 0 : index
    %1040 = vector.load %arg3[%c0_839, %c0_840] : memref<9x32xf32, #tpu.memory_space<vmem>>, vector<1x32xf32>
    %1041 = vector.broadcast %1040 : vector<1x32xf32> to vector<4x32xf32>
    %1042 = arith.mulf %1039, %1041 : vector<4x32xf32>
    %c0_841 = arith.constant 0 : index
    %c0_842 = arith.constant 0 : index
    %1043 = vector.load %arg39[%c0_841, %c0_842] : memref<36x4xf32, #tpu.memory_space<vmem>>, vector<4x4xf32>
    %cst_843 = arith.constant dense<0.000000e+00> : vector<4x32xf32>
    %1044 = tpu.matmul %1043, %1042, %cst_843 {dimension_numbers = #tpu.dot_dimension_numbers<[1], [0], [0], [1], [0, 0, 1, 1], [], []>} : vector<4x4xf32>, vector<4x32xf32>, vector<4x32xf32> -> vector<4x32xf32>
    %1045 = arith.addf %1038, %1044 : vector<4x32xf32>
    %c0_844 = arith.constant 0 : index
    %c1_845 = arith.constant 1 : index
    %1046 = vector.load %arg48[%c0_844, %c1_845] : memref<4x42xf32, #tpu.memory_space<vmem>>, vector<4x32xf32>
    %c1_846 = arith.constant 1 : index
    %c0_847 = arith.constant 0 : index
    %1047 = vector.load %arg3[%c1_846, %c0_847] : memref<9x32xf32, #tpu.memory_space<vmem>>, vector<1x32xf32>
    %1048 = vector.broadcast %1047 : vector<1x32xf32> to vector<4x32xf32>
    %1049 = arith.mulf %1046, %1048 : vector<4x32xf32>
    %c4_848 = arith.constant 4 : index
    %c0_849 = arith.constant 0 : index
    %1050 = vector.load %arg39[%c4_848, %c0_849] : memref<36x4xf32, #tpu.memory_space<vmem>>, vector<4x4xf32>
    %cst_850 = arith.constant dense<0.000000e+00> : vector<4x32xf32>
    %1051 = tpu.matmul %1050, %1049, %cst_850 {dimension_numbers = #tpu.dot_dimension_numbers<[1], [0], [0], [1], [0, 0, 1, 1], [], []>} : vector<4x4xf32>, vector<4x32xf32>, vector<4x32xf32> -> vector<4x32xf32>
    %1052 = arith.addf %1045, %1051 : vector<4x32xf32>
    %c0_851 = arith.constant 0 : index
    %c2_852 = arith.constant 2 : index
    %1053 = vector.load %arg48[%c0_851, %c2_852] : memref<4x42xf32, #tpu.memory_space<vmem>>, vector<4x32xf32>
    %c2_853 = arith.constant 2 : index
    %c0_854 = arith.constant 0 : index
    %1054 = vector.load %arg3[%c2_853, %c0_854] : memref<9x32xf32, #tpu.memory_space<vmem>>, vector<1x32xf32>
    %1055 = vector.broadcast %1054 : vector<1x32xf32> to vector<4x32xf32>
    %1056 = arith.mulf %1053, %1055 : vector<4x32xf32>
    %c8_855 = arith.constant 8 : index
    %c0_856 = arith.constant 0 : index
    %1057 = vector.load %arg39[%c8_855, %c0_856] : memref<36x4xf32, #tpu.memory_space<vmem>>, vector<4x4xf32>
    %cst_857 = arith.constant dense<0.000000e+00> : vector<4x32xf32>
    %1058 = tpu.matmul %1057, %1056, %cst_857 {dimension_numbers = #tpu.dot_dimension_numbers<[1], [0], [0], [1], [0, 0, 1, 1], [], []>} : vector<4x4xf32>, vector<4x32xf32>, vector<4x32xf32> -> vector<4x32xf32>
    %1059 = arith.addf %1052, %1058 : vector<4x32xf32>
    %c0_858 = arith.constant 0 : index
    %c4_859 = arith.constant 4 : index
    %1060 = vector.load %arg48[%c0_858, %c4_859] : memref<4x42xf32, #tpu.memory_space<vmem>>, vector<4x32xf32>
    %c3_860 = arith.constant 3 : index
    %c0_861 = arith.constant 0 : index
    %1061 = vector.load %arg3[%c3_860, %c0_861] : memref<9x32xf32, #tpu.memory_space<vmem>>, vector<1x32xf32>
    %1062 = vector.broadcast %1061 : vector<1x32xf32> to vector<4x32xf32>
    %1063 = arith.mulf %1060, %1062 : vector<4x32xf32>
    %c12_862 = arith.constant 12 : index
    %c0_863 = arith.constant 0 : index
    %1064 = vector.load %arg39[%c12_862, %c0_863] : memref<36x4xf32, #tpu.memory_space<vmem>>, vector<4x4xf32>
    %cst_864 = arith.constant dense<0.000000e+00> : vector<4x32xf32>
    %1065 = tpu.matmul %1064, %1063, %cst_864 {dimension_numbers = #tpu.dot_dimension_numbers<[1], [0], [0], [1], [0, 0, 1, 1], [], []>} : vector<4x4xf32>, vector<4x32xf32>, vector<4x32xf32> -> vector<4x32xf32>
    %1066 = arith.addf %1059, %1065 : vector<4x32xf32>
    %c0_865 = arith.constant 0 : index
    %c5_866 = arith.constant 5 : index
    %1067 = vector.load %arg48[%c0_865, %c5_866] : memref<4x42xf32, #tpu.memory_space<vmem>>, vector<4x32xf32>
    %c16_867 = arith.constant 16 : index
    %c0_868 = arith.constant 0 : index
    %1068 = vector.load %arg39[%c16_867, %c0_868] : memref<36x4xf32, #tpu.memory_space<vmem>>, vector<4x4xf32>
    %cst_869 = arith.constant dense<0.000000e+00> : vector<4x32xf32>
    %1069 = tpu.matmul %1068, %1067, %cst_869 {dimension_numbers = #tpu.dot_dimension_numbers<[1], [0], [0], [1], [0, 0, 1, 1], [], []>} : vector<4x4xf32>, vector<4x32xf32>, vector<4x32xf32> -> vector<4x32xf32>
    %1070 = arith.addf %1066, %1069 : vector<4x32xf32>
    %c0_870 = arith.constant 0 : index
    %c6_871 = arith.constant 6 : index
    %1071 = vector.load %arg48[%c0_870, %c6_871] : memref<4x42xf32, #tpu.memory_space<vmem>>, vector<4x32xf32>
    %c5_872 = arith.constant 5 : index
    %c0_873 = arith.constant 0 : index
    %1072 = vector.load %arg3[%c5_872, %c0_873] : memref<9x32xf32, #tpu.memory_space<vmem>>, vector<1x32xf32>
    %1073 = vector.broadcast %1072 : vector<1x32xf32> to vector<4x32xf32>
    %1074 = arith.mulf %1071, %1073 : vector<4x32xf32>
    %c20_874 = arith.constant 20 : index
    %c0_875 = arith.constant 0 : index
    %1075 = vector.load %arg39[%c20_874, %c0_875] : memref<36x4xf32, #tpu.memory_space<vmem>>, vector<4x4xf32>
    %cst_876 = arith.constant dense<0.000000e+00> : vector<4x32xf32>
    %1076 = tpu.matmul %1075, %1074, %cst_876 {dimension_numbers = #tpu.dot_dimension_numbers<[1], [0], [0], [1], [0, 0, 1, 1], [], []>} : vector<4x4xf32>, vector<4x32xf32>, vector<4x32xf32> -> vector<4x32xf32>
    %1077 = arith.addf %1070, %1076 : vector<4x32xf32>
    %c0_877 = arith.constant 0 : index
    %c8_878 = arith.constant 8 : index
    %1078 = vector.load %arg48[%c0_877, %c8_878] : memref<4x42xf32, #tpu.memory_space<vmem>>, vector<4x32xf32>
    %c6_879 = arith.constant 6 : index
    %c0_880 = arith.constant 0 : index
    %1079 = vector.load %arg3[%c6_879, %c0_880] : memref<9x32xf32, #tpu.memory_space<vmem>>, vector<1x32xf32>
    %1080 = vector.broadcast %1079 : vector<1x32xf32> to vector<4x32xf32>
    %1081 = arith.mulf %1078, %1080 : vector<4x32xf32>
    %c24_881 = arith.constant 24 : index
    %c0_882 = arith.constant 0 : index
    %1082 = vector.load %arg39[%c24_881, %c0_882] : memref<36x4xf32, #tpu.memory_space<vmem>>, vector<4x4xf32>
    %cst_883 = arith.constant dense<0.000000e+00> : vector<4x32xf32>
    %1083 = tpu.matmul %1082, %1081, %cst_883 {dimension_numbers = #tpu.dot_dimension_numbers<[1], [0], [0], [1], [0, 0, 1, 1], [], []>} : vector<4x4xf32>, vector<4x32xf32>, vector<4x32xf32> -> vector<4x32xf32>
    %1084 = arith.addf %1077, %1083 : vector<4x32xf32>
    %c0_884 = arith.constant 0 : index
    %c9_885 = arith.constant 9 : index
    %1085 = vector.load %arg48[%c0_884, %c9_885] : memref<4x42xf32, #tpu.memory_space<vmem>>, vector<4x32xf32>
    %c7_886 = arith.constant 7 : index
    %c0_887 = arith.constant 0 : index
    %1086 = vector.load %arg3[%c7_886, %c0_887] : memref<9x32xf32, #tpu.memory_space<vmem>>, vector<1x32xf32>
    %1087 = vector.broadcast %1086 : vector<1x32xf32> to vector<4x32xf32>
    %1088 = arith.mulf %1085, %1087 : vector<4x32xf32>
    %c28_888 = arith.constant 28 : index
    %c0_889 = arith.constant 0 : index
    %1089 = vector.load %arg39[%c28_888, %c0_889] : memref<36x4xf32, #tpu.memory_space<vmem>>, vector<4x4xf32>
    %cst_890 = arith.constant dense<0.000000e+00> : vector<4x32xf32>
    %1090 = tpu.matmul %1089, %1088, %cst_890 {dimension_numbers = #tpu.dot_dimension_numbers<[1], [0], [0], [1], [0, 0, 1, 1], [], []>} : vector<4x4xf32>, vector<4x32xf32>, vector<4x32xf32> -> vector<4x32xf32>
    %1091 = arith.addf %1084, %1090 : vector<4x32xf32>
    %c0_891 = arith.constant 0 : index
    %c10_892 = arith.constant 10 : index
    %1092 = vector.load %arg48[%c0_891, %c10_892] : memref<4x42xf32, #tpu.memory_space<vmem>>, vector<4x32xf32>
    %c8_893 = arith.constant 8 : index
    %c0_894 = arith.constant 0 : index
    %1093 = vector.load %arg3[%c8_893, %c0_894] : memref<9x32xf32, #tpu.memory_space<vmem>>, vector<1x32xf32>
    %1094 = vector.broadcast %1093 : vector<1x32xf32> to vector<4x32xf32>
    %1095 = arith.mulf %1092, %1094 : vector<4x32xf32>
    %c32_895 = arith.constant 32 : index
    %c0_896 = arith.constant 0 : index
    %1096 = vector.load %arg39[%c32_895, %c0_896] : memref<36x4xf32, #tpu.memory_space<vmem>>, vector<4x4xf32>
    %cst_897 = arith.constant dense<0.000000e+00> : vector<4x32xf32>
    %1097 = tpu.matmul %1096, %1095, %cst_897 {dimension_numbers = #tpu.dot_dimension_numbers<[1], [0], [0], [1], [0, 0, 1, 1], [], []>} : vector<4x4xf32>, vector<4x32xf32>, vector<4x32xf32> -> vector<4x32xf32>
    %1098 = arith.addf %1091, %1097 : vector<4x32xf32>
    %cst_898 = arith.constant dense<0.000000e+00> : vector<4xf32>
    %1099 = vector.multi_reduction <add>, %1098, %cst_898 [1] : vector<4x32xf32> to vector<4xf32>
    %1100 = vector.shape_cast %1099 : vector<4xf32> to vector<4x1xf32>
    %cst_899 = arith.constant 3.125000e-02 : f32
    %1101 = vector.broadcast %cst_899 : f32 to vector<4x1xf32>
    %1102 = arith.mulf %1100, %1101 : vector<4x1xf32>
    %1103 = arith.mulf %1098, %1098 : vector<4x32xf32>
    %cst_900 = arith.constant dense<0.000000e+00> : vector<4xf32>
    %1104 = vector.multi_reduction <add>, %1103, %cst_900 [1] : vector<4x32xf32> to vector<4xf32>
    %1105 = vector.shape_cast %1104 : vector<4xf32> to vector<4x1xf32>
    %cst_901 = arith.constant 3.125000e-02 : f32
    %1106 = vector.broadcast %cst_901 : f32 to vector<4x1xf32>
    %1107 = arith.mulf %1105, %1106 : vector<4x1xf32>
    %1108 = arith.mulf %1102, %1102 : vector<4x1xf32>
    %1109 = arith.subf %1107, %1108 : vector<4x1xf32>
    %cst_902 = arith.constant 0.000000e+00 : f32
    %1110 = vector.broadcast %cst_902 : f32 to vector<4x1xf32>
    %1111 = arith.maximumf %1109, %1110 : vector<4x1xf32>
    %c0_903 = arith.constant 0 : index
    %c0_904 = arith.constant 0 : index
    %1112 = vector.load %arg40[%c0_903, %c0_904] : memref<4x1xf32, #tpu.memory_space<vmem>>, vector<4x1xf32>
    %cst_905 = arith.constant 9.99999974E-6 : f32
    %1113 = vector.broadcast %cst_905 : f32 to vector<4x1xf32>
    %1114 = arith.addf %1111, %1113 : vector<4x1xf32>
    %1115 = math.rsqrt %1114 : vector<4x1xf32>
    %1116 = arith.mulf %1112, %1115 : vector<4x1xf32>
    %c0_906 = arith.constant 0 : index
    %c0_907 = arith.constant 0 : index
    %1117 = vector.load %arg41[%c0_906, %c0_907] : memref<4x1xf32, #tpu.memory_space<vmem>>, vector<4x1xf32>
    %1118 = arith.mulf %1102, %1116 : vector<4x1xf32>
    %1119 = arith.subf %1117, %1118 : vector<4x1xf32>
    %1120 = vector.broadcast %1116 : vector<4x1xf32> to vector<4x32xf32>
    %1121 = arith.mulf %1098, %1120 : vector<4x32xf32>
    %1122 = vector.broadcast %1119 : vector<4x1xf32> to vector<4x32xf32>
    %1123 = arith.addf %1121, %1122 : vector<4x32xf32>
    %1124 = arith.addf %1123, %944 : vector<4x32xf32>
    %cst_908 = arith.constant 0.000000e+00 : f32
    %1125 = vector.broadcast %cst_908 : f32 to vector<4x32xf32>
    %1126 = arith.cmpf ogt, %1124, %1125 : vector<4x32xf32>
    %cst_909 = arith.constant 2.000000e-01 : f32
    %1127 = vector.broadcast %cst_909 : f32 to vector<4x32xf32>
    %1128 = arith.mulf %1127, %1124 : vector<4x32xf32>
    %1129 = arith.select %1126, %1124, %1128 : vector<4x32xi1>, vector<4x32xf32>
    %c0_910 = arith.constant 0 : index
    %c0_911 = arith.constant 0 : index
    %1130 = vector.load %arg42[%c0_910, %c0_911] : memref<4x32xf32, #tpu.memory_space<vmem>>, vector<4x32xf32>
    tpu.vector_store %arg42[%c0_910, %c0_911], %1129 {strides = array<i32>} : memref<4x32xf32, #tpu.memory_space<vmem>>, vector<4x32xf32>,
    return
  }
}

</mosaic_0001>

<bundles_post_ra>
// kernel: _lambda_.1
= control target key start
LH: loop header
LB: loop body
LE: loop exit
PB: predicated region body
PF: predicated region fallthrough
CT: control target
= control target key end

     0   :  { %s18387_s6 = smov 1   ;;  %s18388_s10 = smov 2   ;;  %s21180_s0 = inlined_call_operand.smem [shape: u32[43], index: -1, kind: input, shape index: {}] }
   0x1   :  { %s18495_s5 = sld [smem:[%s21180_s0]]   ;;  %s18389_s14 = smov 3  }
   0x2   :  { %s18500_s9 = sld [smem:[%s21180_s0 + %s18387_s6]]   ;;  %s18390_s18 = smov 4  }
   0x3   :  { %s18505_s13 = sld [smem:[%s21180_s0 + %s18388_s10]]   ;;  %s18391_s22 = smov 5  }
   0x4   :  { %s18510_s17 = sld [smem:[%s21180_s0 + %s18389_s14]]   ;;  %s18392_s26 = smov 6  }
   0x5   :  { %s18515_s21 = sld [smem:[%s21180_s0 + %s18390_s18]]   ;;  %s18393_s30 = smov 7  }
   0x6   :  { %s18520_s25 = sld [smem:[%s21180_s0 + %s18391_s22]]   ;;  %s18394_s4 = smov 8  }
   0x7   :  { %21198 = sst [smem:[#allocation62_spill]] %s18495_s5  ;;  %s18395_s10 = smov 9  }
   0x8   :  { %21199 = sst [smem:[#allocation63_spill]] %s18500_s9  ;;  %s18396_s15 = smov 10  }
   0x9   :  { %s18525_s29 = sld [smem:[%s21180_s0 + %s18392_s26]]   ;;  %s18397_s20 = smov 11  }
   0xa   :  { %s18530_s3 = sld [smem:[%s21180_s0 + %s18393_s30]]   ;;  %s18398_s26 = smov 12  }
   0xb   :  { %s18535_s8 = sld [smem:[%s21180_s0 + %s18394_s4]]   ;;  %s18399_s1 = smov 13  }
   0xc   :  { %21200 = sst [smem:[#allocation64_spill]] %s18520_s25  ;;  %s18400_s7 = smov 14  }
   0xd   :  { %s18540_s14 = sld [smem:[%s21180_s0 + %s18395_s10]]   ;;  %s18402_s22 = smov 16  }
   0xe   :  { %s18545_s19 = sld [smem:[%s21180_s0 + %s18396_s15]]   ;;  %s18401_s15 = smov 15  }
   0xf   :  { %s18550_s24 = sld [smem:[%s21180_s0 + %s18397_s20]]   ;;  %s18403_s28 = smov 17  }
  0x10   :  { %21201 = sst [smem:[#allocation65_spill]] %s18530_s3 }
  0x11   :  { %s18555_s30 = sld [smem:[%s21180_s0 + %s18398_s26]]  }
  0x12   :  { %s18560_s6 = sld [smem:[%s21180_s0 + %s18399_s1]]  }
  0x13   :  { %21202 = sst [smem:[#allocation66_spill]] %s18540_s14 }
  0x14   :  { %s18565_s12 = sld [smem:[%s21180_s0 + %s18400_s7]]   ;;  %s18404_s7 = smov 18  }
  0x15   :  { %21203 = sst [smem:[#allocation67_spill]] %s18550_s24 }
  0x16   :  { %s18570_s20 = sld [smem:[%s21180_s0 + %s18401_s15]]   ;;  %s18405_s15 = smov 19  }
  0x17   :  { %s18575_s27 = sld [smem:[%s21180_s0 + %s18402_s22]]   ;;  %s18406_s22 = smov 20  }
  0x18   :  { %21204 = sst [smem:[#allocation68_spill]] %s18560_s6 }
  0x19   :  { %s18580_s4 = sld [smem:[%s21180_s0 + %s18403_s28]]   ;;  %s18407_s28 = smov 21  }
  0x1a   :  { %s18585_s25 = sld [smem:[%s21180_s0 + %s18404_s7]]   ;;  %s18408_s7 = smov 22  }
  0x1b   :  { %s18590_s5 = sld [smem:[%s21180_s0 + %s18405_s15]]   ;;  %s18409_s15 = smov 23  }
  0x1c   :  { %21205 = sst [smem:[#allocation69_spill]] %s18570_s20 }
  0x1d   :  { %s18595_s9 = sld [smem:[%s21180_s0 + %s18406_s22]]   ;;  %s18410_s22 = smov 24  }
  0x1e   :  { %s18610_s20 = sld [smem:[%s21180_s0 + %s18409_s15]]   ;;  %s18413_s15 = smov 27  }
  0x1f   :  { %21206 = sst [smem:[#allocation70_spill]] %s18580_s4 }
  0x20   :  { %21207 = sst [smem:[#allocation71_spill]] %s18585_s25 }
  0x21   :  { %s18600_s4 = sld [smem:[%s21180_s0 + %s18407_s28]]   ;;  %s18411_s28 = smov 25  }
  0x22   :  { %s18605_s25 = sld [smem:[%s21180_s0 + %s18408_s7]]   ;;  %s18412_s7 = smov 26  }
  0x23   :  { %21208 = sst [smem:[#allocation72_spill]] %s18595_s9 }
  0x24   :  { %s18615_s9 = sld [smem:[%s21180_s0 + %s18410_s22]]   ;;  %s18414_s22 = smov 28  }
  0x25   :  { %s18620_s6 = sld [smem:[%s21180_s0 + %s18411_s28]]   ;;  %s18415_s28 = smov 29  }
  0x26   :  { %s18630_s24 = sld [smem:[%s21180_s0 + %s18413_s15]]   ;;  %s18417_s15 = smov 31  }
  0x27   :  { %s18640_s14 = sld [smem:[%s21180_s0 + %s18415_s28]]   ;;  %s18419_s28 = smov 33  }
  0x28   :  { %21209 = sst [smem:[#allocation73_spill]] %s18605_s25 }
  0x29   :  { %s18625_s25 = sld [smem:[%s21180_s0 + %s18412_s7]]   ;;  %s18416_s7 = smov 30  }
  0x2a   :  { %21210 = sst [smem:[#allocation74_spill]] %s18615_s9 }
  0x2b   :  { %s18635_s9 = sld [smem:[%s21180_s0 + %s18414_s22]]   ;;  %s18418_s22 = smov 32  }
  0x2c   :  { %s18650_s3 = sld [smem:[%s21180_s0 + %s18417_s15]]   ;;  %s18421_s15 = smov 35  }
  0x2d   :  { %21213 = sst [smem:[#allocation77_spill]] %s18640_s14 }
  0x2e   :  { %s18660_s14 = sld [smem:[%s21180_s0 + %s18419_s28]]   ;;  %s18423_s28 = smov 37  }
  0x2f   :  { %21211 = sst [smem:[#allocation75_spill]] %s18625_s25 }
  0x30   :  { %s18645_s25 = sld [smem:[%s21180_s0 + %s18416_s7]]   ;;  %s18420_s7 = smov 34  }
  0x31   :  { %21212 = sst [smem:[#allocation76_spill]] %s18635_s9 }
  0x32   :  { %21215 = sst [smem:[#allocation79_spill]] %s18650_s3 }
  0x33   :  { %s18655_s9 = sld [smem:[%s21180_s0 + %s18418_s22]]   ;;  %s18422_s22 = smov 36  }
  0x34   :  { %21217 = sst [smem:[#allocation81_spill]] %s18660_s14 }
  0x35   :  { %s18670_s3 = sld [smem:[%s21180_s0 + %s18421_s15]]   ;;  %s18425_s15 = smov 39  }
  0x36   :  { %21214 = sst [smem:[#allocation78_spill]] %s18645_s25 }
  0x37   :  { %s18665_s25 = sld [smem:[%s21180_s0 + %s18420_s7]]   ;;  %s18424_s7 = smov 38  }
  0x38   :  { %s18680_s14 = sld [smem:[%s21180_s0 + %s18423_s28]]   ;;  %s18427_s28 = smov 41  }
  0x39   :  { %21216 = sst [smem:[#allocation80_spill]] %s18655_s9 }
  0x3a   :  { %s18675_s9 = sld [smem:[%s21180_s0 + %s18422_s22]]   ;;  %s18426_s22 = smov 40  }
  0x3b   :  { %21219 = sst [smem:[#allocation83_spill]] %s18670_s3 }
  0x3c   :  { %s18690_s3 = sld [smem:[%s21180_s0 + %s18425_s15]]  }
  0x3d   :  { %21218 = sst [smem:[#allocation82_spill]] %s18665_s25 }
  0x3e   :  { %21221 = sst [smem:[#allocation85_spill]] %s18680_s14 }
  0x3f   :  { %s18685_s25 = sld [smem:[%s21180_s0 + %s18424_s7]]   ;;  %s18428_s7 = smov 42  }
  0x40   :  { %21220 = sst [smem:[#allocation84_spill]] %s18675_s9 }
  0x41   :  { %s18695_s9 = sld [smem:[%s21180_s0 + %s18426_s22]]  }
  0x42   :  { %s18700_s14 = sld [smem:[%s21180_s0 + %s18427_s28]]  }
  0x45   :  { %21222 = sst [smem:[#allocation86_spill]] %s18685_s25 }
  0x46   :  { %s18705_s25 = sld [smem:[%s21180_s0 + %s18428_s7]]  }
  0x47   :  { %90 = vsyncpa [#allocation9], 0 }
  0x48   :  { %91 = vsyncpa [#allocation11], 0 }
  0x49   :  { %92 = vsyncpa [#allocation14], 0 }
  0x4a   :  { %93 = vsyncpa [#allocation17], 0 }
  0x4b   :  { %94 = vsyncpa [#allocation20], 0 }
  0x4c   :  { %95 = vsyncpa [#allocation23], 0 }
  0x4d   :  { %96 = vsyncpa [#allocation26], 0 }
  0x4e   :  { %97 = vsyncpa [#allocation29], 0 }
  0x4f   :  { %98 = vsyncpa [#allocation32], 0 }
  0x50   :  { %99 = vsyncpa [#allocation35], 0 }
  0x51   :  { %100 = vsyncpa [#allocation38], 0 }
  0x52   :  { %101 = vsyncpa [#allocation41], 0 }
  0x53   :  { %102 = vsyncpa [#allocation44], 0 }
  0x54   :  { %103 = vsyncpa [#allocation47], 0  ;;  %s18429_s15 = smov [#allocation10]   ;;  %s18430_s18 = smov [#allocation13]  }
  0x55   :  { %s125_s16 = sshll.u32 %s18429_s15, 4  ;;  %s151_s22 = sshll.u32 %s18430_s18, 4  ;;  %s126_s16 = int_to_ptr.vmem [resolvable:$true] %s125_s16  ;;  %s152_s22 = int_to_ptr.vmem [resolvable:$true] %s151_s22 }
  0x56   :  { %s17847_s0 = scalar_lea.vmem %s126_s16, 256  ;;  %p17852_p1 = scmp.lt.s32.totalorder %s126_s16, %s126_s16 }
  0x57   :  { %p17848_p0 = scmp.ne.s32.totalorder %s126_s16, %s17847_s0  ;;  %p17853_p2 = scmp.lt.s32.totalorder %s17847_s0, %s17847_s0 }
  0x59   :  { %p17854_p3 = por %p17853_p2, %p17852_p1 }
  0x5b   :  { %p17855_p4 = pnand %p17854_p3, %p17848_p0 }
  0x5d   :  { %17858 = shalt.err (!%p17855_p4)
}
  0x5e   :  { %s18431_s23 = smov 128   ;;  %s18432_s26 = smov 8  }
  0x5f   :  { %131 = dma.hbm_to_vmem [thread:$0]  %s18510_s17, 256, %s126_s16, [#allocation11], %s18431_s23, %s18431_s23, %s18432_s26  }
  0x60   :  { %s17867_s28 = scalar_lea.vmem %s152_s22, 640  ;;  %p17872_p6 = scmp.lt.s32.totalorder %s152_s22, %s152_s22 }
  0x61   :  { %p17868_p5 = scmp.ne.s32.totalorder %s152_s22, %s17867_s28  ;;  %p17873_p7 = scmp.lt.s32.totalorder %s17867_s28, %s17867_s28 }
  0x63   :  { %p17874_p8 = por %p17873_p7, %p17872_p6 }
  0x65   :  { %p17875_p9 = pnand %p17874_p8, %p17868_p5 }
  0x67   :  { %17878 = shalt.err (!%p17875_p9)
}
  0x68   :  { %157 = dma.hbm_to_vmem [thread:$0]  %s18525_s29, 640, %s152_s22, [#allocation14], %s18431_s23, %s18431_s23, %s18432_s26  }
  0x69   :  { %s18433_s1 = smov [#allocation16]   ;;  %s18434_s7 = smov [#allocation19]  }
  0x6a   :  { %s174_s2 = sshll.u32 %s18433_s1, 4  ;;  %s196_s10 = sshll.u32 %s18434_s7, 4  ;;  %s175_s2 = int_to_ptr.vmem [resolvable:$true] %s174_s2  ;;  %s197_s10 = int_to_ptr.vmem [resolvable:$true] %s196_s10 }
  0x6b   :  { %s17887_s11 = scalar_lea.vmem %s175_s2, 64  ;;  %p17892_p11 = scmp.lt.s32.totalorder %s175_s2, %s175_s2 }
  0x6c   :  { %p17888_p10 = scmp.ne.s32.totalorder %s175_s2, %s17887_s11  ;;  %p17893_p12 = scmp.lt.s32.totalorder %s17887_s11, %s17887_s11 }
  0x6e   :  { %p17894_p13 = por %p17893_p12, %p17892_p11 }
  0x70   :  { %p17895_p0 = pnand %p17894_p13, %p17888_p10 }
  0x72   :  { %17898 = shalt.err (!%p17895_p0)
}
  0x73   :  { %177 = dma.hbm_to_vmem [thread:$0]  %s18535_s8, 64, %s175_s2, [#allocation17]  }
  0x74   :  { %s17907_s17 = scalar_lea.vmem %s197_s10, 64  ;;  %p17912_p2 = scmp.lt.s32.totalorder %s197_s10, %s197_s10 }
  0x75   :  { %p17908_p1 = scmp.ne.s32.totalorder %s197_s10, %s17907_s17  ;;  %p17913_p3 = scmp.lt.s32.totalorder %s17907_s17, %s17907_s17 }
  0x77   :  { %p17914_p4 = por %p17913_p3, %p17912_p2 }
  0x79   :  { %p17915_p5 = pnand %p17914_p4, %p17908_p1 }
  0x7b   :  { %17918 = shalt.err (!%p17915_p5)
}
  0x7c   :  { %199 = dma.hbm_to_vmem [thread:$0]  %s18545_s19, 64, %s197_s10, [#allocation20]  }
  0x7d   :  { %s18435_s29 = smov [#allocation22]   ;;  %s18436_s16 = smov [#allocation25]  }
  0x7e   :  { %s215_s15 = sshll.u32 %s18435_s29, 4  ;;  %s238_s18 = sshll.u32 %s18436_s16, 4  ;;  %s216_s15 = int_to_ptr.vmem [resolvable:$true] %s215_s15  ;;  %s239_s18 = int_to_ptr.vmem [resolvable:$true] %s238_s18 }
  0x7f   :  { %s17927_s22 = scalar_lea.vmem %s216_s15, 640  ;;  %p17932_p7 = scmp.lt.s32.totalorder %s216_s15, %s216_s15 }
  0x80   :  { %p17928_p6 = scmp.ne.s32.totalorder %s216_s15, %s17927_s22  ;;  %p17933_p8 = scmp.lt.s32.totalorder %s17927_s22, %s17927_s22 }
  0x82   :  { %p17934_p9 = por %p17933_p8, %p17932_p7 }
  0x84   :  { %p17935_p10 = pnand %p17934_p9, %p17928_p6 }
  0x86   :  { %17938 = shalt.err (!%p17935_p10)
}
  0x87   :  { %221 = dma.hbm_to_vmem [thread:$0]  %s18555_s30, 640, %s216_s15, [#allocation23], %s18431_s23, %s18431_s23, %s18432_s26  }
  0x88   :  { %s17947_s8 = scalar_lea.vmem %s239_s18, 64  ;;  %p17952_p12 = scmp.lt.s32.totalorder %s239_s18, %s239_s18 }
  0x89   :  { %p17948_p11 = scmp.ne.s32.totalorder %s239_s18, %s17947_s8  ;;  %p17953_p13 = scmp.lt.s32.totalorder %s17947_s8, %s17947_s8 }
  0x8b   :  { %p17954_p0 = por %p17953_p13, %p17952_p12 }
  0x8d   :  { %p17955_p1 = pnand %p17954_p0, %p17948_p11 }
  0x8f   :  { %17958 = shalt.err (!%p17955_p1)
}
  0x90   :  { %241 = dma.hbm_to_vmem [thread:$0]  %s18565_s12, 64, %s239_s18, [#allocation26]  }
  0x91   :  { %s18437_s19 = smov [#allocation28]   ;;  %s18438_s28 = smov [#allocation31]  }
  0x92   :  { %s260_s0 = sshll.u32 %s18437_s19, 4  ;;  %s282_s1 = sshll.u32 %s18438_s28, 4  ;;  %s261_s0 = int_to_ptr.vmem [resolvable:$true] %s260_s0  ;;  %s283_s1 = int_to_ptr.vmem [resolvable:$true] %s282_s1 }
  0x93   :  { %s17967_s2 = scalar_lea.vmem %s261_s0, 64  ;;  %p17972_p3 = scmp.lt.s32.totalorder %s261_s0, %s261_s0 }
  0x94   :  { %p17968_p2 = scmp.ne.s32.totalorder %s261_s0, %s17967_s2  ;;  %p17973_p4 = scmp.lt.s32.totalorder %s17967_s2, %s17967_s2 }
  0x96   :  { %p17974_p5 = por %p17973_p4, %p17972_p3 }
  0x98   :  { %p17975_p6 = pnand %p17974_p5, %p17968_p2 }
  0x9a   :  { %17978 = shalt.err (!%p17975_p6)
}
  0x9b   :  { %263 = dma.hbm_to_vmem [thread:$0]  %s18575_s27, 64, %s261_s0, [#allocation29]  }
  0x9c   :  { %s17987_s30 = scalar_lea.vmem %s283_s1, 128  ;;  %p17992_p8 = scmp.lt.s32.totalorder %s283_s1, %s283_s1 }
  0x9d   :  { %p17988_p7 = scmp.ne.s32.totalorder %s283_s1, %s17987_s30  ;;  %p17993_p9 = scmp.lt.s32.totalorder %s17987_s30, %s17987_s30 }
  0x9f   :  { %p17994_p10 = por %p17993_p9, %p17992_p8 }
  0xa1   :  { %p17995_p11 = pnand %p17994_p10, %p17988_p7 }
  0xa3   :  { %17998 = shalt.err (!%p17995_p11)
}
  0xa4   :  { %285 = dma.hbm_to_vmem [thread:$0]  %s18590_s5, 128, %s283_s1, [#allocation32]  }
  0xa5   :  { %s18439_s12 = smov [#allocation34]   ;;  %s18440_s10 = smov [#allocation37]  }
  0xa6   :  { %s301_s7 = sshll.u32 %s18439_s12, 4  ;;  %s324_s11 = sshll.u32 %s18440_s10, 4  ;;  %s302_s7 = int_to_ptr.vmem [resolvable:$true] %s301_s7  ;;  %s325_s11 = int_to_ptr.vmem [resolvable:$true] %s324_s11 }
  0xa7   :  { %s18007_s17 = scalar_lea.vmem %s302_s7, 640  ;;  %p18012_p13 = scmp.lt.s32.totalorder %s302_s7, %s302_s7 }
  0xa8   :  { %p18008_p12 = scmp.ne.s32.totalorder %s302_s7, %s18007_s17  ;;  %p18013_p0 = scmp.lt.s32.totalorder %s18007_s17, %s18007_s17 }
  0xaa   :  { %p18014_p1 = por %p18013_p0, %p18012_p13 }
  0xac   :  { %p18015_p2 = pnand %p18014_p1, %p18008_p12 }
  0xae   :  { %18018 = shalt.err (!%p18015_p2)
}
  0xaf   :  { %307 = dma.hbm_to_vmem [thread:$0]  %s18600_s4, 640, %s302_s7, [#allocation35], %s18431_s23, %s18431_s23, %s18432_s26  }
  0xb0   :  { %s18027_s27 = scalar_lea.vmem %s325_s11, 64  ;;  %p18032_p4 = scmp.lt.s32.totalorder %s325_s11, %s325_s11 }
  0xb1   :  { %p18028_p3 = scmp.ne.s32.totalorder %s325_s11, %s18027_s27  ;;  %p18033_p5 = scmp.lt.s32.totalorder %s18027_s27, %s18027_s27 }
  0xb3   :  { %p18034_p6 = por %p18033_p5, %p18032_p4 }
  0xb5   :  { %p18035_p7 = pnand %p18034_p6, %p18028_p3 }
  0xb7   :  { %18038 = shalt.err (!%p18035_p7)
}
  0xb8   :  { %327 = dma.hbm_to_vmem [thread:$0]  %s18610_s20, 64, %s325_s11, [#allocation38]  }
  0xb9   :  { %s18441_s5 = smov [#allocation40]   ;;  %s18442_s15 = smov [#allocation43]  }
  0xba   :  { %s346_s29 = sshll.u32 %s18441_s5, 4  ;;  %s365_s16 = sshll.u32 %s18442_s15, 4  ;;  %s347_s29 = int_to_ptr.vmem [resolvable:$true] %s346_s29  ;;  %s366_s16 = int_to_ptr.vmem [resolvable:$true] %s365_s16 }
  0xbb   :  { %s18047_s18 = scalar_lea.vmem %s347_s29, 64  ;;  %p18052_p9 = scmp.lt.s32.totalorder %s347_s29, %s347_s29 }
  0xbc   :  { %p18048_p8 = scmp.ne.s32.totalorder %s347_s29, %s18047_s18  ;;  %p18053_p10 = scmp.lt.s32.totalorder %s18047_s18, %s18047_s18 }
  0xbe   :  { %p18054_p11 = por %p18053_p10, %p18052_p9 }
  0xc0   :  { %p18055_p12 = pnand %p18054_p11, %p18048_p8 }
  0xc2   :  { %18058 = shalt.err (!%p18055_p12)
}
  0xc3   :  { %349 = dma.hbm_to_vmem [thread:$0]  %s18620_s6, 64, %s347_s29, [#allocation41]  }
  0xc4   :  { %s18067_s4 = scalar_lea.vmem %s366_s16, 640  ;;  %p18072_p0 = scmp.lt.s32.totalorder %s366_s16, %s366_s16 }
  0xc5   :  { %p18068_p13 = scmp.ne.s32.totalorder %s366_s16, %s18067_s4  ;;  %p18073_p1 = scmp.lt.s32.totalorder %s18067_s4, %s18067_s4 }
  0xc7   :  { %p18074_p2 = por %p18073_p1, %p18072_p0 }
  0xc9   :  { %p18075_p3 = pnand %p18074_p2, %p18068_p13 }
  0xcb   :  { %18078 = shalt.err (!%p18075_p3)
}
  0xcc   :  { %371 = dma.hbm_to_vmem [thread:$0]  %s18630_s24, 640, %s366_s16, [#allocation44], %s18431_s23, %s18431_s23, %s18432_s26  }
  0xcd   :  { %s18443_s20 = smov [#allocation8]   ;;  %s18444_s8 = smov [#allocation12]  }
  0xce   :  { %s113_s22 = sshll.u32 %s18443_s20, 4  ;;  %s137_s19 = sshll.u32 %s18444_s8, 4  ;;  %s114_s22 = int_to_ptr.vmem [resolvable:$true] %s113_s22  ;;  %s138_s19 = int_to_ptr.vmem [resolvable:$true] %s137_s19 }
  0xcf   :  { %s18087_s0 = scalar_lea.vmem %s114_s22, 256  ;;  %p18092_p5 = scmp.lt.s32.totalorder %s114_s22, %s114_s22 }
  0xd0   :  { %p18088_p4 = scmp.ne.s32.totalorder %s114_s22, %s18087_s0  ;;  %p18093_p6 = scmp.lt.s32.totalorder %s18087_s0, %s18087_s0 }
  0xd2   :  { %p18094_p7 = por %p18093_p6, %p18092_p5 }
  0xd4   :  { %p18095_p8 = pnand %p18094_p7, %p18088_p4 }
  0xd6   :  { %18098 = shalt.err (!%p18095_p8)
}
  0xd7   :  { %119 = dma.hbm_to_vmem [thread:$0]  %s18505_s13, 256, %s114_s22, [#allocation9], %s18431_s23, %s18431_s23, %s18432_s26  }
  0xd8   :  { %s18107_s6 = scalar_lea.vmem %s138_s19, 8192  ;;  %p18112_p10 = scmp.lt.s32.totalorder %s138_s19, %s138_s19 }
  0xd9   :  { %p18108_p9 = scmp.ne.s32.totalorder %s138_s19, %s18107_s6  ;;  %p18113_p11 = scmp.lt.s32.totalorder %s18107_s6, %s18107_s6 }
  0xdb   :  { %p18114_p12 = por %p18113_p11, %p18112_p10 }
  0xdd   :  { %p18115_p13 = pnand %p18114_p12, %p18108_p9 }
  0xdf   :  { %18118 = shalt.err (!%p18115_p13)
}
  0xe0   :  { %143 = dma.hbm_to_vmem [thread:$0]  %s18515_s21, 8192, %s138_s19, [#allocation11], %s18431_s23, %s18431_s23, %s18432_s26  }
  0xe1   :  { %s18445_s24 = smov [#allocation15]   ;;  %s18446_s1 = smov [#allocation18]  }
  0xe2   :  { %s164_s28 = sshll.u32 %s18445_s24, 4  ;;  %s183_s2 = sshll.u32 %s18446_s1, 4  ;;  %s165_s28 = int_to_ptr.vmem [resolvable:$true] %s164_s28  ;;  %s184_s2 = int_to_ptr.vmem [resolvable:$true] %s183_s2 }
  0xe3   :  { %s18127_s30 = scalar_lea.vmem %s165_s28, 64  ;;  %p18132_p1 = scmp.lt.s32.totalorder %s165_s28, %s165_s28 }
  0xe4   :  { %p18128_p0 = scmp.ne.s32.totalorder %s165_s28, %s18127_s30  ;;  %p18133_p2 = scmp.lt.s32.totalorder %s18127_s30, %s18127_s30 }
  0xe6   :  { %p18134_p3 = por %p18133_p2, %p18132_p1 }
  0xe8   :  { %p18135_p4 = pnand %p18134_p3, %p18128_p0 }
  0xea   :  { %18138 = shalt.err (!%p18135_p4)
}
  0xeb   :  { %s21223_s13 = sld [smem:[#allocation65_spill]]  ;;  %s18147_s12 = scalar_lea.vmem %s184_s2, 640 }
  0xec   :  { %p18148_p5 = scmp.ne.s32.totalorder %s184_s2, %s18147_s12  ;;  %p18152_p6 = scmp.lt.s32.totalorder %s184_s2, %s184_s2 }
  0xed   :  { %p18153_p7 = scmp.lt.s32.totalorder %s18147_s12, %s18147_s12 }
  0xef   :  { %p18154_p8 = por %p18153_p7, %p18152_p6 }
  0xf1   :  { %167 = dma.hbm_to_vmem [thread:$0]  %s21223_s13, 64, %s165_s28, [#allocation14]  }
  0xf2   :  { %p18155_p9 = pnand %p18154_p8, %p18148_p5 }
  0xf4   :  { %18158 = shalt.err (!%p18155_p9)
}
  0xf5   :  { %s21224_s21 = sld [smem:[#allocation66_spill]]  ;;  %s18447_s7 = smov [#allocation21]  }
  0xf6   :  { %s206_s10 = sshll.u32 %s18447_s7, 4  ;;  %s18448_s11 = smov [#allocation24]   ;;  %s207_s10 = int_to_ptr.vmem [resolvable:$true] %s206_s10 }
  0xf7   :  { %s228_s17 = sshll.u32 %s18448_s11, 4  ;;  %s18167_s27 = scalar_lea.vmem %s207_s10, 64  ;;  %s229_s17 = int_to_ptr.vmem [resolvable:$true] %s228_s17 }
  0xf8   :  { %p18168_p10 = scmp.ne.s32.totalorder %s207_s10, %s18167_s27  ;;  %p18172_p11 = scmp.lt.s32.totalorder %s207_s10, %s207_s10 }
  0xf9   :  { %p18173_p12 = scmp.lt.s32.totalorder %s18167_s27, %s18167_s27 }
  0xfb   :  { %189 = dma.hbm_to_vmem [thread:$0]  %s21224_s21, 640, %s184_s2, [#allocation17], %s18431_s23, %s18431_s23, %s18432_s26  }
  0xfc   :  { %p18174_p13 = por %p18173_p12, %p18172_p11 }
  0xfe   :  { %p18175_p0 = pnand %p18174_p13, %p18168_p10 }
 0x100   :  { %18178 = shalt.err (!%p18175_p0)
}
 0x101   :  { %s21225_s5 = sld [smem:[#allocation67_spill]]  ;;  %s18187_s29 = scalar_lea.vmem %s229_s17, 64 }
 0x102   :  { %p18188_p1 = scmp.ne.s32.totalorder %s229_s17, %s18187_s29  ;;  %p18192_p2 = scmp.lt.s32.totalorder %s229_s17, %s229_s17 }
 0x103   :  { %p18193_p3 = scmp.lt.s32.totalorder %s18187_s29, %s18187_s29 }
 0x105   :  { %p18194_p4 = por %p18193_p3, %p18192_p2 }
 0x107   :  { %209 = dma.hbm_to_vmem [thread:$0]  %s21225_s5, 64, %s207_s10, [#allocation20]  }
 0x108   :  { %p18195_p5 = pnand %p18194_p4, %p18188_p1 }
 0x10a   :  { %18198 = shalt.err (!%p18195_p5)
}
 0x10b   :  { %s21226_s15 = sld [smem:[#allocation68_spill]]  ;;  %s18449_s16 = smov [#allocation27]  }
 0x10c   :  { %s247_s18 = sshll.u32 %s18449_s16, 4  ;;  %s18450_s4 = smov [#allocation30]   ;;  %s248_s18 = int_to_ptr.vmem [resolvable:$true] %s247_s18 }
 0x10d   :  { %s270_s20 = sshll.u32 %s18450_s4, 4  ;;  %s18207_s22 = scalar_lea.vmem %s248_s18, 640  ;;  %s271_s20 = int_to_ptr.vmem [resolvable:$true] %s270_s20 }
 0x10e   :  { %p18208_p6 = scmp.ne.s32.totalorder %s248_s18, %s18207_s22  ;;  %p18212_p7 = scmp.lt.s32.totalorder %s248_s18, %s248_s18 }
 0x10f   :  { %p18213_p8 = scmp.lt.s32.totalorder %s18207_s22, %s18207_s22 }
 0x111   :  { %231 = dma.hbm_to_vmem [thread:$0]  %s21226_s15, 64, %s229_s17, [#allocation23]  }
 0x112   :  { %p18214_p9 = por %p18213_p8, %p18212_p7 }
 0x114   :  { %p18215_p10 = pnand %p18214_p9, %p18208_p6 }
 0x116   :  { %18218 = shalt.err (!%p18215_p10)
}
 0x117   :  { %s21227_s8 = sld [smem:[#allocation69_spill]]  ;;  %s18227_s19 = scalar_lea.vmem %s271_s20, 64 }
 0x118   :  { %p18228_p11 = scmp.ne.s32.totalorder %s271_s20, %s18227_s19  ;;  %p18232_p12 = scmp.lt.s32.totalorder %s271_s20, %s271_s20 }
 0x119   :  { %p18233_p13 = scmp.lt.s32.totalorder %s18227_s19, %s18227_s19 }
 0x11b   :  { %p18234_p0 = por %p18233_p13, %p18232_p12 }
 0x11d   :  { %253 = dma.hbm_to_vmem [thread:$0]  %s21227_s8, 640, %s248_s18, [#allocation26], %s18431_s23, %s18431_s23, %s18432_s26  }
 0x11e   :  { %p18235_p1 = pnand %p18234_p0, %p18228_p11 }
 0x120   :  { %18238 = shalt.err (!%p18235_p1)
}
 0x121   :  { %s21228_s0 = sld [smem:[#allocation70_spill]]  ;;  %s18451_s6 = smov [#allocation33]  }
 0x122   :  { %s292_s24 = sshll.u32 %s18451_s6, 4  ;;  %s18452_s28 = smov [#allocation36]   ;;  %s293_s24 = int_to_ptr.vmem [resolvable:$true] %s292_s24 }
 0x123   :  { %s314_s1 = sshll.u32 %s18452_s28, 4  ;;  %s18247_s2 = scalar_lea.vmem %s293_s24, 128  ;;  %s315_s1 = int_to_ptr.vmem [resolvable:$true] %s314_s1 }
 0x124   :  { %p18248_p2 = scmp.ne.s32.totalorder %s293_s24, %s18247_s2  ;;  %p18252_p3 = scmp.lt.s32.totalorder %s293_s24, %s293_s24 }
 0x125   :  { %p18253_p4 = scmp.lt.s32.totalorder %s18247_s2, %s18247_s2 }
 0x127   :  { %273 = dma.hbm_to_vmem [thread:$0]  %s21228_s0, 64, %s271_s20, [#allocation29]  }
 0x128   :  { %p18254_p5 = por %p18253_p4, %p18252_p3 }
 0x12a   :  { %p18255_p6 = pnand %p18254_p5, %p18248_p2 }
 0x12c   :  { %18258 = shalt.err (!%p18255_p6)
}
 0x12d   :  { %s21229_s30 = sld [smem:[#allocation72_spill]]  ;;  %s18267_s13 = scalar_lea.vmem %s315_s1, 64 }
 0x12e   :  { %p18268_p7 = scmp.ne.s32.totalorder %s315_s1, %s18267_s13  ;;  %p18272_p8 = scmp.lt.s32.totalorder %s315_s1, %s315_s1 }
 0x12f   :  { %p18273_p9 = scmp.lt.s32.totalorder %s18267_s13, %s18267_s13 }
 0x131   :  { %p18274_p10 = por %p18273_p9, %p18272_p8 }
 0x133   :  { %295 = dma.hbm_to_vmem [thread:$0]  %s21229_s30, 128, %s293_s24, [#allocation32]  }
 0x134   :  { %p18275_p11 = pnand %p18274_p10, %p18268_p7 }
 0x136   :  { %18278 = shalt.err (!%p18275_p11)
}
 0x137   :  { %s21230_s12 = sld [smem:[#allocation73_spill]]  ;;  %s18453_s21 = smov [#allocation39]  }
 0x138   :  { %s333_s7 = sshll.u32 %s18453_s21, 4  ;;  %s18454_s10 = smov [#allocation42]   ;;  %s334_s7 = int_to_ptr.vmem [resolvable:$true] %s333_s7 }
 0x139   :  { %s356_s11 = sshll.u32 %s18454_s10, 4  ;;  %s18287_s17 = scalar_lea.vmem %s334_s7, 640  ;;  %s357_s11 = int_to_ptr.vmem [resolvable:$true] %s356_s11 }
 0x13a   :  { %p18288_p12 = scmp.ne.s32.totalorder %s334_s7, %s18287_s17  ;;  %p18292_p13 = scmp.lt.s32.totalorder %s334_s7, %s334_s7 }
 0x13b   :  { %p18293_p0 = scmp.lt.s32.totalorder %s18287_s17, %s18287_s17 }
 0x13d   :  { %317 = dma.hbm_to_vmem [thread:$0]  %s21230_s12, 64, %s315_s1, [#allocation35]  }
 0x13e   :  { %p18294_p1 = por %p18293_p0, %p18292_p13 }
 0x140   :  { %p18295_p2 = pnand %p18294_p1, %p18288_p12 }
 0x142   :  { %18298 = shalt.err (!%p18295_p2)
}
 0x143   :  { %s21231_s27 = sld [smem:[#allocation74_spill]]  ;;  %s18307_s5 = scalar_lea.vmem %s357_s11, 64 }
 0x144   :  { %p18308_p3 = scmp.ne.s32.totalorder %s357_s11, %s18307_s5  ;;  %p18312_p4 = scmp.lt.s32.totalorder %s357_s11, %s357_s11 }
 0x145   :  { %p18313_p5 = scmp.lt.s32.totalorder %s18307_s5, %s18307_s5 }
 0x147   :  { %p18314_p6 = por %p18313_p5, %p18312_p4 }
 0x149   :  { %339 = dma.hbm_to_vmem [thread:$0]  %s21231_s27, 640, %s334_s7, [#allocation38], %s18431_s23, %s18431_s23, %s18432_s26  }
 0x14a   :  { %p18315_p7 = pnand %p18314_p6, %p18308_p3 }
 0x14c   :  { %18318 = shalt.err (!%p18315_p7)
}
 0x14d   :  { %s21232_s29 = sld [smem:[#allocation75_spill]]  ;;  %s18455_s15 = smov [#allocation45]  }
 0x14e   :  { %s378_s16 = sshll.u32 %s18455_s15, 4  ;;  %s18456_s18 = smov [#allocation46]   ;;  %s379_s16 = int_to_ptr.vmem [resolvable:$true] %s378_s16 }
 0x14f   :  { %s388_s4 = sshll.u32 %s18456_s18, 4  ;;  %s18327_s20 = scalar_lea.vmem %s379_s16, 64  ;;  %s389_s4 = int_to_ptr.vmem [resolvable:$true] %s388_s4 }
 0x150   :  { %p18328_p8 = scmp.ne.s32.totalorder %s379_s16, %s18327_s20  ;;  %p18332_p9 = scmp.lt.s32.totalorder %s379_s16, %s379_s16 }
 0x151   :  { %p18333_p10 = scmp.lt.s32.totalorder %s18327_s20, %s18327_s20 }
 0x153   :  { %359 = dma.hbm_to_vmem [thread:$0]  %s21232_s29, 64, %s357_s11, [#allocation41]  }
 0x154   :  { %p18334_p11 = por %p18333_p10, %p18332_p9 }
 0x156   :  { %p18335_p12 = pnand %p18334_p11, %p18328_p8 }
 0x158   :  { %18338 = shalt.err (!%p18335_p12)
}
 0x159   :  { %s21233_s23 = sld [smem:[#allocation76_spill]]  ;;  %s18347_s22 = scalar_lea.vmem %s389_s4, 64 }
 0x15a   :  { %p18348_p13 = scmp.ne.s32.totalorder %s389_s4, %s18347_s22  ;;  %p18352_p0 = scmp.lt.s32.totalorder %s389_s4, %s389_s4 }
 0x15b   :  { %p18353_p1 = scmp.lt.s32.totalorder %s18347_s22, %s18347_s22 }
 0x15d   :  { %p18354_p2 = por %p18353_p1, %p18352_p0 }
 0x15f   :  { %381 = dma.hbm_to_vmem [thread:$0]  %s21233_s23, 64, %s379_s16, [#allocation44]  }
 0x160   :  { %p18355_p3 = pnand %p18354_p2, %p18348_p13 }
 0x162   :  { %18358 = shalt.err (!%p18355_p3)
}
 0x163   :  { %s21234_s8 = sld [smem:[#allocation77_spill]] }
 0x169   :  { %391 = dma.hbm_to_vmem [thread:$0]  %s21234_s8, 64, %s389_s4, [#allocation47]  }
 0x16a   :  { %18359 = dma.done.wait [#allocation9], 256  }
 0x16b   :  { %18360 = vsyncadd [#allocation9], 4294967040 }
 0x16c   :  { %18361 = dma.done.wait [#allocation11], 8448  }
 0x16d   :  { %18362 = vsyncadd [#allocation11], 4294958848 }
 0x16e   :  { %18363 = dma.done.wait [#allocation14], 704  }
 0x16f   :  { %18364 = vsyncadd [#allocation14], 4294966592 }
 0x170   :  { %18365 = dma.done.wait [#allocation17], 704  }
 0x171   :  { %18366 = vsyncadd [#allocation17], 4294966592 }
 0x172   :  { %18367 = dma.done.wait [#allocation20], 128  }
 0x173   :  { %18368 = vsyncadd [#allocation20], 4294967168 }
 0x174   :  { %18369 = dma.done.wait [#allocation23], 704  }
 0x175   :  { %18370 = vsyncadd [#allocation23], 4294966592 }
 0x176   :  { %18371 = dma.done.wait [#allocation26], 704  }
 0x177   :  { %18372 = vsyncadd [#allocation26], 4294966592 }
 0x178   :  { %18373 = dma.done.wait [#allocation29], 128  }
 0x179   :  { %18374 = vsyncadd [#allocation29], 4294967168 }
 0x17a   :  { %18375 = dma.done.wait [#allocation32], 256  }
 0x17b   :  { %18376 = vsyncadd [#allocation32], 4294967040 }
 0x17c   :  { %18377 = dma.done.wait [#allocation35], 704  }
 0x17d   :  { %18378 = vsyncadd [#allocation35], 4294966592 }
 0x17e   :  { %18379 = dma.done.wait [#allocation38], 704  }
 0x17f   :  { %18380 = vsyncadd [#allocation38], 4294966592 }
 0x180   :  { %18381 = dma.done.wait [#allocation41], 128  }
 0x181   :  { %18382 = vsyncadd [#allocation41], 4294967168 }
 0x182   :  { %18383 = dma.done.wait [#allocation44], 704  }
 0x183   :  { %18384 = vsyncadd [#allocation44], 4294966592 }
 0x184   :  { %18385 = dma.done.wait [#allocation47], 64  }
 0x185   :  { %18386 = vsyncadd [#allocation47], 4294967232  ;;  %s21235_s19 = sld [smem:[#allocation63_spill]]  ;;  %v514_v0 = vlaneseq  ;;  %s18457_s0 = smov 2   ;;  %vm936_vm0 = vcmask 15360   ;;  %vm564_vm1 = vcmask 7168  }
 0x186   :  { %s18458_s6 = smov 1   ;;  %s18459_s24 = smov 16   ;;  %vm501_vm2 = vcmask 1043456   ;;  %vm21196_vm3 = vcmask 261120   ;;  %vm1154_vm4 = vcmask 130048   ;;  %vm1550_vm5 = vcmask 146432  }
 0x187   :  { %v515_v1 = vshrl.u32 %v514_v0, 7  ;;  %s18460_s28 = smov 18   ;;  %s21236_s1 = sld [smem:[#allocation62_spill]]  ;;  %vm1986_vm6 = vcmask 269312   ;;  %vm2204_vm7 = vcmask 277504   ;;  %vm21194_vm8 = vcmask 1039360  }
 0x188   :  { %s18461_s2 = smov 32   ;;  %s18462_s30 = smov 33   ;;  %vm595_vm9 = vcmask 31744   ;;  %vm21195_vm10 = vcmask 1031168   ;;  %vm21193_vm11 = vcmask 916480   ;;  %vm21192_vm12 = vcmask 908288  }
 0x189   :  { %v18763_v2 = vsub.s32 0, %v515_v1  ;;  %v18765_v3 = vsub.s32 1, %v515_v1  ;;  %v18767_v4 = vsub.s32 2, %v515_v1  ;;  %v18769_v5 = vsub.s32 3, %v515_v1  ;;  %s18463_s13 = smov 34   ;;  %s18464_s12 = smov 111  }
 0x18a   :  { %s18465_s21 = smov 127   ;;  %s18466_s7 = smov 126   ;;  %vm21188_vm13 = vcmask 900096   ;;  %vm21191_vm14 = vcmask 785408   ;;  %vm21190_vm15 = vcmask 777216  }
 0x18b   :  { %v16666_v6 = vld [vmem:[%s21235_s19 + $0x2] ss:$8 sm:$0xf]  ;;  %v16653_v7 = vld [vmem:[%s21235_s19 + $0x1] ss:$8 sm:$0xf] }
 0x18c   :  { %v915_v8 = vrot.slane %v16666_v6, %v18763_v2  ;;  %v919_v9 = vrot.slane %v16666_v6, %v18765_v3  ;;  %v543_v10 = vrot.slane %v16653_v7, %v18763_v2  ;;  %v547_v11 = vrot.slane %v16653_v7, %v18765_v3  ;;  %v16673_v12 = vld [vmem:[%s21235_s19 + $0x3] ss:$8 sm:$0xf]  ;;  %v16686_v25 = vld [vmem:[%s21235_s19 + $0x5] ss:$8 sm:$0xf] }
 0x18d   :  { %v923_v13 = vrot.slane %v16666_v6, %v18767_v4  ;;  %v927_v14 = vrot.slane %v16666_v6, %v18769_v5  ;;  %v551_v15 = vrot.slane %v16653_v7, %v18767_v4  ;;  %v555_v16 = vrot.slane %v16653_v7, %v18769_v5  ;;  %v16693_v32 = vld [vmem:[%s21235_s19 + $0x6] ss:$8 sm:$0xf]  ;;  %v16700_v39 = vld [vmem:[%s21235_s19 + $0x7] ss:$8 sm:$0xf] }
 0x18e   :  { %v928_v17 = vcombine.low %v915_v8, %v919_v9  ;;  %v556_v18 = vcombine.low %v543_v10, %v547_v11  ;;  %v1141_v20 = vrot.slane %v16673_v12, %v18767_v4  ;;  %v1145_v21 = vrot.slane %v16673_v12, %v18769_v5  ;;  %v16707_v46 = vld [vmem:[%s21235_s19 + $0x20] ss:$8 sm:$0xf]  ;;  %s18467_s10 = smov 112   ;;  %s18468_s11 = smov 110  }
 0x18f   :  { %v929_v19 = vcombine.low %v923_v13, %v927_v14  ;;  %v557_v22 = vcombine.low %v551_v15, %v555_v16  ;;  %v1133_v23 = vrot.slane %v16673_v12, %v18763_v2  ;;  %v1137_v24 = vrot.slane %v16673_v12, %v18765_v3  ;;  %v18819_v55 = vld [vmem:[%s21236_s1] sm:$0xff]  ;;  %v18826_v57 = vld [vmem:[%s21236_s1 + $0x8] sm:$0xff]  ;;  %v511_v59 = vld [vmem:[%s21236_s1 + $0x10] sm:$0xf]  ;;  %s18469_s17 = smov 96   ;;  %s18471_s27 = smov 95  }
 0x190   :  { %930 = vrot.lane.b32.xlu1 %v928_v17, %s18457_s0  ;;  %558 = vrot.lane.b32.xlu0 %v556_v18, %s18458_s6  ;;  %v1147_v26 = vcombine.low %v1141_v20, %v1145_v21  ;;  %v1537_v27 = vrot.slane %v16686_v25, %v18767_v4  ;;  %v1541_v28 = vrot.slane %v16686_v25, %v18769_v5  ;;  %v908_v1 = vld [vmem:[%s21236_s1 + $0x10] sm:$0xf]  ;;  %s18472_s5 = smov 94   ;;  %s18474_s29 = smov 17  }
 0x191   :  { %v1146_v29 = vcombine.low %v1133_v23, %v1137_v24  ;;  %v1529_v30 = vrot.slane %v16686_v25, %v18763_v2  ;;  %v1533_v31 = vrot.slane %v16686_v25, %v18765_v3  ;;  %v1755_v34 = vrot.slane %v16693_v32, %v18767_v4  ;;  %v1126_v13 = vld [vmem:[%s21236_s1 + $0x10] sm:$0xf]  ;;  %s21316_s15 = sld [smem:[#allocation71_spill]]  ;;  %s18475_s16 = smov 9  }
 0x192   :  { %v1543_v33 = vcombine.low %v1537_v27, %v1541_v28  ;;  %v1759_v35 = vrot.slane %v16693_v32, %v18769_v5  ;;  %v1747_v37 = vrot.slane %v16693_v32, %v18763_v2  ;;  %v1751_v38 = vrot.slane %v16693_v32, %v18765_v3  ;;  %v1522_v20 = vld [vmem:[%s21236_s1 + $0x10] sm:$0xf]  ;;  %s18476_s18 = smov 10   ;;  %s18478_s4 = smov 119  }
 0x193   :  { %v1542_v36 = vcombine.low %v1529_v30, %v1533_v31  ;;  %v1973_v40 = vrot.slane %v16700_v39, %v18767_v4  ;;  %v1977_v41 = vrot.slane %v16700_v39, %v18769_v5  ;;  %v1965_v42 = vrot.slane %v16700_v39, %v18763_v2  ;;  %s18479_s20 = smov 120   ;;  %s18480_s23 = smov 118  }
 0x194   :  { %932 = vrot.lane.b32.xlu1 %v929_v19, %s18457_s0  ;;  %560 = vrot.lane.b32.xlu0 %v557_v22, %s18458_s6  ;;  %v1761_v43 = vcombine.low %v1755_v34, %v1759_v35  ;;  %v1760_v44 = vcombine.low %v1747_v37, %v1751_v38  ;;  %v1969_v45 = vrot.slane %v16700_v39, %v18765_v3  ;;  %s21367_s22 = sld [smem:[#allocation78_spill]] }
 0x195   :  { %v1979_v47 = vcombine.low %v1973_v40, %v1977_v41  ;;  %v2183_v48 = vrot.slane %v16707_v46, %v18763_v2  ;;  %v2187_v49 = vrot.slane %v16707_v46, %v18765_v3  ;;  %v2191_v51 = vrot.slane %v16707_v46, %v18767_v4  ;;  %s21371_s8 = sld [smem:[#allocation64_spill]] }
 0x196   :  { %v1978_v50 = vcombine.low %v1965_v42, %v1969_v45  ;;  %v2195_v52 = vrot.slane %v16707_v46, %v18769_v5  ;;  %v1346_v56 = vcombine.high %v18819_v55, %v18819_v55  ;;  %v1347_v58 = vcombine.high %v18826_v57, %v18826_v57 }
 0x197   :  { %v2196_v53 = vcombine.low %v2183_v48, %v2187_v49  ;;  %v18470_v49 = vmov 0.0  }
 0x198   :  { %1150 = vrot.lane.b32.xlu1 %v1147_v26, %s18459_s24  ;;  %1148 = vrot.lane.b32.xlu0 %v1146_v29, %s18459_s24  ;;  %v2197_v54 = vcombine.low %v2191_v51, %v2195_v52  ;;  %494 = vst [vmem:[#allocation2] sm:$0xff] %v18470_v49  ;;  %498 = vst [vmem:[#allocation3] sm:$0xff] %v18470_v49 }
 0x199   :  { %671 = vmatprep.mubr.f32.mxu0 %v18470_v49  ;;  %742 = vmatprep.mubr.f32.mxu1 %v18470_v49 }
 0x19c   :  { %1546 = vrot.lane.b32.xlu1 %v1543_v33, %s18460_s28  ;;  %1544 = vrot.lane.b32.xlu0 %v1542_v36, %s18460_s28 }
 0x1a0   :  { %1764 = vrot.lane.b32.xlu1 %v1761_v43, %s18461_s2  ;;  %1762 = vrot.lane.b32.xlu0 %v1760_v44, %s18461_s2 }
 0x1a4   :  { %1982 = vrot.lane.b32.xlu1 %v1979_v47, %s18462_s30  ;;  %1980 = vrot.lane.b32.xlu0 %v1978_v50, %s18462_s30 }
 0x1a8   :  { %2198 = vrot.lane.b32.xlu0 %v2196_v53, %s18463_s13  ;;  %2200 = vrot.lane.b32.xlu1 %v2197_v54, %s18463_s13 }
 0x1ac   :  { %1350 = vrot.lane.b32.xlu1 %v1346_v56, %s18464_s12  ;;  %1352 = vrot.lane.b32.xlu0 %v18826_v57, %s18464_s12 }
 0x1b0   :  { %1348 = vrot.lane.b32.xlu1 %v18819_v55, %s18464_s12  ;;  %1354 = vrot.lane.b32.xlu0 %v1347_v58, %s18464_s12 }
 0x1b4   :  { %1356 = vrot.lane.b32.xlu1 %v511_v59, %s18464_s12 }
 0x202   :  { %v931_v60 = vpop.permute.xlu1 %930  ;;  %v559_v61 = vpop.permute.xlu0 %558 }
 0x203   :  { %v934_v62 = vrot.slane %v931_v60, 4  ;;  %v562_v17 = vrot.slane %v559_v61, 4 }
 0x205   :  { %v937_v10 = vsel %vm936_vm0, %v934_v62, %v931_v60  ;;  %v565_v23 = vsel %vm564_vm1, %v562_v17, %v559_v61 }
 0x206   :  { %v933_v63 = vpop.permute.xlu1 %932  ;;  %v561_v0 = vpop.permute.xlu0 %560  ;;  %v943_v16 = vmul.f32 %v937_v10, %v18819_v55  ;;  %v571_v29 = vmul.f32 %v565_v23, %v18819_v55 }
 0x207   :  { %v935_v6 = vrot.slane %v933_v63, 4  ;;  %v563_v7 = vrot.slane %v561_v0, 4 }
 0x208   :  { %v950_v53 = vcombine.high %v943_v16, %v943_v16  ;;  %v578_v54 = vcombine.high %v571_v29, %v571_v29 }
 0x209   :  { %v573_v8 = vmul.f32 %v563_v7, %v511_v59  ;;  %v945_v9 = vmul.f32 %v935_v6, %v908_v1  ;;  %v566_v27 = vsel %vm501_vm2, %v562_v17, %v563_v7  ;;  %v938_v39 = vsel %vm501_vm2, %v934_v62, %v935_v6 }
 0x20a   :  { %v1151_v11 = vpop.permute.xlu1 %1150  ;;  %v1149_v12 = vpop.permute.xlu0 %1148  ;;  %v567_v33 = vsel %vm564_vm1, %v566_v27, %v561_v0  ;;  %v939_v44 = vsel %vm936_vm0, %v938_v39, %v933_v63  ;;  %v1740_v0 = vld [vmem:[%s21236_s1 + $0x10] sm:$0xf] }
 0x20b   :  { %v1153_v14 = vrot.slane %v1151_v11, 4  ;;  %588 = vrot.lane.b32.xlu0 %v573_v8, %s18465_s21  ;;  %960 = vrot.lane.b32.xlu1 %v945_v9, %s18466_s7  ;;  %v1152_v24 = vrot.slane %v1149_v12, 4  ;;  %v572_v38 = vmul.f32 %v567_v33, %v18826_v57  ;;  %v944_v48 = vmul.f32 %v939_v44, %v18826_v57 }
 0x20d   :  { %v1163_v15 = vmul.f32 %v1153_v14, %v1126_v13  ;;  %v1155_v30 = vsel %vm1154_vm4, %v1152_v24, %v1149_v12  ;;  %v1156_v35 = vsel %vm501_vm2, %v1152_v24, %v1153_v14  ;;  %v579_v63 = vcombine.high %v572_v38, %v572_v38 }
 0x20e   :  { %v1547_v18 = vpop.permute.xlu1 %1546  ;;  %v1545_v19 = vpop.permute.xlu0 %1544  ;;  %v1161_v36 = vmul.f32 %v1155_v30, %v18819_v55  ;;  %v1157_v41 = vsel %vm1154_vm4, %v1156_v35, %v1151_v11  ;;  %v951_v13 = vcombine.high %v944_v48, %v944_v48  ;;  %v2176_v30 = vld [vmem:[%s21236_s1 + $0x10] sm:$0xf] }
 0x20f   :  { %v1549_v21 = vrot.slane %v1547_v18, 4  ;;  %1178 = vrot.lane.b32.xlu0 %v1163_v15, %s18467_s10  ;;  %952 = vrot.lane.b32.xlu1 %v943_v16, %s18466_s7  ;;  %v1548_v31 = vrot.slane %v1545_v19, 4  ;;  %v1162_v45 = vmul.f32 %v1157_v41, %v18826_v57 }
 0x210   :  { %v1168_v62 = vcombine.high %v1161_v36, %v1161_v36 }
 0x211   :  { %v1559_v22 = vmul.f32 %v1549_v21, %v1522_v20  ;;  %v1551_v37 = vsel %vm1550_vm5, %v1548_v31, %v1545_v19  ;;  %v1552_v42 = vsel %vm501_vm2, %v1548_v31, %v1549_v21  ;;  %v1958_v21 = vld [vmem:[%s21236_s1 + $0x10] sm:$0xf]  ;;  %s18482_s1 = smov 5  }
 0x212   :  { %v1763_v25 = vpop.permute.xlu0 %1762  ;;  %v1765_v34 = vpop.permute.xlu1 %1764  ;;  %v1557_v43 = vmul.f32 %v1551_v37, %v18819_v55  ;;  %v1553_v46 = vsel %vm1550_vm5, %v1552_v42, %v1547_v18  ;;  %v1169_v18 = vcombine.high %v1162_v45, %v1162_v45 }
 0x213   :  { %v1766_v26 = vrot.slane %v1763_v25, 4  ;;  %1574 = vrot.lane.b32.xlu0 %v1559_v22, %s18468_s11  ;;  %v1767_v40 = vrot.slane %v1765_v34, 4  ;;  %v1558_v50 = vmul.f32 %v1553_v46, %v18826_v57  ;;  %v512_v46 = vld [vmem:[%s21235_s19] ss:$8 sm:$0xf] }
 0x214   :  { %v1564_v7 = vcombine.high %v1557_v43, %v1557_v43 }
 0x215   :  { %v1769_v28 = vsel %vm21196_vm3, %v1766_v26, %v1763_v25  ;;  %v1770_v47 = vsel %vm501_vm2, %v1766_v26, %v1767_v40  ;;  %v1777_v9 = vmul.f32 %v1767_v40, %v1740_v0  ;;  %v1565_v24 = vcombine.high %v1558_v50, %v1558_v50 }
 0x216   :  { %v1775_v32 = vmul.f32 %v1769_v28, %v18819_v55  ;;  %v1771_v51 = vsel %vm21196_vm3, %v1770_v47, %v1765_v34  ;;  %v1983_v56 = vpop.permute.xlu1 %1982  ;;  %v1981_v58 = vpop.permute.xlu0 %1980 }
 0x217   :  { %580 = vrot.lane.b32.xlu0 %v571_v29, %s18465_s21  ;;  %v1776_v52 = vmul.f32 %v1771_v51, %v18826_v57  ;;  %v1985_v60 = vrot.slane %v1983_v56, 4  ;;  %v1984_v61 = vrot.slane %v1981_v58, 4  ;;  %v521_v51 = vrot.slane %v512_v46, %v18765_v3 }
 0x218   :  { %1784 = vrot.lane.b32.xlu1 %v1775_v32, %s18469_s17  ;;  %v1782_v59 = vcombine.high %v1775_v32, %v1775_v32 }
 0x219   :  { %v1988_v6 = vsel %vm501_vm2, %v1984_v61, %v1985_v60  ;;  %v1987_v8 = vsel %vm1986_vm6, %v1984_v61, %v1981_v58  ;;  %v1995_v23 = vmul.f32 %v1985_v60, %v1958_v21  ;;  %v1783_v26 = vcombine.high %v1776_v52, %v1776_v52 }
 0x21a   :  { %v2199_v1 = vpop.permute.xlu0 %2198  ;;  %v1989_v11 = vsel %vm1986_vm6, %v1988_v6, %v1983_v56  ;;  %v1993_v12 = vmul.f32 %v1987_v8, %v18819_v55  ;;  %v2201_v19 = vpop.permute.xlu1 %2200  ;;  %v525_v58 = vrot.slane %v512_v46, %v18767_v4 }
 0x21b   :  { %1170 = vrot.lane.b32.xlu0 %v1161_v36, %s18467_s10  ;;  %v2202_v10 = vrot.slane %v2199_v1, 4  ;;  %v1994_v14 = vmul.f32 %v1989_v11, %v18826_v57  ;;  %v2203_v22 = vrot.slane %v2201_v19, 4 }
 0x21c   :  { %584 = vrot.lane.b32.xlu1 %v572_v38, %s18465_s21  ;;  %v2000_v16 = vcombine.high %v1993_v12, %v1993_v12 }
 0x21d   :  { %v2205_v15 = vsel %vm2204_vm7, %v2202_v10, %v2199_v1  ;;  %v2206_v25 = vsel %vm501_vm2, %v2202_v10, %v2203_v22  ;;  %v2001_v29 = vcombine.high %v1994_v14, %v1994_v14  ;;  %v2213_v32 = vmul.f32 %v2203_v22, %v2176_v30 }
 0x21e   :  { %v2211_v17 = vmul.f32 %v2205_v15, %v18819_v55  ;;  %v2207_v27 = vsel %vm2204_vm7, %v2206_v25, %v2201_v19  ;;  %v18918_v33 = vpop.permute.xlu1 %1350  ;;  %v18920_v34 = vpop.permute.xlu0 %1352 }
 0x21f   :  { %1566 = vrot.lane.b32.xlu0 %v1557_v43, %s18468_s11  ;;  %v2212_v28 = vmul.f32 %v2207_v27, %v18826_v57  ;;  %v18990_v25 = vsel %vm21192_vm12, %v18918_v33, %v18920_v34  ;;  %v1164_v27 = vld [vmem:[#allocation13 + $0xc] sm:$0xf] }
 0x220   :  { %1174 = vrot.lane.b32.xlu1 %v1162_v45, %s18467_s10  ;;  %v2218_v20 = vcombine.high %v2211_v17, %v2211_v17 }
 0x221   :  { %v2219_v31 = vcombine.high %v2212_v28, %v2212_v28 }
 0x222   :  { %v18922_v35 = vpop.permute.xlu1 %1348  ;;  %v18924_v36 = vpop.permute.xlu0 %1354 }
 0x223   :  { %956 = vrot.lane.b32.xlu0 %v944_v48, %s18466_s7 }
 0x224   :  { %1570 = vrot.lane.b32.xlu1 %v1558_v50, %s18468_s11  ;;  %v517_v50 = vrot.slane %v512_v46, %v18763_v2 }
 0x226   :  { %v18926_v37 = vpop.permute.xlu1 %1356 }
 0x227   :  { %1788 = vrot.lane.b32.xlu0 %v1776_v52, %s18469_s17 }
 0x228   :  { %954 = vrot.lane.b32.xlu1 %v950_v53, %s18466_s7 }
 0x22b   :  { %582 = vrot.lane.b32.xlu0 %v578_v54, %s18465_s21  ;;  %v530_v54 = vcombine.low %v517_v50, %v521_v51 }
 0x22c   :  { %1786 = vrot.lane.b32.xlu1 %v1782_v59, %s18469_s17  ;;  %v529_v59 = vrot.slane %v512_v46, %v18769_v5  ;;  %v19036_v46 = vsel %vm21192_vm12, %v18920_v34, %v18924_v36 }
 0x22d   :  { %v534_v61 = vmul.f32 %v530_v54, %v18819_v55 }
 0x22f   :  { %1172 = vrot.lane.b32.xlu0 %v1168_v62, %s18467_s10  ;;  %v751_v1 = vcombine.high %v534_v61, %v534_v61 }
 0x230   :  { %586 = vrot.lane.b32.xlu1 %v579_v63, %s18465_s21  ;;  %v531_v63 = vcombine.low %v525_v58, %v529_v59 }
 0x232   :  { %v535_v10 = vmul.f32 %v531_v63, %v18826_v57 }
 0x233   :  { %1568 = vrot.lane.b32.xlu0 %v1564_v7, %s18468_s11 }
 0x234   :  { %1792 = vrot.lane.b32.xlu1 %v1777_v9, %s18469_s17  ;;  %v574_v9 = vld [vmem:[#allocation13 + $0x4] sm:$0xf]  ;;  %v752_v15 = vcombine.high %v535_v10, %v535_v10 }
 0x237   :  { %958 = vrot.lane.b32.xlu0 %v951_v13, %s18466_s7  ;;  %v536_v13 = vld [vmem:[#allocation13] sm:$0xf] }
 0x238   :  { %2006 = vrot.lane.b32.xlu1 %v1994_v14, %s18471_s27 }
 0x23b   :  { %2004 = vrot.lane.b32.xlu0 %v2000_v16, %s18471_s27 }
 0x23c   :  { %1176 = vrot.lane.b32.xlu1 %v1169_v18, %s18467_s10 }
 0x23f   :  { %2002 = vrot.lane.b32.xlu0 %v1993_v12, %s18471_s27 }
 0x240   :  { %2222 = vrot.lane.b32.xlu1 %v2218_v20, %s18472_s5  ;;  %v946_v20 = vld [vmem:[#allocation13 + $0x8] sm:$0xf] }
 0x243   :  { %2010 = vrot.lane.b32.xlu0 %v1995_v23, %s18471_s27 }
 0x244   :  { %1572 = vrot.lane.b32.xlu1 %v1565_v24, %s18468_s11 }
 0x247   :  { %1790 = vrot.lane.b32.xlu0 %v1783_v26, %s18469_s17 }
 0x248   :  { %2220 = vrot.lane.b32.xlu1 %v2211_v17, %s18472_s5 }
 0x24b   :  { %2224 = vrot.lane.b32.xlu0 %v2212_v28, %s18472_s5  ;;  %v19002_v28 = vsel %vm21192_vm12, %v18922_v35, %v18918_v33 }
 0x24c   :  { %2008 = vrot.lane.b32.xlu1 %v2001_v29, %s18471_s27 }
 0x24f   :  { %2226 = vrot.lane.b32.xlu0 %v2219_v31, %s18472_s5 }
 0x250   :  { %2228 = vrot.lane.b32.xlu1 %v2213_v32, %s18472_s5  ;;  %v1342_v32 = vld [vmem:[#allocation13 + $0x10] sm:$0xf] }
 0x27d   :  { %v589_v38 = vpop.permute.xlu0 %588  ;;  %v18928_v39 = vpop.permute.xlu1 %960 }
 0x281   :  { %v18930_v40 = vpop.permute.xlu0 %1178  ;;  %v953_v42 = vpop.permute.xlu1 %952 }
 0x285   :  { %v18932_v41 = vpop.permute.xlu0 %1574 }
 0x289   :  { %v581_v43 = vpop.permute.xlu0 %580 }
 0x28a   :  { %v18934_v44 = vpop.permute.xlu1 %1784 }
 0x28d   :  { %v1171_v45 = vpop.permute.xlu0 %1170 }
 0x28e   :  { %v585_v47 = vpop.permute.xlu1 %584 }
 0x291   :  { %v18937_v48 = vpop.permute.xlu0 %1566 }
 0x292   :  { %v18941_v52 = vpop.permute.xlu1 %1174 }
 0x295   :  { %v957_v53 = vpop.permute.xlu0 %956 }
 0x296   :  { %v18943_v56 = vpop.permute.xlu1 %1570 }
 0x299   :  { %v18947_v60 = vpop.permute.xlu0 %1788 }
 0x29a   :  { %v955_v62 = vpop.permute.xlu1 %954 }
 0x29b   :  { %v964_v12 = vsel %vm21195_vm10, %v955_v62, %v957_v53  ;;  %v963_v16 = vsel %vm21195_vm10, %v953_v42, %v955_v62  ;;  %v19026_v42 = vsel %vm21192_vm12, %v18924_v36, %v18926_v37 }
 0x29d   :  { %v583_v0 = vpop.permute.xlu0 %582 }
 0x29e   :  { %v18950_v6 = vpop.permute.xlu1 %1786  ;;  %v592_v7 = vsel %vm21194_vm8, %v583_v0, %v585_v47  ;;  %v591_v8 = vsel %vm21194_vm8, %v581_v43, %v583_v0 }
 0x29f   :  { %16654 = vmatprep.subr.msk.mxu0 %vm501_vm2, %v592_v7  ;;  %v1796_v43 = vsel %vm21191_vm14, %v18950_v6, %v18947_v60  ;;  %v1795_v37 = vsel %vm21191_vm14, %v18934_v44, %v18950_v6 }
 0x2a0   :  { %16655 = vmatpush1.msk.msra.mxu0 %vm501_vm2, %v591_v8 }
 0x2a1   :  { %16656 = vmatmul.mubr.msk.f32.vlgmr.msra.gmra.mxu0 %vm595_vm9, %v574_v9  ;;  %v1173_v55 = vpop.permute.xlu0 %1172  ;;  %16660 = vmatprep.subr.msk.mxu0 %vm501_vm2, %v751_v1 }
 0x2a2   :  { %v587_v11 = vpop.permute.xlu1 %586  ;;  %16661 = vmatpush1.msk.msra.mxu0 %vm501_vm2, %v534_v61  ;;  %828 = vmatprep.mubr.f32.mxu0 %v18470_v49  ;;  %v1182_v19 = vsel %vm21193_vm11, %v1173_v55, %v18941_v52  ;;  %v1181_v21 = vsel %vm21193_vm11, %v1171_v45, %v1173_v55  ;;  %v1560_v45 = vld [vmem:[#allocation13 + $0x14] sm:$0xf]  ;;  %v2214_v61 = vld [vmem:[#allocation13 + $0x20] sm:$0xf] }
 0x2a3   :  { %16667 = vmatprep.subr.msk.mxu0 %vm501_vm2, %v964_v12  ;;  %v594_v57 = vsel %vm21194_vm8, %v587_v11, %v589_v38  ;;  %v593_v14 = vsel %vm21194_vm8, %v585_v47, %v587_v11 }
 0x2a4   :  { %16657 = vmatprep.subr.msk.mxu1 %vm501_vm2, %v594_v57 }
 0x2a5   :  { %16658 = vmatpush1.msk.msra.mxu1 %vm501_vm2, %v593_v14  ;;  %v1569_v17 = vpop.permute.xlu0 %1568  ;;  %16662 = vmatmul.mubr.msk.f32.vlgmr.msra.gmra.mxu0 %vm595_vm9, %v536_v13 }
 0x2a6   :  { %16668 = vmatpush1.msk.msra.mxu0 %vm501_vm2, %v963_v16  ;;  %16659 = vmatmul.mubr.msk.f32.vlgmr.msra.gmra.mxu1 %vm595_vm9, %v574_v9  ;;  %v18971_v18 = vpop.permute.xlu1 %1792  ;;  %v1578_v31 = vsel %vm21188_vm13, %v1569_v17, %v18943_v56  ;;  %v1577_v38 = vsel %vm21188_vm13, %v18937_v48, %v1569_v17  ;;  %v1778_v48 = vld [vmem:[#allocation13 + $0x18] sm:$0xf] }
 0x2a7   :  { %16674 = vmatprep.subr.msk.mxu0 %vm501_vm2, %v1182_v19  ;;  %16663 = vmatprep.subr.msk.mxu1 %vm501_vm2, %v752_v15 }
 0x2a8   :  { %1042 = vmatprep.mubr.f32.mxu0 %v18470_v49  ;;  %16664 = vmatpush1.msk.msra.mxu1 %vm501_vm2, %v535_v10 }
 0x2a9   :  { %899 = vmatprep.mubr.f32.mxu1 %v18470_v49  ;;  %v959_v22 = vpop.permute.xlu0 %958  ;;  %16669 = vmatmul.mubr.msk.f32.vlgmr.msra.gmra.mxu0 %vm595_vm9, %v946_v20 }
 0x2aa   :  { %v965_v23 = vsel %vm21195_vm10, %v957_v53, %v959_v22  ;;  %16675 = vmatpush1.msk.msra.mxu0 %vm501_vm2, %v1181_v21  ;;  %16665 = vmatmul.mubr.msk.f32.vlgmr.msra.gmra.mxu1 %vm595_vm9, %v536_v13  ;;  %v18985_v24 = vpop.permute.xlu1 %2006  ;;  %v966_v26 = vsel %vm21195_vm10, %v959_v22, %v18928_v39 }
 0x2ab   :  { %16680 = vmatprep.subr.msk.mxu0 %vm501_vm2, %v18990_v25  ;;  %16670 = vmatprep.subr.msk.mxu1 %vm501_vm2, %v966_v26 }
 0x2ac   :  { %16671 = vmatpush1.msk.msra.mxu1 %vm501_vm2, %v965_v23  ;;  %1260 = vmatprep.mubr.f32.mxu0 %v18470_v49 }
 0x2ad   :  { %1113 = vmatprep.mubr.f32.mxu1 %v18470_v49  ;;  %v2005_v29 = vpop.permute.xlu0 %2004  ;;  %16676 = vmatmul.mubr.msk.f32.vlgmr.msra.gmra.mxu0 %vm595_vm9, %v1164_v27 }
 0x2ae   :  { %16681 = vmatpush1.msk.msra.mxu0 %vm501_vm2, %v19002_v28  ;;  %v1177_v30 = vpop.permute.xlu1 %1176  ;;  %16672 = vmatmul.mubr.msk.f32.vlgmr.msra.gmra.mxu1 %vm595_vm9, %v946_v20  ;;  %v2014_v36 = vsel %vm21190_vm15, %v2005_v29, %v18985_v24 }
 0x2af   :  { %v1183_v33 = vsel %vm21193_vm11, %v18941_v52, %v1177_v30  ;;  %16687 = vmatprep.subr.msk.mxu0 %vm501_vm2, %v1578_v31  ;;  %v1184_v35 = vsel %vm21193_vm11, %v1177_v30, %v18930_v40  ;;  %1438 = vmatprep.mubr.f32.mxu0 %v18470_v49 }
 0x2b0   :  { %16677 = vmatprep.subr.msk.mxu1 %vm501_vm2, %v1184_v35  ;;  %1331 = vmatprep.mubr.f32.mxu1 %v18470_v49 }
 0x2b1   :  { %16678 = vmatpush1.msk.msra.mxu1 %vm501_vm2, %v1183_v33  ;;  %v2003_v39 = vpop.permute.xlu0 %2002  ;;  %16682 = vmatmul.mubr.msk.f32.vlgmr.msra.gmra.mxu0 %vm595_vm9, %v1342_v32 }
 0x2b2   :  { %16688 = vmatpush1.msk.msra.mxu0 %vm501_vm2, %v1577_v38  ;;  %v2223_v40 = vpop.permute.xlu1 %2222  ;;  %16679 = vmatmul.mubr.msk.f32.vlgmr.msra.gmra.mxu1 %vm595_vm9, %v1164_v27  ;;  %v2013_v51 = vsel %vm21190_vm15, %v2003_v39, %v2005_v29 }
 0x2b3   :  { %16683 = vmatprep.subr.msk.mxu1 %vm501_vm2, %v19026_v42  ;;  %16694 = vmatprep.subr.msk.mxu0 %vm501_vm2, %v1796_v43 }
 0x2b4   :  { %16684 = vmatpush1.msk.msra.mxu1 %vm501_vm2, %v19036_v46  ;;  %1656 = vmatprep.mubr.f32.mxu0 %v18470_v49 }
 0x2b5   :  { %1509 = vmatprep.mubr.f32.mxu1 %v18470_v49  ;;  %v2011_v47 = vpop.permute.xlu0 %2010  ;;  %16689 = vmatmul.mubr.msk.f32.vlgmr.msra.gmra.mxu0 %vm595_vm9, %v1560_v45 }
 0x2b6   :  { %16695 = vmatpush1.msk.msra.mxu0 %vm501_vm2, %v1795_v37  ;;  %v1573_v34 = vpop.permute.xlu1 %1572  ;;  %16685 = vmatmul.mubr.msk.f32.vlgmr.msra.gmra.mxu1 %vm595_vm9, %v1342_v32 }
 0x2b7   :  { %v1579_v50 = vsel %vm21188_vm13, %v18943_v56, %v1573_v34  ;;  %16701 = vmatprep.subr.msk.mxu0 %vm501_vm2, %v2014_v36  ;;  %v1580_v44 = vsel %vm21188_vm13, %v1573_v34, %v18932_v41  ;;  %1874 = vmatprep.mubr.f32.mxu0 %v18470_v49  ;;  %v1996_v56 = vld [vmem:[#allocation13 + $0x1c] sm:$0xf]  ;;  %vm21189_vm13 = vcmask 769024  }
 0x2b8   :  { %16690 = vmatprep.subr.msk.mxu1 %vm501_vm2, %v1580_v44  ;;  %1727 = vmatprep.mubr.f32.mxu1 %v18470_v49 }
 0x2b9   :  { %16691 = vmatpush1.msk.msra.mxu1 %vm501_vm2, %v1579_v50  ;;  %v1791_v52 = vpop.permute.xlu0 %1790  ;;  %16696 = vmatmul.mubr.msk.f32.vlgmr.msra.gmra.mxu0 %vm595_vm9, %v1778_v48 }
 0x2ba   :  { %v1797_v53 = vsel %vm21191_vm14, %v18947_v60, %v1791_v52  ;;  %16702 = vmatpush1.msk.msra.mxu0 %vm501_vm2, %v2013_v51  ;;  %v2221_v54 = vpop.permute.xlu1 %2220  ;;  %16692 = vmatmul.mubr.msk.f32.vlgmr.msra.gmra.mxu1 %vm595_vm9, %v1560_v45  ;;  %v1798_v41 = vsel %vm21191_vm14, %v1791_v52, %v18971_v18 }
 0x2bb   :  { %16697 = vmatprep.subr.msk.mxu1 %vm501_vm2, %v1798_v41  ;;  %2092 = vmatprep.mubr.f32.mxu0 %v18470_v49  ;;  %v2231_v62 = vsel %vm21189_vm13, %v2221_v54, %v2223_v40 }
 0x2bc   :  { %16698 = vmatpush1.msk.msra.mxu1 %vm501_vm2, %v1797_v53  ;;  %1945 = vmatprep.mubr.f32.mxu1 %v18470_v49 }
 0x2bd   :  { %v2225_v58 = vpop.permute.xlu0 %2224  ;;  %16703 = vmatmul.mubr.msk.f32.vlgmr.msra.gmra.mxu0 %vm595_vm9, %v1996_v56 }
 0x2be   :  { %v2009_v59 = vpop.permute.xlu1 %2008  ;;  %16699 = vmatmul.mubr.msk.f32.vlgmr.msra.gmra.mxu1 %vm595_vm9, %v1778_v48  ;;  %v2232_v60 = vsel %vm21189_vm13, %v2223_v40, %v2225_v58  ;;  %2310 = vmatprep.mubr.f32.mxu0 %v18470_v49 }
 0x2bf   :  { %v2015_v63 = vsel %vm21190_vm15, %v18985_v24, %v2009_v59  ;;  %16708 = vmatprep.subr.msk.mxu0 %vm501_vm2, %v2232_v60  ;;  %v2016_v0 = vsel %vm21190_vm15, %v2009_v59, %v2011_v47  ;;  %2163 = vmatprep.mubr.f32.mxu1 %v18470_v49 }
 0x2c0   :  { %16704 = vmatprep.subr.msk.mxu1 %vm501_vm2, %v2016_v0  ;;  %16709 = vmatpush1.msk.msra.mxu0 %vm501_vm2, %v2231_v62 }
 0x2c1   :  { %16705 = vmatpush1.msk.msra.mxu1 %vm501_vm2, %v2015_v63  ;;  %v2227_v1 = vpop.permute.xlu0 %2226  ;;  %16710 = vmatmul.mubr.msk.f32.vlgmr.msra.gmra.mxu0 %vm595_vm9, %v2214_v61 }
 0x2c2   :  { %v2229_v6 = vpop.permute.xlu1 %2228  ;;  %16706 = vmatmul.mubr.msk.f32.vlgmr.msra.gmra.mxu1 %vm595_vm9, %v1996_v56  ;;  %2640 = vmatprep.mubr.f32.mxu0 %v18470_v49  ;;  %v2233_v8 = vsel %vm21189_vm13, %v2225_v58, %v2227_v1 }
 0x2c3   :  { %v2234_v7 = vsel %vm21189_vm13, %v2227_v1, %v2229_v6  ;;  %2381 = vmatprep.mubr.f32.mxu1 %v18470_v49  ;;  %vm496_vm13 = vcmask 273408  }
 0x2c4   :  { %16711 = vmatprep.subr.msk.mxu1 %vm501_vm2, %v2234_v7  ;;  %500 = vst.msk [vmem:[#allocation3 + $0x10] sm:$0xf] %vm496_vm13, %v18470_v49  ;;  %497 = vst.msk [vmem:[#allocation2 + $0x10] sm:$0xf] %vm496_vm13, %v18470_v49  ;;  %vm2468_vm13 = vcmask 138240  }
 0x2c5   :  { %16712 = vmatpush1.msk.msra.mxu1 %vm501_vm2, %v2233_v8 }
 0x2c6   :  { %16713 = vmatmul.mubr.msk.f32.vlgmr.msra.gmra.mxu1 %vm595_vm9, %v2214_v61 }
 0x2c7   :  { %2711 = vmatprep.mubr.f32.mxu1 %v18470_v49 }
 0x361   :  { %v673_v9 = vpop.f32.mrf.mxu0 }
 0x363   :  { %v675_v10 = vpop.f32.mrf.mxu0 }
 0x365   :  { %v830_v55 = vpop.f32.mrf.mxu0 }
 0x366   :  { %v744_v11 = vpop.f32.mrf.mxu1  ;;  %v831_v24 = vadd.f32 %v830_v55, %v673_v9 }
 0x367   :  { %v832_v12 = vpop.f32.mrf.mxu0 }
 0x368   :  { %v746_v13 = vpop.f32.mrf.mxu1  ;;  %v833_v29 = vadd.f32 %v832_v12, %v675_v10 }
 0x369   :  { %v1044_v57 = vpop.f32.mrf.mxu0 }
 0x36a   :  { %v901_v14 = vpop.f32.mrf.mxu1  ;;  %v1120_v30 = vadd.f32 %v1044_v57, %v831_v24 }
 0x36b   :  { %v1046_v15 = vpop.f32.mrf.mxu0  ;;  %v902_v39 = vadd.f32 %v901_v14, %v744_v11 }
 0x36c   :  { %v903_v16 = vpop.f32.mrf.mxu1  ;;  %v1121_v33 = vadd.f32 %v1046_v15, %v833_v29 }
 0x36d   :  { %v1262_v17 = vpop.f32.mrf.mxu0  ;;  %v904_v47 = vadd.f32 %v903_v16, %v746_v13 }
 0x36e   :  { %v1115_v18 = vpop.f32.mrf.mxu1  ;;  %v1338_v35 = vadd.f32 %v1262_v17, %v1120_v30 }
 0x36f   :  { %v1264_v19 = vpop.f32.mrf.mxu0  ;;  %v1122_v34 = vadd.f32 %v1115_v18, %v902_v39 }
 0x370   :  { %v1117_v20 = vpop.f32.mrf.mxu1  ;;  %v1339_v43 = vadd.f32 %v1264_v19, %v1121_v33 }
 0x371   :  { %v1440_v21 = vpop.f32.mrf.mxu0  ;;  %v1123_v51 = vadd.f32 %v1117_v20, %v904_v47 }
 0x372   :  { %v1333_v22 = vpop.f32.mrf.mxu1  ;;  %v1516_v45 = vadd.f32 %v1440_v21, %v1338_v35 }
 0x373   :  { %v1442_v23 = vpop.f32.mrf.mxu0  ;;  %v1340_v52 = vadd.f32 %v1333_v22, %v1122_v34 }
 0x374   :  { %v1335_v26 = vpop.f32.mrf.mxu1  ;;  %v1517_v48 = vadd.f32 %v1442_v23, %v1339_v43 }
 0x375   :  { %v1658_v27 = vpop.f32.mrf.mxu0  ;;  %v1341_v58 = vadd.f32 %v1335_v26, %v1123_v51 }
 0x376   :  { %v1511_v31 = vpop.f32.mrf.mxu1  ;;  %v1734_v50 = vadd.f32 %v1658_v27, %v1516_v45 }
 0x377   :  { %v1660_v32 = vpop.f32.mrf.mxu0  ;;  %v1518_v59 = vadd.f32 %v1511_v31, %v1340_v52 }
 0x378   :  { %v1513_v38 = vpop.f32.mrf.mxu1  ;;  %v1735_v54 = vadd.f32 %v1660_v32, %v1517_v48 }
 0x379   :  { %v1876_v40 = vpop.f32.mrf.mxu0  ;;  %v1519_v0 = vadd.f32 %v1513_v38, %v1341_v58 }
 0x37a   :  { %v1729_v37 = vpop.f32.mrf.mxu1  ;;  %v1952_v41 = vadd.f32 %v1876_v40, %v1734_v50 }
 0x37b   :  { %v1878_v36 = vpop.f32.mrf.mxu0  ;;  %v1736_v1 = vadd.f32 %v1729_v37, %v1518_v59  ;;  %v18473_v37 = vmov 0  }
 0x37c   :  { %v1731_v44 = vpop.f32.mrf.mxu1  ;;  %v1953_v61 = vadd.f32 %v1878_v36, %v1735_v54  ;;  %17803 = vset.pattern.permute.xlu0 %v18473_v37  ;;  %17804 = vset.pattern.permute.xlu1 %v18473_v37  ;;  %v19126_v54 = vld [vmem:[%s21235_s19 + $0x3] ss:$8 sm:$0xf] }
 0x37d   :  { %v2094_v53 = vpop.f32.mrf.mxu0  ;;  %v1737_v10 = vadd.f32 %v1731_v44, %v1519_v0  ;;  %v3102_v58 = vrot.slane %v19126_v54, %v18765_v3  ;;  %v19136_v0 = vld [vmem:[%s21235_s19 + $0x5] ss:$8 sm:$0xf] }
 0x37e   :  { %v1947_v56 = vpop.f32.mrf.mxu1  ;;  %v2170_v62 = vadd.f32 %v2094_v53, %v1952_v41  ;;  %v2419_v53 = vld [vmem:[#allocation15] sm:$0xf] }
 0x37f   :  { %v2096_v60 = vpop.f32.mrf.mxu0  ;;  %v1954_v55 = vadd.f32 %v1947_v56, %v1736_v1  ;;  %v16714_v41 = vld [vmem:[%s21235_s19 + $0x1] ss:$8 sm:$0xf]  ;;  %v3098_v56 = vrot.slane %v19126_v54, %v18763_v2 }
 0x380   :  { %v1949_v63 = vpop.f32.mrf.mxu1  ;;  %v2171_v7 = vadd.f32 %v2096_v60, %v1953_v61  ;;  %v2423_v61 = vld [vmem:[#allocation16] sm:$0xf] }
 0x381   :  { %v2312_v6 = vpop.f32.mrf.mxu0  ;;  %v1955_v14 = vadd.f32 %v1949_v63, %v1737_v10  ;;  %v2519_v63 = vrot.slane %v16714_v41, %v18765_v3  ;;  %v19143_v10 = vld [vmem:[%s21235_s19 + $0x6] ss:$8 sm:$0xf] }
 0x382   :  { %v19097_v8 = vadd.f32 %v2312_v6, %v2170_v62  ;;  %v2165_v9 = vpop.f32.mrf.mxu1  ;;  %v2515_v62 = vrot.slane %v16714_v41, %v18763_v2  ;;  %v3111_v6 = vcombine.low %v3098_v56, %v3102_v58 }
 0x383   :  { %v2314_v11 = vpop.f32.mrf.mxu0  ;;  %v2172_v15 = vadd.f32 %v2165_v9, %v1954_v55  ;;  %v3497_v9 = vrot.slane %v19136_v0, %v18765_v3 }
 0x384   :  { %v2402_v12 = vmul.f32 %v19097_v8, %v19097_v8  ;;  %v19101_v13 = vadd.f32 %v2314_v11, %v2171_v7  ;;  %v2167_v57 = vpop.f32.mrf.mxu1  ;;  %v2392_v16 = vsel %vm501_vm2, %v19097_v8, 0.0  ;;  %v3493_v7 = vrot.slane %v19136_v0, %v18763_v2 }
 0x385   :  { %v2173_v20 = vadd.f32 %v2167_v57, %v1955_v14  ;;  %v2528_v11 = vcombine.low %v2515_v62, %v2519_v63  ;;  %v2527_v57 = vrot.slane %v16714_v41, %v18769_v5  ;;  %v3501_v62 = vrot.slane %v19136_v0, %v18767_v4 }
 0x386   :  { %v2393_v17 = vsel %vm501_vm2, %v19101_v13, 0.0  ;;  %v2403_v18 = vmul.f32 %v19101_v13, %v19101_v13  ;;  %v2383_v19 = vpop.f32.mrf.mxu1  ;;  %v2406_v24 = vsel %vm501_vm2, %v2402_v12, 0.0  ;;  %v2523_v12 = vrot.slane %v16714_v41, %v18767_v4 }
 0x387   :  { %v19109_v21 = vadd.f32 %v2383_v19, %v2172_v15  ;;  %v2394_v22 = vadd.f32 %v2393_v17, %v2392_v16  ;;  %v3506_v14 = vcombine.low %v3493_v7, %v3497_v9  ;;  %v3708_v15 = vrot.slane %v19143_v10, %v18763_v2 }
 0x388   :  { %v2385_v23 = vpop.f32.mrf.mxu1  ;;  %v2407_v26 = vsel %vm501_vm2, %v2403_v18, 0.0  ;;  %v3712_v16 = vrot.slane %v19143_v10, %v18765_v3  ;;  %v2529_v17 = vcombine.low %v2523_v12, %v2527_v57  ;;  %v19153_v18 = vld [vmem:[%s21235_s19 + $0x7] ss:$8 sm:$0xf]  ;;  %v3505_v63 = vrot.slane %v19136_v0, %v18769_v5 }
 0x389   :  { %v2404_v27 = vmul.f32 %v19109_v21, %v19109_v21  ;;  %v19115_v29 = vadd.f32 %v2385_v23, %v2173_v20  ;;  %v2395_v30 = vsel %vm501_vm2, %v19109_v21, 0.0  ;;  %v2408_v31 = vadd.f32 %v2407_v26, %v2406_v24  ;;  %v19162_v23 = vld [vmem:[%s21235_s19 + $0x20] ss:$8 sm:$0xf] }
 0x38a   :  { %v2396_v32 = vadd.f32 %v2395_v30, %v2394_v22  ;;  %v3721_v19 = vcombine.low %v3708_v15, %v3712_v16  ;;  %v3923_v20 = vrot.slane %v19153_v18, %v18763_v2  ;;  %v3927_v22 = vrot.slane %v19153_v18, %v18765_v3 }
 0x38b   :  { %v2397_v33 = vsel %vm501_vm2, %v19115_v29, 0.0  ;;  %v2405_v35 = vmul.f32 %v19115_v29, %v19115_v29  ;;  %v2409_v38 = vsel %vm501_vm2, %v2404_v27, 0.0  ;;  %v4138_v26 = vrot.slane %v19162_v23, %v18763_v2 }
 0x38c   :  { %v2398_v39 = vadd.f32 %v2397_v33, %v2396_v32  ;;  %v2410_v40 = vadd.f32 %v2409_v38, %v2408_v31  ;;  %v3936_v24 = vcombine.low %v3923_v20, %v3927_v22  ;;  %v4142_v27 = vrot.slane %v19162_v23, %v18765_v3 }
 0x38d   :  { %v2411_v43 = vsel %vm501_vm2, %v2405_v35, 0.0  ;;  %v3720_v7 = vrot.slane %v19143_v10, %v18769_v5  ;;  %v3931_v9 = vrot.slane %v19153_v18, %v18767_v4  ;;  %v4150_v12 = vrot.slane %v19162_v23, %v18769_v5 }
 0x38e   :  { %2399 = vadd.xlane.f32.xlu0 %v2398_v39  ;;  %v2412_v45 = vadd.f32 %v2411_v43, %v2410_v40  ;;  %v4151_v30 = vcombine.low %v4138_v26, %v4142_v27 }
 0x390   :  { %2413 = vadd.xlane.f32.xlu1 %v2412_v45 }
 0x417   :  { %v2400_v47 = vpop.xlane.xlu0 %2399 }
 0x418   :  { %v2401_v34 = vmul.f32 0.001953125, %v2400_v47 }
 0x419   :  { %v2414_v36 = vpop.xlane.xlu1 %2413 }
 0x41a   :  { %v2416_v48 = vmul.f32 %v2401_v34, %v2401_v34  ;;  %v2415_v50 = vmul.f32 0.001953125, %v2414_v36  ;;  %v16727_v36 = vld [vmem:[%s21235_s19 + $0x2] ss:$8 sm:$0xf] }
 0x41b   :  { %v2887_v49 = vrot.slane %v16727_v36, %v18765_v3  ;;  %v2891_v41 = vrot.slane %v16727_v36, %v18767_v4  ;;  %v2895_v56 = vrot.slane %v16727_v36, %v18769_v5 }
 0x41c   :  { %v2417_v44 = vsub.f32 %v2415_v50, %v2416_v48 }
 0x41d   :  { %v2897_v58 = vcombine.low %v2891_v41, %v2895_v56 }
 0x41e   :  { %v2418_v51 = vmax.f32 %v2417_v44, 0.0 }
 0x420   :  { %v2420_v52 = vadd.f32 1e-05, %v2418_v51  ;;  %v2883_v51 = vrot.slane %v16727_v36, %v18763_v2 }
 0x422   :  { %17814 = vrsqrt.f32 %v2420_v52 }
 0x42f   :  { %v17815_v59 = vpop.eup %17814 }
 0x430   :  { %v2422_v60 = vmul.f32 %v17815_v59, %v2419_v53  ;;  %v2896_v53 = vcombine.low %v2883_v51, %v2887_v49  ;;  %v3106_v59 = vrot.slane %v19126_v54, %v18767_v4 }
 0x432   :  { %2428 = vperm.xlu0 %17803, %v2422_v60   ;;  %v2424_v1 = vmul.f32 %v2422_v60, %v2401_v34  ;;  %v3110_v60 = vrot.slane %v19126_v54, %v18769_v5 }
 0x434   :  { %v2425_v55 = vsub.f32 %v2423_v61, %v2424_v1  ;;  %v3112_v61 = vcombine.low %v3106_v59, %v3110_v60  ;;  %v3507_v1 = vcombine.low %v3501_v62, %v3505_v63 }
 0x436   :  { %2437 = vperm.xlu1 %17804, %v2425_v55   ;;  %3113 = vrot.lane.b32.xlu0 %v3111_v6, %s18459_s24  ;;  %v3716_v6 = vrot.slane %v19143_v10, %v18767_v4  ;;  %v3935_v55 = vrot.slane %v19153_v18, %v18769_v5 }
 0x438   :  { %v3722_v54 = vcombine.low %v3716_v6, %v3720_v7  ;;  %v3937_v0 = vcombine.low %v3931_v9, %v3935_v55 }
 0x43a   :  { %2530 = vrot.lane.b32.xlu1 %v2528_v11, %s18458_s6  ;;  %3508 = vrot.lane.b32.xlu0 %v3506_v14, %s18460_s28  ;;  %v4146_v11 = vrot.slane %v19162_v23, %v18767_v4 }
 0x43c   :  { %v4152_v10 = vcombine.low %v4146_v11, %v4150_v12 }
 0x43e   :  { %2532 = vrot.lane.b32.xlu1 %v2529_v17, %s18458_s6  ;;  %3723 = vrot.lane.b32.xlu0 %v3721_v19, %s18461_s2 }
 0x442   :  { %3938 = vrot.lane.b32.xlu0 %v3936_v24, %s18462_s30 }
 0x446   :  { %4153 = vrot.lane.b32.xlu0 %v4151_v30, %s18463_s13 }
 0x4ad   :  { %v2429_v31 = vpop.permute.xlu0 %2428 }
 0x4ae   :  { %v2431_v32 = vmul.f32 %v2429_v31, %v19097_v8  ;;  %v2432_v33 = vmul.f32 %v2429_v31, %v19101_v13  ;;  %v2433_v35 = vmul.f32 %v2429_v31, %v19109_v21  ;;  %v2434_v38 = vmul.f32 %v2429_v31, %v19115_v29 }
 0x4b1   :  { %v2438_v39 = vpop.permute.xlu1 %2437  ;;  %v3114_v24 = vpop.permute.xlu0 %3113 }
 0x4b2   :  { %v2440_v40 = vadd.f32 %v2438_v39, %v2431_v32  ;;  %v2441_v43 = vadd.f32 %v2438_v39, %v2432_v33  ;;  %v2442_v45 = vadd.f32 %v2438_v39, %v2433_v35  ;;  %v2443_v37 = vadd.f32 %v2438_v39, %v2434_v38 }
 0x4b4   :  { %vm2444_vm15 = vcmp.gt.f32.partialorder %v2440_v40, 0.0  ;;  %vm2445_vm14 = vcmp.gt.f32.partialorder %v2441_v43, 0.0  ;;  %v2448_v8 = vmul.f32 0.2, %v2440_v40  ;;  %v2449_v47 = vmul.f32 0.2, %v2441_v43 }
 0x4b5   :  { %vm2446_vm12 = vcmp.gt.f32.partialorder %v2442_v45, 0.0  ;;  %vm2447_vm11 = vcmp.gt.f32.partialorder %v2443_v37, 0.0  ;;  %v2450_v13 = vmul.f32 0.2, %v2442_v45  ;;  %v2451_v21 = vmul.f32 0.2, %v2443_v37  ;;  %v2531_v57 = vpop.permute.xlu1 %2530 }
 0x4b6   :  { %v2452_v29 = vsel %vm2444_vm15, %v2440_v40, %v2448_v8  ;;  %v2453_v34 = vsel %vm2445_vm14, %v2441_v43, %v2449_v47  ;;  %vm2480_vm15 = vcmask 134144  }
 0x4b7   :  { %v2460_v48 = vcombine.low %v2452_v29, %v2453_v34  ;;  %v2454_v50 = vsel %vm2446_vm12, %v2442_v45, %v2450_v13  ;;  %v2455_v44 = vsel %vm2447_vm11, %v2443_v37, %v2451_v21  ;;  %vm2475_vm11 = vcmask 1043592   ;;  %v3509_v45 = vpop.permute.xlu0 %3508 }
 0x4b8   :  { %v2461_v52 = vcombine.low %v2454_v50, %v2455_v44  ;;  %vm2476_vm12 = vcmask 1047556   ;;  %v2534_v50 = vrot.slane %v2531_v57, 4  ;;  %v3512_v60 = vrot.slane %v3509_v45, 4 }
 0x4b9   :  { %2462 = vrot.lane.b32.xlu1 %v2460_v48, %s18474_s29  ;;  %v19212_v14 = vpop.permute.xlu1 %2532  ;;  %vm19214_vm14 = vmor %vm2476_vm12, %vm2475_vm11  ;;  %vm21239_vm11 = vcmask 916480  }
 0x4ba   :  { %v2535_v26 = vrot.slane %v19212_v14, 4  ;;  %v2536_v41 = vsel %vm564_vm1, %v2534_v50, %v2531_v57  ;;  %v3514_v7 = vsel %vm1550_vm5, %v3512_v60, %v3509_v45  ;;  %vm21240_vm12 = vmmov %vm21239_vm11 }
 0x4bb   :  { %v3724_v36 = vpop.permute.xlu0 %3723 }
 0x4bc   :  { %v3727_v44 = vrot.slane %v3724_v36, 4 }
 0x4bd   :  { %2464 = vrot.lane.b32.xlu1 %v2461_v52, %s18474_s29  ;;  %v3117_v52 = vrot.slane %v3114_v24, 4 }
 0x4be   :  { %v3729_v56 = vsel %vm21196_vm3, %v3727_v44, %v3724_v36 }
 0x4bf   :  { %v3119_v59 = vsel %vm1154_vm4, %v3117_v52, %v3114_v24 }
 0x4c1   :  { %2898 = vrot.lane.b32.xlu1 %v2896_v53, %s18457_s0 }
 0x4c5   :  { %2900 = vrot.lane.b32.xlu1 %v2897_v58, %s18457_s0 }
 0x4c9   :  { %3115 = vrot.lane.b32.xlu1 %v3112_v61, %s18459_s24  ;;  %v2537_v61 = vsel %vm501_vm2, %v2534_v50, %v2535_v26 }
 0x4ca   :  { %v2538_v6 = vsel %vm564_vm1, %v2537_v61, %v19212_v14 }
 0x4cd   :  { %3510 = vrot.lane.b32.xlu1 %v3507_v1, %s18460_s28 }
 0x4d1   :  { %3725 = vrot.lane.b32.xlu1 %v3722_v54, %s18461_s2 }
 0x4d5   :  { %3940 = vrot.lane.b32.xlu1 %v3937_v0, %s18462_s30 }
 0x4d9   :  { %4155 = vrot.lane.b32.xlu1 %v4152_v10, %s18463_s13 }
 0x52b   :  { %v2463_v15 = vpop.permute.xlu1 %2462 }
 0x52c   :  { %v2466_v17 = vrot.slane %v2463_v15, 4 }
 0x52e   :  { %v2469_v18 = vsel %vm2468_vm13, %v2466_v17, %v2463_v15 }
 0x52f   :  { %2478 = vst.msk [vmem:[#allocation3] sm:$0xff] %vm19214_vm14, %v2469_v18  ;;  %v2465_v19 = vpop.permute.xlu1 %2464 }
 0x530   :  { %v2467_v20 = vrot.slane %v2465_v19, 4 }
 0x532   :  { %2481 = vst.msk [vmem:[#allocation3 + $0x10] sm:$0xf] %vm2480_vm15, %v2467_v20  ;;  %v2470_v47 = vsel %vm501_vm2, %v2466_v17, %v2467_v20 }
 0x533   :  { %v2899_v22 = vpop.permute.xlu1 %2898  ;;  %v19234_v34 = vsel %vm2468_vm13, %v2470_v47, %v2465_v19 }
 0x534   :  { %v2902_v39 = vrot.slane %v2899_v22, 4  ;;  %v2543_v9 = vmul.f32 %v2538_v6, %v19234_v34  ;;  %v3313_v20 = vcombine.high %v19234_v34, %v19234_v34 }
 0x536   :  { %v19225_v38 = vld [vmem:[#allocation3] sm:$0xff]  ;;  %v2904_v21 = vsel %vm936_vm0, %v2902_v39, %v2899_v22 }
 0x537   :  { %v2901_v23 = vpop.permute.xlu1 %2900  ;;  %v2910_v48 = vmul.f32 %v19225_v38, %v2904_v21  ;;  %v3312_v53 = vcombine.high %v19225_v38, %v19225_v38  ;;  %v2542_v58 = vmul.f32 %v19225_v38, %v2536_v41  ;;  %v3735_v62 = vmul.f32 %v19225_v38, %v3729_v56 }
 0x538   :  { %v2903_v33 = vrot.slane %v2901_v23, 4  ;;  %v3125_v1 = vmul.f32 %v19225_v38, %v3119_v59  ;;  %v3520_v12 = vmul.f32 %v19225_v38, %v3514_v7 }
 0x539   :  { %v3307_v27 = vld [vmem:[#allocation3 + $0x10] sm:$0xf] }
 0x53a   :  { %v2509_v30 = vld [vmem:[#allocation3 + $0x10] sm:$0xf]  ;;  %3322 = vrot.lane.b32.xlu1 %v3307_v27, %s18464_s12  ;;  %v2905_v54 = vsel %vm501_vm2, %v2902_v39, %v2903_v33  ;;  %v3939_v27 = vpop.permute.xlu0 %3938 }
 0x53b   :  { %v2544_v31 = vmul.f32 %v2535_v26, %v2509_v30  ;;  %v3116_v32 = vpop.permute.xlu1 %3115  ;;  %v3092_v40 = vld [vmem:[#allocation3 + $0x10] sm:$0xf]  ;;  %v2906_v10 = vsel %vm936_vm0, %v2905_v54, %v2901_v23  ;;  %v2917_v23 = vcombine.high %v2910_v48, %v2910_v48  ;;  %v3742_v30 = vcombine.high %v3735_v62, %v3735_v62 }
 0x53c   :  { %v3118_v35 = vrot.slane %v3116_v32, 4  ;;  %v2877_v43 = vld [vmem:[#allocation3 + $0x10] sm:$0xf]  ;;  %v2911_v17 = vmul.f32 %v2906_v10, %v19234_v34 }
 0x53d   :  { %2559 = vrot.lane.b32.xlu0 %v2544_v31, %s18465_s21  ;;  %v2912_v13 = vmul.f32 %v2903_v33, %v2877_v43  ;;  %v3487_v51 = vld [vmem:[#allocation3 + $0x10] sm:$0xf]  ;;  %v3942_v33 = vrot.slane %v3939_v27, 4  ;;  %v3132_v43 = vcombine.high %v3125_v1, %v3125_v1 }
 0x53e   :  { %3314 = vrot.lane.b32.xlu1 %v19225_v38, %s18464_s12  ;;  %v3127_v37 = vmul.f32 %v3118_v35, %v3092_v40  ;;  %v3120_v63 = vsel %vm501_vm2, %v3117_v52, %v3118_v35  ;;  %v2550_v35 = vcombine.high %v2543_v9, %v2543_v9  ;;  %v4154_v39 = vpop.permute.xlu0 %4153  ;;  %v3702_v45 = vld [vmem:[#allocation3 + $0x10] sm:$0xf]  ;;  %v2918_v50 = vcombine.high %v2911_v17, %v2911_v17 }
 0x53f   :  { %v3511_v8 = vpop.permute.xlu1 %3510  ;;  %v3121_v55 = vsel %vm1154_vm4, %v3120_v63, %v3116_v32  ;;  %v2549_v32 = vcombine.high %v2542_v58, %v2542_v58  ;;  %v3944_v21 = vsel %vm1986_vm6, %v3942_v33, %v3939_v27  ;;  %v4132_v6 = vld [vmem:[#allocation3 + $0x10] sm:$0xf] }
 0x540   :  { %v3513_v29 = vrot.slane %v3511_v8, 4  ;;  %v3126_v14 = vmul.f32 %v3121_v55, %v19234_v34 }
 0x541   :  { %3142 = vrot.lane.b32.xlu0 %v3127_v37, %s18467_s10 }
 0x542   :  { %2927 = vrot.lane.b32.xlu1 %v2912_v13, %s18466_s7  ;;  %v3522_v49 = vmul.f32 %v3513_v29, %v3487_v51  ;;  %v3515_v11 = vsel %vm501_vm2, %v3512_v60, %v3513_v29  ;;  %v3527_v13 = vcombine.high %v3520_v12, %v3520_v12  ;;  %v3133_v51 = vcombine.high %v3126_v14, %v3126_v14 }
 0x543   :  { %v3726_v0 = vpop.permute.xlu1 %3725  ;;  %v3516_v15 = vsel %vm1550_vm5, %v3515_v11, %v3511_v8  ;;  %v4157_v8 = vrot.slane %v4154_v39, 4 }
 0x544   :  { %v3728_v57 = vrot.slane %v3726_v0, 4  ;;  %v3521_v19 = vmul.f32 %v3516_v15, %v19234_v34 }
 0x545   :  { %3318 = vrot.lane.b32.xlu0 %v19234_v34, %s18464_s12  ;;  %v4159_v36 = vsel %vm2204_vm7, %v4157_v8, %v4154_v39 }
 0x546   :  { %2919 = vrot.lane.b32.xlu1 %v2910_v48, %s18466_s7  ;;  %v3730_v18 = vsel %vm501_vm2, %v3727_v44, %v3728_v57  ;;  %v3737_v37 = vmul.f32 %v3728_v57, %v3702_v45  ;;  %v3950_v48 = vmul.f32 %v3944_v21, %v19225_v38  ;;  %v4165_v44 = vmul.f32 %v4159_v36, %v19225_v38  ;;  %v2545_v36 = vld [vmem:[#allocation18 + $0x4] sm:$0xf] }
 0x547   :  { %v3731_v22 = vsel %vm21196_vm3, %v3730_v18, %v3726_v0  ;;  %v3941_v26 = vpop.permute.xlu1 %3940  ;;  %v3528_v56 = vcombine.high %v3521_v19, %v3521_v19 }
 0x548   :  { %v3736_v24 = vmul.f32 %v3731_v22, %v19234_v34  ;;  %v3943_v31 = vrot.slane %v3941_v26, 4  ;;  %v4172_v52 = vcombine.high %v4165_v44, %v4165_v44 }
 0x549   :  { %3537 = vrot.lane.b32.xlu0 %v3522_v49, %s18468_s11  ;;  %v3957_v49 = vcombine.high %v3950_v48, %v3950_v48 }
 0x54a   :  { %3316 = vrot.lane.b32.xlu1 %v3312_v53, %s18464_s12  ;;  %v3945_v40 = vsel %vm501_vm2, %v3942_v33, %v3943_v31  ;;  %v3743_v61 = vcombine.high %v3736_v24, %v3736_v24 }
 0x54b   :  { %v3946_v47 = vsel %vm1986_vm6, %v3945_v40, %v3941_v26  ;;  %v4156_v53 = vpop.permute.xlu1 %4155  ;;  %v2484_v26 = vld [vmem:[%s21235_s19] ss:$8 sm:$0xf] }
 0x54c   :  { %v3951_v29 = vmul.f32 %v3946_v47, %v19234_v34  ;;  %v4158_v41 = vrot.slane %v4156_v53, 4  ;;  %v2497_v33 = vrot.slane %v2484_v26, %v18767_v4 }
 0x54d   :  { %2551 = vrot.lane.b32.xlu0 %v2542_v58, %s18465_s21  ;;  %v3917_v58 = vld [vmem:[#allocation3 + $0x10] sm:$0xf] }
 0x54e   :  { %3744 = vrot.lane.b32.xlu1 %v3735_v62, %s18469_s17  ;;  %v3952_v59 = vmul.f32 %v3943_v31, %v3917_v58  ;;  %v4160_v60 = vsel %vm501_vm2, %v4157_v8, %v4158_v41  ;;  %v3958_v63 = vcombine.high %v3951_v29, %v3951_v29  ;;  %v4167_v7 = vmul.f32 %v4158_v41, %v4132_v6  ;;  %v19363_v41 = vld [vmem:[#allocation2] sm:$0xff] }
 0x54f   :  { %v4161_v62 = vsel %vm2204_vm7, %v4160_v60, %v4156_v53  ;;  %v2493_v31 = vrot.slane %v2484_v26, %v18765_v3  ;;  %v2508_v53 = vld [vmem:[#allocation18] sm:$0xf] }
 0x551   :  { %3134 = vrot.lane.b32.xlu0 %v3125_v1, %s18467_s10  ;;  %v4166_v1 = vmul.f32 %v4161_v62, %v19234_v34 }
 0x552   :  { %2555 = vrot.lane.b32.xlu1 %v2543_v9, %s18465_s21 }
 0x553   :  { %v4173_v54 = vcombine.high %v4166_v1, %v4166_v1 }
 0x555   :  { %3529 = vrot.lane.b32.xlu0 %v3520_v12, %s18468_s11 }
 0x556   :  { %3138 = vrot.lane.b32.xlu1 %v3126_v14, %s18467_s10 }
 0x559   :  { %2923 = vrot.lane.b32.xlu0 %v2911_v17, %s18466_s7 }
 0x55a   :  { %3533 = vrot.lane.b32.xlu1 %v3521_v19, %s18468_s11 }
 0x55d   :  { %3320 = vrot.lane.b32.xlu0 %v3313_v20, %s18464_s12 }
 0x55e   :  { %2921 = vrot.lane.b32.xlu1 %v2917_v23, %s18466_s7 }
 0x561   :  { %3748 = vrot.lane.b32.xlu0 %v3736_v24, %s18469_s17 }
 0x562   :  { %3746 = vrot.lane.b32.xlu1 %v3742_v30, %s18469_s17  ;;  %v2489_v30 = vrot.slane %v2484_v26, %v18763_v2 }
 0x564   :  { %v2502_v40 = vcombine.low %v2489_v30, %v2493_v31  ;;  %v3523_v31 = vld [vmem:[#allocation18 + $0x14] sm:$0xf] }
 0x565   :  { %2553 = vrot.lane.b32.xlu0 %v2549_v32, %s18465_s21 }
 0x566   :  { %2557 = vrot.lane.b32.xlu1 %v2550_v35, %s18465_s21  ;;  %v2501_v35 = vrot.slane %v2484_v26, %v18769_v5  ;;  %v2506_v8 = vmul.f32 %v19225_v38, %v2502_v40 }
 0x568   :  { %v2503_v45 = vcombine.low %v2497_v33, %v2501_v35  ;;  %v3738_v35 = vld [vmem:[#allocation18 + $0x18] sm:$0xf] }
 0x569   :  { %3136 = vrot.lane.b32.xlu0 %v3132_v43, %s18467_s10 }
 0x56a   :  { %3752 = vrot.lane.b32.xlu1 %v3737_v37, %s18469_s17 }
 0x56d   :  { %3531 = vrot.lane.b32.xlu0 %v3527_v13, %s18468_s11  ;;  %v2507_v13 = vmul.f32 %v2503_v45, %v19234_v34 }
 0x56e   :  { %3963 = vrot.lane.b32.xlu1 %v3951_v29, %s18471_s27 }
 0x56f   :  { %v2721_v34 = vcombine.high %v2507_v13, %v2507_v13 }
 0x571   :  { %2925 = vrot.lane.b32.xlu0 %v2918_v50, %s18466_s7 }
 0x572   :  { %3140 = vrot.lane.b32.xlu1 %v3133_v51, %s18467_s10  ;;  %v2720_v51 = vcombine.high %v2506_v8, %v2506_v8 }
 0x575   :  { %3961 = vrot.lane.b32.xlu0 %v3957_v49, %s18471_s27 }
 0x576   :  { %4176 = vrot.lane.b32.xlu1 %v4172_v52, %s18472_s5 }
 0x579   :  { %3959 = vrot.lane.b32.xlu0 %v3950_v48, %s18471_s27 }
 0x57a   :  { %3535 = vrot.lane.b32.xlu1 %v3528_v56, %s18468_s11 }
 0x57d   :  { %3967 = vrot.lane.b32.xlu0 %v3952_v59, %s18471_s27 }
 0x57e   :  { %4174 = vrot.lane.b32.xlu1 %v4165_v44, %s18472_s5 }
 0x581   :  { %3750 = vrot.lane.b32.xlu0 %v3743_v61, %s18469_s17  ;;  %v2913_v61 = vld [vmem:[#allocation18 + $0x8] sm:$0xf] }
 0x582   :  { %3965 = vrot.lane.b32.xlu1 %v3958_v63, %s18471_s27 }
 0x585   :  { %4178 = vrot.lane.b32.xlu0 %v4166_v1, %s18472_s5 }
 0x586   :  { %4182 = vrot.lane.b32.xlu1 %v4167_v7, %s18472_s5 }
 0x589   :  { %4180 = vrot.lane.b32.xlu0 %v4173_v54, %s18472_s5 }
 0x5ac   :  { %v19311_v9 = vpop.permute.xlu1 %3322 }
 0x5af   :  { %v2560_v55 = vpop.permute.xlu0 %2559 }
 0x5b0   :  { %v19313_v0 = vpop.permute.xlu1 %3314 }
 0x5b3   :  { %v19315_v11 = vpop.permute.xlu0 %3142 }
 0x5b4   :  { %v19317_v12 = vpop.permute.xlu1 %2927 }
 0x5b7   :  { %v19319_v10 = vpop.permute.xlu0 %3318 }
 0x5b8   :  { %v2920_v57 = vpop.permute.xlu1 %2919 }
 0x5bb   :  { %v19321_v14 = vpop.permute.xlu0 %3537 }
 0x5bc   :  { %v19323_v15 = vpop.permute.xlu1 %3316 }
 0x5bf   :  { %v2552_v17 = vpop.permute.xlu0 %2551 }
 0x5c0   :  { %v19325_v18 = vpop.permute.xlu1 %3744 }
 0x5c3   :  { %v3135_v19 = vpop.permute.xlu0 %3134 }
 0x5c4   :  { %v2556_v20 = vpop.permute.xlu1 %2555 }
 0x5c7   :  { %v19327_v22 = vpop.permute.xlu0 %3529 }
 0x5c8   :  { %v19329_v23 = vpop.permute.xlu1 %3138 }
 0x5cb   :  { %v2924_v24 = vpop.permute.xlu0 %2923 }
 0x5cc   :  { %v19332_v27 = vpop.permute.xlu1 %3533 }
 0x5cf   :  { %v19336_v32 = vpop.permute.xlu0 %3320 }
 0x5d0   :  { %v2922_v39 = vpop.permute.xlu1 %2921 }
 0x5d1   :  { %v2930_v52 = vsel %vm21195_vm10, %v2922_v39, %v2924_v24  ;;  %v2929_v58 = vsel %vm21195_vm10, %v2920_v57, %v2922_v39 }
 0x5d3   :  { %v19340_v43 = vpop.permute.xlu0 %3748 }
 0x5d4   :  { %v19342_v37 = vpop.permute.xlu1 %3746 }
 0x5d7   :  { %v2554_v47 = vpop.permute.xlu0 %2553 }
 0x5d8   :  { %v2561_v21 = vsel %vm21194_vm8, %v2552_v17, %v2554_v47  ;;  %v2562_v29 = vsel %vm21194_vm8, %v2554_v47, %v2556_v20  ;;  %v2558_v48 = vpop.permute.xlu1 %2557 }
 0x5d9   :  { %16715 = vmatprep.subr.msk.mxu0 %vm501_vm2, %v2562_v29  ;;  %v2563_v50 = vsel %vm21194_vm8, %v2556_v20, %v2558_v48  ;;  %v2564_v44 = vsel %vm21194_vm8, %v2558_v48, %v2560_v55  ;;  %v3128_v55 = vld [vmem:[#allocation18 + $0xc] sm:$0xf]  ;;  %vm21242_vm8 = vmmov %vm21240_vm12 }
 0x5da   :  { %16716 = vmatpush1.msk.msra.mxu0 %vm501_vm2, %v2561_v21  ;;  %16718 = vmatprep.subr.msk.mxu1 %vm501_vm2, %v2564_v44 }
 0x5db   :  { %16717 = vmatmul.mubr.msk.f32.vlgmr.msra.gmra.mxu0 %vm595_vm9, %v2545_v36  ;;  %v3137_v38 = vpop.permute.xlu0 %3136  ;;  %16721 = vmatprep.subr.msk.mxu0 %vm501_vm2, %v2720_v51 }
 0x5dc   :  { %16719 = vmatpush1.msk.msra.mxu1 %vm501_vm2, %v2563_v50  ;;  %16722 = vmatpush1.msk.msra.mxu0 %vm501_vm2, %v2506_v8  ;;  %v19358_v49 = vpop.permute.xlu1 %3752  ;;  %v3145_v59 = vsel %vm21239_vm11, %v3137_v38, %v19329_v23  ;;  %v3144_v63 = vsel %vm21240_vm12, %v3135_v19, %v3137_v38  ;;  %vm21241_vm11 = vcmask 908288   ;;  %v3953_v8 = vld [vmem:[#allocation18 + $0x1c] sm:$0xf] }
 0x5dd   :  { %16720 = vmatmul.mubr.msk.f32.vlgmr.msra.gmra.mxu1 %vm595_vm9, %v2545_v36  ;;  %16724 = vmatprep.subr.msk.mxu1 %vm501_vm2, %v2721_v34  ;;  %v3325_v7 = vsel %vm21241_vm11, %v19323_v15, %v19319_v10  ;;  %v3324_v19 = vsel %vm21241_vm11, %v19313_v0, %v19323_v15  ;;  %v4168_v36 = vld [vmem:[#allocation18 + $0x20] sm:$0xf] }
 0x5de   :  { %16728 = vmatprep.subr.msk.mxu0 %vm501_vm2, %v2930_v52  ;;  %2797 = vmatprep.mubr.f32.mxu0 %v19363_v41 }
 0x5df   :  { %16725 = vmatpush1.msk.msra.mxu1 %vm501_vm2, %v2507_v13  ;;  %v3532_v56 = vpop.permute.xlu0 %3531  ;;  %16723 = vmatmul.mubr.msk.f32.vlgmr.msra.gmra.mxu0 %vm595_vm9, %v2508_v53 }
 0x5e0   :  { %2868 = vmatprep.mubr.f32.mxu1 %v19363_v41  ;;  %16729 = vmatpush1.msk.msra.mxu0 %vm501_vm2, %v2929_v58  ;;  %v19374_v60 = vpop.permute.xlu1 %3963 }
 0x5e1   :  { %16726 = vmatmul.mubr.msk.f32.vlgmr.msra.gmra.mxu1 %vm595_vm9, %v2508_v53  ;;  %16735 = vmatprep.subr.msk.mxu0 %vm501_vm2, %v3145_v59 }
 0x5e2   :  { %3008 = vmatprep.mubr.f32.mxu0 %v19363_v41  ;;  %3079 = vmatprep.mubr.f32.mxu1 %v19363_v41 }
 0x5e3   :  { %v2926_v62 = vpop.permute.xlu0 %2925  ;;  %16730 = vmatmul.mubr.msk.f32.vlgmr.msra.gmra.mxu0 %vm595_vm9, %v2913_v61 }
 0x5e4   :  { %v2931_v1 = vsel %vm21195_vm10, %v2924_v24, %v2926_v62  ;;  %v2932_v6 = vsel %vm21195_vm10, %v2926_v62, %v19317_v12  ;;  %16736 = vmatpush1.msk.msra.mxu0 %vm501_vm2, %v3144_v63  ;;  %v3141_v54 = vpop.permute.xlu1 %3140  ;;  %3223 = vmatprep.mubr.f32.mxu0 %v19363_v41  ;;  %v3308_v24 = vld [vmem:[#allocation18 + $0x10] sm:$0xf] }
 0x5e5   :  { %16731 = vmatprep.subr.msk.mxu1 %vm501_vm2, %v2932_v6  ;;  %16741 = vmatprep.subr.msk.mxu0 %vm501_vm2, %v3325_v7  ;;  %v3146_v57 = vsel %vm21240_vm12, %v19329_v23, %v3141_v54  ;;  %v3147_v12 = vsel %vm21242_vm8, %v3141_v54, %v19315_v11  ;;  %vm21243_vm12 = vcmask 900096   ;;  %vm21244_vm8 = vmmov %vm21241_vm11 }
 0x5e6   :  { %16732 = vmatpush1.msk.msra.mxu1 %vm501_vm2, %v2931_v1  ;;  %v3540_v11 = vsel %vm21243_vm12, %v3532_v56, %v19332_v27  ;;  %v3327_v23 = vsel %vm21244_vm8, %v19336_v32, %v19311_v9  ;;  %vm21245_vm11 = vmmov %vm21244_vm8  ;;  %v3539_v26 = vsel %vm21243_vm12, %v19327_v22, %v3532_v56  ;;  %vm21246_vm8 = vcmask 785408  }
 0x5e7   :  { %16733 = vmatmul.mubr.msk.f32.vlgmr.msra.gmra.mxu1 %vm595_vm9, %v2913_v61  ;;  %v3962_v17 = vpop.permute.xlu0 %3961  ;;  %16738 = vmatprep.subr.msk.mxu1 %vm501_vm2, %v3147_v12  ;;  %v3326_v15 = vsel %vm21245_vm11, %v19319_v10, %v19336_v32  ;;  %v3755_v9 = vsel %vm21246_vm8, %v19342_v37, %v19340_v43  ;;  %vm21247_vm11 = vmmov %vm21243_vm12  ;;  %v3754_v33 = vsel %vm21246_vm8, %v19325_v18, %v19342_v37 }
 0x5e8   :  { %16737 = vmatmul.mubr.msk.f32.vlgmr.msra.gmra.mxu0 %vm595_vm9, %v3128_v55  ;;  %16739 = vmatpush1.msk.msra.mxu1 %vm501_vm2, %v3146_v57  ;;  %v4177_v20 = vpop.permute.xlu1 %4176  ;;  %vm21248_vm12 = vmmov %vm21247_vm11 }
 0x5e9   :  { %16742 = vmatpush1.msk.msra.mxu0 %vm501_vm2, %v3324_v19  ;;  %16744 = vmatprep.subr.msk.mxu1 %vm501_vm2, %v3327_v23 }
 0x5ea   :  { %16748 = vmatprep.subr.msk.mxu0 %vm501_vm2, %v3540_v11  ;;  %3294 = vmatprep.mubr.f32.mxu1 %v19363_v41 }
 0x5eb   :  { %3403 = vmatprep.mubr.f32.mxu0 %v19363_v41  ;;  %v3960_v0 = vpop.permute.xlu0 %3959  ;;  %16740 = vmatmul.mubr.msk.f32.vlgmr.msra.gmra.mxu1 %vm595_vm9, %v3128_v55 }
 0x5ec   :  { %16743 = vmatmul.mubr.msk.f32.vlgmr.msra.gmra.mxu0 %vm595_vm9, %v3308_v24  ;;  %16745 = vmatpush1.msk.msra.mxu1 %vm501_vm2, %v3326_v15  ;;  %v3536_v30 = vpop.permute.xlu1 %3535 }
 0x5ed   :  { %16749 = vmatpush1.msk.msra.mxu0 %vm501_vm2, %v3539_v26  ;;  %v3541_v10 = vsel %vm21247_vm11, %v19332_v27, %v3536_v30  ;;  %3474 = vmatprep.mubr.f32.mxu1 %v19363_v41  ;;  %v3542_v22 = vsel %vm21248_vm12, %v3536_v30, %v19321_v14  ;;  %vm21249_vm11 = vcmask 777216  }
 0x5ee   :  { %16755 = vmatprep.subr.msk.mxu0 %vm501_vm2, %v3755_v9  ;;  %3618 = vmatprep.mubr.f32.mxu0 %v19363_v41  ;;  %v3970_v14 = vsel %vm21249_vm11, %v3962_v17, %v19374_v60  ;;  %vm21250_vm12 = vmmov %vm21249_vm11 }
 0x5ef   :  { %16751 = vmatprep.subr.msk.mxu1 %vm501_vm2, %v3542_v22  ;;  %v3968_v32 = vpop.permute.xlu0 %3967  ;;  %16746 = vmatmul.mubr.msk.f32.vlgmr.msra.gmra.mxu1 %vm595_vm9, %v3308_v24  ;;  %v3969_v39 = vsel %vm21250_vm12, %v3960_v0, %v3962_v17  ;;  %vm21251_vm11 = vmmov %vm21246_vm8 }
 0x5f0   :  { %16750 = vmatmul.mubr.msk.f32.vlgmr.msra.gmra.mxu0 %vm595_vm9, %v3523_v31  ;;  %16752 = vmatpush1.msk.msra.mxu1 %vm501_vm2, %v3541_v10  ;;  %v4175_v27 = vpop.permute.xlu1 %4174  ;;  %vm21252_vm10 = vmmov %vm21250_vm12 }
 0x5f1   :  { %16756 = vmatpush1.msk.msra.mxu0 %vm501_vm2, %v3754_v33  ;;  %3689 = vmatprep.mubr.f32.mxu1 %v19363_v41  ;;  %vm21253_vm12 = vmmov %vm21252_vm10 }
 0x5f2   :  { %16762 = vmatprep.subr.msk.mxu0 %vm501_vm2, %v3970_v14  ;;  %3833 = vmatprep.mubr.f32.mxu0 %v19363_v41 }
 0x5f3   :  { %v3751_v18 = vpop.permute.xlu0 %3750  ;;  %16753 = vmatmul.mubr.msk.f32.vlgmr.msra.gmra.mxu1 %vm595_vm9, %v3523_v31 }
 0x5f4   :  { %v3756_v40 = vsel %vm21246_vm8, %v19340_v43, %v3751_v18  ;;  %16757 = vmatmul.mubr.msk.f32.vlgmr.msra.gmra.mxu0 %vm595_vm9, %v3738_v35  ;;  %v3757_v45 = vsel %vm21251_vm11, %v3751_v18, %v19358_v49  ;;  %v3966_v37 = vpop.permute.xlu1 %3965  ;;  %3904 = vmatprep.mubr.f32.mxu1 %v19363_v41  ;;  %vm21254_vm8 = vcmask 769024  }
 0x5f5   :  { %16763 = vmatpush1.msk.msra.mxu0 %vm501_vm2, %v3969_v39  ;;  %16758 = vmatprep.subr.msk.mxu1 %vm501_vm2, %v3757_v45  ;;  %v3971_v47 = vsel %vm21252_vm10, %v19374_v60, %v3966_v37  ;;  %v3972_v43 = vsel %vm21253_vm12, %v3966_v37, %v3968_v32  ;;  %vm21255_vm11 = vmmov %vm21254_vm8 }
 0x5f6   :  { %16759 = vmatpush1.msk.msra.mxu1 %vm501_vm2, %v3756_v40  ;;  %4048 = vmatprep.mubr.f32.mxu0 %v19363_v41  ;;  %v4184_v29 = vsel %vm21255_vm11, %v4175_v27, %v4177_v20  ;;  %vm21256_vm10 = vmmov %vm21254_vm8 }
 0x5f7   :  { %16765 = vmatprep.subr.msk.mxu1 %vm501_vm2, %v3972_v43  ;;  %v4179_v13 = vpop.permute.xlu0 %4178  ;;  %16760 = vmatmul.mubr.msk.f32.vlgmr.msra.gmra.mxu1 %vm595_vm9, %v3738_v35  ;;  %vm21257_vm12 = vmmov %vm21254_vm8 }
 0x5f8   :  { %16764 = vmatmul.mubr.msk.f32.vlgmr.msra.gmra.mxu0 %vm595_vm9, %v3953_v8  ;;  %v4185_v21 = vsel %vm21254_vm8, %v4177_v20, %v4179_v13  ;;  %16766 = vmatpush1.msk.msra.mxu1 %vm501_vm2, %v3971_v47  ;;  %v4183_v48 = vpop.permute.xlu1 %4182 }
 0x5f9   :  { %16769 = vmatprep.subr.msk.mxu0 %vm501_vm2, %v4185_v21  ;;  %4119 = vmatprep.mubr.f32.mxu1 %v19363_v41 }
 0x5fa   :  { %16770 = vmatpush1.msk.msra.mxu0 %vm501_vm2, %v4184_v29  ;;  %4263 = vmatprep.mubr.f32.mxu0 %v19363_v41 }
 0x5fb   :  { %v4181_v50 = vpop.permute.xlu0 %4180  ;;  %16767 = vmatmul.mubr.msk.f32.vlgmr.msra.gmra.mxu1 %vm595_vm9, %v3953_v8 }
 0x5fc   :  { %v4186_v44 = vsel %vm21256_vm10, %v4179_v13, %v4181_v50  ;;  %16771 = vmatmul.mubr.msk.f32.vlgmr.msra.gmra.mxu0 %vm595_vm9, %v4168_v36  ;;  %v4187_v51 = vsel %vm21257_vm12, %v4181_v50, %v4183_v48  ;;  %4334 = vmatprep.mubr.f32.mxu1 %v19363_v41 }
 0x5fd   :  { %16772 = vmatprep.subr.msk.mxu1 %vm501_vm2, %v4187_v51  ;;  %4596 = vmatprep.mubr.f32.mxu0 %v19363_v41 }
 0x5fe   :  { %16773 = vmatpush1.msk.msra.mxu1 %vm501_vm2, %v4186_v44 }
 0x5ff   :  { %16774 = vmatmul.mubr.msk.f32.vlgmr.msra.gmra.mxu1 %vm595_vm9, %v4168_v36 }
 0x600   :  { %4667 = vmatprep.mubr.f32.mxu1 %v19363_v41 }
 0x69b   :  { %v2642_v38 = vpop.f32.mrf.mxu0 }
 0x69d   :  { %v2644_v34 = vpop.f32.mrf.mxu0  ;;  %v2713_v49 = vpop.f32.mrf.mxu1 }
 0x69f   :  { %v2715_v52 = vpop.f32.mrf.mxu1  ;;  %v2799_v53 = vpop.f32.mrf.mxu0 }
 0x6a0   :  { %v2800_v12 = vadd.f32 %v2799_v53, %v2642_v38 }
 0x6a1   :  { %v2870_v56 = vpop.f32.mrf.mxu1  ;;  %v2801_v58 = vpop.f32.mrf.mxu0 }
 0x6a2   :  { %v2802_v11 = vadd.f32 %v2801_v58, %v2644_v34  ;;  %v2871_v0 = vadd.f32 %v2870_v56, %v2713_v49 }
 0x6a3   :  { %v3010_v59 = vpop.f32.mrf.mxu0  ;;  %v2872_v60 = vpop.f32.mrf.mxu1 }
 0x6a4   :  { %v3086_v20 = vadd.f32 %v3010_v59, %v2800_v12  ;;  %v2873_v31 = vadd.f32 %v2872_v60, %v2715_v52 }
 0x6a5   :  { %v3012_v61 = vpop.f32.mrf.mxu0 }
 0x6a6   :  { %v3087_v15 = vadd.f32 %v3012_v61, %v2802_v11 }
 0x6a7   :  { %v3081_v62 = vpop.f32.mrf.mxu1 }
 0x6a8   :  { %v3225_v63 = vpop.f32.mrf.mxu0  ;;  %v3088_v10 = vadd.f32 %v3081_v62, %v2871_v0 }
 0x6a9   :  { %v3083_v1 = vpop.f32.mrf.mxu1  ;;  %v3301_v26 = vadd.f32 %v3225_v63, %v3086_v20 }
 0x6aa   :  { %v3227_v6 = vpop.f32.mrf.mxu0  ;;  %v3089_v27 = vadd.f32 %v3083_v1, %v2873_v31 }
 0x6ab   :  { %v3296_v7 = vpop.f32.mrf.mxu1  ;;  %v3302_v22 = vadd.f32 %v3227_v6, %v3087_v15 }
 0x6ac   :  { %v3405_v54 = vpop.f32.mrf.mxu0  ;;  %v3303_v35 = vadd.f32 %v3296_v7, %v3088_v10 }
 0x6ad   :  { %v3298_v55 = vpop.f32.mrf.mxu1  ;;  %v3481_v32 = vadd.f32 %v3405_v54, %v3301_v26 }
 0x6ae   :  { %v3407_v57 = vpop.f32.mrf.mxu0  ;;  %v3304_v37 = vadd.f32 %v3298_v55, %v3089_v27 }
 0x6af   :  { %v3476_v17 = vpop.f32.mrf.mxu1  ;;  %v3482_v18 = vadd.f32 %v3407_v57, %v3302_v22 }
 0x6b0   :  { %v3620_v19 = vpop.f32.mrf.mxu0  ;;  %v3483_v8 = vadd.f32 %v3476_v17, %v3303_v35 }
 0x6b1   :  { %v3478_v23 = vpop.f32.mrf.mxu1  ;;  %v3696_v39 = vadd.f32 %v3620_v19, %v3481_v32 }
 0x6b2   :  { %v3622_v24 = vpop.f32.mrf.mxu0  ;;  %v3484_v29 = vadd.f32 %v3478_v23, %v3304_v37 }
 0x6b3   :  { %v3691_v9 = vpop.f32.mrf.mxu1  ;;  %v3697_v47 = vadd.f32 %v3622_v24, %v3482_v18 }
 0x6b4   :  { %v3835_v30 = vpop.f32.mrf.mxu0  ;;  %v3698_v36 = vadd.f32 %v3691_v9, %v3483_v8  ;;  %v4376_v8 = vld [vmem:[#allocation21] sm:$0xf] }
 0x6b5   :  { %v3693_v33 = vpop.f32.mrf.mxu1  ;;  %v3911_v43 = vadd.f32 %v3835_v30, %v3696_v39 }
 0x6b6   :  { %v3837_v14 = vpop.f32.mrf.mxu0  ;;  %v3699_v38 = vadd.f32 %v3693_v33, %v3484_v29 }
 0x6b7   :  { %v3906_v40 = vpop.f32.mrf.mxu1  ;;  %v3912_v48 = vadd.f32 %v3837_v14, %v3697_v47 }
 0x6b8   :  { %v4050_v45 = vpop.f32.mrf.mxu0  ;;  %v3913_v34 = vadd.f32 %v3906_v40, %v3698_v36  ;;  %v4372_v40 = vld [vmem:[#allocation19] sm:$0xf] }
 0x6b9   :  { %v3908_v13 = vpop.f32.mrf.mxu1  ;;  %v4126_v50 = vadd.f32 %v4050_v45, %v3911_v43 }
 0x6ba   :  { %v4052_v21 = vpop.f32.mrf.mxu0  ;;  %v3914_v58 = vadd.f32 %v3908_v13, %v3699_v38 }
 0x6bb   :  { %v4121_v44 = vpop.f32.mrf.mxu1  ;;  %v4127_v49 = vadd.f32 %v4052_v21, %v3912_v48 }
 0x6bc   :  { %v4265_v51 = vpop.f32.mrf.mxu0  ;;  %v4128_v59 = vadd.f32 %v4121_v44, %v3913_v34 }
 0x6bd   :  { %v4341_v52 = vadd.f32 %v4265_v51, %v4126_v50  ;;  %v4123_v53 = vpop.f32.mrf.mxu1 }
 0x6be   :  { %v4267_v56 = vpop.f32.mrf.mxu0  ;;  %v4129_v1 = vadd.f32 %v4123_v53, %v3914_v58 }
 0x6bf   :  { %v4355_v60 = vmul.f32 %v4341_v52, %v4341_v52  ;;  %v4342_v61 = vadd.f32 %v4267_v56, %v4127_v49  ;;  %v4345_v62 = vsel %vm501_vm2, %v4341_v52, 0.0  ;;  %v4336_v63 = vpop.f32.mrf.mxu1  ;;  %v16775_v49 = vld [vmem:[%s21235_s19 + $0x1] ss:$8 sm:$0xf] }
 0x6c0   :  { %v4343_v54 = vadd.f32 %v4336_v63, %v4128_v59 }
 0x6c1   :  { %v4346_v6 = vsel %vm501_vm2, %v4342_v61, 0.0  ;;  %v4356_v7 = vmul.f32 %v4342_v61, %v4342_v61  ;;  %v4359_v55 = vsel %vm501_vm2, %v4355_v60, 0.0  ;;  %v4338_v12 = vpop.f32.mrf.mxu1  ;;  %v4483_v60 = vrot.slane %v16775_v49, %v18769_v5 }
 0x6c2   :  { %v4347_v57 = vadd.f32 %v4346_v6, %v4345_v62  ;;  %v4348_v19 = vsel %vm501_vm2, %v4343_v54, 0.0  ;;  %v4357_v11 = vmul.f32 %v4343_v54, %v4343_v54  ;;  %v4344_v20 = vadd.f32 %v4338_v12, %v4129_v1  ;;  %v16788_v6 = vld [vmem:[%s21235_s19 + $0x2] ss:$8 sm:$0xf] }
 0x6c3   :  { %v4360_v17 = vsel %vm501_vm2, %v4356_v7, 0.0 }
 0x6c4   :  { %v4349_v23 = vadd.f32 %v4348_v19, %v4347_v57  ;;  %v4361_v24 = vadd.f32 %v4360_v17, %v4359_v55  ;;  %v4358_v0 = vmul.f32 %v4344_v20, %v4344_v20  ;;  %v4350_v15 = vsel %vm501_vm2, %v4344_v20, 0.0 }
 0x6c5   :  { %v4362_v26 = vsel %vm501_vm2, %v4357_v11, 0.0  ;;  %v4847_v17 = vrot.slane %v16788_v6, %v18767_v4  ;;  %v4851_v19 = vrot.slane %v16788_v6, %v18769_v5 }
 0x6c6   :  { %v4351_v9 = vadd.f32 %v4350_v15, %v4349_v23  ;;  %v4363_v30 = vadd.f32 %v4362_v26, %v4361_v24  ;;  %v4364_v31 = vsel %vm501_vm2, %v4358_v0, 0.0  ;;  %v4843_v23 = vrot.slane %v16788_v6, %v18765_v3  ;;  %v16795_v24 = vld [vmem:[%s21235_s19 + $0x3] ss:$8 sm:$0xf] }
 0x6c7   :  { %v4853_v0 = vcombine.low %v4847_v17, %v4851_v19  ;;  %v5062_v15 = vrot.slane %v16795_v24, %v18767_v4  ;;  %v5066_v26 = vrot.slane %v16795_v24, %v18769_v5 }
 0x6c8   :  { %4352 = vadd.xlane.f32.xlu0 %v4351_v9  ;;  %v4365_v10 = vadd.f32 %v4364_v31, %v4363_v30  ;;  %v5054_v30 = vrot.slane %v16795_v24, %v18763_v2  ;;  %v5058_v31 = vrot.slane %v16795_v24, %v18765_v3 }
 0x6ca   :  { %4366 = vadd.xlane.f32.xlu1 %v4365_v10  ;;  %v16808_v10 = vld [vmem:[%s21235_s19 + $0x5] ss:$8 sm:$0xf] }
 0x751   :  { %v4353_v22 = vpop.xlane.xlu0 %4352 }
 0x752   :  { %v4354_v32 = vmul.f32 0.001953125, %v4353_v22  ;;  %v5068_v22 = vcombine.low %v5062_v15, %v5066_v26 }
 0x753   :  { %v4367_v33 = vpop.xlane.xlu1 %4366 }
 0x754   :  { %v4369_v14 = vmul.f32 %v4354_v32, %v4354_v32  ;;  %v4368_v27 = vmul.f32 0.001953125, %v4367_v33  ;;  %v5461_v33 = vrot.slane %v16808_v10, %v18769_v5 }
 0x756   :  { %v4370_v35 = vsub.f32 %v4368_v27, %v4369_v14  ;;  %v5067_v14 = vcombine.low %v5054_v30, %v5058_v31  ;;  %v5449_v27 = vrot.slane %v16808_v10, %v18763_v2 }
 0x758   :  { %v4371_v18 = vmax.f32 %v4370_v35, 0.0  ;;  %v5453_v35 = vrot.slane %v16808_v10, %v18765_v3 }
 0x75a   :  { %v4373_v39 = vadd.f32 1e-05, %v4371_v18  ;;  %v16815_v18 = vld [vmem:[%s21235_s19 + $0x6] ss:$8 sm:$0xf] }
 0x75c   :  { %17816 = vrsqrt.f32 %v4373_v39 }
 0x769   :  { %v17817_v45 = vpop.eup %17816 }
 0x76a   :  { %v4375_v37 = vmul.f32 %v17817_v45, %v4372_v40  ;;  %v5672_v40 = vrot.slane %v16815_v18, %v18767_v4  ;;  %v5676_v45 = vrot.slane %v16815_v18, %v18769_v5 }
 0x76c   :  { %4381 = vperm.xlu0 %17803, %v4375_v37   ;;  %v4377_v47 = vmul.f32 %v4375_v37, %v4354_v32  ;;  %v5457_v32 = vrot.slane %v16808_v10, %v18767_v4  ;;  %v5462_v37 = vcombine.low %v5449_v27, %v5453_v35 }
 0x76e   :  { %v4378_v43 = vsub.f32 %v4376_v8, %v4377_v47  ;;  %v5463_v39 = vcombine.low %v5457_v32, %v5461_v33  ;;  %v5664_v8 = vrot.slane %v16815_v18, %v18763_v2  ;;  %v5668_v47 = vrot.slane %v16815_v18, %v18765_v3 }
 0x770   :  { %4390 = vperm.xlu1 %17804, %v4378_v43   ;;  %v16822_v43 = vld [vmem:[%s21235_s19 + $0x7] ss:$8 sm:$0xf] }
 0x7e7   :  { %v4382_v13 = vpop.permute.xlu0 %4381 }
 0x7e8   :  { %v4384_v21 = vmul.f32 %v4382_v13, %v4341_v52  ;;  %v4385_v29 = vmul.f32 %v4382_v13, %v4342_v61  ;;  %v4386_v36 = vmul.f32 %v4382_v13, %v4343_v54  ;;  %v4387_v48 = vmul.f32 %v4382_v13, %v4344_v20 }
 0x7e9   :  { %v4479_v52 = vrot.slane %v16775_v49, %v18767_v4  ;;  %v4839_v20 = vrot.slane %v16788_v6, %v18763_v2  ;;  %v5678_v13 = vcombine.low %v5672_v40, %v5676_v45 }
 0x7eb   :  { %v4391_v50 = vpop.permute.xlu1 %4390  ;;  %v4485_v12 = vcombine.low %v4479_v52, %v4483_v60  ;;  %v4852_v9 = vcombine.low %v4839_v20, %v4843_v23 }
 0x7ec   :  { %v4393_v44 = vadd.f32 %v4391_v50, %v4384_v21  ;;  %v4394_v51 = vadd.f32 %v4391_v50, %v4385_v29  ;;  %v4395_v38 = vadd.f32 %v4391_v50, %v4386_v36  ;;  %v4396_v34 = vadd.f32 %v4391_v50, %v4387_v48 }
 0x7ed   :  { %v5887_v21 = vrot.slane %v16822_v43, %v18767_v4  ;;  %v5891_v29 = vrot.slane %v16822_v43, %v18769_v5  ;;  %v5677_v36 = vcombine.low %v5664_v8, %v5668_v47  ;;  %v5879_v48 = vrot.slane %v16822_v43, %v18763_v2 }
 0x7ee   :  { %v4401_v53 = vadd.f32 %v4393_v44, %v19002_v28  ;;  %v4402_v56 = vadd.f32 %v4394_v51, %v18990_v25  ;;  %v4403_v58 = vadd.f32 %v4395_v38, %v19036_v46  ;;  %v4404_v59 = vadd.f32 %v4396_v34, %v19026_v42  ;;  %v16829_v44 = vld [vmem:[%s21235_s19 + $0x20] ss:$8 sm:$0xf] }
 0x7ef   :  { %v4471_v46 = vrot.slane %v16775_v49, %v18763_v2  ;;  %v4475_v42 = vrot.slane %v16775_v49, %v18765_v3  ;;  %v5883_v50 = vrot.slane %v16822_v43, %v18765_v3  ;;  %v5893_v51 = vcombine.low %v5887_v21, %v5891_v29 }
 0x7f0   :  { %vm4407_vm8 = vcmp.gt.f32.partialorder %v4403_v58, 0.0  ;;  %vm4408_vm11 = vcmp.gt.f32.partialorder %v4404_v59, 0.0  ;;  %v4411_v61 = vmul.f32 0.2, %v4403_v58  ;;  %v4412_v62 = vmul.f32 0.2, %v4404_v59 }
 0x7f1   :  { %vm4405_vm10 = vcmp.gt.f32.partialorder %v4401_v53, 0.0  ;;  %vm4406_vm12 = vcmp.gt.f32.partialorder %v4402_v56, 0.0  ;;  %v4409_v63 = vmul.f32 0.2, %v4401_v53  ;;  %v4410_v1 = vmul.f32 0.2, %v4402_v56 }
 0x7f2   :  { %v19495_v28 = vsel %vm4407_vm8, %v4403_v58, %v4411_v61  ;;  %v19497_v25 = vsel %vm4408_vm11, %v4404_v59, %v4412_v62  ;;  %v4484_v11 = vcombine.low %v4471_v46, %v4475_v42  ;;  %v6102_v38 = vrot.slane %v16829_v44, %v18767_v4 }
 0x7f3   :  { %v4422_v7 = vcombine.low %v19495_v28, %v19497_v25  ;;  %v19504_v54 = vsel %vm4405_vm10, %v4401_v53, %v4409_v63  ;;  %v19506_v55 = vsel %vm4406_vm12, %v4402_v56, %v4410_v1  ;;  %v6106_v34 = vrot.slane %v16829_v44, %v18769_v5 }
 0x7f4   :  { %v4421_v57 = vcombine.low %v19504_v54, %v19506_v55  ;;  %v5892_v49 = vcombine.low %v5879_v48, %v5883_v50  ;;  %v6094_v53 = vrot.slane %v16829_v44, %v18763_v2  ;;  %v6098_v56 = vrot.slane %v16829_v44, %v18765_v3 }
 0x7f5   :  { %4425 = vrot.lane.b32.xlu1 %v4422_v7, %s18474_s29  ;;  %v6108_v58 = vcombine.low %v6102_v38, %v6106_v34  ;;  %vm21258_vm8 = vcmask 1039360  }
 0x7f6   :  { %4423 = vrot.lane.b32.xlu0 %v4421_v57, %s18474_s29  ;;  %v6107_v59 = vcombine.low %v6094_v53, %v6098_v56  ;;  %vm21259_vm11 = vmmov %vm21258_vm8 }
 0x7f7   :  { %vm21260_vm10 = vmmov %vm21258_vm8 }
 0x7f8   :  { %vm21261_vm12 = vmmov %vm21258_vm8 }
 0x7f9   :  { %4488 = vrot.lane.b32.xlu1 %v4485_v12, %s18458_s6 }
 0x7fa   :  { %4486 = vrot.lane.b32.xlu0 %v4484_v11, %s18458_s6 }
 0x7fd   :  { %4856 = vrot.lane.b32.xlu1 %v4853_v0, %s18457_s0 }
 0x7fe   :  { %4854 = vrot.lane.b32.xlu0 %v4852_v9, %s18457_s0 }
 0x801   :  { %5071 = vrot.lane.b32.xlu1 %v5068_v22, %s18459_s24 }
 0x802   :  { %5069 = vrot.lane.b32.xlu0 %v5067_v14, %s18459_s24 }
 0x805   :  { %5466 = vrot.lane.b32.xlu1 %v5463_v39, %s18460_s28 }
 0x806   :  { %5464 = vrot.lane.b32.xlu0 %v5462_v37, %s18460_s28 }
 0x809   :  { %5681 = vrot.lane.b32.xlu1 %v5678_v13, %s18461_s2 }
 0x80a   :  { %5679 = vrot.lane.b32.xlu0 %v5677_v36, %s18461_s2 }
 0x80d   :  { %5896 = vrot.lane.b32.xlu1 %v5893_v51, %s18462_s30 }
 0x80e   :  { %5894 = vrot.lane.b32.xlu0 %v5892_v49, %s18462_s30 }
 0x811   :  { %6111 = vrot.lane.b32.xlu1 %v6108_v58, %s18463_s13 }
 0x812   :  { %6109 = vrot.lane.b32.xlu0 %v6107_v59, %s18463_s13 }
 0x867   :  { %v4426_v52 = vpop.permute.xlu1 %4425 }
 0x868   :  { %v4428_v60 = vrot.slane %v4426_v52, 4  ;;  %v4424_v61 = vpop.permute.xlu0 %4423 }
 0x869   :  { %v4427_v62 = vrot.slane %v4424_v61, 4 }
 0x86a   :  { %4437 = vst.msk [vmem:[#allocation2 + $0x10] sm:$0xf] %vm2480_vm15, %v4428_v60 }
 0x86b   :  { %v4429_v63 = vsel %vm2468_vm13, %v4427_v62, %v4424_v61  ;;  %v4489_v1 = vpop.permute.xlu1 %4488  ;;  %v4430_v31 = vsel %vm501_vm2, %v4427_v62, %v4428_v60 }
 0x86c   :  { %4435 = vst.msk [vmem:[#allocation2] sm:$0xff] %vm19214_vm14, %v4429_v63  ;;  %v4487_v46 = vpop.permute.xlu0 %4486  ;;  %v4491_v6 = vrot.slane %v4489_v1, 4  ;;  %v19569_v14 = vsel %vm2468_vm13, %v4430_v31, %v4426_v52 }
 0x86d   :  { %v4490_v35 = vrot.slane %v4487_v46, 4 }
 0x86f   :  { %v4857_v42 = vpop.permute.xlu1 %4856  ;;  %v4492_v37 = vsel %vm564_vm1, %v4490_v35, %v4487_v46  ;;  %v4493_v21 = vsel %vm501_vm2, %v4490_v35, %v4491_v6 }
 0x870   :  { %v4855_v7 = vpop.permute.xlu0 %4854  ;;  %v4859_v23 = vrot.slane %v4857_v42, 4  ;;  %v4494_v44 = vsel %vm564_vm1, %v4493_v21, %v4489_v1 }
 0x871   :  { %v4465_v57 = vld [vmem:[#allocation2 + $0x10] sm:$0xf]  ;;  %v4858_v26 = vrot.slane %v4855_v7, 4  ;;  %v4499_v53 = vmul.f32 %v4494_v44, %v19569_v14 }
 0x872   :  { %v4500_v12 = vmul.f32 %v4491_v6, %v4465_v57  ;;  %v5263_v17 = vld [vmem:[#allocation2 + $0x10] sm:$0xf] }
 0x873   :  { %5278 = vrot.lane.b32.xlu1 %v5263_v17, %s18464_s12  ;;  %v5072_v19 = vpop.permute.xlu1 %5071  ;;  %v5048_v24 = vld [vmem:[#allocation2 + $0x10] sm:$0xf]  ;;  %v19561_v0 = vld [vmem:[#allocation2] sm:$0xff]  ;;  %v4860_v32 = vsel %vm936_vm0, %v4858_v26, %v4855_v7  ;;  %v4861_v34 = vsel %vm501_vm2, %v4858_v26, %v4859_v23 }
 0x874   :  { %v5074_v11 = vrot.slane %v5072_v19, 4  ;;  %v5070_v20 = vpop.permute.xlu0 %5069  ;;  %4515 = vrot.lane.b32.xlu0 %v4500_v12, %s18465_s21  ;;  %v4833_v15 = vld [vmem:[#allocation2 + $0x10] sm:$0xf]  ;;  %v4866_v18 = vmul.f32 %v4860_v32, %v19561_v0  ;;  %v5268_v47 = vcombine.high %v19561_v0, %v19561_v0  ;;  %v4498_v43 = vmul.f32 %v4492_v37, %v19561_v0 }
 0x875   :  { %v4868_v22 = vmul.f32 %v4859_v23, %v4833_v15  ;;  %v5443_v39 = vld [vmem:[#allocation2 + $0x10] sm:$0xf]  ;;  %v5073_v8 = vrot.slane %v5070_v20, 4  ;;  %v4862_v52 = vsel %vm936_vm0, %v4861_v34, %v4857_v42  ;;  %v5269_v42 = vcombine.high %v19569_v14, %v19569_v14 }
 0x876   :  { %v5083_v9 = vmul.f32 %v5074_v11, %v5048_v24  ;;  %v4867_v62 = vmul.f32 %v4862_v52, %v19569_v14  ;;  %v4873_v7 = vcombine.high %v4866_v18, %v4866_v18  ;;  %v4506_v24 = vcombine.high %v4499_v53, %v4499_v53 }
 0x877   :  { %5270 = vrot.lane.b32.xlu1 %v19561_v0, %s18464_s12  ;;  %v5467_v30 = vpop.permute.xlu1 %5466  ;;  %v5075_v29 = vsel %vm1154_vm4, %v5073_v8, %v5070_v20  ;;  %v5076_v51 = vsel %vm501_vm2, %v5073_v8, %v5074_v11  ;;  %v4505_v11 = vcombine.high %v4498_v43, %v4498_v43 }
 0x878   :  { %v5465_v10 = vpop.permute.xlu0 %5464  ;;  %5098 = vrot.lane.b32.xlu0 %v5083_v9, %s18467_s10  ;;  %v5469_v33 = vrot.slane %v5467_v30, 4  ;;  %v5081_v50 = vmul.f32 %v5075_v29, %v19561_v0  ;;  %v5077_v58 = vsel %vm1154_vm4, %v5076_v51, %v5072_v19 }
 0x879   :  { %v5468_v36 = vrot.slane %v5465_v10, 4  ;;  %v5082_v61 = vmul.f32 %v5077_v58, %v19569_v14 }
 0x87a   :  { %v5478_v40 = vmul.f32 %v5469_v33, %v5443_v39  ;;  %v5088_v15 = vcombine.high %v5081_v50, %v5081_v50  ;;  %v4874_v39 = vcombine.high %v4867_v62, %v4867_v62 }
 0x87b   :  { %4883 = vrot.lane.b32.xlu1 %v4868_v22, %s18466_s7  ;;  %v5470_v38 = vsel %vm1550_vm5, %v5468_v36, %v5465_v10  ;;  %v5682_v49 = vpop.permute.xlu1 %5681  ;;  %v5471_v59 = vsel %vm501_vm2, %v5468_v36, %v5469_v33 }
 0x87c   :  { %v5680_v27 = vpop.permute.xlu0 %5679  ;;  %5274 = vrot.lane.b32.xlu0 %v19569_v14, %s18464_s12  ;;  %v5476_v56 = vmul.f32 %v5470_v38, %v19561_v0  ;;  %v5684_v60 = vrot.slane %v5682_v49, 4  ;;  %v5472_v63 = vsel %vm1550_vm5, %v5471_v59, %v5467_v30  ;;  %v5658_v30 = vld [vmem:[#allocation2 + $0x10] sm:$0xf] }
 0x87d   :  { %v5683_v45 = vrot.slane %v5680_v27, 4  ;;  %v5477_v46 = vmul.f32 %v5472_v63, %v19569_v14  ;;  %v6088_v38 = vld [vmem:[#allocation2 + $0x10] sm:$0xf] }
 0x87e   :  { %v5693_v31 = vmul.f32 %v5684_v60, %v5658_v30  ;;  %v5483_v10 = vcombine.high %v5476_v56, %v5476_v56 }
 0x87f   :  { %4875 = vrot.lane.b32.xlu1 %v4866_v18, %s18466_s7  ;;  %v5685_v13 = vsel %vm21196_vm3, %v5683_v45, %v5680_v27  ;;  %v5686_v1 = vsel %vm501_vm2, %v5683_v45, %v5684_v60  ;;  %v5897_v12 = vpop.permute.xlu1 %5896  ;;  %v5089_v45 = vcombine.high %v5082_v61, %v5082_v61  ;;  %v5484_v21 = vcombine.high %v5477_v46, %v5477_v46 }
 0x880   :  { %5493 = vrot.lane.b32.xlu0 %v5478_v40, %s18468_s11  ;;  %v5691_v48 = vmul.f32 %v5685_v13, %v19561_v0  ;;  %v5687_v6 = vsel %vm21196_vm3, %v5686_v1, %v5682_v49  ;;  %v5895_v17 = vpop.permute.xlu0 %5894  ;;  %v5899_v20 = vrot.slane %v5897_v12, 4  ;;  %v5873_v13 = vld [vmem:[#allocation2 + $0x10] sm:$0xf] }
 0x881   :  { %v5692_v57 = vmul.f32 %v5687_v6, %v19569_v14  ;;  %v5898_v23 = vrot.slane %v5895_v17, 4 }
 0x882   :  { %v5698_v19 = vcombine.high %v5691_v48, %v5691_v48  ;;  %v5908_v29 = vmul.f32 %v5899_v20, %v5873_v13 }
 0x883   :  { %5272 = vrot.lane.b32.xlu1 %v5268_v47, %s18464_s12  ;;  %v5901_v26 = vsel %vm501_vm2, %v5898_v23, %v5899_v20  ;;  %v5900_v33 = vsel %vm1986_vm6, %v5898_v23, %v5895_v17  ;;  %v6112_v8 = vpop.permute.xlu1 %6111  ;;  %v4440_v17 = vld [vmem:[%s21235_s19] ss:$8 sm:$0xf] }
 0x884   :  { %4507 = vrot.lane.b32.xlu0 %v4498_v43, %s18465_s21  ;;  %v6110_v9 = vpop.permute.xlu0 %6109  ;;  %v5902_v32 = vsel %vm1986_vm6, %v5901_v26, %v5897_v12  ;;  %v5906_v35 = vmul.f32 %v5900_v33, %v19561_v0  ;;  %v6114_v43 = vrot.slane %v6112_v8, 4 }
 0x885   :  { %v6113_v22 = vrot.slane %v6110_v9, 4  ;;  %v5907_v27 = vmul.f32 %v5902_v32, %v19569_v14 }
 0x886   :  { %v5913_v37 = vcombine.high %v5906_v35, %v5906_v35  ;;  %v6123_v34 = vmul.f32 %v6114_v43, %v6088_v38 }
 0x887   :  { %5700 = vrot.lane.b32.xlu1 %v5691_v48, %s18469_s17  ;;  %v6115_v18 = vsel %vm2204_vm7, %v6113_v22, %v6110_v9  ;;  %v6116_v36 = vsel %vm501_vm2, %v6113_v22, %v6114_v43  ;;  %v5699_v48 = vcombine.high %v5692_v57, %v5692_v57  ;;  %v5914_v44 = vcombine.high %v5907_v27, %v5907_v27 }
 0x888   :  { %5090 = vrot.lane.b32.xlu0 %v5081_v50, %s18467_s10  ;;  %v6121_v40 = vmul.f32 %v6115_v18, %v19561_v0  ;;  %v6117_v50 = vsel %vm2204_vm7, %v6116_v36, %v6112_v8  ;;  %v4869_v36 = vld [vmem:[#allocation22 + $0x8] sm:$0xf] }
 0x889   :  { %v6122_v51 = vmul.f32 %v6117_v50, %v19569_v14 }
 0x88a   :  { %v6128_v47 = vcombine.high %v6121_v40, %v6121_v40 }
 0x88b   :  { %4511 = vrot.lane.b32.xlu1 %v4499_v53, %s18465_s21  ;;  %v6129_v49 = vcombine.high %v6122_v51, %v6122_v51 }
 0x88c   :  { %5485 = vrot.lane.b32.xlu0 %v5476_v56, %s18468_s11 }
 0x88f   :  { %5094 = vrot.lane.b32.xlu1 %v5082_v61, %s18467_s10 }
 0x890   :  { %4879 = vrot.lane.b32.xlu0 %v4867_v62, %s18466_s7 }
 0x893   :  { %5489 = vrot.lane.b32.xlu1 %v5477_v46, %s18468_s11 }
 0x894   :  { %5276 = vrot.lane.b32.xlu0 %v5269_v42, %s18464_s12 }
 0x897   :  { %4877 = vrot.lane.b32.xlu1 %v4873_v7, %s18466_s7 }
 0x898   :  { %5704 = vrot.lane.b32.xlu0 %v5692_v57, %s18469_s17 }
 0x89b   :  { %5702 = vrot.lane.b32.xlu1 %v5698_v19, %s18469_s17  ;;  %v4445_v19 = vrot.slane %v4440_v17, %v18763_v2 }
 0x89c   :  { %4509 = vrot.lane.b32.xlu0 %v4505_v11, %s18465_s21  ;;  %v4449_v11 = vrot.slane %v4440_v17, %v18765_v3 }
 0x89e   :  { %v4458_v26 = vcombine.low %v4445_v19, %v4449_v11 }
 0x89f   :  { %4513 = vrot.lane.b32.xlu1 %v4506_v24, %s18465_s21  ;;  %v4453_v24 = vrot.slane %v4440_v17, %v18767_v4 }
 0x8a0   :  { %5092 = vrot.lane.b32.xlu0 %v5088_v15, %s18467_s10  ;;  %v4457_v15 = vrot.slane %v4440_v17, %v18769_v5 }
 0x8a3   :  { %5708 = vrot.lane.b32.xlu1 %v5693_v31, %s18469_s17  ;;  %v4459_v31 = vcombine.low %v4453_v24, %v4457_v15 }
 0x8a4   :  { %5487 = vrot.lane.b32.xlu0 %v5483_v10, %s18468_s11  ;;  %v4462_v10 = vmul.f32 %v4458_v26, %v19561_v0 }
 0x8a5   :  { %v4463_v18 = vmul.f32 %v4459_v31, %v19569_v14 }
 0x8a7   :  { %5919 = vrot.lane.b32.xlu1 %v5907_v27, %s18471_s27  ;;  %v4677_v14 = vcombine.high %v4463_v18, %v4463_v18 }
 0x8a8   :  { %4881 = vrot.lane.b32.xlu0 %v4874_v39, %s18466_s7  ;;  %v4676_v39 = vcombine.high %v4462_v10, %v4462_v10 }
 0x8ab   :  { %5096 = vrot.lane.b32.xlu1 %v5089_v45, %s18467_s10 }
 0x8ac   :  { %5917 = vrot.lane.b32.xlu0 %v5913_v37, %s18471_s27 }
 0x8af   :  { %6132 = vrot.lane.b32.xlu1 %v6128_v47, %s18472_s5  ;;  %v4464_v47 = vld [vmem:[#allocation22] sm:$0xf] }
 0x8b0   :  { %5915 = vrot.lane.b32.xlu0 %v5906_v35, %s18471_s27  ;;  %v4501_v35 = vld [vmem:[#allocation22 + $0x4] sm:$0xf] }
 0x8b3   :  { %5491 = vrot.lane.b32.xlu1 %v5484_v21, %s18468_s11 }
 0x8b4   :  { %5923 = vrot.lane.b32.xlu0 %v5908_v29, %s18471_s27 }
 0x8b7   :  { %6130 = vrot.lane.b32.xlu1 %v6121_v40, %s18472_s5 }
 0x8b8   :  { %5706 = vrot.lane.b32.xlu0 %v5699_v48, %s18469_s17 }
 0x8bb   :  { %5921 = vrot.lane.b32.xlu1 %v5914_v44, %s18471_s27 }
 0x8bc   :  { %6134 = vrot.lane.b32.xlu0 %v6122_v51, %s18472_s5 }
 0x8bf   :  { %6138 = vrot.lane.b32.xlu1 %v6123_v34, %s18472_s5 }
 0x8c0   :  { %6136 = vrot.lane.b32.xlu0 %v6129_v49, %s18472_s5  ;;  %v5084_v49 = vld [vmem:[#allocation22 + $0xc] sm:$0xf] }
 0x8e5   :  { %v19646_v53 = vpop.permute.xlu1 %5278 }
 0x8e6   :  { %v4516_v56 = vpop.permute.xlu0 %4515 }
 0x8e9   :  { %v19648_v58 = vpop.permute.xlu1 %5270 }
 0x8ea   :  { %v19650_v59 = vpop.permute.xlu0 %5098 }
 0x8ed   :  { %v19652_v52 = vpop.permute.xlu1 %4883 }
 0x8ee   :  { %v19654_v60 = vpop.permute.xlu0 %5274 }
 0x8f1   :  { %v4876_v61 = vpop.permute.xlu1 %4875 }
 0x8f2   :  { %v19656_v62 = vpop.permute.xlu0 %5493 }
 0x8f5   :  { %v19658_v63 = vpop.permute.xlu1 %5272 }
 0x8f6   :  { %v4508_v1 = vpop.permute.xlu0 %4507 }
 0x8f9   :  { %v19660_v46 = vpop.permute.xlu1 %5700 }
 0x8fa   :  { %v5091_v42 = vpop.permute.xlu0 %5090 }
 0x8fd   :  { %v4512_v6 = vpop.permute.xlu1 %4511 }
 0x8fe   :  { %v19662_v7 = vpop.permute.xlu0 %5485 }
 0x901   :  { %v19664_v57 = vpop.permute.xlu1 %5094 }
 0x902   :  { %v4880_v12 = vpop.permute.xlu0 %4879 }
 0x905   :  { %v19669_v20 = vpop.permute.xlu1 %5489 }
 0x906   :  { %v19671_v23 = vpop.permute.xlu0 %5276 }
 0x909   :  { %v4878_v9 = vpop.permute.xlu1 %4877 }
 0x90a   :  { %v19675_v30 = vpop.permute.xlu0 %5704 }
 0x90d   :  { %v19678_v22 = vpop.permute.xlu1 %5702 }
 0x90e   :  { %v4510_v32 = vpop.permute.xlu0 %4509 }
 0x90f   :  { %v4517_v33 = vsel %vm21258_vm8, %v4508_v1, %v4510_v32  ;;  %v4518_v27 = vsel %vm21259_vm11, %v4510_v32, %v4512_v6  ;;  %vm21262_vm8 = vcmask 1031168  }
 0x910   :  { %16776 = vmatprep.subr.msk.mxu0 %vm501_vm2, %v4518_v27  ;;  %v4886_v8 = vsel %vm21262_vm8, %v4878_v9, %v4880_v12  ;;  %vm21263_vm11 = vmmov %vm21262_vm8 }
 0x911   :  { %v4514_v40 = vpop.permute.xlu1 %4513  ;;  %16777 = vmatpush1.msk.msra.mxu0 %vm501_vm2, %v4517_v33  ;;  %v4885_v21 = vsel %vm21263_vm11, %v4876_v61, %v4878_v9  ;;  %vm21266_vm11 = vmmov %vm21262_vm8 }
 0x912   :  { %v4519_v45 = vsel %vm21260_vm10, %v4512_v6, %v4514_v40  ;;  %16778 = vmatmul.mubr.msk.f32.vlgmr.msra.gmra.mxu0 %vm595_vm9, %v4501_v35  ;;  %v4520_v0 = vsel %vm21261_vm12, %v4514_v40, %v4516_v56  ;;  %v5093_v37 = vpop.permute.xlu0 %5092  ;;  %16782 = vmatprep.subr.msk.mxu0 %vm501_vm2, %v4676_v39  ;;  %vm21264_vm10 = vcmask 916480  }
 0x913   :  { %16779 = vmatprep.subr.msk.mxu1 %vm501_vm2, %v4520_v0  ;;  %16783 = vmatpush1.msk.msra.mxu0 %vm501_vm2, %v4462_v10  ;;  %v5101_v29 = vsel %vm21264_vm10, %v5093_v37, %v19664_v57  ;;  %vm21265_vm12 = vmmov %vm21264_vm10  ;;  %vm21267_vm10 = vcmask 908288  }
 0x914   :  { %16780 = vmatpush1.msk.msra.mxu1 %vm501_vm2, %v4519_v45  ;;  %16789 = vmatprep.subr.msk.mxu0 %vm501_vm2, %v4886_v8  ;;  %v5100_v44 = vsel %vm21265_vm12, %v5091_v42, %v5093_v37  ;;  %v5281_v34 = vsel %vm21267_vm10, %v19658_v63, %v19654_v60 }
 0x915   :  { %16781 = vmatmul.mubr.msk.f32.vlgmr.msra.gmra.mxu1 %vm595_vm9, %v4501_v35  ;;  %16785 = vmatprep.subr.msk.mxu1 %vm501_vm2, %v4677_v14  ;;  %v19696_v43 = vpop.permute.xlu1 %5708 }
 0x916   :  { %4753 = vmatprep.mubr.f32.mxu0 %v19363_v41  ;;  %16786 = vmatpush1.msk.msra.mxu1 %vm501_vm2, %v4463_v18  ;;  %v5488_v13 = vpop.permute.xlu0 %5487  ;;  %v6124_v18 = vld [vmem:[#allocation22 + $0x20] sm:$0xf] }
 0x917   :  { %16784 = vmatmul.mubr.msk.f32.vlgmr.msra.gmra.mxu0 %vm595_vm9, %v4464_v47  ;;  %4824 = vmatprep.mubr.f32.mxu1 %v19363_v41 }
 0x918   :  { %16790 = vmatpush1.msk.msra.mxu0 %vm501_vm2, %v4885_v21  ;;  %4964 = vmatprep.mubr.f32.mxu0 %v19363_v41 }
 0x919   :  { %16796 = vmatprep.subr.msk.mxu0 %vm501_vm2, %v5101_v29  ;;  %16787 = vmatmul.mubr.msk.f32.vlgmr.msra.gmra.mxu1 %vm595_vm9, %v4464_v47  ;;  %v19709_v48 = vpop.permute.xlu1 %5919 }
 0x91a   :  { %v4882_v50 = vpop.permute.xlu0 %4881  ;;  %5035 = vmatprep.mubr.f32.mxu1 %v19363_v41 }
 0x91b   :  { %v4887_v51 = vsel %vm21262_vm8, %v4880_v12, %v4882_v50  ;;  %16791 = vmatmul.mubr.msk.f32.vlgmr.msra.gmra.mxu0 %vm595_vm9, %v4869_v36  ;;  %v4888_v38 = vsel %vm21266_vm11, %v4882_v50, %v19652_v52  ;;  %vm21268_vm8 = vmmov %vm21265_vm12 }
 0x91c   :  { %16797 = vmatpush1.msk.msra.mxu0 %vm501_vm2, %v5100_v44  ;;  %16792 = vmatprep.subr.msk.mxu1 %vm501_vm2, %v4888_v38  ;;  %vm21269_vm11 = vmmov %vm21267_vm10  ;;  %vm21270_vm10 = vcmask 900096  }
 0x91d   :  { %16802 = vmatprep.subr.msk.mxu0 %vm501_vm2, %v5281_v34  ;;  %v5097_v56 = vpop.permute.xlu1 %5096  ;;  %16793 = vmatpush1.msk.msra.mxu1 %vm501_vm2, %v4887_v51  ;;  %v5280_v42 = vsel %vm21269_vm11, %v19648_v58, %v19658_v63  ;;  %v5496_v6 = vsel %vm21270_vm10, %v5488_v13, %v19669_v20 }
 0x91e   :  { %v5102_v61 = vsel %vm21265_vm12, %v19664_v57, %v5097_v56  ;;  %5179 = vmatprep.mubr.f32.mxu0 %v19363_v41  ;;  %16794 = vmatmul.mubr.msk.f32.vlgmr.msra.gmra.mxu1 %vm595_vm9, %v4869_v36  ;;  %v5103_v52 = vsel %vm21268_vm8, %v5097_v56, %v19650_v59  ;;  %v5918_v1 = vpop.permute.xlu0 %5917  ;;  %vm21271_vm12 = vmmov %vm21269_vm11  ;;  %v5264_v57 = vld [vmem:[#allocation22 + $0x10] sm:$0xf] }
 0x91f   :  { %16799 = vmatprep.subr.msk.mxu1 %vm501_vm2, %v5103_v52  ;;  %16798 = vmatmul.mubr.msk.f32.vlgmr.msra.gmra.mxu0 %vm595_vm9, %v5084_v49  ;;  %v5283_v59 = vsel %vm21271_vm12, %v19671_v23, %v19646_v53  ;;  %vm21272_vm8 = vmmov %vm21269_vm11 }
 0x920   :  { %16803 = vmatpush1.msk.msra.mxu0 %vm501_vm2, %v5280_v42  ;;  %16800 = vmatpush1.msk.msra.mxu1 %vm501_vm2, %v5102_v61  ;;  %v5282_v63 = vsel %vm21272_vm8, %v19654_v60, %v19671_v23  ;;  %vm21273_vm11 = vmmov %vm21270_vm10  ;;  %vm21274_vm10 = vcmask 785408   ;;  %v5479_v60 = vld [vmem:[#allocation22 + $0x14] sm:$0xf] }
 0x921   :  { %16809 = vmatprep.subr.msk.mxu0 %vm501_vm2, %v5496_v6  ;;  %v6133_v12 = vpop.permute.xlu1 %6132  ;;  %16805 = vmatprep.subr.msk.mxu1 %vm501_vm2, %v5283_v59  ;;  %v5495_v17 = vsel %vm21273_vm11, %v19662_v7, %v5488_v13  ;;  %v5711_v53 = vsel %vm21274_vm10, %v19678_v22, %v19675_v30  ;;  %vm21275_vm12 = vmmov %vm21273_vm11 }
 0x922   :  { %5250 = vmatprep.mubr.f32.mxu1 %v19363_v41  ;;  %5359 = vmatprep.mubr.f32.mxu0 %v19363_v41  ;;  %v5916_v58 = vpop.permute.xlu0 %5915  ;;  %vm21276_vm8 = vmmov %vm21273_vm11 }
 0x923   :  { %16801 = vmatmul.mubr.msk.f32.vlgmr.msra.gmra.mxu1 %vm595_vm9, %v5084_v49  ;;  %16804 = vmatmul.mubr.msk.f32.vlgmr.msra.gmra.mxu0 %vm595_vm9, %v5264_v57  ;;  %vm21277_vm11 = vmmov %vm21274_vm10  ;;  %vm21278_vm10 = vcmask 777216  }
 0x924   :  { %16806 = vmatpush1.msk.msra.mxu1 %vm501_vm2, %v5282_v63  ;;  %16810 = vmatpush1.msk.msra.mxu0 %vm501_vm2, %v5495_v17  ;;  %v5710_v24 = vsel %vm21277_vm11, %v19660_v46, %v19678_v22  ;;  %v5909_v22 = vld [vmem:[#allocation22 + $0x1c] sm:$0xf] }
 0x925   :  { %16816 = vmatprep.subr.msk.mxu0 %vm501_vm2, %v5711_v53  ;;  %v5492_v19 = vpop.permute.xlu1 %5491  ;;  %5430 = vmatprep.mubr.f32.mxu1 %v19363_v41 }
 0x926   :  { %v5497_v7 = vsel %vm21275_vm12, %v19669_v20, %v5492_v19  ;;  %5574 = vmatprep.mubr.f32.mxu0 %v19363_v41  ;;  %v5498_v11 = vsel %vm21276_vm8, %v5492_v19, %v19656_v62  ;;  %v5924_v23 = vpop.permute.xlu0 %5923  ;;  %v5926_v20 = vsel %vm21278_vm10, %v5918_v1, %v19709_v48  ;;  %v5694_v62 = vld [vmem:[#allocation22 + $0x18] sm:$0xf]  ;;  %vm21279_vm12 = vmmov %vm21277_vm11 }
 0x927   :  { %16807 = vmatmul.mubr.msk.f32.vlgmr.msra.gmra.mxu1 %vm595_vm9, %v5264_v57  ;;  %16812 = vmatprep.subr.msk.mxu1 %vm501_vm2, %v5498_v11  ;;  %vm21280_vm8 = vmmov %vm21277_vm11 }
 0x928   :  { %16811 = vmatmul.mubr.msk.f32.vlgmr.msra.gmra.mxu0 %vm595_vm9, %v5479_v60  ;;  %16813 = vmatpush1.msk.msra.mxu1 %vm501_vm2, %v5497_v7  ;;  %vm21281_vm11 = vmmov %vm21278_vm10 }
 0x929   :  { %16817 = vmatpush1.msk.msra.mxu0 %vm501_vm2, %v5710_v24  ;;  %v6131_v15 = vpop.permute.xlu1 %6130  ;;  %5645 = vmatprep.mubr.f32.mxu1 %v19363_v41  ;;  %v5925_v31 = vsel %vm21281_vm11, %v5916_v58, %v5918_v1 }
 0x92a   :  { %16823 = vmatprep.subr.msk.mxu0 %vm501_vm2, %v5926_v20  ;;  %5789 = vmatprep.mubr.f32.mxu0 %v19363_v41  ;;  %v5707_v26 = vpop.permute.xlu0 %5706 }
 0x92b   :  { %16814 = vmatmul.mubr.msk.f32.vlgmr.msra.gmra.mxu1 %vm595_vm9, %v5479_v60  ;;  %v5712_v46 = vsel %vm21279_vm12, %v19675_v30, %v5707_v26  ;;  %v5713_v9 = vsel %vm21280_vm8, %v5707_v26, %v19696_v43  ;;  %vm21282_vm12 = vmmov %vm21278_vm10  ;;  %vm21283_vm8 = vcmask 769024  }
 0x92c   :  { %16818 = vmatmul.mubr.msk.f32.vlgmr.msra.gmra.mxu0 %vm595_vm9, %v5694_v62  ;;  %16819 = vmatprep.subr.msk.mxu1 %vm501_vm2, %v5713_v9  ;;  %vm21284_vm11 = vmmov %vm21283_vm8 }
 0x92d   :  { %16824 = vmatpush1.msk.msra.mxu0 %vm501_vm2, %v5925_v31  ;;  %v5922_v10 = vpop.permute.xlu1 %5921  ;;  %16820 = vmatpush1.msk.msra.mxu1 %vm501_vm2, %v5712_v46  ;;  %v6140_v35 = vsel %vm21284_vm11, %v6131_v15, %v6133_v12 }
 0x92e   :  { %v5927_v32 = vsel %vm21278_vm10, %v19709_v48, %v5922_v10  ;;  %5860 = vmatprep.mubr.f32.mxu1 %v19363_v41  ;;  %6004 = vmatprep.mubr.f32.mxu0 %v19363_v41  ;;  %v5928_v30 = vsel %vm21282_vm12, %v5922_v10, %v5924_v23  ;;  %v6135_v33 = vpop.permute.xlu0 %6134  ;;  %vm21285_vm10 = vmmov %vm21283_vm8 }
 0x92f   :  { %16821 = vmatmul.mubr.msk.f32.vlgmr.msra.gmra.mxu1 %vm595_vm9, %v5694_v62  ;;  %16826 = vmatprep.subr.msk.mxu1 %vm501_vm2, %v5928_v30  ;;  %v6141_v27 = vsel %vm21283_vm8, %v6133_v12, %v6135_v33  ;;  %vm21286_vm12 = vmmov %vm21283_vm8 }
 0x930   :  { %16825 = vmatmul.mubr.msk.f32.vlgmr.msra.gmra.mxu0 %vm595_vm9, %v5909_v22  ;;  %16827 = vmatpush1.msk.msra.mxu1 %vm501_vm2, %v5927_v32 }
 0x931   :  { %16830 = vmatprep.subr.msk.mxu0 %vm501_vm2, %v6141_v27  ;;  %6075 = vmatprep.mubr.f32.mxu1 %v19363_v41  ;;  %v6139_v39 = vpop.permute.xlu1 %6138 }
 0x932   :  { %16831 = vmatpush1.msk.msra.mxu0 %vm501_vm2, %v6140_v35  ;;  %6219 = vmatprep.mubr.f32.mxu0 %v19363_v41  ;;  %v6137_v40 = vpop.permute.xlu0 %6136 }
 0x933   :  { %16828 = vmatmul.mubr.msk.f32.vlgmr.msra.gmra.mxu1 %vm595_vm9, %v5909_v22  ;;  %v6142_v45 = vsel %vm21285_vm10, %v6135_v33, %v6137_v40  ;;  %v6143_v0 = vsel %vm21286_vm12, %v6137_v40, %v6139_v39 }
 0x934   :  { %16832 = vmatmul.mubr.msk.f32.vlgmr.msra.gmra.mxu0 %vm595_vm9, %v6124_v18  ;;  %16833 = vmatprep.subr.msk.mxu1 %vm501_vm2, %v6143_v0 }
 0x935   :  { %16834 = vmatpush1.msk.msra.mxu1 %vm501_vm2, %v6142_v45  ;;  %6290 = vmatprep.mubr.f32.mxu1 %v19363_v41 }
 0x936   :  { %6544 = vmatprep.mubr.f32.mxu0 %v19363_v41 }
 0x937   :  { %16835 = vmatmul.mubr.msk.f32.vlgmr.msra.gmra.mxu1 %vm595_vm9, %v6124_v18 }
 0x938   :  { %6615 = vmatprep.mubr.f32.mxu1 %v19363_v41 }
 0x9d2   :  { %v4598_v37 = vpop.f32.mrf.mxu0 }
 0x9d4   :  { %v4600_v14 = vpop.f32.mrf.mxu0 }
 0x9d5   :  { %v4669_v8 = vpop.f32.mrf.mxu1 }
 0x9d7   :  { %v4671_v47 = vpop.f32.mrf.mxu1  ;;  %v4755_v43 = vpop.f32.mrf.mxu0 }
 0x9d8   :  { %v4756_v52 = vadd.f32 %v4755_v43, %v4598_v37 }
 0x9d9   :  { %v4757_v13 = vpop.f32.mrf.mxu0  ;;  %v4826_v21 = vpop.f32.mrf.mxu1 }
 0x9da   :  { %v4758_v6 = vadd.f32 %v4757_v13, %v4600_v14  ;;  %v4827_v12 = vadd.f32 %v4826_v21, %v4669_v8 }
 0x9db   :  { %v4966_v29 = vpop.f32.mrf.mxu0  ;;  %v4828_v36 = vpop.f32.mrf.mxu1 }
 0x9dc   :  { %v5042_v59 = vadd.f32 %v4966_v29, %v4756_v52  ;;  %v4829_v19 = vadd.f32 %v4828_v36, %v4671_v47 }
 0x9dd   :  { %v4968_v48 = vpop.f32.mrf.mxu0 }
 0x9de   :  { %v5037_v50 = vpop.f32.mrf.mxu1  ;;  %v5043_v63 = vadd.f32 %v4968_v48, %v4758_v6 }
 0x9df   :  { %v5181_v44 = vpop.f32.mrf.mxu0  ;;  %v5044_v60 = vadd.f32 %v5037_v50, %v4827_v12 }
 0x9e0   :  { %v5039_v51 = vpop.f32.mrf.mxu1  ;;  %v5257_v17 = vadd.f32 %v5181_v44, %v5042_v59 }
 0x9e1   :  { %v5183_v38 = vpop.f32.mrf.mxu0  ;;  %v5045_v20 = vadd.f32 %v5039_v51, %v4829_v19 }
 0x9e2   :  { %v5258_v11 = vadd.f32 %v5183_v38, %v5043_v63 }
 0x9e3   :  { %v5252_v34 = vpop.f32.mrf.mxu1  ;;  %v5361_v49 = vpop.f32.mrf.mxu0 }
 0x9e4   :  { %v5437_v23 = vadd.f32 %v5361_v49, %v5257_v17  ;;  %v5259_v15 = vadd.f32 %v5252_v34, %v5044_v60 }
 0x9e5   :  { %v5254_v56 = vpop.f32.mrf.mxu1  ;;  %v5363_v61 = vpop.f32.mrf.mxu0 }
 0x9e6   :  { %v5438_v26 = vadd.f32 %v5363_v61, %v5258_v11  ;;  %v5260_v31 = vadd.f32 %v5254_v56, %v5045_v20 }
 0x9e7   :  { %v5432_v1 = vpop.f32.mrf.mxu1 }
 0x9e8   :  { %v5576_v42 = vpop.f32.mrf.mxu0  ;;  %v5439_v10 = vadd.f32 %v5432_v1, %v5259_v15 }
 0x9e9   :  { %v5434_v57 = vpop.f32.mrf.mxu1  ;;  %v5652_v46 = vadd.f32 %v5576_v42, %v5437_v23 }
 0x9ea   :  { %v5578_v58 = vpop.f32.mrf.mxu0  ;;  %v5440_v27 = vadd.f32 %v5434_v57, %v5260_v31 }
 0x9eb   :  { %v5647_v53 = vpop.f32.mrf.mxu1  ;;  %v5653_v32 = vadd.f32 %v5578_v58, %v5438_v26 }
 0x9ec   :  { %v5791_v7 = vpop.f32.mrf.mxu0  ;;  %v5654_v35 = vadd.f32 %v5647_v53, %v5439_v10 }
 0x9ed   :  { %v5649_v24 = vpop.f32.mrf.mxu1  ;;  %v5867_v30 = vadd.f32 %v5791_v7, %v5652_v46 }
 0x9ee   :  { %v5793_v62 = vpop.f32.mrf.mxu0  ;;  %v5655_v0 = vadd.f32 %v5649_v24, %v5440_v27 }
 0x9ef   :  { %v5862_v9 = vpop.f32.mrf.mxu1  ;;  %v5868_v39 = vadd.f32 %v5793_v62, %v5653_v32 }
 0x9f0   :  { %v6006_v22 = vpop.f32.mrf.mxu0  ;;  %v5869_v37 = vadd.f32 %v5862_v9, %v5654_v35  ;;  %v6328_v9 = vld [vmem:[#allocation24] sm:$0xf] }
 0x9f1   :  { %v5864_v33 = vpop.f32.mrf.mxu1  ;;  %v6082_v40 = vadd.f32 %v6006_v22, %v5867_v30  ;;  %v6332_v22 = vld [vmem:[#allocation25] sm:$0xf] }
 0x9f2   :  { %v6008_v18 = vpop.f32.mrf.mxu0  ;;  %v5870_v13 = vadd.f32 %v5864_v33, %v5655_v0 }
 0x9f3   :  { %v6077_v45 = vpop.f32.mrf.mxu1  ;;  %v6083_v8 = vadd.f32 %v6008_v18, %v5868_v39 }
 0x9f4   :  { %v6221_v14 = vpop.f32.mrf.mxu0  ;;  %v6084_v21 = vadd.f32 %v6077_v45, %v5869_v37 }
 0x9f5   :  { %v6297_v47 = vadd.f32 %v6221_v14, %v6082_v40  ;;  %v6079_v43 = vpop.f32.mrf.mxu1  ;;  %v16836_v40 = vld [vmem:[%s21235_s19 + $0x1] ss:$8 sm:$0xf] }
 0x9f6   :  { %v6223_v29 = vpop.f32.mrf.mxu0  ;;  %v6085_v44 = vadd.f32 %v6079_v43, %v5870_v13  ;;  %v6427_v43 = vrot.slane %v16836_v40, %v18767_v4  ;;  %v6431_v13 = vrot.slane %v16836_v40, %v18769_v5 }
 0x9f7   :  { %v6311_v36 = vmul.f32 %v6297_v47, %v6297_v47  ;;  %v6298_v48 = vadd.f32 %v6223_v29, %v6083_v8  ;;  %v6292_v50 = vpop.f32.mrf.mxu1  ;;  %v6301_v38 = vsel %vm501_vm2, %v6297_v47, 0.0 }
 0x9f8   :  { %v6299_v51 = vadd.f32 %v6292_v50, %v6084_v21 }
 0x9f9   :  { %v6302_v34 = vsel %vm501_vm2, %v6298_v48, 0.0  ;;  %v6312_v49 = vmul.f32 %v6298_v48, %v6298_v48  ;;  %v6294_v56 = vpop.f32.mrf.mxu1  ;;  %v6315_v6 = vsel %vm501_vm2, %v6311_v36, 0.0 }
 0x9fa   :  { %v6303_v61 = vadd.f32 %v6302_v34, %v6301_v38  ;;  %v6304_v52 = vsel %vm501_vm2, %v6299_v51, 0.0  ;;  %v6313_v1 = vmul.f32 %v6299_v51, %v6299_v51  ;;  %v6300_v42 = vadd.f32 %v6294_v56, %v6085_v44  ;;  %v16849_v38 = vld [vmem:[%s21235_s19 + $0x2] ss:$8 sm:$0xf] }
 0x9fb   :  { %v6316_v59 = vsel %vm501_vm2, %v6312_v49, 0.0  ;;  %v6419_v44 = vrot.slane %v16836_v40, %v18763_v2 }
 0x9fc   :  { %v6314_v57 = vmul.f32 %v6300_v42, %v6300_v42  ;;  %v6305_v12 = vadd.f32 %v6304_v52, %v6303_v61  ;;  %v6306_v58 = vsel %vm501_vm2, %v6300_v42, 0.0  ;;  %v6317_v63 = vadd.f32 %v6316_v59, %v6315_v6 }
 0x9fd   :  { %v6318_v17 = vsel %vm501_vm2, %v6313_v1, 0.0  ;;  %v6433_v52 = vcombine.low %v6427_v43, %v6431_v13  ;;  %v6795_v1 = vrot.slane %v16849_v38, %v18767_v4  ;;  %v6787_v59 = vrot.slane %v16849_v38, %v18763_v2 }
 0x9fe   :  { %v6307_v53 = vadd.f32 %v6306_v58, %v6305_v12  ;;  %v6319_v19 = vadd.f32 %v6318_v17, %v6317_v63  ;;  %v6320_v60 = vsel %vm501_vm2, %v6314_v57, 0.0  ;;  %v6791_v57 = vrot.slane %v16849_v38, %v18765_v3  ;;  %v16856_v12 = vld [vmem:[%s21235_s19 + $0x3] ss:$8 sm:$0xf] }
 0x9ff   :  { %v7010_v63 = vrot.slane %v16856_v12, %v18767_v4  ;;  %v7014_v17 = vrot.slane %v16856_v12, %v18769_v5 }
 0xa00   :  { %6308 = vadd.xlane.f32.xlu0 %v6307_v53  ;;  %v6321_v7 = vadd.f32 %v6320_v60, %v6319_v19  ;;  %v6800_v53 = vcombine.low %v6787_v59, %v6791_v57  ;;  %v7002_v19 = vrot.slane %v16856_v12, %v18763_v2  ;;  %v7006_v60 = vrot.slane %v16856_v12, %v18765_v3 }
 0xa02   :  { %6322 = vadd.xlane.f32.xlu1 %v6321_v7  ;;  %v16869_v7 = vld [vmem:[%s21235_s19 + $0x5] ss:$8 sm:$0xf] }
 0xa89   :  { %v6309_v11 = vpop.xlane.xlu0 %6308 }
 0xa8a   :  { %v6310_v23 = vmul.f32 0.001953125, %v6309_v11  ;;  %v7016_v11 = vcombine.low %v7010_v63, %v7014_v17 }
 0xa8b   :  { %v6323_v24 = vpop.xlane.xlu1 %6322 }
 0xa8c   :  { %v6325_v20 = vmul.f32 %v6310_v23, %v6310_v23  ;;  %v6324_v15 = vmul.f32 0.001953125, %v6323_v24  ;;  %v7409_v24 = vrot.slane %v16869_v7, %v18769_v5 }
 0xa8e   :  { %v6326_v62 = vsub.f32 %v6324_v15, %v6325_v20  ;;  %v7015_v20 = vcombine.low %v7002_v19, %v7006_v60  ;;  %v7397_v15 = vrot.slane %v16869_v7, %v18763_v2 }
 0xa90   :  { %v6327_v26 = vmax.f32 %v6326_v62, 0.0  ;;  %v7401_v62 = vrot.slane %v16869_v7, %v18765_v3 }
 0xa92   :  { %v6329_v46 = vadd.f32 1e-05, %v6327_v26  ;;  %v16876_v26 = vld [vmem:[%s21235_s19 + $0x6] ss:$8 sm:$0xf] }
 0xa94   :  { %17818 = vrsqrt.f32 %v6329_v46 }
 0xaa1   :  { %v17819_v31 = vpop.eup %17818 }
 0xaa2   :  { %v6331_v10 = vmul.f32 %v17819_v31, %v6328_v9  ;;  %v7620_v9 = vrot.slane %v16876_v26, %v18767_v4  ;;  %v7624_v31 = vrot.slane %v16876_v26, %v18769_v5 }
 0xaa4   :  { %6337 = vperm.xlu0 %17803, %v6331_v10   ;;  %v6333_v32 = vmul.f32 %v6331_v10, %v6310_v23  ;;  %v7405_v23 = vrot.slane %v16869_v7, %v18767_v4  ;;  %v7410_v10 = vcombine.low %v7397_v15, %v7401_v62 }
 0xaa6   :  { %v6334_v30 = vsub.f32 %v6332_v22, %v6333_v32  ;;  %v7411_v46 = vcombine.low %v7405_v23, %v7409_v24  ;;  %v7612_v22 = vrot.slane %v16876_v26, %v18763_v2  ;;  %v7616_v32 = vrot.slane %v16876_v26, %v18765_v3 }
 0xaa8   :  { %6346 = vperm.xlu1 %17804, %v6334_v30   ;;  %v16883_v30 = vld [vmem:[%s21235_s19 + $0x7] ss:$8 sm:$0xf] }
 0xb1f   :  { %v6338_v33 = vpop.permute.xlu0 %6337 }
 0xb20   :  { %v6340_v27 = vmul.f32 %v6338_v33, %v6297_v47  ;;  %v6341_v35 = vmul.f32 %v6338_v33, %v6298_v48  ;;  %v6342_v18 = vmul.f32 %v6338_v33, %v6299_v51  ;;  %v6343_v39 = vmul.f32 %v6338_v33, %v6300_v42 }
 0xb21   :  { %v6423_v51 = vrot.slane %v16836_v40, %v18765_v3  ;;  %v6799_v42 = vrot.slane %v16849_v38, %v18769_v5  ;;  %v7626_v33 = vcombine.low %v7620_v9, %v7624_v31  ;;  %v7831_v40 = vrot.slane %v16883_v30, %v18765_v3 }
 0xb23   :  { %v6347_v45 = vpop.permute.xlu1 %6346  ;;  %v6432_v6 = vcombine.low %v6419_v44, %v6423_v51  ;;  %v6801_v58 = vcombine.low %v6795_v1, %v6799_v42 }
 0xb24   :  { %v6349_v0 = vadd.f32 %v6347_v45, %v6340_v27  ;;  %v6350_v37 = vadd.f32 %v6347_v45, %v6341_v35  ;;  %v6351_v14 = vadd.f32 %v6347_v45, %v6342_v18  ;;  %v6352_v8 = vadd.f32 %v6347_v45, %v6343_v39  ;;  %v16890_v45 = vld [vmem:[%s21235_s19 + $0x20] ss:$8 sm:$0xf] }
 0xb25   :  { %v7835_v27 = vrot.slane %v16883_v30, %v18767_v4  ;;  %v7839_v35 = vrot.slane %v16883_v30, %v18769_v5  ;;  %v7625_v18 = vcombine.low %v7612_v22, %v7616_v32  ;;  %v7827_v39 = vrot.slane %v16883_v30, %v18763_v2 }
 0xb26   :  { %vm6355_vm8 = vcmp.gt.f32.partialorder %v6351_v14, 0.0  ;;  %vm6356_vm11 = vcmp.gt.f32.partialorder %v6352_v8, 0.0  ;;  %v6359_v21 = vmul.f32 0.2, %v6351_v14  ;;  %v6360_v29 = vmul.f32 0.2, %v6352_v8 }
 0xb27   :  { %vm6353_vm10 = vcmp.gt.f32.partialorder %v6349_v0, 0.0  ;;  %vm6354_vm12 = vcmp.gt.f32.partialorder %v6350_v37, 0.0  ;;  %v6357_v47 = vmul.f32 0.2, %v6349_v0  ;;  %v6358_v36 = vmul.f32 0.2, %v6350_v37 }
 0xb28   :  { %v6363_v48 = vsel %vm6355_vm8, %v6351_v14, %v6359_v21  ;;  %v6364_v50 = vsel %vm6356_vm11, %v6352_v8, %v6360_v29  ;;  %v8054_v14 = vrot.slane %v16890_v45, %v18769_v5  ;;  %v7840_v8 = vcombine.low %v7827_v39, %v7831_v40 }
 0xb29   :  { %v6370_v34 = vcombine.low %v6363_v48, %v6364_v50  ;;  %v6361_v49 = vsel %vm6353_vm10, %v6349_v0, %v6357_v47  ;;  %v6362_v56 = vsel %vm6354_vm12, %v6350_v37, %v6358_v36  ;;  %v7841_v0 = vcombine.low %v7835_v27, %v7839_v35 }
 0xb2a   :  { %v6369_v61 = vcombine.low %v6361_v49, %v6362_v56  ;;  %v8050_v37 = vrot.slane %v16890_v45, %v18767_v4  ;;  %v8042_v43 = vrot.slane %v16890_v45, %v18763_v2  ;;  %v8046_v13 = vrot.slane %v16890_v45, %v18765_v3 }
 0xb2b   :  { %6373 = vrot.lane.b32.xlu1 %v6370_v34, %s18474_s29  ;;  %vm21287_vm8 = vcmask 1039360  }
 0xb2c   :  { %6371 = vrot.lane.b32.xlu0 %v6369_v61, %s18474_s29  ;;  %v8056_v21 = vcombine.low %v8050_v37, %v8054_v14  ;;  %v8055_v29 = vcombine.low %v8042_v43, %v8046_v13  ;;  %vm21288_vm11 = vmmov %vm21287_vm8 }
 0xb2d   :  { %vm21289_vm10 = vmmov %vm21287_vm8 }
 0xb2e   :  { %vm21290_vm12 = vmmov %vm21287_vm8 }
 0xb2f   :  { %6436 = vrot.lane.b32.xlu1 %v6433_v52, %s18458_s6 }
 0xb30   :  { %6434 = vrot.lane.b32.xlu0 %v6432_v6, %s18458_s6 }
 0xb33   :  { %6804 = vrot.lane.b32.xlu1 %v6801_v58, %s18457_s0 }
 0xb34   :  { %6802 = vrot.lane.b32.xlu0 %v6800_v53, %s18457_s0 }
 0xb37   :  { %7019 = vrot.lane.b32.xlu1 %v7016_v11, %s18459_s24 }
 0xb38   :  { %7017 = vrot.lane.b32.xlu0 %v7015_v20, %s18459_s24 }
 0xb3b   :  { %7414 = vrot.lane.b32.xlu1 %v7411_v46, %s18460_s28 }
 0xb3c   :  { %7412 = vrot.lane.b32.xlu0 %v7410_v10, %s18460_s28 }
 0xb3f   :  { %7629 = vrot.lane.b32.xlu1 %v7626_v33, %s18461_s2 }
 0xb40   :  { %7627 = vrot.lane.b32.xlu0 %v7625_v18, %s18461_s2 }
 0xb43   :  { %7844 = vrot.lane.b32.xlu1 %v7841_v0, %s18462_s30 }
 0xb44   :  { %7842 = vrot.lane.b32.xlu0 %v7840_v8, %s18462_s30 }
 0xb47   :  { %8059 = vrot.lane.b32.xlu1 %v8056_v21, %s18463_s13 }
 0xb48   :  { %8057 = vrot.lane.b32.xlu0 %v8055_v29, %s18463_s13 }
 0xb9d   :  { %v6374_v47 = vpop.permute.xlu1 %6373 }
 0xb9e   :  { %v6376_v36 = vrot.slane %v6374_v47, 4  ;;  %v6372_v48 = vpop.permute.xlu0 %6371 }
 0xb9f   :  { %v6375_v50 = vrot.slane %v6372_v48, 4 }
 0xba0   :  { %6385 = vst.msk [vmem:[#allocation3 + $0x10] sm:$0xf] %vm2480_vm15, %v6376_v36 }
 0xba1   :  { %v6377_v44 = vsel %vm2468_vm13, %v6375_v50, %v6372_v48  ;;  %v6378_v51 = vsel %vm501_vm2, %v6375_v50, %v6376_v36  ;;  %v6437_v38 = vpop.permute.xlu1 %6436 }
 0xba2   :  { %v19876_v34 = vsel %vm2468_vm13, %v6378_v51, %v6374_v47  ;;  %6383 = vst.msk [vmem:[#allocation3] sm:$0xff] %vm19214_vm14, %v6377_v44  ;;  %v6435_v49 = vpop.permute.xlu0 %6434  ;;  %v6439_v61 = vrot.slane %v6437_v38, 4 }
 0xba3   :  { %v6438_v62 = vrot.slane %v6435_v49, 4 }
 0xba5   :  { %v6805_v56 = vpop.permute.xlu1 %6804  ;;  %v6440_v10 = vsel %vm564_vm1, %v6438_v62, %v6435_v49  ;;  %v6441_v27 = vsel %vm501_vm2, %v6438_v62, %v6439_v61  ;;  %v7217_v49 = vcombine.high %v19876_v34, %v19876_v34 }
 0xba6   :  { %v6803_v52 = vpop.permute.xlu0 %6802  ;;  %v6807_v58 = vrot.slane %v6805_v56, 4  ;;  %v6442_v45 = vsel %vm564_vm1, %v6441_v27, %v6437_v38 }
 0xba7   :  { %v6413_v1 = vld [vmem:[#allocation3 + $0x10] sm:$0xf]  ;;  %v6806_v19 = vrot.slane %v6803_v52, 4  ;;  %v6447_v43 = vmul.f32 %v6442_v45, %v19876_v34 }
 0xba8   :  { %v6448_v42 = vmul.f32 %v6439_v61, %v6413_v1  ;;  %v7211_v6 = vld [vmem:[#allocation3 + $0x10] sm:$0xf] }
 0xba9   :  { %7226 = vrot.lane.b32.xlu1 %v7211_v6, %s18464_s12  ;;  %v7020_v59 = vpop.permute.xlu1 %7019  ;;  %v6996_v63 = vld [vmem:[#allocation3 + $0x10] sm:$0xf]  ;;  %v19882_v17 = vld [vmem:[#allocation3] sm:$0xff]  ;;  %v6808_v24 = vsel %vm936_vm0, %v6806_v19, %v6803_v52  ;;  %v6809_v14 = vsel %vm501_vm2, %v6806_v19, %v6807_v58 }
 0xbaa   :  { %v7022_v57 = vrot.slane %v7020_v59, 4  ;;  %v7018_v12 = vpop.permute.xlu0 %7017  ;;  %6463 = vrot.lane.b32.xlu0 %v6448_v42, %s18465_s21  ;;  %v6781_v53 = vld [vmem:[#allocation3 + $0x10] sm:$0xf]  ;;  %v6814_v26 = vmul.f32 %v6808_v24, %v19882_v17  ;;  %v7216_v32 = vcombine.high %v19882_v17, %v19882_v17  ;;  %v6446_v30 = vmul.f32 %v6440_v10, %v19882_v17 }
 0xbab   :  { %v6816_v23 = vmul.f32 %v6807_v58, %v6781_v53  ;;  %v7391_v46 = vld [vmem:[#allocation3 + $0x10] sm:$0xf]  ;;  %v7021_v22 = vrot.slane %v7018_v12, 4  ;;  %v6810_v47 = vsel %vm936_vm0, %v6809_v14, %v6805_v56  ;;  %v6454_v58 = vcombine.high %v6447_v43, %v6447_v43 }
 0xbac   :  { %v7031_v60 = vmul.f32 %v7022_v57, %v6996_v63  ;;  %v6815_v50 = vmul.f32 %v6810_v47, %v19876_v34  ;;  %v6821_v61 = vcombine.high %v6814_v26, %v6814_v26 }
 0xbad   :  { %7218 = vrot.lane.b32.xlu1 %v19882_v17, %s18464_s12  ;;  %v7415_v7 = vpop.permute.xlu1 %7414  ;;  %v7023_v35 = vsel %vm1154_vm4, %v7021_v22, %v7018_v12  ;;  %v7024_v0 = vsel %vm501_vm2, %v7021_v22, %v7022_v57 }
 0xbae   :  { %v7413_v11 = vpop.permute.xlu0 %7412  ;;  %7046 = vrot.lane.b32.xlu0 %v7031_v60, %s18467_s10  ;;  %v7417_v20 = vrot.slane %v7415_v7, 4  ;;  %v7029_v40 = vmul.f32 %v7023_v35, %v19882_v17  ;;  %v7025_v21 = vsel %vm1154_vm4, %v7024_v0, %v7020_v59  ;;  %v6453_v59 = vcombine.high %v6446_v30, %v6446_v30  ;;  %v7606_v60 = vld [vmem:[#allocation3 + $0x10] sm:$0xf] }
 0xbaf   :  { %v7416_v18 = vrot.slane %v7413_v11, 4  ;;  %v7030_v48 = vmul.f32 %v7025_v21, %v19876_v34 }
 0xbb0   :  { %v7426_v9 = vmul.f32 %v7417_v20, %v7391_v46  ;;  %v7036_v63 = vcombine.high %v7029_v40, %v7029_v40  ;;  %v6822_v46 = vcombine.high %v6815_v50, %v6815_v50 }
 0xbb1   :  { %6831 = vrot.lane.b32.xlu1 %v6816_v23, %s18466_s7  ;;  %v7418_v37 = vsel %vm1550_vm5, %v7416_v18, %v7413_v11  ;;  %v7630_v8 = vpop.permute.xlu1 %7629  ;;  %v7419_v29 = vsel %vm501_vm2, %v7416_v18, %v7417_v20 }
 0xbb2   :  { %v7628_v15 = vpop.permute.xlu0 %7627  ;;  %7222 = vrot.lane.b32.xlu0 %v19876_v34, %s18464_s12  ;;  %v7424_v13 = vmul.f32 %v7418_v37, %v19882_v17  ;;  %v7632_v36 = vrot.slane %v7630_v8, 4  ;;  %v7420_v44 = vsel %vm1550_vm5, %v7419_v29, %v7415_v7  ;;  %v8036_v37 = vld [vmem:[#allocation3 + $0x10] sm:$0xf] }
 0xbb3   :  { %v7631_v31 = vrot.slane %v7628_v15, 4  ;;  %v7425_v38 = vmul.f32 %v7420_v44, %v19876_v34 }
 0xbb4   :  { %v7641_v7 = vmul.f32 %v7632_v36, %v7606_v60  ;;  %v7431_v11 = vcombine.high %v7424_v13, %v7424_v13 }
 0xbb5   :  { %6823 = vrot.lane.b32.xlu1 %v6814_v26, %s18466_s7  ;;  %v7633_v33 = vsel %vm21196_vm3, %v7631_v31, %v7628_v15  ;;  %v7634_v51 = vsel %vm501_vm2, %v7631_v31, %v7632_v36  ;;  %v7845_v1 = vpop.permute.xlu1 %7844  ;;  %v7037_v31 = vcombine.high %v7030_v48, %v7030_v48  ;;  %v7432_v27 = vcombine.high %v7425_v38, %v7425_v38 }
 0xbb6   :  { %7441 = vrot.lane.b32.xlu0 %v7426_v9, %s18468_s11  ;;  %v7639_v39 = vmul.f32 %v7633_v33, %v19882_v17  ;;  %v7635_v56 = vsel %vm21196_vm3, %v7634_v51, %v7630_v8  ;;  %v7843_v42 = vpop.permute.xlu0 %7842  ;;  %v7847_v57 = vrot.slane %v7845_v1, 4  ;;  %v7821_v33 = vld [vmem:[#allocation3 + $0x10] sm:$0xf] }
 0xbb7   :  { %v7640_v52 = vmul.f32 %v7635_v56, %v19876_v34  ;;  %v7846_v12 = vrot.slane %v7843_v42, 4 }
 0xbb8   :  { %v7646_v6 = vcombine.high %v7639_v39, %v7639_v39  ;;  %v7856_v35 = vmul.f32 %v7847_v57, %v7821_v33 }
 0xbb9   :  { %7220 = vrot.lane.b32.xlu1 %v7216_v32, %s18464_s12  ;;  %v7849_v53 = vsel %vm501_vm2, %v7846_v12, %v7847_v57  ;;  %v7848_v20 = vsel %vm1986_vm6, %v7846_v12, %v7843_v42  ;;  %v8060_v22 = vpop.permute.xlu1 %8059  ;;  %v6388_v42 = vld [vmem:[%s21235_s19] ss:$8 sm:$0xf] }
 0xbba   :  { %6455 = vrot.lane.b32.xlu0 %v6446_v30, %s18465_s21  ;;  %v8058_v19 = vpop.permute.xlu0 %8057  ;;  %v7850_v24 = vsel %vm1986_vm6, %v7849_v53, %v7845_v1  ;;  %v7854_v62 = vmul.f32 %v7848_v20, %v19882_v17  ;;  %v8062_v30 = vrot.slane %v8060_v22, 4 }
 0xbbb   :  { %v8061_v23 = vrot.slane %v8058_v19, 4  ;;  %v7855_v15 = vmul.f32 %v7850_v24, %v19876_v34 }
 0xbbc   :  { %v7861_v10 = vcombine.high %v7854_v62, %v7854_v62  ;;  %v8071_v14 = vmul.f32 %v8062_v30, %v8036_v37 }
 0xbbd   :  { %7648 = vrot.lane.b32.xlu1 %v7639_v39, %s18469_s17  ;;  %v8063_v26 = vsel %vm2204_vm7, %v8061_v23, %v8058_v19  ;;  %v8064_v18 = vsel %vm501_vm2, %v8061_v23, %v8062_v30  ;;  %v7647_v39 = vcombine.high %v7640_v52, %v7640_v52  ;;  %v7862_v45 = vcombine.high %v7855_v15, %v7855_v15 }
 0xbbe   :  { %7038 = vrot.lane.b32.xlu0 %v7029_v40, %s18467_s10  ;;  %v8069_v9 = vmul.f32 %v8063_v26, %v19882_v17  ;;  %v8065_v40 = vsel %vm2204_vm7, %v8064_v18, %v8060_v22  ;;  %v6817_v18 = vld [vmem:[#allocation27 + $0x8] sm:$0xf] }
 0xbbf   :  { %v8070_v0 = vmul.f32 %v8065_v40, %v19876_v34 }
 0xbc0   :  { %v8076_v32 = vcombine.high %v8069_v9, %v8069_v9 }
 0xbc1   :  { %6459 = vrot.lane.b32.xlu1 %v6447_v43, %s18465_s21  ;;  %v8077_v8 = vcombine.high %v8070_v0, %v8070_v0 }
 0xbc2   :  { %7433 = vrot.lane.b32.xlu0 %v7424_v13, %s18468_s11 }
 0xbc5   :  { %7042 = vrot.lane.b32.xlu1 %v7030_v48, %s18467_s10 }
 0xbc6   :  { %6827 = vrot.lane.b32.xlu0 %v6815_v50, %s18466_s7 }
 0xbc9   :  { %7437 = vrot.lane.b32.xlu1 %v7425_v38, %s18468_s11 }
 0xbca   :  { %7224 = vrot.lane.b32.xlu0 %v7217_v49, %s18464_s12 }
 0xbcd   :  { %6825 = vrot.lane.b32.xlu1 %v6821_v61, %s18466_s7 }
 0xbce   :  { %7652 = vrot.lane.b32.xlu0 %v7640_v52, %s18469_s17 }
 0xbd1   :  { %7650 = vrot.lane.b32.xlu1 %v7646_v6, %s18469_s17  ;;  %v6393_v6 = vrot.slane %v6388_v42, %v18763_v2 }
 0xbd2   :  { %6457 = vrot.lane.b32.xlu0 %v6453_v59, %s18465_s21  ;;  %v6397_v59 = vrot.slane %v6388_v42, %v18765_v3 }
 0xbd4   :  { %v6406_v53 = vcombine.low %v6393_v6, %v6397_v59  ;;  %v7427_v6 = vld [vmem:[#allocation27 + $0x14] sm:$0xf] }
 0xbd5   :  { %6461 = vrot.lane.b32.xlu1 %v6454_v58, %s18465_s21  ;;  %v6401_v58 = vrot.slane %v6388_v42, %v18767_v4 }
 0xbd6   :  { %7040 = vrot.lane.b32.xlu0 %v7036_v63, %s18467_s10  ;;  %v6405_v63 = vrot.slane %v6388_v42, %v18769_v5 }
 0xbd9   :  { %7656 = vrot.lane.b32.xlu1 %v7641_v7, %s18469_s17  ;;  %v6407_v7 = vcombine.low %v6401_v58, %v6405_v63  ;;  %v7642_v63 = vld [vmem:[#allocation27 + $0x18] sm:$0xf] }
 0xbda   :  { %7435 = vrot.lane.b32.xlu0 %v7431_v11, %s18468_s11  ;;  %v6410_v11 = vmul.f32 %v6406_v53, %v19882_v17 }
 0xbdb   :  { %v6411_v26 = vmul.f32 %v6407_v7, %v19876_v34 }
 0xbdd   :  { %7867 = vrot.lane.b32.xlu1 %v7855_v15, %s18471_s27  ;;  %v6625_v34 = vcombine.high %v6411_v26, %v6411_v26 }
 0xbde   :  { %6829 = vrot.lane.b32.xlu0 %v6822_v46, %s18466_s7  ;;  %v6624_v46 = vcombine.high %v6410_v11, %v6410_v11 }
 0xbe1   :  { %7044 = vrot.lane.b32.xlu1 %v7037_v31, %s18467_s10 }
 0xbe2   :  { %7865 = vrot.lane.b32.xlu0 %v7861_v10, %s18471_s27 }
 0xbe5   :  { %8080 = vrot.lane.b32.xlu1 %v8076_v32, %s18472_s5  ;;  %v6412_v32 = vld [vmem:[#allocation27] sm:$0xf] }
 0xbe6   :  { %7863 = vrot.lane.b32.xlu0 %v7854_v62, %s18471_s27  ;;  %v6449_v62 = vld [vmem:[#allocation27 + $0x4] sm:$0xf] }
 0xbe9   :  { %7439 = vrot.lane.b32.xlu1 %v7432_v27, %s18468_s11 }
 0xbea   :  { %7871 = vrot.lane.b32.xlu0 %v7856_v35, %s18471_s27 }
 0xbed   :  { %8078 = vrot.lane.b32.xlu1 %v8069_v9, %s18472_s5 }
 0xbee   :  { %7654 = vrot.lane.b32.xlu0 %v7647_v39, %s18469_s17 }
 0xbf1   :  { %7869 = vrot.lane.b32.xlu1 %v7862_v45, %s18471_s27 }
 0xbf2   :  { %8082 = vrot.lane.b32.xlu0 %v8070_v0, %s18472_s5 }
 0xbf5   :  { %8086 = vrot.lane.b32.xlu1 %v8071_v14, %s18472_s5 }
 0xbf6   :  { %8084 = vrot.lane.b32.xlu0 %v8077_v8, %s18472_s5  ;;  %v7032_v8 = vld [vmem:[#allocation27 + $0xc] sm:$0xf] }
 0xc1b   :  { %v19963_v43 = vpop.permute.xlu1 %7226 }
 0xc1c   :  { %v6464_v13 = vpop.permute.xlu0 %6463 }
 0xc1f   :  { %v19965_v21 = vpop.permute.xlu1 %7218 }
 0xc20   :  { %v19967_v29 = vpop.permute.xlu0 %7046 }
 0xc23   :  { %v19969_v47 = vpop.permute.xlu1 %6831 }
 0xc24   :  { %v19971_v36 = vpop.permute.xlu0 %7222 }
 0xc27   :  { %v6824_v48 = vpop.permute.xlu1 %6823 }
 0xc28   :  { %v19973_v50 = vpop.permute.xlu0 %7441 }
 0xc2b   :  { %v19975_v44 = vpop.permute.xlu1 %7220 }
 0xc2c   :  { %v6456_v51 = vpop.permute.xlu0 %6455 }
 0xc2f   :  { %v19977_v38 = vpop.permute.xlu1 %7648 }
 0xc30   :  { %v7039_v49 = vpop.permute.xlu0 %7038 }
 0xc33   :  { %v6460_v56 = vpop.permute.xlu1 %6459 }
 0xc34   :  { %v19979_v61 = vpop.permute.xlu0 %7433 }
 0xc37   :  { %v19981_v52 = vpop.permute.xlu1 %7042 }
 0xc38   :  { %v6828_v1 = vpop.permute.xlu0 %6827 }
 0xc3b   :  { %v19986_v57 = vpop.permute.xlu1 %7437 }
 0xc3c   :  { %v19988_v12 = vpop.permute.xlu0 %7224 }
 0xc3f   :  { %v6826_v19 = vpop.permute.xlu1 %6825 }
 0xc40   :  { %v19992_v60 = vpop.permute.xlu0 %7652 }
 0xc43   :  { %v19995_v23 = vpop.permute.xlu1 %7650 }
 0xc44   :  { %v6458_v24 = vpop.permute.xlu0 %6457 }
 0xc45   :  { %v6465_v20 = vsel %vm21287_vm8, %v6456_v51, %v6458_v24  ;;  %v6466_v15 = vsel %vm21288_vm11, %v6458_v24, %v6460_v56  ;;  %vm21291_vm8 = vcmask 1031168  }
 0xc46   :  { %16837 = vmatprep.subr.msk.mxu0 %vm501_vm2, %v6466_v15  ;;  %v6834_v22 = vsel %vm21291_vm8, %v6826_v19, %v6828_v1  ;;  %vm21292_vm11 = vmmov %vm21291_vm8 }
 0xc47   :  { %v6462_v9 = vpop.permute.xlu1 %6461  ;;  %16838 = vmatpush1.msk.msra.mxu0 %vm501_vm2, %v6465_v20  ;;  %v6833_v27 = vsel %vm21292_vm11, %v6824_v48, %v6826_v19  ;;  %vm21295_vm11 = vmmov %vm21291_vm8 }
 0xc48   :  { %v6467_v31 = vsel %vm21289_vm10, %v6460_v56, %v6462_v9  ;;  %16839 = vmatmul.mubr.msk.f32.vlgmr.msra.gmra.mxu0 %vm595_vm9, %v6449_v62  ;;  %v6468_v17 = vsel %vm21290_vm12, %v6462_v9, %v6464_v13  ;;  %16843 = vmatprep.subr.msk.mxu0 %vm501_vm2, %v6624_v46  ;;  %v7041_v10 = vpop.permute.xlu0 %7040  ;;  %vm21293_vm10 = vcmask 916480  }
 0xc49   :  { %16840 = vmatprep.subr.msk.mxu1 %vm501_vm2, %v6468_v17  ;;  %16844 = vmatpush1.msk.msra.mxu0 %vm501_vm2, %v6410_v11  ;;  %v7049_v35 = vsel %vm21293_vm10, %v7041_v10, %v19981_v52  ;;  %vm21294_vm12 = vmmov %vm21293_vm10  ;;  %vm21296_vm10 = vcmask 908288   ;;  %v7857_v11 = vld [vmem:[#allocation27 + $0x1c] sm:$0xf] }
 0xc4a   :  { %16841 = vmatpush1.msk.msra.mxu1 %vm501_vm2, %v6467_v31  ;;  %16850 = vmatprep.subr.msk.mxu0 %vm501_vm2, %v6834_v22  ;;  %v7048_v45 = vsel %vm21294_vm12, %v7039_v49, %v7041_v10  ;;  %v7229_v14 = vsel %vm21296_vm10, %v19975_v44, %v19971_v36 }
 0xc4b   :  { %v20011_v30 = vpop.permute.xlu1 %7656  ;;  %16842 = vmatmul.mubr.msk.f32.vlgmr.msra.gmra.mxu1 %vm595_vm9, %v6449_v62  ;;  %16846 = vmatprep.subr.msk.mxu1 %vm501_vm2, %v6625_v34  ;;  %v8072_v62 = vld [vmem:[#allocation27 + $0x20] sm:$0xf] }
 0xc4c   :  { %6701 = vmatprep.mubr.f32.mxu0 %v19363_v41  ;;  %16847 = vmatpush1.msk.msra.mxu1 %vm501_vm2, %v6411_v26  ;;  %v7436_v33 = vpop.permute.xlu0 %7435 }
 0xc4d   :  { %16845 = vmatmul.mubr.msk.f32.vlgmr.msra.gmra.mxu0 %vm595_vm9, %v6412_v32  ;;  %6772 = vmatprep.mubr.f32.mxu1 %v19363_v41 }
 0xc4e   :  { %16851 = vmatpush1.msk.msra.mxu0 %vm501_vm2, %v6833_v27  ;;  %6912 = vmatprep.mubr.f32.mxu0 %v19363_v41 }
 0xc4f   :  { %16857 = vmatprep.subr.msk.mxu0 %vm501_vm2, %v7049_v35  ;;  %v20025_v39 = vpop.permute.xlu1 %7867  ;;  %16848 = vmatmul.mubr.msk.f32.vlgmr.msra.gmra.mxu1 %vm595_vm9, %v6412_v32 }
 0xc50   :  { %v6830_v40 = vpop.permute.xlu0 %6829  ;;  %6983 = vmatprep.mubr.f32.mxu1 %v19363_v41 }
 0xc51   :  { %16852 = vmatmul.mubr.msk.f32.vlgmr.msra.gmra.mxu0 %vm595_vm9, %v6817_v18  ;;  %v6835_v0 = vsel %vm21291_vm8, %v6828_v1, %v6830_v40  ;;  %v6836_v37 = vsel %vm21295_vm11, %v6830_v40, %v19969_v47  ;;  %vm21297_vm8 = vmmov %vm21294_vm12 }
 0xc52   :  { %16858 = vmatpush1.msk.msra.mxu0 %vm501_vm2, %v7048_v45  ;;  %16853 = vmatprep.subr.msk.mxu1 %vm501_vm2, %v6836_v37  ;;  %vm21298_vm11 = vmmov %vm21296_vm10  ;;  %vm21299_vm10 = vcmask 900096  }
 0xc53   :  { %16863 = vmatprep.subr.msk.mxu0 %vm501_vm2, %v7229_v14  ;;  %v7045_v13 = vpop.permute.xlu1 %7044  ;;  %16854 = vmatpush1.msk.msra.mxu1 %vm501_vm2, %v6835_v0  ;;  %v7228_v49 = vsel %vm21298_vm11, %v19965_v21, %v19975_v44  ;;  %v7444_v56 = vsel %vm21299_vm10, %v7436_v33, %v19986_v57 }
 0xc54   :  { %v7050_v48 = vsel %vm21294_vm12, %v19981_v52, %v7045_v13  ;;  %7127 = vmatprep.mubr.f32.mxu0 %v19363_v41  ;;  %16855 = vmatmul.mubr.msk.f32.vlgmr.msra.gmra.mxu1 %vm595_vm9, %v6817_v18  ;;  %v7051_v47 = vsel %vm21297_vm8, %v7045_v13, %v19967_v29  ;;  %v7866_v51 = vpop.permute.xlu0 %7865  ;;  %vm21300_vm12 = vmmov %vm21298_vm11  ;;  %v7212_v52 = vld [vmem:[#allocation27 + $0x10] sm:$0xf] }
 0xc55   :  { %16859 = vmatmul.mubr.msk.f32.vlgmr.msra.gmra.mxu0 %vm595_vm9, %v7032_v8  ;;  %16860 = vmatprep.subr.msk.mxu1 %vm501_vm2, %v7051_v47  ;;  %v7231_v29 = vsel %vm21300_vm12, %v19988_v12, %v19963_v43  ;;  %vm21301_vm8 = vmmov %vm21298_vm11 }
 0xc56   :  { %16864 = vmatpush1.msk.msra.mxu0 %vm501_vm2, %v7228_v49  ;;  %16861 = vmatpush1.msk.msra.mxu1 %vm501_vm2, %v7050_v48  ;;  %v7230_v44 = vsel %vm21301_vm8, %v19971_v36, %v19988_v12  ;;  %vm21302_vm11 = vmmov %vm21299_vm10  ;;  %vm21303_vm10 = vcmask 785408  }
 0xc57   :  { %16870 = vmatprep.subr.msk.mxu0 %vm501_vm2, %v7444_v56  ;;  %v8081_v1 = vpop.permute.xlu1 %8080  ;;  %16866 = vmatprep.subr.msk.mxu1 %vm501_vm2, %v7231_v29  ;;  %v7443_v42 = vsel %vm21302_vm11, %v19979_v61, %v7436_v33  ;;  %v7659_v43 = vsel %vm21303_vm10, %v19995_v23, %v19992_v60  ;;  %vm21304_vm12 = vmmov %vm21302_vm11 }
 0xc58   :  { %7198 = vmatprep.mubr.f32.mxu1 %v19363_v41  ;;  %7307 = vmatprep.mubr.f32.mxu0 %v19363_v41  ;;  %v7864_v21 = vpop.permute.xlu0 %7863  ;;  %vm21305_vm8 = vmmov %vm21302_vm11 }
 0xc59   :  { %16862 = vmatmul.mubr.msk.f32.vlgmr.msra.gmra.mxu1 %vm595_vm9, %v7032_v8  ;;  %16865 = vmatmul.mubr.msk.f32.vlgmr.msra.gmra.mxu0 %vm595_vm9, %v7212_v52  ;;  %vm21306_vm11 = vmmov %vm21303_vm10  ;;  %vm21307_vm10 = vcmask 777216  }
 0xc5a   :  { %16867 = vmatpush1.msk.msra.mxu1 %vm501_vm2, %v7230_v44  ;;  %16871 = vmatpush1.msk.msra.mxu0 %vm501_vm2, %v7443_v42  ;;  %v7658_v58 = vsel %vm21306_vm11, %v19977_v38, %v19995_v23 }
 0xc5b   :  { %16877 = vmatprep.subr.msk.mxu0 %vm501_vm2, %v7659_v43  ;;  %v7440_v59 = vpop.permute.xlu1 %7439  ;;  %7378 = vmatprep.mubr.f32.mxu1 %v19363_v41 }
 0xc5c   :  { %v7445_v36 = vsel %vm21304_vm12, %v19986_v57, %v7440_v59  ;;  %7522 = vmatprep.mubr.f32.mxu0 %v19363_v41  ;;  %v7446_v61 = vsel %vm21305_vm8, %v7440_v59, %v19973_v50  ;;  %v7872_v12 = vpop.permute.xlu0 %7871  ;;  %v7874_v57 = vsel %vm21307_vm10, %v7866_v51, %v20025_v39  ;;  %vm21308_vm12 = vmmov %vm21307_vm10 }
 0xc5d   :  { %16868 = vmatmul.mubr.msk.f32.vlgmr.msra.gmra.mxu1 %vm595_vm9, %v7212_v52  ;;  %16872 = vmatmul.mubr.msk.f32.vlgmr.msra.gmra.mxu0 %vm595_vm9, %v7427_v6  ;;  %v7873_v53 = vsel %vm21308_vm12, %v7864_v21, %v7866_v51  ;;  %vm21309_vm8 = vmmov %vm21306_vm11 }
 0xc5e   :  { %16873 = vmatprep.subr.msk.mxu1 %vm501_vm2, %v7446_v61  ;;  %16878 = vmatpush1.msk.msra.mxu0 %vm501_vm2, %v7658_v58  ;;  %vm21310_vm11 = vmmov %vm21309_vm8 }
 0xc5f   :  { %16874 = vmatpush1.msk.msra.mxu1 %vm501_vm2, %v7445_v36  ;;  %16884 = vmatprep.subr.msk.mxu0 %vm501_vm2, %v7874_v57  ;;  %v8079_v50 = vpop.permute.xlu1 %8078  ;;  %vm21311_vm12 = vmmov %vm21307_vm10 }
 0xc60   :  { %7593 = vmatprep.mubr.f32.mxu1 %v19363_v41  ;;  %7737 = vmatprep.mubr.f32.mxu0 %v19363_v41  ;;  %v7655_v38 = vpop.permute.xlu0 %7654 }
 0xc61   :  { %16875 = vmatmul.mubr.msk.f32.vlgmr.msra.gmra.mxu1 %vm595_vm9, %v7427_v6  ;;  %16879 = vmatmul.mubr.msk.f32.vlgmr.msra.gmra.mxu0 %vm595_vm9, %v7642_v63  ;;  %v7660_v19 = vsel %vm21309_vm8, %v19992_v60, %v7655_v38  ;;  %v7661_v7 = vsel %vm21310_vm11, %v7655_v38, %v20011_v30  ;;  %vm21312_vm8 = vcmask 769024  }
 0xc62   :  { %16885 = vmatpush1.msk.msra.mxu0 %vm501_vm2, %v7873_v53  ;;  %16880 = vmatprep.subr.msk.mxu1 %vm501_vm2, %v7661_v7  ;;  %vm21313_vm11 = vmmov %vm21312_vm8 }
 0xc63   :  { %v7870_v23 = vpop.permute.xlu1 %7869  ;;  %16881 = vmatpush1.msk.msra.mxu1 %vm501_vm2, %v7660_v19  ;;  %7808 = vmatprep.mubr.f32.mxu1 %v19363_v41  ;;  %v8088_v26 = vsel %vm21313_vm11, %v8079_v50, %v8081_v1 }
 0xc64   :  { %v7875_v24 = vsel %vm21307_vm10, %v20025_v39, %v7870_v23  ;;  %7952 = vmatprep.mubr.f32.mxu0 %v19363_v41  ;;  %v7876_v60 = vsel %vm21311_vm12, %v7870_v23, %v7872_v12  ;;  %v8083_v20 = vpop.permute.xlu0 %8082  ;;  %vm21314_vm10 = vmmov %vm21312_vm8 }
 0xc65   :  { %16882 = vmatmul.mubr.msk.f32.vlgmr.msra.gmra.mxu1 %vm595_vm9, %v7642_v63  ;;  %16886 = vmatmul.mubr.msk.f32.vlgmr.msra.gmra.mxu0 %vm595_vm9, %v7857_v11  ;;  %v8089_v15 = vsel %vm21312_vm8, %v8081_v1, %v8083_v20  ;;  %vm21315_vm12 = vmmov %vm21312_vm8 }
 0xc66   :  { %16887 = vmatprep.subr.msk.mxu1 %vm501_vm2, %v7876_v60  ;;  %16891 = vmatprep.subr.msk.mxu0 %vm501_vm2, %v8089_v15 }
 0xc67   :  { %16888 = vmatpush1.msk.msra.mxu1 %vm501_vm2, %v7875_v24  ;;  %8023 = vmatprep.mubr.f32.mxu1 %v19363_v41  ;;  %v8087_v46 = vpop.permute.xlu1 %8086 }
 0xc68   :  { %16892 = vmatpush1.msk.msra.mxu0 %vm501_vm2, %v8088_v26  ;;  %8167 = vmatprep.mubr.f32.mxu0 %v19363_v41  ;;  %v8085_v9 = vpop.permute.xlu0 %8084 }
 0xc69   :  { %16889 = vmatmul.mubr.msk.f32.vlgmr.msra.gmra.mxu1 %vm595_vm9, %v7857_v11  ;;  %16893 = vmatmul.mubr.msk.f32.vlgmr.msra.gmra.mxu0 %vm595_vm9, %v8072_v62  ;;  %v8090_v31 = vsel %vm21314_vm10, %v8083_v20, %v8085_v9  ;;  %v8091_v17 = vsel %vm21315_vm12, %v8085_v9, %v8087_v46 }
 0xc6a   :  { %16894 = vmatprep.subr.msk.mxu1 %vm501_vm2, %v8091_v17  ;;  %8238 = vmatprep.mubr.f32.mxu1 %v19363_v41 }
 0xc6b   :  { %16895 = vmatpush1.msk.msra.mxu1 %vm501_vm2, %v8090_v31  ;;  %8496 = vmatprep.mubr.f32.mxu0 %v19363_v41 }
 0xc6d   :  { %16896 = vmatmul.mubr.msk.f32.vlgmr.msra.gmra.mxu1 %vm595_vm9, %v8072_v62 }
 0xc6e   :  { %8567 = vmatprep.mubr.f32.mxu1 %v19363_v41 }
 0xd08   :  { %v6546_v10 = vpop.f32.mrf.mxu0 }
 0xd0a   :  { %v6548_v34 = vpop.f32.mrf.mxu0 }
 0xd0b   :  { %v6617_v22 = vpop.f32.mrf.mxu1 }
 0xd0d   :  { %v6619_v32 = vpop.f32.mrf.mxu1  ;;  %v6703_v30 = vpop.f32.mrf.mxu0 }
 0xd0e   :  { %v6704_v47 = vadd.f32 %v6703_v30, %v6546_v10 }
 0xd0f   :  { %v6705_v33 = vpop.f32.mrf.mxu0  ;;  %v6774_v27 = vpop.f32.mrf.mxu1 }
 0xd10   :  { %v6706_v56 = vadd.f32 %v6705_v33, %v6548_v34  ;;  %v6775_v21 = vadd.f32 %v6774_v27, %v6617_v22 }
 0xd11   :  { %v6914_v35 = vpop.f32.mrf.mxu0  ;;  %v6776_v18 = vpop.f32.mrf.mxu1 }
 0xd12   :  { %v6990_v29 = vadd.f32 %v6914_v35, %v6704_v47  ;;  %v6777_v59 = vadd.f32 %v6776_v18, %v6619_v32 }
 0xd13   :  { %v6916_v39 = vpop.f32.mrf.mxu0 }
 0xd14   :  { %v6985_v40 = vpop.f32.mrf.mxu1  ;;  %v6991_v44 = vadd.f32 %v6916_v39, %v6706_v56 }
 0xd15   :  { %v7129_v45 = vpop.f32.mrf.mxu0  ;;  %v6992_v36 = vadd.f32 %v6985_v40, %v6775_v21 }
 0xd16   :  { %v6987_v0 = vpop.f32.mrf.mxu1  ;;  %v7205_v42 = vadd.f32 %v7129_v45, %v6990_v29 }
 0xd17   :  { %v7131_v37 = vpop.f32.mrf.mxu0  ;;  %v6993_v63 = vadd.f32 %v6987_v0, %v6777_v59 }
 0xd18   :  { %v7206_v61 = vadd.f32 %v7131_v37, %v6991_v44 }
 0xd19   :  { %v7200_v14 = vpop.f32.mrf.mxu1  ;;  %v7309_v8 = vpop.f32.mrf.mxu0 }
 0xd1a   :  { %v7385_v12 = vadd.f32 %v7309_v8, %v7205_v42  ;;  %v7207_v50 = vadd.f32 %v7200_v14, %v6992_v36 }
 0xd1b   :  { %v7202_v13 = vpop.f32.mrf.mxu1  ;;  %v7311_v48 = vpop.f32.mrf.mxu0 }
 0xd1c   :  { %v7386_v38 = vadd.f32 %v7311_v48, %v7206_v61  ;;  %v7208_v11 = vadd.f32 %v7202_v13, %v6993_v63 }
 0xd1d   :  { %v7380_v51 = vpop.f32.mrf.mxu1  ;;  %v7524_v49 = vpop.f32.mrf.mxu0 }
 0xd1e   :  { %v7600_v53 = vadd.f32 %v7524_v49, %v7385_v12  ;;  %v7387_v23 = vadd.f32 %v7380_v51, %v7207_v50 }
 0xd1f   :  { %v7382_v52 = vpop.f32.mrf.mxu1  ;;  %v7526_v1 = vpop.f32.mrf.mxu0 }
 0xd20   :  { %v7601_v24 = vadd.f32 %v7526_v1, %v7386_v38  ;;  %v7388_v62 = vadd.f32 %v7382_v52, %v7208_v11 }
 0xd21   :  { %v7595_v43 = vpop.f32.mrf.mxu1  ;;  %v7739_v6 = vpop.f32.mrf.mxu0 }
 0xd22   :  { %v7815_v60 = vadd.f32 %v7739_v6, %v7600_v53  ;;  %v7602_v26 = vadd.f32 %v7595_v43, %v7387_v23  ;;  %v8280_v23 = vld [vmem:[#allocation30] sm:$0xf] }
 0xd23   :  { %v7597_v58 = vpop.f32.mrf.mxu1  ;;  %v7741_v57 = vpop.f32.mrf.mxu0 }
 0xd24   :  { %v7816_v46 = vadd.f32 %v7741_v57, %v7601_v24  ;;  %v7603_v10 = vadd.f32 %v7597_v58, %v7388_v62 }
 0xd25   :  { %v7810_v19 = vpop.f32.mrf.mxu1  ;;  %v7954_v7 = vpop.f32.mrf.mxu0 }
 0xd26   :  { %v8030_v9 = vadd.f32 %v7954_v7, %v7815_v60  ;;  %v7817_v34 = vadd.f32 %v7810_v19, %v7602_v26  ;;  %v8276_v19 = vld [vmem:[#allocation28] sm:$0xf] }
 0xd27   :  { %v7812_v20 = vpop.f32.mrf.mxu1  ;;  %v7956_v15 = vpop.f32.mrf.mxu0 }
 0xd28   :  { %v8031_v22 = vadd.f32 %v7956_v15, %v7816_v46  ;;  %v7818_v27 = vadd.f32 %v7812_v20, %v7603_v10 }
 0xd29   :  { %v8025_v31 = vpop.f32.mrf.mxu1  ;;  %v8169_v17 = vpop.f32.mrf.mxu0 }
 0xd2a   :  { %v8245_v32 = vadd.f32 %v8169_v17, %v8030_v9  ;;  %v8032_v35 = vadd.f32 %v8025_v31, %v7817_v34 }
 0xd2b   :  { %v8027_v30 = vpop.f32.mrf.mxu1  ;;  %v8171_v33 = vpop.f32.mrf.mxu0 }
 0xd2c   :  { %v8259_v18 = vmul.f32 %v8245_v32, %v8245_v32  ;;  %v8246_v39 = vadd.f32 %v8171_v33, %v8031_v22  ;;  %v8249_v40 = vsel %vm501_vm2, %v8245_v32, 0.0  ;;  %v8033_v0 = vadd.f32 %v8027_v30, %v7818_v27  ;;  %v16897_v22 = vld [vmem:[%s21235_s19 + $0x1] ss:$8 sm:$0xf] }
 0xd2d   :  { %v8240_v45 = vpop.f32.mrf.mxu1 }
 0xd2e   :  { %v8250_v37 = vsel %vm501_vm2, %v8246_v39, 0.0  ;;  %v8260_v14 = vmul.f32 %v8246_v39, %v8246_v39  ;;  %v8247_v8 = vadd.f32 %v8240_v45, %v8032_v35  ;;  %v8263_v13 = vsel %vm501_vm2, %v8259_v18, 0.0 }
 0xd2f   :  { %v8251_v48 = vadd.f32 %v8250_v37, %v8249_v40  ;;  %v8242_v47 = vpop.f32.mrf.mxu1  ;;  %v8383_v18 = vrot.slane %v16897_v22, %v18769_v5 }
 0xd30   :  { %v8264_v51 = vsel %vm501_vm2, %v8260_v14, 0.0  ;;  %v8252_v49 = vsel %vm501_vm2, %v8247_v8, 0.0  ;;  %v8261_v56 = vmul.f32 %v8247_v8, %v8247_v8  ;;  %v8248_v29 = vadd.f32 %v8242_v47, %v8033_v0 }
 0xd31   :  { %v8253_v52 = vadd.f32 %v8252_v49, %v8251_v48  ;;  %v8265_v1 = vadd.f32 %v8264_v51, %v8263_v13 }
 0xd32   :  { %v8262_v21 = vmul.f32 %v8248_v29, %v8248_v29  ;;  %v8254_v44 = vsel %vm501_vm2, %v8248_v29, 0.0  ;;  %v8266_v42 = vsel %vm501_vm2, %v8261_v56, 0.0 }
 0xd33   :  { %v8255_v43 = vadd.f32 %v8254_v44, %v8253_v52  ;;  %v8267_v6 = vadd.f32 %v8266_v42, %v8265_v1  ;;  %v16917_v1 = vld [vmem:[%s21235_s19 + $0x3] ss:$8 sm:$0xf] }
 0xd34   :  { %v8268_v59 = vsel %vm501_vm2, %v8262_v21, 0.0  ;;  %v8962_v44 = vrot.slane %v16917_v1, %v18767_v4  ;;  %v8966_v42 = vrot.slane %v16917_v1, %v18769_v5 }
 0xd35   :  { %8256 = vadd.xlane.f32.xlu0 %v8255_v43  ;;  %v8269_v36 = vadd.f32 %v8268_v59, %v8267_v6  ;;  %v8954_v6 = vrot.slane %v16917_v1, %v18763_v2  ;;  %v8958_v59 = vrot.slane %v16917_v1, %v18765_v3 }
 0xd37   :  { %8270 = vadd.xlane.f32.xlu1 %v8269_v36  ;;  %v16930_v36 = vld [vmem:[%s21235_s19 + $0x5] ss:$8 sm:$0xf] }
 0xdbe   :  { %v8257_v61 = vpop.xlane.xlu0 %8256 }
 0xdbf   :  { %v8258_v12 = vmul.f32 0.001953125, %v8257_v61  ;;  %v8968_v61 = vcombine.low %v8962_v44, %v8966_v42 }
 0xdc0   :  { %v8271_v58 = vpop.xlane.xlu1 %8270 }
 0xdc1   :  { %v8273_v57 = vmul.f32 %v8258_v12, %v8258_v12  ;;  %v8272_v63 = vmul.f32 0.001953125, %v8271_v58  ;;  %v9361_v58 = vrot.slane %v16930_v36, %v18769_v5 }
 0xdc3   :  { %v8274_v50 = vsub.f32 %v8272_v63, %v8273_v57  ;;  %v8967_v57 = vcombine.low %v8954_v6, %v8958_v59  ;;  %v9349_v63 = vrot.slane %v16930_v36, %v18763_v2 }
 0xdc5   :  { %v8275_v38 = vmax.f32 %v8274_v50, 0.0  ;;  %v9353_v50 = vrot.slane %v16930_v36, %v18765_v3 }
 0xdc7   :  { %v8277_v53 = vadd.f32 1e-05, %v8275_v38  ;;  %v16937_v38 = vld [vmem:[%s21235_s19 + $0x6] ss:$8 sm:$0xf] }
 0xdc9   :  { %17820 = vrsqrt.f32 %v8277_v53 }
 0xdd6   :  { %v17821_v7 = vpop.eup %17820 }
 0xdd7   :  { %v8279_v11 = vmul.f32 %v17821_v7, %v8276_v19  ;;  %v9572_v19 = vrot.slane %v16937_v38, %v18767_v4  ;;  %v9576_v7 = vrot.slane %v16937_v38, %v18769_v5 }
 0xdd9   :  { %8285 = vperm.xlu0 %17803, %v8279_v11   ;;  %v8281_v24 = vmul.f32 %v8279_v11, %v8258_v12  ;;  %v9357_v12 = vrot.slane %v16930_v36, %v18767_v4  ;;  %v9362_v11 = vcombine.low %v9349_v63, %v9353_v50 }
 0xddb   :  { %v8282_v60 = vsub.f32 %v8280_v23, %v8281_v24  ;;  %v9363_v53 = vcombine.low %v9357_v12, %v9361_v58  ;;  %v9564_v23 = vrot.slane %v16937_v38, %v18763_v2  ;;  %v9568_v24 = vrot.slane %v16937_v38, %v18765_v3 }
 0xddd   :  { %8294 = vperm.xlu1 %17804, %v8282_v60   ;;  %v16944_v60 = vld [vmem:[%s21235_s19 + $0x7] ss:$8 sm:$0xf] }
 0xe54   :  { %v8286_v20 = vpop.permute.xlu0 %8285 }
 0xe55   :  { %v8288_v15 = vmul.f32 %v8286_v20, %v8245_v32  ;;  %v8289_v62 = vmul.f32 %v8286_v20, %v8246_v39  ;;  %v8290_v26 = vmul.f32 %v8286_v20, %v8247_v8  ;;  %v8291_v46 = vmul.f32 %v8286_v20, %v8248_v29 }
 0xe56   :  { %v8379_v32 = vrot.slane %v16897_v22, %v18767_v4  ;;  %v9578_v20 = vcombine.low %v9572_v19, %v9576_v7 }
 0xe58   :  { %v8295_v9 = vpop.permute.xlu1 %8294  ;;  %v8385_v47 = vcombine.low %v8379_v32, %v8383_v18 }
 0xe59   :  { %v8297_v31 = vadd.f32 %v8295_v9, %v8288_v15  ;;  %v8298_v17 = vadd.f32 %v8295_v9, %v8289_v62  ;;  %v8299_v10 = vadd.f32 %v8295_v9, %v8290_v26  ;;  %v8300_v34 = vadd.f32 %v8295_v9, %v8291_v46 }
 0xe5a   :  { %v9787_v15 = vrot.slane %v16944_v60, %v18767_v4  ;;  %v9791_v62 = vrot.slane %v16944_v60, %v18769_v5  ;;  %v9577_v26 = vcombine.low %v9564_v23, %v9568_v24  ;;  %v9779_v46 = vrot.slane %v16944_v60, %v18763_v2 }
 0xe5b   :  { %v8301_v30 = vadd.f32 %v8297_v31, %v19504_v54  ;;  %v8302_v33 = vadd.f32 %v8298_v17, %v19506_v55  ;;  %v8303_v27 = vadd.f32 %v8299_v10, %v19495_v28  ;;  %v8304_v35 = vadd.f32 %v8300_v34, %v19497_v25  ;;  %v16910_v25 = vld [vmem:[%s21235_s19 + $0x2] ss:$8 sm:$0xf]  ;;  %v16951_v31 = vld [vmem:[%s21235_s19 + $0x20] ss:$8 sm:$0xf] }
 0xe5c   :  { %v8371_v28 = vrot.slane %v16897_v22, %v18763_v2  ;;  %v8375_v55 = vrot.slane %v16897_v22, %v18765_v3  ;;  %v8747_v51 = vrot.slane %v16910_v25, %v18767_v4  ;;  %v8751_v49 = vrot.slane %v16910_v25, %v18769_v5 }
 0xe5d   :  { %vm8307_vm8 = vcmp.gt.f32.partialorder %v8303_v27, 0.0  ;;  %vm8308_vm11 = vcmp.gt.f32.partialorder %v8304_v35, 0.0  ;;  %v8311_v39 = vmul.f32 0.2, %v8303_v27  ;;  %v8312_v40 = vmul.f32 0.2, %v8304_v35 }
 0xe5e   :  { %vm8305_vm10 = vcmp.gt.f32.partialorder %v8301_v30, 0.0  ;;  %vm8306_vm12 = vcmp.gt.f32.partialorder %v8302_v33, 0.0  ;;  %v8309_v45 = vmul.f32 0.2, %v8301_v30  ;;  %v8310_v0 = vmul.f32 0.2, %v8302_v33 }
 0xe5f   :  { %v8315_v54 = vsel %vm8307_vm8, %v8303_v27, %v8311_v39  ;;  %v8316_v37 = vsel %vm8308_vm11, %v8304_v35, %v8312_v40  ;;  %v8384_v56 = vcombine.low %v8371_v28, %v8375_v55  ;;  %v8739_v29 = vrot.slane %v16910_v25, %v18763_v2 }
 0xe60   :  { %v8322_v14 = vcombine.low %v8315_v54, %v8316_v37  ;;  %v8313_v8 = vsel %vm8305_vm10, %v8301_v30, %v8309_v45  ;;  %v8314_v13 = vsel %vm8306_vm12, %v8302_v33, %v8310_v0  ;;  %v8743_v52 = vrot.slane %v16910_v25, %v18765_v3 }
 0xe61   :  { %v8321_v48 = vcombine.low %v8313_v8, %v8314_v13  ;;  %v8753_v21 = vcombine.low %v8747_v51, %v8751_v49  ;;  %v9783_v9 = vrot.slane %v16944_v60, %v18765_v3  ;;  %v9793_v17 = vcombine.low %v9787_v15, %v9791_v62 }
 0xe62   :  { %8325 = vrot.lane.b32.xlu1 %v8322_v14, %s18474_s29  ;;  %v8752_v43 = vcombine.low %v8739_v29, %v8743_v52  ;;  %v10002_v10 = vrot.slane %v16951_v31, %v18767_v4  ;;  %v10006_v34 = vrot.slane %v16951_v31, %v18769_v5  ;;  %v9994_v30 = vrot.slane %v16951_v31, %v18763_v2 }
 0xe63   :  { %8323 = vrot.lane.b32.xlu0 %v8321_v48, %s18474_s29  ;;  %v9792_v22 = vcombine.low %v9779_v46, %v9783_v9  ;;  %v9998_v33 = vrot.slane %v16951_v31, %v18765_v3  ;;  %vm21321_vm8 = vcmask 916480  }
 0xe64   :  { %v10008_v27 = vcombine.low %v10002_v10, %v10006_v34  ;;  %vm21322_vm11 = vmmov %vm21321_vm8 }
 0xe65   :  { %v10007_v35 = vcombine.low %v9994_v30, %v9998_v33 }
 0xe66   :  { %8388 = vrot.lane.b32.xlu1 %v8385_v47, %s18458_s6 }
 0xe67   :  { %8386 = vrot.lane.b32.xlu0 %v8384_v56, %s18458_s6 }
 0xe6a   :  { %8756 = vrot.lane.b32.xlu1 %v8753_v21, %s18457_s0 }
 0xe6b   :  { %8754 = vrot.lane.b32.xlu0 %v8752_v43, %s18457_s0 }
 0xe6e   :  { %8971 = vrot.lane.b32.xlu1 %v8968_v61, %s18459_s24 }
 0xe6f   :  { %8969 = vrot.lane.b32.xlu0 %v8967_v57, %s18459_s24 }
 0xe72   :  { %9366 = vrot.lane.b32.xlu1 %v9363_v53, %s18460_s28 }
 0xe73   :  { %9364 = vrot.lane.b32.xlu0 %v9362_v11, %s18460_s28 }
 0xe76   :  { %9581 = vrot.lane.b32.xlu1 %v9578_v20, %s18461_s2 }
 0xe77   :  { %9579 = vrot.lane.b32.xlu0 %v9577_v26, %s18461_s2  ;;  %s18483_s2 = smov 6  }
 0xe7a   :  { %9796 = vrot.lane.b32.xlu1 %v9793_v17, %s18462_s30 }
 0xe7b   :  { %9794 = vrot.lane.b32.xlu0 %v9792_v22, %s18462_s30  ;;  %s18484_s30 = smov 123  }
 0xe7e   :  { %10011 = vrot.lane.b32.xlu1 %v10008_v27, %s18463_s13 }
 0xe7f   :  { %10009 = vrot.lane.b32.xlu0 %v10007_v35, %s18463_s13  ;;  %s21379_s13 = sld [smem:[#allocation81_spill]] }
 0xed4   :  { %v8326_v32 = vpop.permute.xlu1 %8325 }
 0xed5   :  { %v8328_v18 = vrot.slane %v8326_v32, 4  ;;  %v8324_v39 = vpop.permute.xlu0 %8323 }
 0xed6   :  { %v8327_v40 = vrot.slane %v8324_v39, 4 }
 0xed7   :  { %8337 = vst.msk [vmem:[#allocation2 + $0x10] sm:$0xf] %vm2480_vm15, %v8328_v18 }
 0xed8   :  { %v8329_v45 = vsel %vm2468_vm13, %v8327_v40, %v8324_v39  ;;  %v8330_v0 = vsel %vm501_vm2, %v8327_v40, %v8328_v18  ;;  %v8389_v54 = vpop.permute.xlu1 %8388 }
 0xed9   :  { %v20197_v37 = vsel %vm2468_vm13, %v8330_v0, %v8326_v32  ;;  %8335 = vst.msk [vmem:[#allocation2] sm:$0xff] %vm19214_vm14, %v8329_v45  ;;  %v8387_v28 = vpop.permute.xlu0 %8386  ;;  %v8391_v49 = vrot.slane %v8389_v54, 4  ;;  %vm21319_vm14 = vcmask 1031168  }
 0xeda   :  { %v8390_v21 = vrot.slane %v8387_v28, 4  ;;  %v9169_v18 = vcombine.high %v20197_v37, %v20197_v37  ;;  %vm21320_vm15 = vmmov %vm21319_vm14 }
 0xedc   :  { %v8757_v55 = vpop.permute.xlu1 %8756  ;;  %v8392_v42 = vsel %vm564_vm1, %v8390_v21, %v8387_v28  ;;  %v8393_v15 = vsel %vm501_vm2, %v8390_v21, %v8391_v49 }
 0xedd   :  { %v8755_v25 = vpop.permute.xlu0 %8754  ;;  %v8759_v14 = vrot.slane %v8757_v55, 4  ;;  %v8394_v31 = vsel %vm564_vm1, %v8393_v15, %v8389_v54 }
 0xede   :  { %v8733_v8 = vld [vmem:[#allocation2 + $0x10] sm:$0xf]  ;;  %v8758_v61 = vrot.slane %v8755_v25, 4  ;;  %v8399_v34 = vmul.f32 %v8394_v31, %v20197_v37 }
 0xedf   :  { %v9163_v13 = vld [vmem:[#allocation2 + $0x10] sm:$0xf]  ;;  %v8768_v29 = vmul.f32 %v8759_v14, %v8733_v8 }
 0xee0   :  { %v8365_v48 = vld [vmem:[#allocation2 + $0x10] sm:$0xf]  ;;  %v20201_v47 = vld [vmem:[#allocation2] sm:$0xff]  ;;  %9178 = vrot.lane.b32.xlu0 %v9163_v13, %s18464_s12  ;;  %v8972_v51 = vpop.permute.xlu1 %8971  ;;  %v8760_v38 = vsel %vm936_vm0, %v8758_v61, %v8755_v25  ;;  %v8761_v24 = vsel %vm501_vm2, %v8758_v61, %v8759_v14  ;;  %v8406_v13 = vcombine.high %v8399_v34, %v8399_v34 }
 0xee1   :  { %9170 = vrot.lane.b32.xlu1 %v20201_v47, %s18464_s12  ;;  %v8970_v56 = vpop.permute.xlu0 %8969  ;;  %v8400_v16 = vmul.f32 %v8391_v49, %v8365_v48  ;;  %v8974_v52 = vrot.slane %v8972_v51, 4  ;;  %v8948_v44 = vld [vmem:[#allocation2 + $0x10] sm:$0xf]  ;;  %v8398_v12 = vmul.f32 %v8392_v42, %v20201_v47  ;;  %v8766_v11 = vmul.f32 %v8760_v38, %v20201_v47 }
 0xee2   :  { %v8973_v6 = vrot.slane %v8970_v56, 4  ;;  %v9343_v58 = vld [vmem:[#allocation2 + $0x10] sm:$0xf]  ;;  %v9168_v26 = vcombine.high %v20201_v47, %v20201_v47  ;;  %v8762_v46 = vsel %vm936_vm0, %v8761_v24, %v8757_v55 }
 0xee3   :  { %v8983_v43 = vmul.f32 %v8974_v52, %v8948_v44  ;;  %v8767_v10 = vmul.f32 %v8762_v46, %v20197_v37  ;;  %v8405_v32 = vcombine.high %v8398_v12, %v8398_v12  ;;  %v8773_v55 = vcombine.high %v8766_v11, %v8766_v11  ;;  %v9558_v49 = vld [vmem:[#allocation2 + $0x10] sm:$0xf] }
 0xee4   :  { %8783 = vrot.lane.b32.xlu0 %v8768_v29, %s18466_s7  ;;  %v9367_v1 = vpop.permute.xlu1 %9366  ;;  %v8975_v57 = vsel %vm1154_vm4, %v8973_v6, %v8970_v56  ;;  %v8976_v17 = vsel %vm501_vm2, %v8973_v6, %v8974_v52 }
 0xee5   :  { %8415 = vrot.lane.b32.xlu1 %v8400_v16, %s18465_s21  ;;  %v9369_v59 = vrot.slane %v9367_v1, 4  ;;  %v9365_v36 = vpop.permute.xlu0 %9364  ;;  %v8981_v7 = vmul.f32 %v8975_v57, %v20201_v47  ;;  %v8977_v30 = vsel %vm1154_vm4, %v8976_v17, %v8972_v51  ;;  %v8774_v52 = vcombine.high %v8767_v10, %v8767_v10 }
 0xee6   :  { %v9368_v50 = vrot.slane %v9365_v36, 4  ;;  %v8982_v27 = vmul.f32 %v8977_v30, %v20197_v37 }
 0xee7   :  { %v9378_v63 = vmul.f32 %v9369_v59, %v9343_v58  ;;  %v8988_v40 = vcombine.high %v8981_v7, %v8981_v7 }
 0xee8   :  { %9174 = vrot.lane.b32.xlu0 %v20197_v37, %s18464_s12  ;;  %v9582_v53 = vpop.permute.xlu1 %9581  ;;  %v9370_v23 = vsel %vm1550_vm5, %v9368_v50, %v9365_v36  ;;  %v9371_v35 = vsel %vm501_vm2, %v9368_v50, %v9369_v59  ;;  %v8989_v6 = vcombine.high %v8982_v27, %v8982_v27 }
 0xee9   :  { %8998 = vrot.lane.b32.xlu1 %v8983_v43, %s18467_s10  ;;  %v9580_v19 = vpop.permute.xlu0 %9579  ;;  %v9584_v60 = vrot.slane %v9582_v53, 4  ;;  %v9376_v62 = vmul.f32 %v9370_v23, %v20201_v47  ;;  %v9372_v39 = vsel %vm1550_vm5, %v9371_v35, %v9367_v1 }
 0xeea   :  { %v9583_v20 = vrot.slane %v9580_v19, 4  ;;  %v9377_v45 = vmul.f32 %v9372_v39, %v20197_v37 }
 0xeeb   :  { %v9383_v28 = vcombine.high %v9376_v62, %v9376_v62  ;;  %v9593_v29 = vmul.f32 %v9584_v60, %v9558_v49 }
 0xeec   :  { %8407 = vrot.lane.b32.xlu0 %v8398_v12, %s18465_s21  ;;  %v9586_v9 = vsel %vm501_vm2, %v9583_v20, %v9584_v60  ;;  %v9585_v0 = vsel %vm21196_vm3, %v9583_v20, %v9580_v19  ;;  %v9797_v8 = vpop.permute.xlu1 %9796  ;;  %v9773_v12 = vld [vmem:[#allocation2 + $0x10] sm:$0xf]  ;;  %v9384_v50 = vcombine.high %v9377_v45, %v9377_v45 }
 0xeed   :  { %9393 = vrot.lane.b32.xlu1 %v9378_v63, %s18468_s11  ;;  %v9587_v22 = vsel %vm21196_vm3, %v9586_v9, %v9582_v53  ;;  %v9795_v54 = vpop.permute.xlu0 %9794  ;;  %v9591_v25 = vmul.f32 %v9585_v0, %v20201_v47  ;;  %v9799_v56 = vrot.slane %v9797_v8, 4  ;;  %v9988_v60 = vld [vmem:[#allocation2 + $0x10] sm:$0xf]  ;;  %vm10746_vm3 = vcmask 982016  }
 0xeee   :  { %v9592_v33 = vmul.f32 %v9587_v22, %v20197_v37  ;;  %v9798_v14 = vrot.slane %v9795_v54, 4 }
 0xeef   :  { %v9598_v48 = vcombine.high %v9591_v25, %v9591_v25  ;;  %v9808_v58 = vmul.f32 %v9799_v56, %v9773_v12 }
 0xef0   :  { %8990 = vrot.lane.b32.xlu0 %v8981_v7, %s18467_s10  ;;  %v9800_v51 = vsel %vm1986_vm6, %v9798_v14, %v9795_v54  ;;  %v9801_v1 = vsel %vm501_vm2, %v9798_v14, %v9799_v56  ;;  %v10012_v42 = vpop.permute.xlu1 %10011  ;;  %v9599_v53 = vcombine.high %v9592_v33, %v9592_v33 }
 0xef1   :  { %8775 = vrot.lane.b32.xlu1 %v8766_v11, %s18466_s7  ;;  %v9806_v16 = vmul.f32 %v9800_v51, %v20201_v47  ;;  %v9802_v44 = vsel %vm1986_vm6, %v9801_v1, %v9797_v8  ;;  %v10010_v43 = vpop.permute.xlu0 %10009  ;;  %v10014_v36 = vrot.slane %v10012_v42, 4  ;;  %vm21317_vm6 = vcmask 1039360   ;;  %v8364_v51 = vld [vmem:[%s21316_s15] sm:$0xff] }
 0xef2   :  { %v9807_v59 = vmul.f32 %v9802_v44, %v20197_v37  ;;  %v10013_v61 = vrot.slane %v10010_v43, 4  ;;  %vm21323_vm10 = vmmov %vm21317_vm6 }
 0xef3   :  { %v9813_v21 = vcombine.high %v9806_v16, %v9806_v16  ;;  %v10023_v20 = vmul.f32 %v10014_v36, %v9988_v60  ;;  %vm21324_vm12 = vmmov %vm21317_vm6 }
 0xef4   :  { %9385 = vrot.lane.b32.xlu0 %v9376_v62, %s18468_s11  ;;  %v10015_v57 = vsel %vm2204_vm7, %v10013_v61, %v10010_v43  ;;  %v10016_v63 = vsel %vm501_vm2, %v10013_v61, %v10014_v36  ;;  %v9814_v23 = vcombine.high %v9807_v59, %v9807_v59  ;;  %v8984_v36 = vld [vmem:[%s21316_s15 + $0x18] sm:$0xff] }
 0xef5   :  { %9172 = vrot.lane.b32.xlu1 %v9168_v26, %s18464_s12  ;;  %v10021_v38 = vmul.f32 %v10015_v57, %v20201_v47  ;;  %v10017_v19 = vsel %vm2204_vm7, %v10016_v63, %v10012_v42  ;;  %vm21318_vm7 = vmmov %vm21317_vm6 }
 0xef6   :  { %v10022_v7 = vmul.f32 %v10017_v19, %v20197_v37 }
 0xef7   :  { %v10028_v11 = vcombine.high %v10021_v38, %v10021_v38 }
 0xef8   :  { %8779 = vrot.lane.b32.xlu0 %v8767_v10, %s18466_s7  ;;  %v10029_v24 = vcombine.high %v10022_v7, %v10022_v7 }
 0xef9   :  { %8411 = vrot.lane.b32.xlu1 %v8399_v34, %s18465_s21 }
 0xefc   :  { %9604 = vrot.lane.b32.xlu0 %v9592_v33, %s18469_s17  ;;  %v8340_v33 = vld [vmem:[%s21235_s19] ss:$8 sm:$0xf]  ;;  %s21375_s19 = sld [smem:[#allocation79_spill]] }
 0xefd   :  { %8994 = vrot.lane.b32.xlu1 %v8982_v27, %s18467_s10  ;;  %v8345_v35 = vrot.slane %v8340_v33, %v18763_v2  ;;  %v8401_v2 = vld [vmem:[%s21316_s15 + $0x8] sm:$0xff]  ;;  %v8353_v8 = vrot.slane %v8340_v33, %v18767_v4 }
 0xf00   :  { %8409 = vrot.lane.b32.xlu0 %v8405_v32, %s18465_s21  ;;  %v8349_v32 = vrot.slane %v8340_v33, %v18765_v3 }
 0xf01   :  { %9176 = vrot.lane.b32.xlu1 %v9169_v18, %s18464_s12 }
 0xf04   :  { %8992 = vrot.lane.b32.xlu0 %v8988_v40, %s18467_s10  ;;  %v8358_v40 = vcombine.low %v8345_v35, %v8349_v32 }
 0xf05   :  { %9389 = vrot.lane.b32.xlu1 %v9377_v45, %s18468_s11 }
 0xf06   :  { %v8362_v54 = vmul.f32 %v8358_v40, %v20201_v47 }
 0xf08   :  { %9387 = vrot.lane.b32.xlu0 %v9383_v28, %s18468_s11  ;;  %v8576_v3 = vcombine.high %v8362_v54, %v8362_v54 }
 0xf09   :  { %8777 = vrot.lane.b32.xlu1 %v8773_v55, %s18466_s7 }
 0xf0c   :  { %8413 = vrot.lane.b32.xlu0 %v8406_v13, %s18465_s21  ;;  %v8357_v13 = vrot.slane %v8340_v33, %v18769_v5 }
 0xf0d   :  { %9602 = vrot.lane.b32.xlu1 %v9598_v48, %s18469_s17 }
 0xf0e   :  { %v8359_v49 = vcombine.low %v8353_v8, %v8357_v13 }
 0xf10   :  { %9608 = vrot.lane.b32.xlu0 %v9593_v29, %s18469_s17 }
 0xf11   :  { %8781 = vrot.lane.b32.xlu1 %v8774_v52, %s18466_s7  ;;  %v8363_v52 = vmul.f32 %v8359_v49, %v20197_v37  ;;  %v10248_v49 = vld [vmem:[#allocation12 + $0x178] sm:$0xff] }
 0xf14   :  { %9817 = vrot.lane.b32.xlu0 %v9813_v21, %s18471_s27 }
 0xf15   :  { %9600 = vrot.lane.b32.xlu1 %v9591_v25, %s18469_s17 }
 0xf18   :  { %8996 = vrot.lane.b32.xlu0 %v8989_v6, %s18467_s10 }
 0xf19   :  { %9819 = vrot.lane.b32.xlu1 %v9807_v59, %s18471_s27  ;;  %v8577_v59 = vcombine.high %v8363_v52, %v8363_v52 }
 0xf1c   :  { %9815 = vrot.lane.b32.xlu0 %v9806_v16, %s18471_s27  ;;  %v8769_v16 = vld [vmem:[%s21316_s15 + $0x10] sm:$0xff] }
 0xf1d   :  { %9823 = vrot.lane.b32.xlu1 %v9808_v58, %s18471_s27 }
 0xf20   :  { %9391 = vrot.lane.b32.xlu0 %v9384_v50, %s18468_s11 }
 0xf21   :  { %9606 = vrot.lane.b32.xlu1 %v9599_v53, %s18469_s17  ;;  %s21381_s17 = sld [smem:[#allocation83_spill]] }
 0xf24   :  { %10034 = vrot.lane.b32.xlu0 %v10022_v7, %s18472_s5 }
 0xf25   :  { %10032 = vrot.lane.b32.xlu1 %v10028_v11, %s18472_s5 }
 0xf28   :  { %9821 = vrot.lane.b32.xlu0 %v9814_v23, %s18471_s27  ;;  %v9379_v23 = vld [vmem:[%s21316_s15 + $0x28] sm:$0xff]  ;;  %s21382_s27 = sld [smem:[#allocation84_spill]] }
 0xf29   :  { %10036 = vrot.lane.b32.xlu1 %v10029_v24, %s18472_s5 }
 0xf2c   :  { %10038 = vrot.lane.b32.xlu0 %v10023_v20, %s18472_s5 }
 0xf2d   :  { %10030 = vrot.lane.b32.xlu1 %v10021_v38, %s18472_s5  ;;  %v9164_v38 = vld [vmem:[%s21316_s15 + $0x20] sm:$0xff]  ;;  %s21383_s5 = sld [smem:[#allocation85_spill]] }
 0xf52   :  { %v20284_v15 = vpop.permute.xlu0 %9178 }
 0xf53   :  { %v20286_v62 = vpop.permute.xlu1 %9170 }
 0xf56   :  { %v20288_v26 = vpop.permute.xlu0 %8783 }
 0xf57   :  { %v8416_v46 = vpop.permute.xlu1 %8415 }
 0xf5a   :  { %v20290_v9 = vpop.permute.xlu0 %9174 }
 0xf5b   :  { %v20292_v31 = vpop.permute.xlu1 %8998 }
 0xf5e   :  { %v8408_v17 = vpop.permute.xlu0 %8407 }
 0xf5f   :  { %v20294_v10 = vpop.permute.xlu1 %9393 }
 0xf62   :  { %v8991_v34 = vpop.permute.xlu0 %8990 }
 0xf63   :  { %v8776_v22 = vpop.permute.xlu1 %8775 }
 0xf66   :  { %v20296_v30 = vpop.permute.xlu0 %9385 }
 0xf67   :  { %v9173_v27 = vpop.permute.xlu1 %9172 }
 0xf6a   :  { %v8780_v18 = vpop.permute.xlu0 %8779 }
 0xf6b   :  { %v8412_v39 = vpop.permute.xlu1 %8411 }
 0xf6e   :  { %v20301_v45 = vpop.permute.xlu0 %9604 }
 0xf6f   :  { %v20303_v0 = vpop.permute.xlu1 %8994 }
 0xf72   :  { %v8410_v28 = vpop.permute.xlu0 %8409 }
 0xf73   :  { %v8417_v55 = vsel %vm21317_vm6, %v8408_v17, %v8410_v28  ;;  %v20307_v25 = vpop.permute.xlu1 %9176  ;;  %v8418_v14 = vsel %vm21318_vm7, %v8410_v28, %v8412_v39  ;;  %vm21325_vm6 = vcmask 908288   ;;  %v9594_v17 = vld [vmem:[%s21316_s15 + $0x30] sm:$0xff] }
 0xf74   :  { %16898 = vmatprep.subr.msk.mxu0 %vm501_vm2, %v8418_v14  ;;  %v9181_v6 = vsel %vm21325_vm6, %v9173_v27, %v20290_v9  ;;  %vm21326_vm7 = vmmov %vm21325_vm6 }
 0xf75   :  { %16899 = vmatpush1.msk.msra.mxu0 %vm501_vm2, %v8417_v55  ;;  %v9180_v58 = vsel %vm21326_vm7, %v20286_v62, %v9173_v27 }
 0xf76   :  { %16904 = vmatprep.subr.msk.mxu0 %vm501_vm2, %v8576_v3  ;;  %v8993_v47 = vpop.permute.xlu0 %8992  ;;  %16900 = vmatmul.mubr.msk.f32.vlgmr.msra.gmra.mxu0 %vm595_vm9, %v8401_v2  ;;  %v10024_v3 = vld [vmem:[%s21316_s15 + $0x40] sm:$0xff] }
 0xf77   :  { %v20317_v48 = vpop.permute.xlu1 %9389  ;;  %16905 = vmatpush1.msk.msra.mxu0 %vm501_vm2, %v8362_v54  ;;  %8653 = vmatprep.mubr.f32.mxu0 %v19363_v41  ;;  %v9001_v21 = vsel %vm21321_vm8, %v8993_v47, %v20303_v0  ;;  %v9000_v44 = vsel %vm21322_vm11, %v8991_v34, %v8993_v47  ;;  %vm21328_vm8 = vcmask 900096   ;;  %v10232_v47 = vld [vmem:[#allocation12 + $0xf8] sm:$0xff] }
 0xf78   :  { %vm21329_vm11 = vmmov %vm21328_vm8 }
 0xf7a   :  { %v9388_v56 = vpop.permute.xlu0 %9387  ;;  %16906 = vmatmul.mubr.msk.f32.vlgmr.msra.gmra.mxu0 %vm595_vm9, %v8364_v51 }
 0xf7b   :  { %v8778_v4 = vpop.permute.xlu1 %8777  ;;  %8864 = vmatprep.mubr.f32.mxu0 %v19363_v41  ;;  %v9396_v50 = vsel %vm21328_vm8, %v9388_v56, %v20317_v48  ;;  %v9395_v7 = vsel %vm21329_vm11, %v20296_v30, %v9388_v56  ;;  %v10231_v56 = vld [vmem:[#allocation12 + $0xf0] sm:$0xff] }
 0xf7c   :  { %v8785_v5 = vsel %vm21319_vm14, %v8776_v22, %v8778_v4  ;;  %v8786_v29 = vsel %vm21320_vm15, %v8778_v4, %v8780_v18  ;;  %vm21327_vm15 = vmmov %vm21319_vm14  ;;  %v10263_v4 = vld [vmem:[#allocation12 + $0x1f0] sm:$0xff] }
 0xf7d   :  { %16911 = vmatprep.subr.msk.mxu0 %vm501_vm2, %v8786_v29  ;;  %v10247_v29 = vld [vmem:[#allocation12 + $0x170] sm:$0xff] }
 0xf7e   :  { %16912 = vmatpush1.msk.msra.mxu0 %vm501_vm2, %v8785_v5  ;;  %v8414_v1 = vpop.permute.xlu0 %8413  ;;  %v10215_v5 = vld [vmem:[#allocation12 + $0x70] sm:$0xff] }
 0xf7f   :  { %v8419_v42 = vsel %vm21323_vm10, %v8412_v39, %v8414_v1  ;;  %v9603_v43 = vpop.permute.xlu1 %9602  ;;  %16913 = vmatmul.mubr.msk.f32.vlgmr.msra.gmra.mxu0 %vm595_vm9, %v8769_v16  ;;  %16918 = vmatprep.subr.msk.mxu0 %vm501_vm2, %v9001_v21  ;;  %v8420_v37 = vsel %vm21324_vm12, %v8414_v1, %v8416_v46  ;;  %vm21330_vm10 = vcmask 785408   ;;  %vm21331_vm12 = vcmask 916480   ;;  %v10214_v1 = vld [vmem:[#allocation12 + $0x68] sm:$0xff] }
 0xf80   :  { %16901 = vmatprep.subr.msk.mxu1 %vm501_vm2, %v8420_v37  ;;  %16919 = vmatpush1.msk.msra.mxu0 %vm501_vm2, %v9000_v44  ;;  %v9611_v11 = vsel %vm21330_vm10, %v9603_v43, %v20301_v45  ;;  %vm21332_vm6 = vmmov %vm21331_vm12  ;;  %v10246_v21 = vld [vmem:[#allocation12 + $0x168] sm:$0xff]  ;;  %v10229_v44 = vld [vmem:[#allocation12 + $0xe0] sm:$0xff] }
 0xf81   :  { %16902 = vmatpush1.msk.msra.mxu1 %vm501_vm2, %v8419_v42  ;;  %16924 = vmatprep.subr.msk.mxu0 %vm501_vm2, %v9181_v6  ;;  %vm21333_vm7 = vmmov %vm21330_vm10  ;;  %vm21338_vm10 = vcmask 900096   ;;  %v10261_v42 = vld [vmem:[#allocation12 + $0x1e0] sm:$0xff]  ;;  %v10228_v6 = vld [vmem:[#allocation12 + $0xd8] sm:$0xff] }
 0xf82   :  { %16903 = vmatmul.mubr.msk.f32.vlgmr.msra.gmra.mxu1 %vm595_vm9, %v8401_v2  ;;  %16907 = vmatprep.subr.msk.mxu1 %vm501_vm2, %v8577_v59  ;;  %v20346_v61 = vpop.permute.xlu0 %9608  ;;  %v10245_v37 = vld [vmem:[#allocation12 + $0x160] sm:$0xff]  ;;  %v10260_v59 = vld [vmem:[#allocation12 + $0x1d8] sm:$0xff] }
 0xf83   :  { %9079 = vmatprep.mubr.f32.mxu0 %v19363_v41  ;;  %v8782_v12 = vpop.permute.xlu1 %8781  ;;  %16908 = vmatpush1.msk.msra.mxu1 %vm501_vm2, %v8363_v52  ;;  %v10262_v52 = vld [vmem:[#allocation12 + $0x1e8] sm:$0xff] }
 0xf84   :  { %v8787_v57 = vsel %vm21319_vm14, %v8780_v18, %v8782_v12  ;;  %16920 = vmatmul.mubr.msk.f32.vlgmr.msra.gmra.mxu0 %vm595_vm9, %v8984_v36  ;;  %8724 = vmatprep.mubr.f32.mxu1 %v19363_v41  ;;  %v8788_v63 = vsel %vm21327_vm15, %v8782_v12, %v20288_v26  ;;  %vm21334_vm14 = vcmask 777216   ;;  %vm21335_vm15 = vcmask 908288   ;;  %v10227_v12 = vld [vmem:[#allocation12 + $0xd0] sm:$0xff] }
 0xf85   :  { %16925 = vmatpush1.msk.msra.mxu0 %vm501_vm2, %v9180_v58  ;;  %16914 = vmatprep.subr.msk.mxu1 %vm501_vm2, %v8788_v63  ;;  %vm21336_vm8 = vmmov %vm21335_vm15  ;;  %v10259_v58 = vld [vmem:[#allocation12 + $0x1d0] sm:$0xff] }
 0xf86   :  { %16931 = vmatprep.subr.msk.mxu0 %vm501_vm2, %v9396_v50  ;;  %16909 = vmatmul.mubr.msk.f32.vlgmr.msra.gmra.mxu1 %vm595_vm9, %v8364_v51  ;;  %v9818_v53 = vpop.permute.xlu0 %9817  ;;  %v9182_v22 = vsel %vm21336_vm8, %v20290_v9, %v20307_v25  ;;  %vm21337_vm11 = vmmov %vm21334_vm14  ;;  %v10216_v51 = vld [vmem:[#allocation12 + $0x78] sm:$0xff]  ;;  %v10243_v63 = vld [vmem:[#allocation12 + $0x150] sm:$0xff] }
 0xf87   :  { %16915 = vmatpush1.msk.msra.mxu1 %vm501_vm2, %v8787_v57  ;;  %9259 = vmatprep.mubr.f32.mxu0 %v19363_v41  ;;  %v9601_v19 = vpop.permute.xlu1 %9600  ;;  %vm21344_vm8 = vmmov %vm21337_vm11  ;;  %v10211_v57 = vld [vmem:[#allocation12 + $0x50] sm:$0xff]  ;;  %v10226_v50 = vld [vmem:[#allocation12 + $0xc8] sm:$0xff] }
 0xf88   :  { %16926 = vmatmul.mubr.msk.f32.vlgmr.msra.gmra.mxu0 %vm595_vm9, %v9164_v38  ;;  %8935 = vmatprep.mubr.f32.mxu1 %v19363_v41  ;;  %v9610_v26 = vsel %vm21333_vm7, %v9601_v19, %v9603_v43  ;;  %v10213_v43 = vld [vmem:[#allocation12 + $0x60] sm:$0xff]  ;;  %v10242_v19 = vld [vmem:[#allocation12 + $0x148] sm:$0xff] }
 0xf89   :  { %16932 = vmatpush1.msk.msra.mxu0 %vm501_vm2, %v9395_v7  ;;  %9474 = vmatprep.mubr.f32.mxu0 %v19363_v41  ;;  %v10225_v7 = vld [vmem:[#allocation12 + $0xc0] sm:$0xff] }
 0xf8a   :  { %16938 = vmatprep.subr.msk.mxu0 %vm501_vm2, %v9611_v11  ;;  %16916 = vmatmul.mubr.msk.f32.vlgmr.msra.gmra.mxu1 %vm595_vm9, %v8769_v16  ;;  %v8997_v24 = vpop.permute.xlu0 %8996  ;;  %v10230_v16 = vld [vmem:[#allocation12 + $0xe8] sm:$0xff]  ;;  %v10257_v11 = vld [vmem:[#allocation12 + $0x1c0] sm:$0xff] }
 0xf8b   :  { %v9002_v60 = vsel %vm21331_vm12, %v20303_v0, %v8997_v24  ;;  %v9820_v20 = vpop.permute.xlu1 %9819  ;;  %v9003_v62 = vsel %vm21332_vm6, %v8997_v24, %v20292_v31  ;;  %9150 = vmatprep.mubr.f32.mxu1 %v19363_v41  ;;  %v9183_v31 = vsel %vm21335_vm15, %v20307_v25, %v20284_v15  ;;  %v9809_v15 = vld [vmem:[%s21316_s15 + $0x38] sm:$0xff]  ;;  %vm21339_vm12 = vmmov %vm21338_vm10  ;;  %v10241_v24 = vld [vmem:[#allocation12 + $0x140] sm:$0xff] }
 0xf8c   :  { %16933 = vmatmul.mubr.msk.f32.vlgmr.msra.gmra.mxu0 %vm595_vm9, %v9379_v23  ;;  %16921 = vmatprep.subr.msk.mxu1 %vm501_vm2, %v9003_v62  ;;  %v9826_v46 = vsel %vm21334_vm14, %v9818_v53, %v9820_v20  ;;  %vm21340_vm6 = vmmov %vm21333_vm7  ;;  %vm21342_vm14 = vcmask 769024   ;;  %v10208_v62 = vld [vmem:[#allocation12 + $0x38] sm:$0xff] }
 0xf8d   :  { %16939 = vmatpush1.msk.msra.mxu0 %vm501_vm2, %v9610_v26  ;;  %16922 = vmatpush1.msk.msra.mxu1 %vm501_vm2, %v9002_v60  ;;  %vm21341_vm7 = vmmov %vm21340_vm6  ;;  %v10224_v60 = vld [vmem:[#allocation12 + $0xb8] sm:$0xff] }
 0xf8e   :  { %16945 = vmatprep.subr.msk.mxu0 %vm501_vm2, %v9826_v46  ;;  %16923 = vmatmul.mubr.msk.f32.vlgmr.msra.gmra.mxu1 %vm595_vm9, %v8984_v36  ;;  %v9816_v34 = vpop.permute.xlu0 %9815  ;;  %vm21343_vm15 = vmmov %vm21337_vm11  ;;  %v10212_v36 = vld [vmem:[#allocation12 + $0x58] sm:$0xff]  ;;  %v10223_v46 = vld [vmem:[#allocation12 + $0xb0] sm:$0xff] }
 0xf8f   :  { %16927 = vmatprep.subr.msk.mxu1 %vm501_vm2, %v9183_v31  ;;  %9689 = vmatprep.mubr.f32.mxu0 %v19363_v41  ;;  %v9825_v30 = vsel %vm21337_vm11, %v9816_v34, %v9818_v53  ;;  %v9824_v33 = vpop.permute.xlu1 %9823  ;;  %vm21345_vm11 = vmmov %vm21342_vm14  ;;  %v10210_v53 = vld [vmem:[#allocation12 + $0x48] sm:$0xff]  ;;  %v10240_v26 = vld [vmem:[#allocation12 + $0x138] sm:$0xff] }
 0xf90   :  { %16928 = vmatpush1.msk.msra.mxu1 %vm501_vm2, %v9182_v22  ;;  %16940 = vmatmul.mubr.msk.f32.vlgmr.msra.gmra.mxu0 %vm595_vm9, %v9594_v17  ;;  %v10207_v31 = vld [vmem:[#allocation12 + $0x30] sm:$0xff]  ;;  %v10222_v22 = vld [vmem:[#allocation12 + $0xa8] sm:$0xff] }
 0xf91   :  { %16946 = vmatpush1.msk.msra.mxu0 %vm501_vm2, %v9825_v30  ;;  %9330 = vmatprep.mubr.f32.mxu1 %v19363_v41  ;;  %v10239_v34 = vld [vmem:[#allocation12 + $0x130] sm:$0xff]  ;;  %v10254_v30 = vld [vmem:[#allocation12 + $0x1a8] sm:$0xff] }
 0xf92   :  { %16929 = vmatmul.mubr.msk.f32.vlgmr.msra.gmra.mxu1 %vm595_vm9, %v9164_v38  ;;  %9904 = vmatprep.mubr.f32.mxu0 %v19363_v41  ;;  %v9392_v9 = vpop.permute.xlu0 %9391  ;;  %v10258_v38 = vld [vmem:[#allocation12 + $0x1c8] sm:$0xff] }
 0xf93   :  { %v9397_v27 = vsel %vm21338_vm10, %v20317_v48, %v9392_v9  ;;  %v9607_v35 = vpop.permute.xlu1 %9606  ;;  %v9398_v32 = vsel %vm21339_vm12, %v9392_v9, %v20294_v10  ;;  %9545 = vmatprep.mubr.f32.mxu1 %v19363_v41  ;;  %vm21346_vm10 = vmmov %vm21345_vm11  ;;  %v10264_v48 = vld [vmem:[#allocation12 + $0x1f8] sm:$0xff]  ;;  %v10221_v9 = vld [vmem:[#allocation12 + $0xa0] sm:$0xff] }
 0xf94   :  { %16947 = vmatmul.mubr.msk.f32.vlgmr.msra.gmra.mxu0 %vm595_vm9, %v9809_v15  ;;  %16934 = vmatprep.subr.msk.mxu1 %vm501_vm2, %v9398_v32  ;;  %v9613_v18 = vsel %vm21340_vm6, %v9607_v35, %v20346_v61  ;;  %v9612_v39 = vsel %vm21341_vm7, %v20301_v45, %v9607_v35  ;;  %vm21347_vm12 = vmmov %vm21346_vm10  ;;  %v10244_v61 = vld [vmem:[#allocation12 + $0x158] sm:$0xff]  ;;  %v10205_v35 = vld [vmem:[#allocation12 + $0x20] sm:$0xff]  ;;  %vm502_vm6 = vcmask 146436  }
 0xf95   :  { %16935 = vmatpush1.msk.msra.mxu1 %vm501_vm2, %v9397_v27  ;;  %10119 = vmatprep.mubr.f32.mxu0 %v19363_v41  ;;  %v10253_v27 = vld [vmem:[#allocation12 + $0x1a0] sm:$0xff]  ;;  %vm503_vm7 = vmor %vm502_vm6, %vm501_vm2  ;;  %vm10735_vm6 = vcmask 64512  }
 0xf96   :  { %16936 = vmatmul.mubr.msk.f32.vlgmr.msra.gmra.mxu1 %vm595_vm9, %v9379_v23  ;;  %16941 = vmatprep.subr.msk.mxu1 %vm501_vm2, %v9613_v18  ;;  %v10035_v10 = vpop.permute.xlu0 %10034  ;;  %v10209_v23 = vld [vmem:[#allocation12 + $0x40] sm:$0xff]  ;;  %v10220_v18 = vld [vmem:[#allocation12 + $0x98] sm:$0xff]  ;;  %505 = vst.msk [vmem:[#allocation5] sm:$0xff] %vm503_vm7, %v19363_v41  ;;  %504 = vst.msk [vmem:[#allocation4] sm:$0xff] %vm503_vm7, %v19363_v41  ;;  %vm10920_vm7 = vcmask 80896  }
 0xf97   :  { %v10033_v40 = vpop.permute.xlu1 %10032  ;;  %16942 = vmatpush1.msk.msra.mxu1 %vm501_vm2, %v9612_v39  ;;  %9760 = vmatprep.mubr.f32.mxu1 %v19363_v41  ;;  %v10237_v32 = vld [vmem:[#allocation12 + $0x120] sm:$0xff]  ;;  %v10252_v39 = vld [vmem:[#allocation12 + $0x198] sm:$0xff] }
 0xf98   :  { %v10041_v0 = vsel %vm21342_vm14, %v10033_v40, %v10035_v10 }
 0xf99   :  { %16952 = vmatprep.subr.msk.mxu0 %vm501_vm2, %v10041_v0  ;;  %v10219_v0 = vld [vmem:[#allocation12 + $0x90] sm:$0xff] }
 0xf9a   :  { %16943 = vmatmul.mubr.msk.f32.vlgmr.msra.gmra.mxu1 %vm595_vm9, %v9594_v17  ;;  %v9822_v54 = vpop.permute.xlu0 %9821  ;;  %v10255_v17 = vld [vmem:[#allocation12 + $0x1b0] sm:$0xff] }
 0xf9b   :  { %v9827_v45 = vsel %vm21343_vm15, %v9820_v20, %v9822_v54  ;;  %v10037_v28 = vpop.permute.xlu1 %10036  ;;  %v9828_v55 = vsel %vm21344_vm8, %v9822_v54, %v9824_v33  ;;  %9975 = vmatprep.mubr.f32.mxu1 %v19363_v41  ;;  %v10256_v20 = vld [vmem:[#allocation12 + $0x1b8] sm:$0xff]  ;;  %v10206_v33 = vld [vmem:[#allocation12 + $0x28] sm:$0xff]  ;;  %v10251_v54 = vld [vmem:[#allocation12 + $0x190] sm:$0xff]  ;;  %vm10444_vm15 = vcmask 1043528   ;;  %vm10445_vm8 = vcmask 72708  }
 0xf9c   :  { %16948 = vmatprep.subr.msk.mxu1 %vm501_vm2, %v9828_v55  ;;  %v10042_v8 = vsel %vm21346_vm10, %v10035_v10, %v10037_v28  ;;  %v10204_v10 = vld [vmem:[#allocation12 + $0x18] sm:$0xff]  ;;  %v10218_v55 = vld [vmem:[#allocation12 + $0x88] sm:$0xff]  ;;  %vm20482_vm10 = vmor %vm10445_vm8, %vm10444_vm15  ;;  %vm10832_vm15 = vcmask 973824   ;;  %vm21351_vm8 = vcmask 1031168  }
 0xf9d   :  { %16949 = vmatpush1.msk.msra.mxu1 %vm501_vm2, %v9827_v45  ;;  %v10203_v45 = vld [vmem:[#allocation12 + $0x10] sm:$0xff] }
 0xf9e   :  { %16950 = vmatmul.mubr.msk.f32.vlgmr.msra.gmra.mxu1 %vm595_vm9, %v9809_v15  ;;  %v10039_v25 = vpop.permute.xlu0 %10038  ;;  %v10238_v15 = vld [vmem:[#allocation12 + $0x128] sm:$0xff] }
 0xf9f   :  { %v10043_v14 = vsel %vm21345_vm11, %v10037_v28, %v10039_v25  ;;  %v10031_v2 = vpop.permute.xlu1 %10030  ;;  %10190 = vmatprep.mubr.f32.mxu1 %v19363_v41  ;;  %v10235_v28 = vld [vmem:[#allocation12 + $0x110] sm:$0xff]  ;;  %v10250_v25 = vld [vmem:[#allocation12 + $0x188] sm:$0xff]  ;;  %vm10441_vm11 = vcmask 72704  }
 0xfa0   :  { %v10040_v13 = vsel %vm21347_vm12, %v10031_v2, %v10033_v40  ;;  %16955 = vmatprep.subr.msk.mxu1 %vm501_vm2, %v10043_v14  ;;  %v10236_v40 = vld [vmem:[#allocation12 + $0x118] sm:$0xff]  ;;  %v10202_v14 = vld [vmem:[#allocation12 + $0x8] sm:$0xff]  ;;  %vm18477_vm12 = vmmov 0  }
 0xfa1   :  { %16953 = vmatpush1.msk.msra.mxu0 %vm501_vm2, %v10040_v13  ;;  %16956 = vmatpush1.msk.msra.mxu1 %vm501_vm2, %v10042_v8  ;;  %v10234_v2 = vld [vmem:[#allocation12 + $0x108] sm:$0xff]  ;;  %v10249_v8 = vld [vmem:[#allocation12 + $0x180] sm:$0xff] }
 0xfa2   :  { %16954 = vmatmul.mubr.msk.f32.vlgmr.msra.gmra.mxu0 %vm595_vm9, %v10024_v3  ;;  %16957 = vmatmul.mubr.msk.f32.vlgmr.msra.gmra.mxu1 %vm595_vm9, %v10024_v3  ;;  %v10217_v3 = vld [vmem:[#allocation12 + $0x80] sm:$0xff] }
 0xfa3   :  { %17140 = vmatprep.subr.mxu0 %v10232_v47  ;;  %17175 = vmatprep.subr.mxu1 %v10264_v48  ;;  %v10201_v13 = vld [vmem:[#allocation12] sm:$0xff] }
 0xfa4   :  { %17141 = vmatpush3.msra.mxu0 %v10216_v51  ;;  %17176 = vmatpush3.msra.mxu1 %v10248_v49  ;;  %v10233_v47 = vld [vmem:[#allocation12 + $0x100] sm:$0xff] }
 0xfa5   :  { %17142 = vmatprep.subr.mxu0 %v10231_v56  ;;  %17177 = vmatprep.subr.mxu1 %v10263_v4 }
 0xfa6   :  { %17143 = vmatpush3.msra.mxu0 %v10215_v5  ;;  %17178 = vmatpush3.msra.mxu1 %v10247_v29 }
 0xfa7   :  { %17144 = vmatprep.subr.mxu0 %v10230_v16  ;;  %17179 = vmatprep.subr.mxu1 %v10262_v52 }
 0xfa8   :  { %17145 = vmatpush3.msra.mxu0 %v10214_v1  ;;  %17180 = vmatpush3.msra.mxu1 %v10246_v21 }
 0xfa9   :  { %17146 = vmatprep.subr.mxu0 %v10229_v44  ;;  %17181 = vmatprep.subr.mxu1 %v10261_v42 }
 0xfaa   :  { %17147 = vmatpush3.msra.mxu0 %v10213_v43  ;;  %17182 = vmatpush3.msra.mxu1 %v10245_v37 }
 0xfab   :  { %17148 = vmatprep.subr.mxu0 %v10228_v6  ;;  %17183 = vmatprep.subr.mxu1 %v10260_v59 }
 0xfac   :  { %17149 = vmatpush3.msra.mxu0 %v10212_v36  ;;  %17184 = vmatpush3.msra.mxu1 %v10244_v61 }
 0xfad   :  { %17150 = vmatprep.subr.mxu0 %v10227_v12  ;;  %17185 = vmatprep.subr.mxu1 %v10259_v58 }
 0xfae   :  { %17151 = vmatpush3.msra.mxu0 %v10211_v57  ;;  %17186 = vmatpush3.msra.mxu1 %v10243_v63 }
 0xfaf   :  { %17152 = vmatprep.subr.mxu0 %v10226_v50  ;;  %17187 = vmatprep.subr.mxu1 %v10258_v38 }
 0xfb0   :  { %17153 = vmatpush3.msra.mxu0 %v10210_v53  ;;  %17188 = vmatpush3.msra.mxu1 %v10242_v19 }
 0xfb1   :  { %17154 = vmatprep.subr.mxu0 %v10225_v7  ;;  %17189 = vmatprep.subr.mxu1 %v10257_v11 }
 0xfb2   :  { %17155 = vmatpush3.msra.mxu0 %v10209_v23  ;;  %17190 = vmatpush3.msra.mxu1 %v10241_v24 }
 0xfb3   :  { %17156 = vmatprep.subr.mxu0 %v10224_v60  ;;  %17191 = vmatprep.subr.mxu1 %v10256_v20 }
 0xfb4   :  { %17157 = vmatpush3.msra.mxu0 %v10208_v62  ;;  %17192 = vmatpush3.msra.mxu1 %v10240_v26 }
 0xfb5   :  { %17158 = vmatprep.subr.mxu0 %v10223_v46  ;;  %17193 = vmatprep.subr.mxu1 %v10255_v17 }
 0xfb6   :  { %17159 = vmatpush3.msra.mxu0 %v10207_v31  ;;  %17194 = vmatpush3.msra.mxu1 %v10239_v34 }
 0xfb7   :  { %17160 = vmatprep.subr.mxu0 %v10222_v22  ;;  %17195 = vmatprep.subr.mxu1 %v10254_v30 }
 0xfb8   :  { %17161 = vmatpush3.msra.mxu0 %v10206_v33  ;;  %17196 = vmatpush3.msra.mxu1 %v10238_v15 }
 0xfb9   :  { %17162 = vmatprep.subr.mxu0 %v10221_v9  ;;  %17197 = vmatprep.subr.mxu1 %v10253_v27 }
 0xfba   :  { %17163 = vmatpush3.msra.mxu0 %v10205_v35  ;;  %17198 = vmatpush3.msra.mxu1 %v10237_v32 }
 0xfbb   :  { %17164 = vmatprep.subr.mxu0 %v10220_v18  ;;  %17199 = vmatprep.subr.mxu1 %v10252_v39 }
 0xfbc   :  { %17165 = vmatpush3.msra.mxu0 %v10204_v10  ;;  %17200 = vmatpush3.msra.mxu1 %v10236_v40 }
 0xfbd   :  { %17166 = vmatprep.subr.mxu0 %v10219_v0  ;;  %17201 = vmatprep.subr.mxu1 %v10251_v54 }
 0xfbe   :  { %17167 = vmatpush3.msra.mxu0 %v10203_v45  ;;  %17202 = vmatpush3.msra.mxu1 %v10235_v28 }
 0xfbf   :  { %17168 = vmatprep.subr.mxu0 %v10218_v55  ;;  %17203 = vmatprep.subr.mxu1 %v10250_v25 }
 0xfc0   :  { %17169 = vmatpush3.msra.mxu0 %v10202_v14  ;;  %17204 = vmatpush3.msra.mxu1 %v10234_v2 }
 0xfc1   :  { %17170 = vmatprep.subr.mxu0 %v10217_v3  ;;  %17205 = vmatprep.subr.mxu1 %v10249_v8 }
 0xfc2   :  { %17171 = vmatpush3.msra.mxu0 %v10201_v13  ;;  %17206 = vmatpush3.msra.mxu1 %v10233_v47 }
 0xfc3   :  { %17358 = vmatprep.subr.mxu1 %v19363_v41  ;;  %17353 = vmatprep.subr.mxu0 %v19363_v41 }
0x1036   :  { %v8498_v48 = vpop.f32.mrf.mxu0 }
0x1038   :  { %v8500_v51 = vpop.f32.mrf.mxu0 }
0x103a   :  { %v8655_v49 = vpop.f32.mrf.mxu0 }
0x103b   :  { %v8656_v61 = vadd.f32 %v8655_v49, %v8498_v48 }
0x103c   :  { %v8657_v56 = vpop.f32.mrf.mxu0 }
0x103d   :  { %v8658_v57 = vadd.f32 %v8657_v56, %v8500_v51 }
0x103f   :  { %v8866_v4 = vpop.f32.mrf.mxu0 }
0x1040   :  { %v8942_v50 = vadd.f32 %v8866_v4, %v8656_v61 }
0x1041   :  { %v8868_v5 = vpop.f32.mrf.mxu0 }
0x1042   :  { %v8569_v29 = vpop.f32.mrf.mxu1  ;;  %v8943_v19 = vadd.f32 %v8868_v5, %v8658_v57  ;;  %v10415_v57 = vld [vmem:[#allocation31] sm:$0xff] }
0x1044   :  { %v9081_v16 = vpop.f32.mrf.mxu0  ;;  %v8571_v52 = vpop.f32.mrf.mxu1 }
0x1045   :  { %v9157_v23 = vadd.f32 %v9081_v16, %v8942_v50 }
0x1046   :  { %v9083_v1 = vpop.f32.mrf.mxu0  ;;  %v8726_v21 = vpop.f32.mrf.mxu1 }
0x1047   :  { %v8727_v24 = vadd.f32 %v8726_v21, %v8569_v29  ;;  %v9158_v62 = vadd.f32 %v9083_v1, %v8943_v19 }
0x1048   :  { %v9261_v44 = vpop.f32.mrf.mxu0  ;;  %v8728_v42 = vpop.f32.mrf.mxu1 }
0x1049   :  { %v8729_v11 = vadd.f32 %v8728_v42, %v8571_v52  ;;  %v9337_v34 = vadd.f32 %v9261_v44, %v9157_v23  ;;  %v20453_v23 = vld [vmem:[#allocation8 + $0x6] ss:$0 sm:$0xff] }
0x104a   :  { %v9263_v43 = vpop.f32.mrf.mxu0  ;;  %v8937_v37 = vpop.f32.mrf.mxu1 }
0x104b   :  { %v8944_v46 = vadd.f32 %v8937_v37, %v8727_v24  ;;  %v9338_v15 = vadd.f32 %v9263_v43, %v9158_v62  ;;  %v20457_v24 = vld [vmem:[#allocation8 + $0x8] ss:$0 sm:$0xff] }
0x104c   :  { %v9476_v6 = vpop.f32.mrf.mxu0  ;;  %v8939_v59 = vpop.f32.mrf.mxu1 }
0x104d   :  { %v8945_v26 = vadd.f32 %v8939_v59, %v8729_v11  ;;  %v9552_v39 = vadd.f32 %v9476_v6, %v9337_v34  ;;  %v20449_v11 = vld [vmem:[#allocation8 + $0x3] ss:$0 sm:$0xff]  ;;  %v20474_v34 = vld [vmem:[#allocation8 + $0x5] ss:$0 sm:$0xff] }
0x104e   :  { %v9152_v36 = vpop.f32.mrf.mxu1  ;;  %v9478_v12 = vpop.f32.mrf.mxu0 }
0x104f   :  { %v9159_v22 = vadd.f32 %v9152_v36, %v8944_v46  ;;  %v9553_v32 = vadd.f32 %v9478_v12, %v9338_v15 }
0x1050   :  { %v9154_v58 = vpop.f32.mrf.mxu1  ;;  %v9691_v38 = vpop.f32.mrf.mxu0 }
0x1051   :  { %v9160_v31 = vadd.f32 %v9154_v58, %v8945_v26  ;;  %v9767_v28 = vadd.f32 %v9691_v38, %v9552_v39  ;;  %v10419_v38 = vld [vmem:[#allocation33] sm:$0xff]  ;;  %v20493_v39 = vld [vmem:[#allocation8] ss:$0 sm:$0xff] }
0x1052   :  { %v9332_v63 = vpop.f32.mrf.mxu1  ;;  %v9693_v60 = vpop.f32.mrf.mxu0 }
0x1053   :  { %v9339_v27 = vadd.f32 %v9332_v63, %v9159_v22  ;;  %v9768_v54 = vadd.f32 %v9693_v60, %v9553_v32  ;;  %v20478_v22 = vld [vmem:[#allocation8 + $0x7] ss:$0 sm:$0xff] }
0x1054   :  { %v9334_v53 = vpop.f32.mrf.mxu1  ;;  %v9906_v30 = vpop.f32.mrf.mxu0 }
0x1055   :  { %v9340_v9 = vadd.f32 %v9334_v53, %v9160_v31  ;;  %v9982_v8 = vadd.f32 %v9906_v30, %v9767_v28  ;;  %v20470_v31 = vld [vmem:[#allocation8 + $0x2] ss:$0 sm:$0xff] }
0x1056   :  { %v9547_v7 = vpop.f32.mrf.mxu1  ;;  %v9908_v10 = vpop.f32.mrf.mxu0 }
0x1057   :  { %v9554_v40 = vadd.f32 %v9547_v7, %v9339_v27  ;;  %v9983_v2 = vadd.f32 %v9908_v10, %v9768_v54  ;;  %v20445_v7 = vld [vmem:[#allocation8 + $0x1] ss:$0 sm:$0xff] }
0x1058   :  { %v9549_v20 = vpop.f32.mrf.mxu1 }
0x1059   :  { %v9555_v18 = vadd.f32 %v9549_v20, %v9340_v9 }
0x105a   :  { %v9762_v17 = vpop.f32.mrf.mxu1 }
0x105b   :  { %v9769_v55 = vadd.f32 %v9762_v17, %v9554_v40 }
0x105c   :  { %v9764_v33 = vpop.f32.mrf.mxu1 }
0x105d   :  { %v9770_v45 = vadd.f32 %v9764_v33, %v9555_v18  ;;  %v13129_v33 = vld [vmem:[%s21367_s22] sm:$0xff] }
0x105e   :  { %v9977_v35 = vpop.f32.mrf.mxu1 }
0x105f   :  { %v9984_v13 = vadd.f32 %v9977_v35, %v9769_v55 }
0x1060   :  { %v9979_v0 = vpop.f32.mrf.mxu1 }
0x1061   :  { %v9985_v3 = vadd.f32 %v9979_v0, %v9770_v45 }
0x1062   :  { %v10121_v25 = vpop.f32.mrf.mxu0  ;;  %v10192_v14 = vpop.f32.mrf.mxu1 }
0x1063   :  { %v10197_v56 = vadd.f32 %v10121_v25, %v9982_v8  ;;  %v10199_v4 = vadd.f32 %v10192_v14, %v9984_v13  ;;  %v10455_v14 = vld [vmem:[#allocation34] sm:$0xf] }
0x1064   :  { %v10123_v47 = vpop.f32.mrf.mxu0  ;;  %v10194_v48 = vpop.f32.mrf.mxu1 }
0x1065   :  { %v10198_v51 = vadd.f32 %v10123_v47, %v9983_v2  ;;  %v10200_v49 = vadd.f32 %v10194_v48, %v9985_v3 }
0x1067   :  { %10329 = vmatprep.mubr.f32.mxu0 %v10198_v51  ;;  %10399 = vmatprep.mubr.f32.mxu1 %v10200_v49 }
0x1068   :  { %10330 = vmatmul.mubr.f32.vlgmr.msra.gmra.mxu0 %v10197_v56  ;;  %10400 = vmatmul.mubr.f32.vlgmr.msra.gmra.mxu1 %v10199_v4 }
0x1069   :  { %17355 = vmatprep.mubr.msk.f32.mxu0 %vm18477_vm12, %v19363_v41  ;;  %17360 = vmatprep.mubr.msk.f32.mxu1 %vm18477_vm12, %v19363_v41 }
0x1128   :  { %v17172_v5 = vpop.f32.mrf.mxu0  ;;  %v17207_v29 = vpop.f32.mrf.mxu1 }
0x112a   :  { %v17173_v16 = vpop.f32.mrf.mxu0  ;;  %v17208_v52 = vpop.f32.mrf.mxu1 }
0x112b   :  { %v17174_v1 = vadd.f32 %v17173_v16, %v17172_v5  ;;  %v17209_v21 = vadd.f32 %v17208_v52, %v17207_v29 }
0x112d   :  { %v10402_v44 = vadd.f32 %v17209_v21, %v17174_v1 }
0x112f   :  { %10405 = vadd.xlane.f32.xlu0 %v10402_v44  ;;  %v10408_v42 = vmul.f32 %v10402_v44, %v10402_v44 }
0x1131   :  { %10409 = vadd.xlane.f32.xlu1 %v10408_v42 }
0x11b8   :  { %v10406_v43 = vpop.xlane.xlu0 %10405 }
0x11b9   :  { %v10407_v37 = vmul.f32 0.0078125, %v10406_v43 }
0x11ba   :  { %v10410_v6 = vpop.xlane.xlu1 %10409 }
0x11bb   :  { %v10412_v59 = vmul.f32 %v10407_v37, %v10407_v37  ;;  %v10411_v36 = vmul.f32 0.0078125, %v10410_v6 }
0x11bd   :  { %v10413_v61 = vsub.f32 %v10411_v36, %v10412_v59 }
0x11bf   :  { %v10414_v12 = vmax.f32 %v10413_v61, 0.0 }
0x11c1   :  { %v10416_v58 = vadd.f32 1e-05, %v10414_v12 }
0x11c3   :  { %17822 = vrsqrt.f32 %v10416_v58 }
0x11d0   :  { %v17823_v63 = vpop.eup %17822 }
0x11d1   :  { %v10418_v50 = vmul.f32 %v17823_v63, %v10415_v57 }
0x11d3   :  { %10424 = vperm.xlu0 %17803, %v10418_v50   ;;  %v10420_v53 = vmul.f32 %v10418_v50, %v10407_v37 }
0x11d5   :  { %v10421_v19 = vsub.f32 %v10419_v38, %v10420_v53 }
0x11d7   :  { %10430 = vperm.xlu1 %17804, %v10421_v19   ;;  %v10469_v19 = vld [vmem:[#allocation34 + $0x4] sm:$0xf] }
0x11db   :  { %10463 = vrot.lane.b32.xlu1 %v20445_v7, %s18458_s6 }
0x11df   :  { %10732 = vrot.lane.b32.xlu1 %v20449_v11, %s18432_s26 }
0x11e3   :  { %11016 = vrot.lane.b32.xlu1 %v20453_v23, %s18459_s24 }
0x11e7   :  { %11210 = vrot.lane.b32.xlu1 %v20457_v24, %s18460_s28 }
0x124e   :  { %v10425_v60 = vpop.permute.xlu0 %10424 }
0x124f   :  { %v10427_v20 = vmul.f32 %v10425_v60, %v10402_v44 }
0x1252   :  { %v10431_v62 = vpop.permute.xlu1 %10430 }
0x1253   :  { %v20464_v26 = vadd.f32 %v10431_v62, %v10427_v20 }
0x1255   :  { %vm10434_vm14 = vcmp.gt.f32.partialorder %v20464_v26, 0.0  ;;  %v10435_v46 = vmul.f32 0.2, %v20464_v26 }
0x1256   :  { %v10464_v27 = vpop.permute.xlu1 %10463 }
0x1257   :  { %v10436_v17 = vsel %vm10434_vm14, %v20464_v26, %v10435_v46  ;;  %v10465_v35 = vrot.slane %v10464_v27, 4  ;;  %vm21350_vm14 = vcmask 1039360   ;;  %v10641_v46 = vld [vmem:[#allocation34 + $0x8] sm:$0xf] }
0x1258   :  { %10438 = vrot.lane.b32.xlu0 %v10436_v17, %s18475_s16 }
0x1259   :  { %v10466_v0 = vsel %vm564_vm1, %v10465_v35, %v10464_v27  ;;  %v10739_v27 = vld [vmem:[#allocation34 + $0xc] sm:$0xf] }
0x125a   :  { %v10733_v54 = vpop.permute.xlu1 %10732 }
0x125b   :  { %v10734_v55 = vrot.slane %v10733_v54, 4 }
0x125c   :  { %10635 = vrot.lane.b32.xlu0 %v20470_v31, %s18457_s0 }
0x125d   :  { %v10736_v47 = vsel %vm10735_vm6, %v10734_v55, %v10733_v54 }
0x125e   :  { %v11017_v56 = vpop.permute.xlu1 %11016 }
0x125f   :  { %v11018_v4 = vrot.slane %v11017_v56, 4 }
0x1260   :  { %10917 = vrot.lane.b32.xlu0 %v20474_v34, %s18476_s18 }
0x1261   :  { %v11019_v1 = vsel %vm1154_vm4, %v11018_v4, %v11017_v56 }
0x1262   :  { %v11211_v44 = vpop.permute.xlu1 %11210 }
0x1263   :  { %v11212_v37 = vrot.slane %v11211_v44, 4 }
0x1264   :  { %11113 = vrot.lane.b32.xlu0 %v20478_v22, %s18474_s29 }
0x1265   :  { %v11213_v61 = vsel %vm1550_vm5, %v11212_v37, %v11211_v44 }
0x12ca   :  { %v10439_v30 = vpop.permute.xlu0 %10438 }
0x12cb   :  { %v10440_v15 = vrot.slane %v10439_v30, 4 }
0x12cd   :  { %v10442_v9 = vsel %vm10441_vm11, %v10440_v15, %v10439_v30 }
0x12ce   :  { %10447 = vst.msk [vmem:[#allocation5] sm:$0xff] %vm20482_vm10, %v10442_v9  ;;  %v10636_v32 = vpop.permute.xlu0 %10635 }
0x12cf   :  { %v10637_v18 = vrot.slane %v10636_v32, 4 }
0x12d1   :  { %v10638_v25 = vsel %vm936_vm0, %v10637_v18, %v10636_v32  ;;  %v10825_v32 = vld [vmem:[#allocation34 + $0x10] sm:$0xf] }
0x12d2   :  { %v10918_v2 = vpop.permute.xlu0 %10917 }
0x12d3   :  { %v10919_v48 = vrot.slane %v10918_v2, 4 }
0x12d5   :  { %v10725_v10 = vld [vmem:[#allocation5] sm:$0xff]  ;;  %v10921_v5 = vsel %vm10920_vm7, %v10919_v48, %v10918_v2  ;;  %v11119_v2 = vld [vmem:[#allocation34 + $0x1c] sm:$0xf] }
0x12d6   :  { %v10448_v40 = vld [vmem:[#allocation5] sm:$0xf]  ;;  %10828 = vrot.lane.b32.xlu0 %v10725_v10, %s18478_s4  ;;  %v10827_v45 = vcombine.high %v10725_v10, %v10725_v10  ;;  %v10468_v3 = vmul.f32 %v10725_v10, %v10466_v0  ;;  %v10640_v8 = vmul.f32 %v10725_v10, %v10638_v25  ;;  %v10738_v51 = vmul.f32 %v10736_v47, %v10725_v10  ;;  %v11114_v29 = vpop.permute.xlu0 %11113 }
0x12d7   :  { %v10454_v28 = vmul.f32 %v20493_v39, %v10448_v40  ;;  %v10923_v52 = vmul.f32 %v10921_v5, %v10725_v10  ;;  %v11115_v21 = vrot.slane %v11114_v29, 4  ;;  %v11021_v42 = vmul.f32 %v11019_v1, %v10725_v10  ;;  %v10924_v40 = vld [vmem:[#allocation34 + $0x14] sm:$0xf]  ;;  %v11216_v47 = vld [vmem:[#allocation34 + $0x20] sm:$0xf] }
0x12d8   :  { %10830 = vrot.lane.b32.xlu1 %v10827_v45, %s18478_s4  ;;  %v10471_v13 = vcombine.high %v10468_v3, %v10468_v3  ;;  %v10643_v49 = vcombine.high %v10640_v8, %v10640_v8  ;;  %v10741_v16 = vcombine.high %v10738_v51, %v10738_v51  ;;  %v11215_v12 = vmul.f32 %v11213_v61, %v10725_v10 }
0x12d9   :  { %17359 = vmatpush3.msk.msra.mxu1 %vm501_vm2, %v10454_v28  ;;  %v10926_v43 = vcombine.high %v10923_v52, %v10923_v52  ;;  %v11116_v6 = vsel %vm2468_vm13, %v11115_v21, %v11114_v29  ;;  %v11024_v59 = vcombine.high %v11021_v42, %v11021_v42  ;;  %v11022_v28 = vld [vmem:[#allocation34 + $0x18] sm:$0xf] }
0x12da   :  { %17368 = vmatprep.subr.mxu1 %v19363_v41  ;;  %17361 = vmatmul.mubr.msk.f32.vlgmr.msra.gmra.mxu1 %vm595_vm9, %v10455_v14  ;;  %v11118_v36 = vmul.f32 %v11116_v6, %v10725_v10  ;;  %v11218_v57 = vcombine.high %v11215_v12, %v11215_v12 }
0x12db   :  { %10472 = vrot.lane.b32.xlu0 %v10468_v3, %s18465_s21  ;;  %17370 = vmatprep.mubr.msk.f32.mxu1 %vm18477_vm12, %v19363_v41 }
0x12dc   :  { %10474 = vrot.lane.b32.xlu1 %v10471_v13, %s18465_s21  ;;  %v11121_v58 = vcombine.high %v11118_v36, %v11118_v36 }
0x12df   :  { %10644 = vrot.lane.b32.xlu0 %v10640_v8, %s18466_s7 }
0x12e0   :  { %10646 = vrot.lane.b32.xlu1 %v10643_v49, %s18466_s7 }
0x12e3   :  { %10742 = vrot.lane.b32.xlu0 %v10738_v51, %s18479_s20 }
0x12e4   :  { %10744 = vrot.lane.b32.xlu1 %v10741_v16, %s18479_s20 }
0x12e7   :  { %10927 = vrot.lane.b32.xlu0 %v10923_v52, %s18480_s23 }
0x12e8   :  { %10929 = vrot.lane.b32.xlu1 %v10926_v43, %s18480_s23 }
0x12eb   :  { %11025 = vrot.lane.b32.xlu0 %v11021_v42, %s18467_s10 }
0x12ec   :  { %11027 = vrot.lane.b32.xlu1 %v11024_v59, %s18467_s10 }
0x12ef   :  { %11122 = vrot.lane.b32.xlu0 %v11118_v36, %s18464_s12 }
0x12f0   :  { %11124 = vrot.lane.b32.xlu1 %v11121_v58, %s18464_s12 }
0x12f3   :  { %11219 = vrot.lane.b32.xlu0 %v11215_v12, %s18468_s11 }
0x12f4   :  { %11221 = vrot.lane.b32.xlu1 %v11218_v57, %s18468_s11 }
0x1348   :  { %v10829_v63 = vpop.permute.xlu0 %10828 }
0x134a   :  { %v10831_v50 = vpop.permute.xlu1 %10830 }
0x134b   :  { %v10833_v15 = vsel %vm10832_vm15, %v10829_v63, %v10831_v50 }
0x134d   :  { %v10473_v38 = vpop.permute.xlu0 %10472 }
0x134e   :  { %v10475_v53 = vpop.permute.xlu1 %10474 }
0x134f   :  { %v10476_v60 = vsel %vm21350_vm14, %v10473_v38, %v10475_v53  ;;  %vm21197_vm14 = vcmask 965632  }
0x1350   :  { %17354 = vmatpush3.msk.msra.mxu0 %vm501_vm2, %v10476_v60 }
0x1351   :  { %v10645_v20 = vpop.permute.xlu0 %10644  ;;  %17356 = vmatmul.mubr.msk.f32.vlgmr.msra.gmra.mxu0 %vm595_vm9, %v10469_v19  ;;  %17363 = vmatprep.subr.mxu0 %v19363_v41 }
0x1352   :  { %v10647_v62 = vpop.permute.xlu1 %10646  ;;  %17365 = vmatprep.mubr.msk.f32.mxu0 %vm18477_vm12, %v19363_v41 }
0x1353   :  { %v10648_v17 = vsel %vm21351_vm8, %v10645_v20, %v10647_v62  ;;  %vm21352_vm8 = vcmask 916480  }
0x1354   :  { %17364 = vmatpush3.msk.msra.mxu0 %vm501_vm2, %v10648_v17 }
0x1355   :  { %v10743_v30 = vpop.permute.xlu0 %10742  ;;  %17373 = vmatprep.subr.mxu0 %v19363_v41  ;;  %17366 = vmatmul.mubr.msk.f32.vlgmr.msra.gmra.mxu0 %vm595_vm9, %v10641_v46 }
0x1356   :  { %17374 = vmatpush3.msk.msra.mxu0 %vm501_vm2, %v10833_v15  ;;  %v10745_v9 = vpop.permute.xlu1 %10744  ;;  %17375 = vmatprep.mubr.msk.f32.mxu0 %vm18477_vm12, %v19363_v41 }
0x1357   :  { %v10747_v35 = vsel %vm10746_vm3, %v10743_v30, %v10745_v9  ;;  %17383 = vmatprep.subr.mxu0 %v19363_v41 }
0x1358   :  { %17369 = vmatpush3.msk.msra.mxu1 %vm501_vm2, %v10747_v35 }
0x1359   :  { %v10928_v18 = vpop.permute.xlu0 %10927  ;;  %17378 = vmatprep.subr.mxu1 %v19363_v41  ;;  %17371 = vmatmul.mubr.msk.f32.vlgmr.msra.gmra.mxu1 %vm595_vm9, %v10739_v27 }
0x135a   :  { %v10930_v10 = vpop.permute.xlu1 %10929  ;;  %17376 = vmatmul.mubr.msk.f32.vlgmr.msra.gmra.mxu0 %vm595_vm9, %v10825_v32  ;;  %17380 = vmatprep.mubr.msk.f32.mxu1 %vm18477_vm12, %v19363_v41 }
0x135b   :  { %v10932_v0 = vsel %vm21197_vm14, %v10928_v18, %v10930_v10  ;;  %17385 = vmatprep.mubr.msk.f32.mxu0 %vm18477_vm12, %v19363_v41  ;;  %vm21353_vm14 = vcmask 908288   ;;  %v11312_v18 = vld [vmem:[#allocation36] sm:$0xf] }
0x135c   :  { %17379 = vmatpush3.msk.msra.mxu1 %vm501_vm2, %v10932_v0  ;;  %v11316_v0 = vld [vmem:[#allocation37] sm:$0xf] }
0x135d   :  { %v11026_v54 = vpop.permute.xlu0 %11025  ;;  %17381 = vmatmul.mubr.msk.f32.vlgmr.msra.gmra.mxu1 %vm595_vm9, %v10924_v40  ;;  %17388 = vmatprep.subr.mxu1 %v19363_v41 }
0x135e   :  { %v11028_v45 = vpop.permute.xlu1 %11027  ;;  %17390 = vmatprep.mubr.msk.f32.mxu1 %vm18477_vm12, %v19363_v41 }
0x135f   :  { %v11029_v55 = vsel %vm21352_vm8, %v11026_v54, %v11028_v45  ;;  %vm21354_vm8 = vcmask 900096  }
0x1360   :  { %17384 = vmatpush3.msk.msra.mxu0 %vm501_vm2, %v11029_v55 }
0x1361   :  { %v11123_v25 = vpop.permute.xlu0 %11122  ;;  %17386 = vmatmul.mubr.msk.f32.vlgmr.msra.gmra.mxu0 %vm595_vm9, %v11022_v28  ;;  %17393 = vmatprep.subr.mxu0 %v19363_v41 }
0x1362   :  { %v11125_v14 = vpop.permute.xlu1 %11124  ;;  %17395 = vmatprep.mubr.msk.f32.mxu0 %vm18477_vm12, %v19363_v41 }
0x1363   :  { %v11126_v3 = vsel %vm21353_vm14, %v11123_v25, %v11125_v14  ;;  %v11332_v14 = vrot.slane %v20464_v26, 4 }
0x1364   :  { %17389 = vmatpush3.msk.msra.mxu1 %vm501_vm2, %v11126_v3 }
0x1365   :  { %17391 = vmatmul.mubr.msk.f32.vlgmr.msra.gmra.mxu1 %vm595_vm9, %v11119_v2  ;;  %17398 = vmatprep.subr.mxu1 %v19363_v41  ;;  %v11220_v8 = vpop.permute.xlu0 %11219 }
0x1366   :  { %v11222_v13 = vpop.permute.xlu1 %11221  ;;  %17400 = vmatprep.mubr.msk.f32.mxu1 %vm18477_vm12, %v19363_v41 }
0x1367   :  { %v11223_v48 = vsel %vm21354_vm8, %v11220_v8, %v11222_v13  ;;  %vm21355_vm8 = vcmask 1039360  }
0x1368   :  { %17394 = vmatpush3.msk.msra.mxu0 %vm501_vm2, %v11223_v48 }
0x1369   :  { %17396 = vmatmul.mubr.msk.f32.vlgmr.msra.gmra.mxu0 %vm595_vm9, %v11216_v47  ;;  %17403 = vmatprep.subr.mxu0 %v19363_v41 }
0x136a   :  { %17405 = vmatprep.mubr.msk.f32.mxu0 %vm18477_vm12, %v19363_v41 }
0x139a   :  { %v10624_v51 = vpop.f32.mrf.mxu1 }
0x139c   :  { %v17362_v49 = vpop.f32.mrf.mxu1 }
0x1411   :  { %v10548_v56 = vpop.f32.mrf.mxu0 }
0x1412   :  { %v10625_v4 = vadd.f32 %v10624_v51, %v10548_v56 }
0x1413   :  { %v17357_v5 = vpop.f32.mrf.mxu0 }
0x1415   :  { %v10720_v29 = vpop.f32.mrf.mxu0 }
0x1416   :  { %v10724_v16 = vadd.f32 %v10720_v29, %v10625_v4 }
0x1417   :  { %v17367_v52 = vpop.f32.mrf.mxu0 }
0x1419   :  { %v10819_v1 = vpop.f32.mrf.mxu1 }
0x141a   :  { %v10823_v21 = vadd.f32 %v10819_v1, %v10724_v16  ;;  %v10905_v44 = vpop.f32.mrf.mxu0 }
0x141b   :  { %v17372_v42 = vpop.f32.mrf.mxu1 }
0x141c   :  { %v10909_v43 = vadd.f32 %v10905_v44, %v10823_v21  ;;  %v17377_v37 = vpop.f32.mrf.mxu0 }
0x141d   :  { %v11004_v6 = vpop.f32.mrf.mxu1 }
0x141e   :  { %v11008_v36 = vadd.f32 %v11004_v6, %v10909_v43  ;;  %v11352_v43 = vld [vmem:[#allocation39] sm:$0xf] }
0x141f   :  { %v17382_v59 = vpop.f32.mrf.mxu1 }
0x1421   :  { %v11101_v61 = vpop.f32.mrf.mxu0 }
0x1422   :  { %v11105_v58 = vadd.f32 %v11101_v61, %v11008_v36 }
0x1423   :  { %v17387_v12 = vpop.f32.mrf.mxu0 }
0x1425   :  { %v11198_v57 = vpop.f32.mrf.mxu1 }
0x1426   :  { %v11202_v50 = vadd.f32 %v11198_v57, %v11105_v58 }
0x1427   :  { %v17392_v63 = vpop.f32.mrf.mxu1 }
0x1429   :  { %v11295_v38 = vpop.f32.mrf.mxu0 }
0x142a   :  { %v11299_v53 = vadd.f32 %v11295_v38, %v11202_v50 }
0x142b   :  { %v17397_v19 = vpop.f32.mrf.mxu0 }
0x142c   :  { %v11300_v60 = vsel %vm501_vm2, %v11299_v53, 0.0  ;;  %v11304_v20 = vmul.f32 %v11299_v53, %v11299_v53 }
0x142d   :  { %11301 = vadd.xlane.f32.xlu0 %v11300_v60 }
0x142e   :  { %v11305_v62 = vsel %vm501_vm2, %v11304_v20, 0.0 }
0x142f   :  { %11306 = vadd.xlane.f32.xlu1 %v11305_v62 }
0x14b6   :  { %v11302_v46 = vpop.xlane.xlu0 %11301 }
0x14b7   :  { %v11303_v17 = vmul.f32 0.0078125, %v11302_v46 }
0x14b8   :  { %v11307_v30 = vpop.xlane.xlu1 %11306 }
0x14b9   :  { %v11309_v15 = vmul.f32 %v11303_v17, %v11303_v17  ;;  %v11308_v9 = vmul.f32 0.0078125, %v11307_v30 }
0x14bb   :  { %v11310_v27 = vsub.f32 %v11308_v9, %v11309_v15 }
0x14bd   :  { %v11311_v35 = vmax.f32 %v11310_v27, 0.0 }
0x14bf   :  { %v11313_v32 = vadd.f32 1e-05, %v11311_v35 }
0x14c1   :  { %17824 = vrsqrt.f32 %v11313_v32 }
0x14ce   :  { %v17825_v10 = vpop.eup %17824 }
0x14cf   :  { %v11315_v40 = vmul.f32 %v17825_v10, %v11312_v18 }
0x14d1   :  { %11321 = vperm.xlu0 %17803, %v11315_v40   ;;  %v11317_v54 = vmul.f32 %v11315_v40, %v11303_v17 }
0x14d3   :  { %v11318_v45 = vsub.f32 %v11316_v0, %v11317_v54 }
0x14d5   :  { %11327 = vperm.xlu1 %17804, %v11318_v45  }
0x14d9   :  { %11360 = vrot.lane.b32.xlu1 %v20445_v7, %s18458_s6 }
0x14dd   :  { %11629 = vrot.lane.b32.xlu1 %v20449_v11, %s18432_s26 }
0x14e1   :  { %11908 = vrot.lane.b32.xlu1 %v20453_v23, %s18459_s24 }
0x14e5   :  { %12102 = vrot.lane.b32.xlu1 %v20457_v24, %s18460_s28 }
0x154c   :  { %v11322_v28 = vpop.permute.xlu0 %11321 }
0x154d   :  { %v11324_v55 = vmul.f32 %v11322_v28, %v11299_v53 }
0x1550   :  { %v11328_v25 = vpop.permute.xlu1 %11327 }
0x1551   :  { %v11330_v2 = vadd.f32 %v11328_v25, %v11324_v55  ;;  %v11366_v55 = vld [vmem:[#allocation39 + $0x4] sm:$0xf] }
0x1553   :  { %v11334_v3 = vadd.f32 %v11332_v14, %v11330_v2 }
0x1554   :  { %v11361_v51 = vpop.permute.xlu1 %11360 }
0x1555   :  { %vm11335_vm14 = vcmp.gt.f32.partialorder %v11334_v3, 0.0  ;;  %v11336_v8 = vmul.f32 0.2, %v11334_v3  ;;  %v11362_v49 = vrot.slane %v11361_v51, 4 }
0x1557   :  { %v20583_v13 = vsel %vm11335_vm14, %v11334_v3, %v11336_v8  ;;  %v11363_v16 = vsel %vm564_vm1, %v11362_v49, %v11361_v51  ;;  %v11538_v3 = vld [vmem:[#allocation39 + $0x8] sm:$0xf]  ;;  %vm21356_vm14 = vcmask 1031168   ;;  %v11635_v51 = vld [vmem:[#allocation39 + $0xc] sm:$0xf] }
0x1558   :  { %11339 = vrot.lane.b32.xlu0 %v20583_v13, %s18475_s16  ;;  %v11630_v52 = vpop.permute.xlu1 %11629 }
0x1559   :  { %v11631_v44 = vrot.slane %v11630_v52, 4 }
0x155b   :  { %v11632_v61 = vsel %vm10735_vm6, %v11631_v44, %v11630_v52 }
0x155c   :  { %11532 = vrot.lane.b32.xlu0 %v20470_v31, %s18457_s0  ;;  %v11909_v63 = vpop.permute.xlu1 %11908 }
0x155d   :  { %v11910_v50 = vrot.slane %v11909_v63, 4 }
0x155f   :  { %v11911_v20 = vsel %vm1154_vm4, %v11910_v50, %v11909_v63 }
0x1560   :  { %11811 = vrot.lane.b32.xlu0 %v20474_v34, %s18476_s18  ;;  %v12103_v46 = vpop.permute.xlu1 %12102 }
0x1561   :  { %v12104_v15 = vrot.slane %v12103_v46, 4 }
0x1563   :  { %v12105_v32 = vsel %vm1550_vm5, %v12104_v15, %v12103_v46 }
0x1564   :  { %12005 = vrot.lane.b32.xlu0 %v20478_v22, %s18474_s29 }
0x15ca   :  { %v11340_v47 = vpop.permute.xlu0 %11339 }
0x15cb   :  { %v11341_v26 = vrot.slane %v11340_v47, 4 }
0x15cd   :  { %v11342_v48 = vsel %vm10441_vm11, %v11341_v26, %v11340_v47 }
0x15ce   :  { %11344 = vst.msk [vmem:[#allocation4] sm:$0xff] %vm20482_vm10, %v11342_v48  ;;  %v11533_v56 = vpop.permute.xlu0 %11532 }
0x15cf   :  { %v11534_v4 = vrot.slane %v11533_v56, 4 }
0x15d1   :  { %v11535_v42 = vsel %vm936_vm0, %v11534_v4, %v11533_v56  ;;  %v11720_v56 = vld [vmem:[#allocation39 + $0x10] sm:$0xf] }
0x15d2   :  { %v11812_v37 = vpop.permute.xlu0 %11811 }
0x15d3   :  { %v11813_v12 = vrot.slane %v11812_v37, 4 }
0x15d5   :  { %v11622_v5 = vld [vmem:[#allocation4] sm:$0xff]  ;;  %v11814_v38 = vsel %vm10920_vm7, %v11813_v12, %v11812_v37  ;;  %v12011_v37 = vld [vmem:[#allocation39 + $0x1c] sm:$0xf] }
0x15d6   :  { %v11345_v29 = vld [vmem:[#allocation4] sm:$0xf]  ;;  %11723 = vrot.lane.b32.xlu0 %v11622_v5, %s18478_s4  ;;  %v11722_v1 = vcombine.high %v11622_v5, %v11622_v5  ;;  %v11365_v6 = vmul.f32 %v11622_v5, %v11363_v16  ;;  %v11537_v59 = vmul.f32 %v11622_v5, %v11535_v42  ;;  %v11634_v58 = vmul.f32 %v11632_v61, %v11622_v5  ;;  %v12006_v53 = vpop.permute.xlu0 %12005  ;;  %v12108_v61 = vld [vmem:[#allocation39 + $0x20] sm:$0xf] }
0x15d7   :  { %v11351_v21 = vmul.f32 %v20493_v39, %v11345_v29  ;;  %v11816_v60 = vmul.f32 %v11814_v38, %v11622_v5  ;;  %v12007_v62 = vrot.slane %v12006_v53, 4  ;;  %v11913_v17 = vmul.f32 %v11911_v20, %v11622_v5  ;;  %v11817_v29 = vld [vmem:[#allocation39 + $0x14] sm:$0xf] }
0x15d8   :  { %11725 = vrot.lane.b32.xlu1 %v11722_v1, %s18478_s4  ;;  %v11368_v36 = vcombine.high %v11365_v6, %v11365_v6  ;;  %v11540_v57 = vcombine.high %v11537_v59, %v11537_v59  ;;  %v11637_v19 = vcombine.high %v11634_v58, %v11634_v58  ;;  %v12107_v18 = vmul.f32 %v12105_v32, %v11622_v5 }
0x15d9   :  { %17404 = vmatpush3.msk.msra.mxu0 %vm501_vm2, %v11351_v21  ;;  %v11819_v30 = vcombine.high %v11816_v60, %v11816_v60  ;;  %v12008_v9 = vsel %vm2468_vm13, %v12007_v62, %v12006_v53  ;;  %v11916_v27 = vcombine.high %v11913_v17, %v11913_v17  ;;  %v11914_v21 = vld [vmem:[#allocation39 + $0x18] sm:$0xf] }
0x15da   :  { %17413 = vmatprep.subr.mxu0 %v19363_v41  ;;  %17406 = vmatmul.mubr.msk.f32.vlgmr.msra.gmra.mxu0 %vm595_vm9, %v11352_v43  ;;  %v12010_v35 = vmul.f32 %v12008_v9, %v11622_v5  ;;  %v12110_v40 = vcombine.high %v12107_v18, %v12107_v18 }
0x15db   :  { %11369 = vrot.lane.b32.xlu0 %v11365_v6, %s18465_s21  ;;  %17415 = vmatprep.mubr.msk.f32.mxu0 %vm18477_vm12, %v19363_v41 }
0x15dc   :  { %11371 = vrot.lane.b32.xlu1 %v11368_v36, %s18465_s21  ;;  %v12013_v10 = vcombine.high %v12010_v35, %v12010_v35 }
0x15df   :  { %11541 = vrot.lane.b32.xlu0 %v11537_v59, %s18466_s7 }
0x15e0   :  { %11543 = vrot.lane.b32.xlu1 %v11540_v57, %s18466_s7 }
0x15e3   :  { %11638 = vrot.lane.b32.xlu0 %v11634_v58, %s18479_s20 }
0x15e4   :  { %11640 = vrot.lane.b32.xlu1 %v11637_v19, %s18479_s20 }
0x15e7   :  { %11820 = vrot.lane.b32.xlu0 %v11816_v60, %s18480_s23 }
0x15e8   :  { %11822 = vrot.lane.b32.xlu1 %v11819_v30, %s18480_s23 }
0x15eb   :  { %11917 = vrot.lane.b32.xlu0 %v11913_v17, %s18467_s10 }
0x15ec   :  { %11919 = vrot.lane.b32.xlu1 %v11916_v27, %s18467_s10 }
0x15ef   :  { %12014 = vrot.lane.b32.xlu0 %v12010_v35, %s18464_s12 }
0x15f0   :  { %12016 = vrot.lane.b32.xlu1 %v12013_v10, %s18464_s12 }
0x15f3   :  { %12111 = vrot.lane.b32.xlu0 %v12107_v18, %s18468_s11 }
0x15f4   :  { %12113 = vrot.lane.b32.xlu1 %v12110_v40, %s18468_s11 }
0x1648   :  { %v11724_v0 = vpop.permute.xlu0 %11723 }
0x164a   :  { %v11726_v54 = vpop.permute.xlu1 %11725 }
0x164b   :  { %v11727_v26 = vsel %vm10832_vm15, %v11724_v0, %v11726_v54 }
0x164d   :  { %v11370_v45 = vpop.permute.xlu0 %11369 }
0x164e   :  { %v11372_v28 = vpop.permute.xlu1 %11371 }
0x164f   :  { %v11373_v25 = vsel %vm21355_vm8, %v11370_v45, %v11372_v28  ;;  %vm21357_vm8 = vcmask 965632  }
0x1650   :  { %17399 = vmatpush3.msk.msra.mxu1 %vm501_vm2, %v11373_v25 }
0x1651   :  { %v11542_v14 = vpop.permute.xlu0 %11541  ;;  %17401 = vmatmul.mubr.msk.f32.vlgmr.msra.gmra.mxu1 %vm595_vm9, %v11366_v55  ;;  %17408 = vmatprep.subr.mxu1 %v19363_v41 }
0x1652   :  { %v11544_v2 = vpop.permute.xlu1 %11543  ;;  %17410 = vmatprep.mubr.msk.f32.mxu1 %vm18477_vm12, %v19363_v41 }
0x1653   :  { %v11545_v8 = vsel %vm21356_vm14, %v11542_v14, %v11544_v2  ;;  %vm21358_vm14 = vcmask 916480  }
0x1654   :  { %17409 = vmatpush3.msk.msra.mxu1 %vm501_vm2, %v11545_v8 }
0x1655   :  { %v11639_v47 = vpop.permute.xlu0 %11638  ;;  %17418 = vmatprep.subr.mxu1 %v19363_v41  ;;  %17411 = vmatmul.mubr.msk.f32.vlgmr.msra.gmra.mxu1 %vm595_vm9, %v11538_v3 }
0x1656   :  { %17419 = vmatpush3.msk.msra.mxu1 %vm501_vm2, %v11727_v26  ;;  %v11641_v48 = vpop.permute.xlu1 %11640  ;;  %17420 = vmatprep.mubr.msk.f32.mxu1 %vm18477_vm12, %v19363_v41 }
0x1657   :  { %v11642_v49 = vsel %vm10746_vm3, %v11639_v47, %v11641_v48  ;;  %17428 = vmatprep.subr.mxu1 %v19363_v41 }
0x1658   :  { %17414 = vmatpush3.msk.msra.mxu0 %vm501_vm2, %v11642_v49 }
0x1659   :  { %v11821_v4 = vpop.permute.xlu0 %11820  ;;  %17423 = vmatprep.subr.mxu0 %v19363_v41  ;;  %17416 = vmatmul.mubr.msk.f32.vlgmr.msra.gmra.mxu0 %vm595_vm9, %v11635_v51 }
0x165a   :  { %v11823_v5 = vpop.permute.xlu1 %11822  ;;  %17421 = vmatmul.mubr.msk.f32.vlgmr.msra.gmra.mxu1 %vm595_vm9, %v11720_v56  ;;  %17425 = vmatprep.mubr.msk.f32.mxu0 %vm18477_vm12, %v19363_v41 }
0x165b   :  { %v11824_v16 = vsel %vm21357_vm8, %v11821_v4, %v11823_v5  ;;  %17430 = vmatprep.mubr.msk.f32.mxu1 %vm18477_vm12, %v19363_v41  ;;  %vm21359_vm8 = vcmask 908288   ;;  %v12204_v4 = vld [vmem:[#allocation40] sm:$0xf] }
0x165c   :  { %17424 = vmatpush3.msk.msra.mxu0 %vm501_vm2, %v11824_v16  ;;  %v12208_v16 = vld [vmem:[#allocation42] sm:$0xf] }
0x165d   :  { %v11918_v52 = vpop.permute.xlu0 %11917  ;;  %17426 = vmatmul.mubr.msk.f32.vlgmr.msra.gmra.mxu0 %vm595_vm9, %v11817_v29  ;;  %17433 = vmatprep.subr.mxu0 %v19363_v41 }
0x165e   :  { %v11920_v1 = vpop.permute.xlu1 %11919  ;;  %17435 = vmatprep.mubr.msk.f32.mxu0 %vm18477_vm12, %v19363_v41 }
0x165f   :  { %v11921_v44 = vsel %vm21358_vm14, %v11918_v52, %v11920_v1  ;;  %vm21360_vm14 = vcmask 900096  }
0x1660   :  { %17429 = vmatpush3.msk.msra.mxu1 %vm501_vm2, %v11921_v44 }
0x1661   :  { %v12015_v42 = vpop.permute.xlu0 %12014  ;;  %17431 = vmatmul.mubr.msk.f32.vlgmr.msra.gmra.mxu1 %vm595_vm9, %v11914_v21  ;;  %17438 = vmatprep.subr.mxu1 %v19363_v41 }
0x1662   :  { %v12017_v43 = vpop.permute.xlu1 %12016  ;;  %17440 = vmatprep.mubr.msk.f32.mxu1 %vm18477_vm12, %v19363_v41 }
0x1663   :  { %v12018_v6 = vsel %vm21359_vm8, %v12015_v42, %v12017_v43 }
0x1664   :  { %17434 = vmatpush3.msk.msra.mxu0 %vm501_vm2, %v12018_v6 }
0x1665   :  { %17436 = vmatmul.mubr.msk.f32.vlgmr.msra.gmra.mxu0 %vm595_vm9, %v12011_v37  ;;  %17443 = vmatprep.subr.mxu0 %v19363_v41  ;;  %v12112_v59 = vpop.permute.xlu0 %12111 }
0x1666   :  { %v12114_v36 = vpop.permute.xlu1 %12113  ;;  %17445 = vmatprep.mubr.msk.f32.mxu0 %vm18477_vm12, %v19363_v41 }
0x1667   :  { %v12115_v12 = vsel %vm21360_vm14, %v12112_v59, %v12114_v36  ;;  %vm21361_vm14 = vcmask 1039360  }
0x1668   :  { %17439 = vmatpush3.msk.msra.mxu1 %vm501_vm2, %v12115_v12 }
0x1669   :  { %17441 = vmatmul.mubr.msk.f32.vlgmr.msra.gmra.mxu1 %vm595_vm9, %v12108_v61  ;;  %17448 = vmatprep.subr.mxu1 %v19363_v41 }
0x166a   :  { %17450 = vmatprep.mubr.msk.f32.mxu1 %vm18477_vm12, %v19363_v41 }
0x169a   :  { %v11521_v58 = vpop.f32.mrf.mxu0 }
0x169c   :  { %v17407_v57 = vpop.f32.mrf.mxu0 }
0x1711   :  { %v11445_v63 = vpop.f32.mrf.mxu1 }
0x1712   :  { %v11522_v50 = vadd.f32 %v11521_v58, %v11445_v63 }
0x1713   :  { %v17402_v38 = vpop.f32.mrf.mxu1 }
0x1714   :  { %v12240_v38 = vld [vmem:[#allocation43] sm:$0xf] }
0x1715   :  { %v11617_v53 = vpop.f32.mrf.mxu1 }
0x1716   :  { %v11621_v19 = vadd.f32 %v11617_v53, %v11522_v50 }
0x1717   :  { %v17412_v60 = vpop.f32.mrf.mxu1 }
0x1719   :  { %v11714_v20 = vpop.f32.mrf.mxu0 }
0x171a   :  { %v11718_v62 = vadd.f32 %v11714_v20, %v11621_v19  ;;  %v11799_v46 = vpop.f32.mrf.mxu1 }
0x171b   :  { %v17417_v17 = vpop.f32.mrf.mxu0 }
0x171c   :  { %v11803_v30 = vadd.f32 %v11799_v46, %v11718_v62  ;;  %v17422_v15 = vpop.f32.mrf.mxu1 }
0x171d   :  { %v11896_v9 = vpop.f32.mrf.mxu0 }
0x171e   :  { %v11900_v35 = vadd.f32 %v11896_v9, %v11803_v30 }
0x171f   :  { %v17427_v27 = vpop.f32.mrf.mxu0 }
0x1721   :  { %v11993_v32 = vpop.f32.mrf.mxu1 }
0x1722   :  { %v11997_v10 = vadd.f32 %v11993_v32, %v11900_v35 }
0x1723   :  { %v17432_v18 = vpop.f32.mrf.mxu1 }
0x1725   :  { %v12090_v40 = vpop.f32.mrf.mxu0 }
0x1726   :  { %v12094_v54 = vadd.f32 %v12090_v40, %v11997_v10 }
0x1727   :  { %v17437_v0 = vpop.f32.mrf.mxu0 }
0x1729   :  { %v12187_v45 = vpop.f32.mrf.mxu1 }
0x172a   :  { %v12191_v28 = vadd.f32 %v12187_v45, %v12094_v54 }
0x172b   :  { %v17442_v55 = vpop.f32.mrf.mxu1 }
0x172c   :  { %v12192_v25 = vsel %vm501_vm2, %v12191_v28, 0.0  ;;  %v12196_v14 = vmul.f32 %v12191_v28, %v12191_v28 }
0x172d   :  { %12193 = vadd.xlane.f32.xlu0 %v12192_v25 }
0x172e   :  { %v12197_v2 = vsel %vm501_vm2, %v12196_v14, 0.0 }
0x172f   :  { %12198 = vadd.xlane.f32.xlu1 %v12197_v2 }
0x17b6   :  { %v12194_v3 = vpop.xlane.xlu0 %12193 }
0x17b7   :  { %v12195_v8 = vmul.f32 0.0078125, %v12194_v3 }
0x17b8   :  { %v12199_v47 = vpop.xlane.xlu1 %12198 }
0x17b9   :  { %v12201_v26 = vmul.f32 %v12195_v8, %v12195_v8  ;;  %v12200_v48 = vmul.f32 0.0078125, %v12199_v47 }
0x17bb   :  { %v12202_v51 = vsub.f32 %v12200_v48, %v12201_v26 }
0x17bd   :  { %v12203_v49 = vmax.f32 %v12202_v51, 0.0 }
0x17bf   :  { %v12205_v56 = vadd.f32 1e-05, %v12203_v49  ;;  %v12254_v49 = vld [vmem:[#allocation43 + $0x4] sm:$0xf] }
0x17c1   :  { %17826 = vrsqrt.f32 %v12205_v56 }
0x17ce   :  { %v17827_v5 = vpop.eup %17826 }
0x17cf   :  { %v12207_v29 = vmul.f32 %v17827_v5, %v12204_v4 }
0x17d1   :  { %12213 = vperm.xlu0 %17803, %v12207_v29   ;;  %v12209_v52 = vmul.f32 %v12207_v29, %v12195_v8  ;;  %v12426_v29 = vld [vmem:[#allocation43 + $0x8] sm:$0xf] }
0x17d3   :  { %v12210_v1 = vsub.f32 %v12208_v16, %v12209_v52 }
0x17d5   :  { %12219 = vperm.xlu1 %17804, %v12210_v1  }
0x17d9   :  { %12248 = vrot.lane.b32.xlu1 %v20445_v7, %s18458_s6 }
0x17dd   :  { %12517 = vrot.lane.b32.xlu1 %v20449_v11, %s18432_s26 }
0x17e1   :  { %12796 = vrot.lane.b32.xlu1 %v20453_v23, %s18459_s24 }
0x17e5   :  { %12990 = vrot.lane.b32.xlu1 %v20457_v24, %s18460_s28 }
0x184c   :  { %v12214_v21 = vpop.permute.xlu0 %12213 }
0x184d   :  { %v12216_v44 = vmul.f32 %v12214_v21, %v12191_v28 }
0x1850   :  { %v12220_v42 = vpop.permute.xlu1 %12219 }
0x1851   :  { %v12222_v43 = vadd.f32 %v12220_v42, %v12216_v44  ;;  %v12523_v44 = vld [vmem:[#allocation43 + $0xc] sm:$0xf] }
0x1853   :  { %v12224_v37 = vmul.f32 0.2, %v12222_v43  ;;  %vm12223_vm8 = vcmp.gt.f32.partialorder %v12222_v43, 0.0 }
0x1854   :  { %v12249_v24 = vpop.permute.xlu1 %12248 }
0x1855   :  { %v12225_v6 = vsel %vm12223_vm8, %v12222_v43, %v12224_v37  ;;  %v12250_v59 = vrot.slane %v12249_v24, 4  ;;  %vm21362_vm8 = vcmask 1031168   ;;  %v12608_v43 = vld [vmem:[#allocation43 + $0x10] sm:$0xf] }
0x1856   :  { %12227 = vrot.lane.b32.xlu0 %v12225_v6, %s18475_s16 }
0x185a   :  { %12420 = vrot.lane.b32.xlu0 %v20470_v31, %s18457_s0  ;;  %v12251_v31 = vsel %vm564_vm1, %v12250_v59, %v12249_v24  ;;  %v12802_v59 = vld [vmem:[#allocation43 + $0x18] sm:$0xf] }
0x185e   :  { %12699 = vrot.lane.b32.xlu0 %v20474_v34, %s18476_s18  ;;  %v12518_v34 = vpop.permute.xlu1 %12517 }
0x185f   :  { %v12519_v63 = vrot.slane %v12518_v34, 4 }
0x1862   :  { %12893 = vrot.lane.b32.xlu0 %v20478_v22, %s18474_s29  ;;  %v12797_v30 = vpop.permute.xlu1 %12796 }
0x1863   :  { %v12798_v15 = vrot.slane %v12797_v30, 4 }
0x1865   :  { %v12799_v18 = vsel %vm1154_vm4, %v12798_v15, %v12797_v30 }
0x1866   :  { %v12991_v40 = vpop.permute.xlu1 %12990 }
0x1867   :  { %v12992_v45 = vrot.slane %v12991_v40, 4 }
0x1869   :  { %v12993_v14 = vsel %vm1550_vm5, %v12992_v45, %v12991_v40 }
0x18c8   :  { %v12228_v7 = vpop.permute.xlu0 %12227 }
0x18c9   :  { %v12229_v11 = vrot.slane %v12228_v7, 4 }
0x18cb   :  { %v12230_v23 = vsel %vm10441_vm11, %v12229_v11, %v12228_v7  ;;  %v12705_v7 = vld [vmem:[#allocation43 + $0x14] sm:$0xf] }
0x18cc   :  { %12232 = vst.msk [vmem:[#allocation5] sm:$0xff] %vm20482_vm10, %v12230_v23  ;;  %v12421_v36 = vpop.permute.xlu0 %12420 }
0x18cd   :  { %v12422_v61 = vrot.slane %v12421_v36, 4 }
0x18cf   :  { %v12423_v50 = vsel %vm936_vm0, %v12422_v61, %v12421_v36 }
0x18d0   :  { %v12700_v53 = vpop.permute.xlu0 %12699 }
0x18d1   :  { %v12701_v62 = vrot.slane %v12700_v53, 4 }
0x18d3   :  { %v12510_v12 = vld [vmem:[#allocation5] sm:$0xff]  ;;  %v12702_v9 = vsel %vm10920_vm7, %v12701_v62, %v12700_v53 }
0x18d4   :  { %v12233_v58 = vld [vmem:[#allocation5] sm:$0xf]  ;;  %12611 = vrot.lane.b32.xlu0 %v12510_v12, %s18478_s4  ;;  %v12610_v57 = vcombine.high %v12510_v12, %v12510_v12  ;;  %v12253_v19 = vmul.f32 %v12510_v12, %v12251_v31  ;;  %v12425_v60 = vmul.f32 %v12510_v12, %v12423_v50  ;;  %v12894_v27 = vpop.permute.xlu0 %12893  ;;  %v12704_v32 = vmul.f32 %v12702_v9, %v12510_v12 }
0x18d5   :  { %v12239_v22 = vmul.f32 %v20493_v39, %v12233_v58  ;;  %v12520_v39 = vsel %vm10735_vm6, %v12519_v63, %v12518_v34  ;;  %v12895_v10 = vrot.slane %v12894_v27, 4  ;;  %v12801_v0 = vmul.f32 %v12799_v18, %v12510_v12  ;;  %v12899_v58 = vld [vmem:[#allocation43 + $0x1c] sm:$0xf] }
0x18d6   :  { %12613 = vrot.lane.b32.xlu1 %v12610_v57, %s18478_s4  ;;  %v12256_v20 = vcombine.high %v12253_v19, %v12253_v19  ;;  %v12522_v46 = vmul.f32 %v12520_v39, %v12510_v12  ;;  %v12428_v17 = vcombine.high %v12425_v60, %v12425_v60  ;;  %v12707_v54 = vcombine.high %v12704_v32, %v12704_v32 }
0x18d7   :  { %17449 = vmatpush3.msk.msra.mxu1 %vm501_vm2, %v12239_v22  ;;  %v12896_v28 = vsel %vm2468_vm13, %v12895_v10, %v12894_v27  ;;  %v12804_v55 = vcombine.high %v12801_v0, %v12801_v0  ;;  %v12995_v2 = vmul.f32 %v12993_v14, %v12510_v12  ;;  %v12996_v22 = vld [vmem:[#allocation43 + $0x20] sm:$0xf] }
0x18d8   :  { %17458 = vmatprep.subr.mxu1 %v19363_v41  ;;  %17451 = vmatmul.mubr.msk.f32.vlgmr.msra.gmra.mxu1 %vm595_vm9, %v12240_v38  ;;  %v12525_v35 = vcombine.high %v12522_v46, %v12522_v46  ;;  %v12898_v25 = vmul.f32 %v12896_v28, %v12510_v12 }
0x18d9   :  { %12257 = vrot.lane.b32.xlu0 %v12253_v19, %s18465_s21  ;;  %17460 = vmatprep.mubr.msk.f32.mxu1 %vm18477_vm12, %v19363_v41  ;;  %v12998_v8 = vcombine.high %v12995_v2, %v12995_v2 }
0x18da   :  { %12259 = vrot.lane.b32.xlu1 %v12256_v20, %s18465_s21  ;;  %v12901_v3 = vcombine.high %v12898_v25, %v12898_v25 }
0x18dd   :  { %12429 = vrot.lane.b32.xlu0 %v12425_v60, %s18466_s7 }
0x18de   :  { %12431 = vrot.lane.b32.xlu1 %v12428_v17, %s18466_s7 }
0x18e1   :  { %12526 = vrot.lane.b32.xlu0 %v12522_v46, %s18479_s20 }
0x18e2   :  { %12528 = vrot.lane.b32.xlu1 %v12525_v35, %s18479_s20 }
0x18e5   :  { %12708 = vrot.lane.b32.xlu0 %v12704_v32, %s18480_s23 }
0x18e6   :  { %12710 = vrot.lane.b32.xlu1 %v12707_v54, %s18480_s23 }
0x18e9   :  { %12805 = vrot.lane.b32.xlu0 %v12801_v0, %s18467_s10 }
0x18ea   :  { %12807 = vrot.lane.b32.xlu1 %v12804_v55, %s18467_s10 }
0x18ed   :  { %12902 = vrot.lane.b32.xlu0 %v12898_v25, %s18464_s12 }
0x18ee   :  { %12904 = vrot.lane.b32.xlu1 %v12901_v3, %s18464_s12 }
0x18f1   :  { %12999 = vrot.lane.b32.xlu0 %v12995_v2, %s18468_s11 }
0x18f2   :  { %13001 = vrot.lane.b32.xlu1 %v12998_v8, %s18468_s11 }
0x1946   :  { %v12612_v47 = vpop.permute.xlu0 %12611 }
0x1948   :  { %v12614_v26 = vpop.permute.xlu1 %12613 }
0x1949   :  { %v12615_v1 = vsel %vm10832_vm15, %v12612_v47, %v12614_v26 }
0x194b   :  { %v12258_v48 = vpop.permute.xlu0 %12257 }
0x194c   :  { %v12260_v51 = vpop.permute.xlu1 %12259 }
0x194d   :  { %v12261_v56 = vsel %vm21361_vm14, %v12258_v48, %v12260_v51  ;;  %vm21363_vm14 = vcmask 965632  }
0x194e   :  { %17444 = vmatpush3.msk.msra.mxu0 %vm501_vm2, %v12261_v56 }
0x194f   :  { %v12430_v4 = vpop.permute.xlu0 %12429  ;;  %17446 = vmatmul.mubr.msk.f32.vlgmr.msra.gmra.mxu0 %vm595_vm9, %v12254_v49  ;;  %17453 = vmatprep.subr.mxu0 %v19363_v41 }
0x1950   :  { %v12432_v5 = vpop.permute.xlu1 %12431  ;;  %17455 = vmatprep.mubr.msk.f32.mxu0 %vm18477_vm12, %v19363_v41 }
0x1951   :  { %v12433_v16 = vsel %vm21362_vm8, %v12430_v4, %v12432_v5  ;;  %vm21364_vm8 = vcmask 916480  }
0x1952   :  { %17454 = vmatpush3.msk.msra.mxu0 %vm501_vm2, %v12433_v16 }
0x1953   :  { %v12527_v52 = vpop.permute.xlu0 %12526  ;;  %17463 = vmatprep.subr.mxu0 %v19363_v41  ;;  %17456 = vmatmul.mubr.msk.f32.vlgmr.msra.gmra.mxu0 %vm595_vm9, %v12426_v29  ;;  %v13092_v29 = vld [vmem:[#allocation45] sm:$0xf] }
0x1954   :  { %17464 = vmatpush3.msk.msra.mxu0 %vm501_vm2, %v12615_v1  ;;  %v12529_v21 = vpop.permute.xlu1 %12528  ;;  %17465 = vmatprep.mubr.msk.f32.mxu0 %vm18477_vm12, %v19363_v41  ;;  %v13096_v1 = vld [vmem:[#allocation46] sm:$0xf] }
0x1955   :  { %v12530_v42 = vsel %vm10746_vm3, %v12527_v52, %v12529_v21  ;;  %17473 = vmatprep.subr.mxu0 %v19363_v41 }
0x1956   :  { %17459 = vmatpush3.msk.msra.mxu1 %vm501_vm2, %v12530_v42  ;;  %v17037_v42 = vld [vmem:[#allocation8 + $0x1] ss:$0 sm:$0xff] }
0x1957   :  { %v12709_v37 = vpop.permute.xlu0 %12708  ;;  %17468 = vmatprep.subr.mxu1 %v19363_v41  ;;  %17461 = vmatmul.mubr.msk.f32.vlgmr.msra.gmra.mxu1 %vm595_vm9, %v12523_v44 }
0x1958   :  { %v12711_v6 = vpop.permute.xlu1 %12710  ;;  %17466 = vmatmul.mubr.msk.f32.vlgmr.msra.gmra.mxu0 %vm595_vm9, %v12608_v43  ;;  %17470 = vmatprep.mubr.msk.f32.mxu1 %vm18477_vm12, %v19363_v41  ;;  %v17045_v43 = vld [vmem:[#allocation8 + $0x3] ss:$0 sm:$0xff] }
0x1959   :  { %v12712_v11 = vsel %vm21363_vm14, %v12709_v37, %v12711_v6  ;;  %17475 = vmatprep.mubr.msk.f32.mxu0 %vm18477_vm12, %v19363_v41  ;;  %vm21365_vm14 = vcmask 908288   ;;  %v17053_v37 = vld [vmem:[#allocation8 + $0x6] ss:$0 sm:$0xff]  ;;  %v17059_v6 = vld [vmem:[#allocation8 + $0x8] ss:$0 sm:$0xff] }
0x195a   :  { %17469 = vmatpush3.msk.msra.mxu1 %vm501_vm2, %v12712_v11 }
0x195b   :  { %v12806_v23 = vpop.permute.xlu0 %12805  ;;  %17471 = vmatmul.mubr.msk.f32.vlgmr.msra.gmra.mxu1 %vm595_vm9, %v12705_v7  ;;  %17478 = vmatprep.subr.mxu1 %v19363_v41 }
0x195c   :  { %v12808_v24 = vpop.permute.xlu1 %12807  ;;  %17480 = vmatprep.mubr.msk.f32.mxu1 %vm18477_vm12, %v19363_v41 }
0x195d   :  { %v12809_v36 = vsel %vm21364_vm8, %v12806_v23, %v12808_v24  ;;  %vm21366_vm8 = vcmask 900096  }
0x195e   :  { %17474 = vmatpush3.msk.msra.mxu0 %vm501_vm2, %v12809_v36 }
0x195f   :  { %v12903_v61 = vpop.permute.xlu0 %12902  ;;  %17476 = vmatmul.mubr.msk.f32.vlgmr.msra.gmra.mxu0 %vm595_vm9, %v12802_v59  ;;  %17483 = vmatprep.subr.mxu0 %v19363_v41 }
0x1960   :  { %v12905_v12 = vpop.permute.xlu1 %12904  ;;  %17485 = vmatprep.mubr.msk.f32.mxu0 %vm18477_vm12, %v19363_v41 }
0x1961   :  { %v12906_v31 = vsel %vm21365_vm14, %v12903_v61, %v12905_v12  ;;  %v17042_v12 = vld [vmem:[#allocation8 + $0x2] ss:$0 sm:$0xff] }
0x1962   :  { %17479 = vmatpush3.msk.msra.mxu1 %vm501_vm2, %v12906_v31  ;;  %v17056_v31 = vld [vmem:[#allocation8 + $0x7] ss:$0 sm:$0xff] }
0x1963   :  { %17481 = vmatmul.mubr.msk.f32.vlgmr.msra.gmra.mxu1 %vm595_vm9, %v12899_v58  ;;  %17488 = vmatprep.subr.mxu1 %v19363_v41  ;;  %v13000_v34 = vpop.permute.xlu0 %12999  ;;  %v17050_v58 = vld [vmem:[#allocation8 + $0x5] ss:$0 sm:$0xff] }
0x1964   :  { %v13002_v57 = vpop.permute.xlu1 %13001  ;;  %17490 = vmatprep.mubr.msk.f32.mxu1 %vm18477_vm12, %v19363_v41 }
0x1965   :  { %v13003_v63 = vsel %vm21366_vm8, %v13000_v34, %v13002_v57 }
0x1966   :  { %17484 = vmatpush3.msk.msra.mxu0 %vm501_vm2, %v13003_v63 }
0x1967   :  { %17486 = vmatmul.mubr.msk.f32.vlgmr.msra.gmra.mxu0 %vm595_vm9, %v12996_v22  ;;  %17493 = vmatprep.subr.mxu0 %v19363_v41 }
0x1968   :  { %17495 = vmatprep.mubr.msk.f32.mxu0 %vm18477_vm12, %v19363_v41 }
0x1998   :  { %v12409_v50 = vpop.f32.mrf.mxu1 }
0x199a   :  { %v17452_v38 = vpop.f32.mrf.mxu1 }
0x1a0f   :  { %v12333_v53 = vpop.f32.mrf.mxu0 }
0x1a10   :  { %v12410_v19 = vadd.f32 %v12409_v50, %v12333_v53  ;;  %v17036_v53 = vld [vmem:[#allocation8] ss:$0 sm:$0xff] }
0x1a11   :  { %v17447_v60 = vpop.f32.mrf.mxu0 }
0x1a13   :  { %v12505_v20 = vpop.f32.mrf.mxu0 }
0x1a14   :  { %v12509_v39 = vadd.f32 %v12505_v20, %v12410_v19 }
0x1a15   :  { %v17457_v62 = vpop.f32.mrf.mxu0 }
0x1a17   :  { %v12602_v46 = vpop.f32.mrf.mxu1 }
0x1a18   :  { %v12606_v17 = vadd.f32 %v12602_v46, %v12509_v39  ;;  %v12687_v30 = vpop.f32.mrf.mxu0 }
0x1a19   :  { %v17462_v15 = vpop.f32.mrf.mxu1 }
0x1a1a   :  { %v12691_v9 = vadd.f32 %v12687_v30, %v12606_v17  ;;  %v17467_v27 = vpop.f32.mrf.mxu0 }
0x1a1b   :  { %v12784_v35 = vpop.f32.mrf.mxu1 }
0x1a1c   :  { %v12788_v18 = vadd.f32 %v12784_v35, %v12691_v9 }
0x1a1d   :  { %v17472_v32 = vpop.f32.mrf.mxu1 }
0x1a1f   :  { %v12881_v10 = vpop.f32.mrf.mxu0 }
0x1a20   :  { %v12885_v0 = vadd.f32 %v12881_v10, %v12788_v18 }
0x1a21   :  { %v17477_v40 = vpop.f32.mrf.mxu0 }
0x1a23   :  { %v12978_v54 = vpop.f32.mrf.mxu1 }
0x1a24   :  { %v12982_v28 = vadd.f32 %v12978_v54, %v12885_v0 }
0x1a25   :  { %v17482_v45 = vpop.f32.mrf.mxu1 }
0x1a27   :  { %v13075_v55 = vpop.f32.mrf.mxu0 }
0x1a28   :  { %v13079_v25 = vadd.f32 %v13075_v55, %v12982_v28 }
0x1a29   :  { %v17487_v14 = vpop.f32.mrf.mxu0 }
0x1a2a   :  { %v13080_v2 = vsel %vm501_vm2, %v13079_v25, 0.0  ;;  %v13084_v3 = vmul.f32 %v13079_v25, %v13079_v25 }
0x1a2b   :  { %13081 = vadd.xlane.f32.xlu0 %v13080_v2 }
0x1a2c   :  { %v13085_v8 = vsel %vm501_vm2, %v13084_v3, 0.0 }
0x1a2d   :  { %13086 = vadd.xlane.f32.xlu1 %v13085_v8 }
0x1ab4   :  { %v13082_v47 = vpop.xlane.xlu0 %13081 }
0x1ab5   :  { %v13083_v26 = vmul.f32 0.0078125, %v13082_v47 }
0x1ab6   :  { %v13087_v48 = vpop.xlane.xlu1 %13086 }
0x1ab7   :  { %v13089_v51 = vmul.f32 %v13083_v26, %v13083_v26  ;;  %v13088_v49 = vmul.f32 0.0078125, %v13087_v48 }
0x1ab9   :  { %v13090_v56 = vsub.f32 %v13088_v49, %v13089_v51 }
0x1abb   :  { %v13091_v4 = vmax.f32 %v13090_v56, 0.0 }
0x1abd   :  { %v13093_v5 = vadd.f32 1e-05, %v13091_v4 }
0x1abf   :  { %17828 = vrsqrt.f32 %v13093_v5 }
0x1acc   :  { %v17829_v16 = vpop.eup %17828 }
0x1acd   :  { %v13095_v52 = vmul.f32 %v17829_v16, %v13092_v29 }
0x1acf   :  { %13101 = vperm.xlu0 %17803, %v13095_v52   ;;  %v13097_v21 = vmul.f32 %v13095_v52, %v13083_v26 }
0x1ad1   :  { %v13098_v44 = vsub.f32 %v13096_v1, %v13097_v21 }
0x1ad3   :  { %13107 = vperm.xlu1 %17804, %v13098_v44   ;;  %v13143_v44 = vld [vmem:[%s21367_s22 + $0x8] sm:$0xff] }
0x1ad7   :  { %13137 = vrot.lane.b32.xlu1 %v17037_v42, %s18458_s6 }
0x1adb   :  { %13406 = vrot.lane.b32.xlu1 %v17045_v43, %s18432_s26 }
0x1adf   :  { %13685 = vrot.lane.b32.xlu1 %v17053_v37, %s18459_s24  ;;  %s21377_s24 = sld [smem:[#allocation80_spill]] }
0x1ae3   :  { %13879 = vrot.lane.b32.xlu1 %v17059_v6, %s18460_s28  ;;  %v13315_v6 = vld [vmem:[%s21367_s22 + $0x10] sm:$0xff]  ;;  %s18481_s28 = smov 4  }
0x1b4a   :  { %v13102_v7 = vpop.permute.xlu0 %13101 }
0x1b4b   :  { %v13104_v11 = vmul.f32 %v13102_v7, %v13079_v25 }
0x1b4e   :  { %v13108_v23 = vpop.permute.xlu1 %13107 }
0x1b4f   :  { %v13110_v24 = vadd.f32 %v13108_v23, %v13104_v11 }
0x1b51   :  { %v13111_v59 = vadd.f32 %v13110_v24, %v20583_v13 }
0x1b52   :  { %v13138_v13 = vpop.permute.xlu1 %13137 }
0x1b53   :  { %v13113_v36 = vmul.f32 0.2, %v13111_v59  ;;  %vm13112_vm14 = vcmp.gt.f32.partialorder %v13111_v59, 0.0  ;;  %v13139_v63 = vrot.slane %v13138_v13, 4 }
0x1b55   :  { %v13114_v61 = vsel %vm13112_vm14, %v13111_v59, %v13113_v36  ;;  %v13140_v20 = vsel %vm564_vm1, %v13139_v63, %v13138_v13  ;;  %vm21369_vm1 = vcmask 1031168   ;;  %v13412_v59 = vld [vmem:[%s21367_s22 + $0x18] sm:$0xff]  ;;  %v13691_v13 = vld [vmem:[%s21367_s22 + $0x30] sm:$0xff] }
0x1b56   :  { %13116 = vrot.lane.b32.xlu0 %v13114_v61, %s18475_s16  ;;  %v13407_v39 = vpop.permute.xlu1 %13406  ;;  %v13497_v61 = vld [vmem:[%s21367_s22 + $0x20] sm:$0xff] }
0x1b57   :  { %v13408_v17 = vrot.slane %v13407_v39, 4 }
0x1b59   :  { %v13409_v32 = vsel %vm10735_vm6, %v13408_v17, %v13407_v39  ;;  %vm506_vm6 = vcmask 338944  }
0x1b5a   :  { %13309 = vrot.lane.b32.xlu0 %v17042_v12, %s18457_s0  ;;  %v13686_v0 = vpop.permute.xlu1 %13685  ;;  %508 = vst.msk [vmem:[#allocation7] sm:$0xf] %vm506_vm6, %v19363_v41  ;;  %507 = vst.msk [vmem:[#allocation6] sm:$0xf] %vm506_vm6, %v19363_v41 }
0x1b5b   :  { %v13687_v54 = vrot.slane %v13686_v0, 4 }
0x1b5d   :  { %v13688_v14 = vsel %vm1154_vm4, %v13687_v54, %v13686_v0  ;;  %vm21370_vm4 = vcmask 965632   ;;  %v13974_v0 = vld [vmem:[%s21371_s8 + $0x28] sm:$0xff]  ;;  %v13973_v54 = vld [vmem:[%s21371_s8 + $0x20] sm:$0xff] }
0x1b5e   :  { %13588 = vrot.lane.b32.xlu0 %v17050_v58, %s18476_s18  ;;  %v13880_v3 = vpop.permute.xlu1 %13879 }
0x1b5f   :  { %v13881_v26 = vrot.slane %v13880_v3, 4 }
0x1b61   :  { %v13882_v56 = vsel %vm1550_vm5, %v13881_v26, %v13880_v3  ;;  %vm21373_vm5 = vcmask 908288  }
0x1b62   :  { %13782 = vrot.lane.b32.xlu0 %v17056_v31, %s18474_s29  ;;  %v13594_v31 = vld [vmem:[%s21367_s22 + $0x28] sm:$0xff]  ;;  %s21384_s29 = sld [smem:[#allocation86_spill]] }
0x1bc8   :  { %v13117_v34 = vpop.permute.xlu0 %13116 }
0x1bc9   :  { %v13118_v57 = vrot.slane %v13117_v34, 4 }
0x1bcb   :  { %v13119_v22 = vsel %vm10441_vm11, %v13118_v57, %v13117_v34  ;;  %vm21376_vm11 = vcmask 261120  }
0x1bcc   :  { %13121 = vst.msk [vmem:[#allocation4] sm:$0xff] %vm20482_vm10, %v13119_v22  ;;  %v13310_v50 = vpop.permute.xlu0 %13309  ;;  %vm21378_vm10 = vmmov %vm21376_vm11 }
0x1bcd   :  { %v13311_v38 = vrot.slane %v13310_v50, 4 }
0x1bcf   :  { %v13312_v30 = vsel %vm936_vm0, %v13311_v38, %v13310_v50  ;;  %vm21368_vm0 = vcmask 1039360  }
0x1bd0   :  { %v13589_v15 = vpop.permute.xlu0 %13588 }
0x1bd1   :  { %v13590_v18 = vrot.slane %v13589_v15, 4 }
0x1bd3   :  { %v13399_v19 = vld [vmem:[#allocation4] sm:$0xff]  ;;  %v13591_v45 = vsel %vm10920_vm7, %v13590_v18, %v13589_v15  ;;  %v13980_v15 = vld [vmem:[%s21371_s8 + $0x58] sm:$0xff] }
0x1bd4   :  { %v13122_v60 = vld [vmem:[#allocation4] sm:$0xf]  ;;  %13500 = vrot.lane.b32.xlu0 %v13399_v19, %s18478_s4  ;;  %v13499_v62 = vcombine.high %v13399_v19, %v13399_v19  ;;  %v13142_v9 = vmul.f32 %v13399_v19, %v13140_v20  ;;  %v13314_v27 = vmul.f32 %v13399_v19, %v13312_v30  ;;  %v13411_v10 = vmul.f32 %v13409_v32, %v13399_v19  ;;  %v13783_v28 = vpop.permute.xlu0 %13782  ;;  %v13983_v20 = vld [vmem:[%s21371_s8 + $0x70] sm:$0xff]  ;;  %v13976_v18 = vld [vmem:[%s21371_s8 + $0x38] sm:$0xff] }
0x1bd5   :  { %v13128_v46 = vmul.f32 %v17036_v53, %v13122_v60  ;;  %v13593_v25 = vmul.f32 %v13591_v45, %v13399_v19  ;;  %v13784_v2 = vrot.slane %v13783_v28, 4  ;;  %v13690_v8 = vmul.f32 %v13688_v14, %v13399_v19  ;;  %v13788_v53 = vld [vmem:[%s21367_s22 + $0x38] sm:$0xff]  ;;  %v13982_v30 = vld [vmem:[%s21371_s8 + $0x68] sm:$0xff] }
0x1bd6   :  { %13502 = vrot.lane.b32.xlu1 %v13499_v62, %s18478_s4  ;;  %v13145_v35 = vcombine.high %v13142_v9, %v13142_v9  ;;  %v13317_v40 = vcombine.high %v13314_v27, %v13314_v27  ;;  %v13414_v55 = vcombine.high %v13411_v10, %v13411_v10  ;;  %v13884_v4 = vmul.f32 %v13882_v56, %v13399_v19  ;;  %v13984_v60 = vld [vmem:[%s21371_s8 + $0x78] sm:$0xff] }
0x1bd7   :  { %17494 = vmatpush3.msk.msra.mxu0 %vm501_vm2, %v13128_v46  ;;  %v13596_v47 = vcombine.high %v13593_v25, %v13593_v25  ;;  %v13785_v48 = vsel %vm2468_vm13, %v13784_v2, %v13783_v28  ;;  %v13693_v51 = vcombine.high %v13690_v8, %v13690_v8  ;;  %v13885_v46 = vld [vmem:[%s21367_s22 + $0x40] sm:$0xff]  ;;  %vm21374_vm13 = vmmov %vm21366_vm8  ;;  %v13972_v45 = vld [vmem:[%s21371_s8 + $0x18] sm:$0xff]  ;;  %vm14888_vm8 = vcmask 257024  }
0x1bd8   :  { %17503 = vmatprep.subr.mxu0 %v19363_v41  ;;  %17496 = vmatmul.mubr.msk.f32.vlgmr.msra.gmra.mxu0 %vm595_vm9, %v13129_v33  ;;  %v13787_v49 = vmul.f32 %v13785_v48, %v13399_v19  ;;  %v13887_v29 = vcombine.high %v13884_v4, %v13884_v4  ;;  %v13981_v33 = vld [vmem:[%s21371_s8 + $0x60] sm:$0xff]  ;;  %v13971_v28 = vld [vmem:[%s21371_s8 + $0x10] sm:$0xff] }
0x1bd9   :  { %13146 = vrot.lane.b32.xlu0 %v13142_v9, %s18465_s21  ;;  %17505 = vmatprep.mubr.msk.f32.mxu0 %vm18477_vm12, %v19363_v41  ;;  %v13979_v9 = vld [vmem:[%s21371_s8 + $0x50] sm:$0xff] }
0x1bda   :  { %13148 = vrot.lane.b32.xlu1 %v13145_v35, %s18465_s21  ;;  %v13790_v5 = vcombine.high %v13787_v49, %v13787_v49  ;;  %v13977_v35 = vld [vmem:[%s21371_s8 + $0x40] sm:$0xff] }
0x1bdd   :  { %13318 = vrot.lane.b32.xlu0 %v13314_v27, %s18466_s7  ;;  %v13978_v27 = vld [vmem:[%s21371_s8 + $0x48] sm:$0xff] }
0x1bde   :  { %13320 = vrot.lane.b32.xlu1 %v13317_v40, %s18466_s7  ;;  %v13975_v40 = vld [vmem:[%s21371_s8 + $0x30] sm:$0xff] }
0x1be1   :  { %13415 = vrot.lane.b32.xlu0 %v13411_v10, %s18479_s20 }
0x1be2   :  { %13417 = vrot.lane.b32.xlu1 %v13414_v55, %s18479_s20  ;;  %v13970_v55 = vld [vmem:[%s21371_s8 + $0x8] sm:$0xff] }
0x1be5   :  { %13597 = vrot.lane.b32.xlu0 %v13593_v25, %s18480_s23  ;;  %v13969_v25 = vld [vmem:[%s21371_s8] sm:$0xff] }
0x1be6   :  { %13599 = vrot.lane.b32.xlu1 %v13596_v47, %s18480_s23 }
0x1be9   :  { %13694 = vrot.lane.b32.xlu0 %v13690_v8, %s18467_s10 }
0x1bea   :  { %13696 = vrot.lane.b32.xlu1 %v13693_v51, %s18467_s10  ;;  %s18486_s10 = smov 122  }
0x1bed   :  { %13791 = vrot.lane.b32.xlu0 %v13787_v49, %s18464_s12 }
0x1bee   :  { %13793 = vrot.lane.b32.xlu1 %v13790_v5, %s18464_s12  ;;  %s18485_s12 = smov 124  }
0x1bf1   :  { %13888 = vrot.lane.b32.xlu0 %v13884_v4, %s18468_s11 }
0x1bf2   :  { %13890 = vrot.lane.b32.xlu1 %v13887_v29, %s18468_s11  ;;  %s21380_s11 = sld [smem:[#allocation82_spill]] }
0x1c46   :  { %v13501_v16 = vpop.permute.xlu0 %13500 }
0x1c48   :  { %v13503_v52 = vpop.permute.xlu1 %13502 }
0x1c49   :  { %v13504_v23 = vsel %vm10832_vm15, %v13501_v16, %v13503_v52  ;;  %vm14093_vm15 = vcmask 298024  }
0x1c4b   :  { %v13147_v1 = vpop.permute.xlu0 %13146 }
0x1c4c   :  { %v13149_v21 = vpop.permute.xlu1 %13148 }
0x1c4d   :  { %v13150_v42 = vsel %vm21368_vm0, %v13147_v1, %v13149_v21 }
0x1c4e   :  { %17489 = vmatpush3.msk.msra.mxu1 %vm501_vm2, %v13150_v42 }
0x1c4f   :  { %v13319_v43 = vpop.permute.xlu0 %13318  ;;  %17491 = vmatmul.mubr.msk.f32.vlgmr.msra.gmra.mxu1 %vm595_vm9, %v13143_v44  ;;  %17498 = vmatprep.subr.mxu1 %v19363_v41 }
0x1c50   :  { %v13321_v37 = vpop.permute.xlu1 %13320  ;;  %17500 = vmatprep.mubr.msk.f32.mxu1 %vm18477_vm12, %v19363_v41 }
0x1c51   :  { %v13322_v7 = vsel %vm21369_vm1, %v13319_v43, %v13321_v37 }
0x1c52   :  { %17499 = vmatpush3.msk.msra.mxu1 %vm501_vm2, %v13322_v7 }
0x1c53   :  { %v13416_v11 = vpop.permute.xlu0 %13415  ;;  %17508 = vmatprep.subr.mxu1 %v19363_v41  ;;  %17501 = vmatmul.mubr.msk.f32.vlgmr.msra.gmra.mxu1 %vm595_vm9, %v13315_v6 }
0x1c54   :  { %17509 = vmatpush3.msk.msra.mxu1 %vm501_vm2, %v13504_v23  ;;  %v13418_v24 = vpop.permute.xlu1 %13417  ;;  %17510 = vmatprep.mubr.msk.f32.mxu1 %vm18477_vm12, %v19363_v41 }
0x1c55   :  { %v13419_v36 = vsel %vm10746_vm3, %v13416_v11, %v13418_v24  ;;  %17518 = vmatprep.subr.mxu1 %v19363_v41  ;;  %vm21372_vm3 = vcmask 916480  }
0x1c56   :  { %17504 = vmatpush3.msk.msra.mxu0 %vm501_vm2, %v13419_v36 }
0x1c57   :  { %v13598_v12 = vpop.permute.xlu0 %13597  ;;  %17513 = vmatprep.subr.mxu0 %v19363_v41  ;;  %17506 = vmatmul.mubr.msk.f32.vlgmr.msra.gmra.mxu0 %vm595_vm9, %v13412_v59 }
0x1c58   :  { %v13600_v58 = vpop.permute.xlu1 %13599  ;;  %17511 = vmatmul.mubr.msk.f32.vlgmr.msra.gmra.mxu1 %vm595_vm9, %v13497_v61  ;;  %17515 = vmatprep.mubr.msk.f32.mxu0 %vm18477_vm12, %v19363_v41 }
0x1c59   :  { %v13601_v34 = vsel %vm21370_vm4, %v13598_v12, %v13600_v58  ;;  %17520 = vmatprep.mubr.msk.f32.mxu1 %vm18477_vm12, %v19363_v41 }
0x1c5a   :  { %17514 = vmatpush3.msk.msra.mxu0 %vm501_vm2, %v13601_v34 }
0x1c5b   :  { %v13695_v57 = vpop.permute.xlu0 %13694  ;;  %17516 = vmatmul.mubr.msk.f32.vlgmr.msra.gmra.mxu0 %vm595_vm9, %v13594_v31  ;;  %17523 = vmatprep.subr.mxu0 %v19363_v41 }
0x1c5c   :  { %v13697_v22 = vpop.permute.xlu1 %13696  ;;  %17525 = vmatprep.mubr.msk.f32.mxu0 %vm18477_vm12, %v19363_v41 }
0x1c5d   :  { %v13698_v63 = vsel %vm21372_vm3, %v13695_v57, %v13697_v22 }
0x1c5e   :  { %17519 = vmatpush3.msk.msra.mxu1 %vm501_vm2, %v13698_v63 }
0x1c5f   :  { %v13792_v50 = vpop.permute.xlu0 %13791  ;;  %17521 = vmatmul.mubr.msk.f32.vlgmr.msra.gmra.mxu1 %vm595_vm9, %v13691_v13  ;;  %17528 = vmatprep.subr.mxu1 %v19363_v41 }
0x1c60   :  { %v13794_v38 = vpop.permute.xlu1 %13793  ;;  %17530 = vmatprep.mubr.msk.f32.mxu1 %vm18477_vm12, %v19363_v41 }
0x1c61   :  { %v13795_v19 = vsel %vm21373_vm5, %v13792_v50, %v13794_v38  ;;  %v14067_v50 = vld [vmem:[%s21375_s19] sm:$0xff] }
0x1c62   :  { %17524 = vmatpush3.msk.msra.mxu0 %vm501_vm2, %v13795_v19  ;;  %v14071_v19 = vld [vmem:[%s21377_s24] sm:$0xff] }
0x1c63   :  { %17526 = vmatmul.mubr.msk.f32.vlgmr.msra.gmra.mxu0 %vm595_vm9, %v13788_v53  ;;  %17533 = vmatprep.subr.mxu0 %v19363_v41  ;;  %v13889_v39 = vpop.permute.xlu0 %13888 }
0x1c64   :  { %v13891_v62 = vpop.permute.xlu1 %13890  ;;  %17534 = vmatpush3.msra.mxu0 %v13984_v60  ;;  %17565 = vmatprep.mubr.msk.f32.mxu0 %vm18477_vm12, %v19363_v41 }
0x1c65   :  { %v13892_v17 = vsel %vm21374_vm13, %v13889_v39, %v13891_v62  ;;  %17535 = vmatprep.subr.mxu0 %v19363_v41  ;;  %v20907_v39 = vld [vmem:[#allocation10 + $0x1] ss:$0 sm:$0xff]  ;;  %v20911_v62 = vld [vmem:[#allocation10 + $0x3] ss:$0 sm:$0xff] }
0x1c66   :  { %17529 = vmatpush3.msk.msra.mxu1 %vm501_vm2, %v13892_v17  ;;  %17536 = vmatpush3.msra.mxu0 %v13983_v20  ;;  %v20919_v17 = vld [vmem:[#allocation10 + $0x8] ss:$0 sm:$0xff] }
0x1c67   :  { %17531 = vmatmul.mubr.msk.f32.vlgmr.msra.gmra.mxu1 %vm595_vm9, %v13885_v46  ;;  %17537 = vmatprep.subr.mxu0 %v19363_v41  ;;  %v20915_v46 = vld [vmem:[#allocation10 + $0x6] ss:$0 sm:$0xff] }
0x1c68   :  { %17538 = vmatpush3.msra.mxu0 %v13982_v30  ;;  %17568 = vmatprep.subr.mxu1 %v19363_v41 }
0x1c69   :  { %17539 = vmatprep.subr.mxu0 %v19363_v41  ;;  %17570 = vmatprep.mubr.msk.f32.mxu1 %vm18477_vm12, %v19363_v41 }
0x1c6a   :  { %17540 = vmatpush3.msra.mxu0 %v13981_v33 }
0x1c6b   :  { %17541 = vmatprep.subr.mxu0 %v19363_v41 }
0x1c6c   :  { %17542 = vmatpush3.msra.mxu0 %v13980_v15 }
0x1c6d   :  { %17543 = vmatprep.subr.mxu0 %v19363_v41 }
0x1c6e   :  { %17544 = vmatpush3.msra.mxu0 %v13979_v9 }
0x1c6f   :  { %17545 = vmatprep.subr.mxu0 %v19363_v41 }
0x1c70   :  { %17546 = vmatpush3.msra.mxu0 %v13978_v27 }
0x1c71   :  { %17547 = vmatprep.subr.mxu0 %v19363_v41 }
0x1c72   :  { %17548 = vmatpush3.msra.mxu0 %v13977_v35 }
0x1c73   :  { %17549 = vmatprep.subr.mxu0 %v19363_v41 }
0x1c74   :  { %17550 = vmatpush3.msra.mxu0 %v13976_v18  ;;  %v20935_v18 = vld [vmem:[#allocation10 + $0x5] ss:$0 sm:$0xff] }
0x1c75   :  { %17551 = vmatprep.subr.mxu0 %v19363_v41 }
0x1c76   :  { %17552 = vmatpush3.msra.mxu0 %v13975_v40 }
0x1c77   :  { %17553 = vmatprep.subr.mxu0 %v19363_v41 }
0x1c78   :  { %17554 = vmatpush3.msra.mxu0 %v13974_v0 }
0x1c79   :  { %17555 = vmatprep.subr.mxu0 %v19363_v41 }
0x1c7a   :  { %17556 = vmatpush3.msra.mxu0 %v13973_v54 }
0x1c7b   :  { %17557 = vmatprep.subr.mxu0 %v19363_v41 }
0x1c7c   :  { %17558 = vmatpush3.msra.mxu0 %v13972_v45 }
0x1c7d   :  { %17559 = vmatprep.subr.mxu0 %v19363_v41 }
0x1c7e   :  { %17560 = vmatpush3.msra.mxu0 %v13971_v28 }
0x1c7f   :  { %17561 = vmatprep.subr.mxu0 %v19363_v41 }
0x1c80   :  { %17562 = vmatpush3.msra.mxu0 %v13970_v55 }
0x1c81   :  { %17563 = vmatprep.subr.mxu0 %v19363_v41 }
0x1c82   :  { %17564 = vmatpush3.msra.mxu0 %v13969_v25 }
0x1c83   :  { %17608 = vmatprep.subr.mxu0 %v19363_v41 }
0x1c98   :  { %v13298_v32 = vpop.f32.mrf.mxu0 }
0x1c9a   :  { %v17497_v10 = vpop.f32.mrf.mxu0 }
0x1c9b   :  { %v20939_v10 = vld [vmem:[#allocation10 + $0x7] ss:$0 sm:$0xff] }
0x1d0f   :  { %v13222_v14 = vpop.f32.mrf.mxu1 }
0x1d10   :  { %v13299_v2 = vadd.f32 %v13298_v32, %v13222_v14  ;;  %v20931_v32 = vld [vmem:[#allocation10 + $0x2] ss:$0 sm:$0xff] }
0x1d11   :  { %v17492_v3 = vpop.f32.mrf.mxu1 }
0x1d13   :  { %v13394_v8 = vpop.f32.mrf.mxu1 }
0x1d14   :  { %v13398_v47 = vadd.f32 %v13394_v8, %v13299_v2 }
0x1d15   :  { %v17502_v26 = vpop.f32.mrf.mxu1 }
0x1d17   :  { %v13491_v48 = vpop.f32.mrf.mxu0 }
0x1d18   :  { %v13495_v51 = vadd.f32 %v13491_v48, %v13398_v47  ;;  %v13576_v49 = vpop.f32.mrf.mxu1 }
0x1d19   :  { %v17507_v56 = vpop.f32.mrf.mxu0 }
0x1d1a   :  { %v13580_v4 = vadd.f32 %v13576_v49, %v13495_v51  ;;  %v17512_v5 = vpop.f32.mrf.mxu1  ;;  %v20952_v56 = vld [vmem:[#allocation10] ss:$0 sm:$0xff] }
0x1d1b   :  { %v13673_v29 = vpop.f32.mrf.mxu0  ;;  %v14113_v5 = vld [vmem:[%s21379_s13 + $0x4] sm:$0xf] }
0x1d1c   :  { %v13677_v52 = vadd.f32 %v13673_v29, %v13580_v4 }
0x1d1d   :  { %v17517_v16 = vpop.f32.mrf.mxu0 }
0x1d1f   :  { %v13770_v1 = vpop.f32.mrf.mxu1 }
0x1d20   :  { %v13774_v44 = vadd.f32 %v13770_v1, %v13677_v52  ;;  %v14102_v1 = vld [vmem:[%s21379_s13] sm:$0xf] }
0x1d21   :  { %v17522_v21 = vpop.f32.mrf.mxu1 }
0x1d23   :  { %v13867_v42 = vpop.f32.mrf.mxu0 }
0x1d24   :  { %v13871_v37 = vadd.f32 %v13867_v42, %v13774_v44  ;;  %v14278_v44 = vld [vmem:[%s21379_s13 + $0x8] sm:$0xf] }
0x1d25   :  { %v17527_v43 = vpop.f32.mrf.mxu0 }
0x1d26   :  { %v14808_v43 = vld [vmem:[%s21379_s13 + $0x20] sm:$0xf] }
0x1d27   :  { %v13964_v6 = vpop.f32.mrf.mxu1 }
0x1d28   :  { %v13968_v7 = vadd.f32 %v13964_v6, %v13871_v37  ;;  %v14368_v6 = vld [vmem:[%s21379_s13 + $0xc] sm:$0xf] }
0x1d29   :  { %v17532_v11 = vpop.f32.mrf.mxu1 }
0x1d2a   :  { %17566 = vmatmul.mubr.f32.vlgmr.msra.gmra.mxu0 %v13968_v7  ;;  %v14448_v7 = vld [vmem:[%s21379_s13 + $0x10] sm:$0xf] }
0x1d2b   :  { %17610 = vmatprep.mubr.msk.f32.mxu0 %vm18477_vm12, %v19363_v41 }
0x1dea   :  { %v14051_v23 = vpop.f32.mrf.mxu0 }
0x1deb   :  { %v14059_v24 = vmul.f32 %v14051_v23, %v14051_v23  ;;  %v14055_v59 = vsel %vm21376_vm11, %v14051_v23, 0.0 }
0x1dec   :  { %14056 = vadd.xlane.f32.xlu0 %v14055_v59  ;;  %v17567_v36 = vpop.f32.mrf.mxu0 }
0x1ded   :  { %v14060_v61 = vsel %vm21378_vm10, %v14059_v24, 0.0  ;;  %v14628_v24 = vld [vmem:[%s21379_s13 + $0x18] sm:$0xf]  ;;  %v14718_v36 = vld [vmem:[%s21379_s13 + $0x1c] sm:$0xf] }
0x1dee   :  { %14061 = vadd.xlane.f32.xlu1 %v14060_v61 }
0x1e75   :  { %v14057_v12 = vpop.xlane.xlu0 %14056 }
0x1e76   :  { %v14058_v58 = vmul.f32 0.03125, %v14057_v12 }
0x1e77   :  { %v14062_v31 = vpop.xlane.xlu1 %14061 }
0x1e78   :  { %v14064_v34 = vmul.f32 %v14058_v58, %v14058_v58  ;;  %v14063_v57 = vmul.f32 0.03125, %v14062_v31 }
0x1e7a   :  { %v14065_v22 = vsub.f32 %v14063_v57, %v14064_v34 }
0x1e7c   :  { %v14066_v13 = vmax.f32 %v14065_v22, 0.0 }
0x1e7e   :  { %v14068_v63 = vadd.f32 1e-05, %v14066_v13 }
0x1e80   :  { %17830 = vrsqrt.f32 %v14068_v63 }
0x1e8d   :  { %v17831_v38 = vpop.eup %17830 }
0x1e8e   :  { %v14070_v53 = vmul.f32 %v17831_v38, %v14067_v50 }
0x1e90   :  { %14076 = vperm.xlu0 %17803, %v14070_v53   ;;  %v14072_v60 = vmul.f32 %v14070_v53, %v14058_v58 }
0x1e92   :  { %v14073_v20 = vsub.f32 %v14071_v19, %v14072_v60 }
0x1e94   :  { %14082 = vperm.xlu1 %17804, %v14073_v20  }
0x1e98   :  { %14109 = vrot.lane.b32.xlu1 %v20907_v39, %s18458_s6 }
0x1e9c   :  { %14364 = vrot.lane.b32.xlu1 %v20911_v62, %s18481_s28 }
0x1ea0   :  { %14624 = vrot.lane.b32.xlu1 %v20915_v46, %s18432_s26 }
0x1ea4   :  { %14804 = vrot.lane.b32.xlu1 %v20919_v17, %s18476_s18 }
0x1f0b   :  { %v14077_v30 = vpop.permute.xlu0 %14076 }
0x1f0c   :  { %v14079_v33 = vmul.f32 %v14077_v30, %v14051_v23  ;;  %v14538_v23 = vld [vmem:[%s21379_s13 + $0x14] sm:$0xf] }
0x1f0f   :  { %v14083_v15 = vpop.permute.xlu1 %14082 }
0x1f10   :  { %v20925_v9 = vadd.f32 %v14083_v15, %v14079_v33 }
0x1f12   :  { %vm14086_vm7 = vcmp.gt.f32.partialorder %v20925_v9, 0.0  ;;  %v14087_v27 = vmul.f32 0.2, %v20925_v9 }
0x1f13   :  { %v14110_v40 = vpop.permute.xlu1 %14109 }
0x1f14   :  { %v14088_v35 = vsel %vm14086_vm7, %v20925_v9, %v14087_v27 }
0x1f15   :  { %14090 = vrot.lane.b32.xlu0 %v14088_v35, %s18482_s1 }
0x1f17   :  { %v14365_v54 = vpop.permute.xlu1 %14364 }
0x1f19   :  { %14274 = vrot.lane.b32.xlu0 %v20931_v32, %s18457_s0 }
0x1f1b   :  { %v14625_v14 = vpop.permute.xlu1 %14624 }
0x1f1d   :  { %14534 = vrot.lane.b32.xlu0 %v20935_v18, %s18483_s2 }
0x1f1f   :  { %v14805_v26 = vpop.permute.xlu1 %14804 }
0x1f21   :  { %14714 = vrot.lane.b32.xlu0 %v20939_v10, %s18475_s16 }
0x1f87   :  { %v14091_v0 = vpop.permute.xlu0 %14090 }
0x1f88   :  { %14094 = vst.msk [vmem:[#allocation7] sm:$0xf] %vm14093_vm15, %v14091_v0 }
0x1f8b   :  { %v14275_v45 = vpop.permute.xlu0 %14274 }
0x1f8f   :  { %v14095_v28 = vld [vmem:[#allocation7] sm:$0xf]  ;;  %v14535_v2 = vpop.permute.xlu0 %14534 }
0x1f90   :  { %v14277_v55 = vmul.f32 %v14275_v45, %v14095_v28  ;;  %v14112_v25 = vmul.f32 %v14110_v40, %v14095_v28  ;;  %v14367_v3 = vmul.f32 %v14365_v54, %v14095_v28  ;;  %v14627_v8 = vmul.f32 %v14625_v14, %v14095_v28 }
0x1f91   :  { %v14537_v47 = vmul.f32 %v14535_v2, %v14095_v28  ;;  %v14807_v51 = vmul.f32 %v14805_v26, %v14095_v28  ;;  %v14101_v16 = vmul.f32 %v20952_v56, %v14095_v28 }
0x1f92   :  { %14280 = vrot.lane.b32.xlu1 %v14277_v55, %s18466_s7  ;;  %14115 = vrot.lane.b32.xlu0 %v14112_v25, %s18465_s21 }
0x1f93   :  { %v14715_v48 = vpop.permute.xlu0 %14714 }
0x1f94   :  { %v14717_v49 = vmul.f32 %v14715_v48, %v14095_v28 }
0x1f96   :  { %14450 = vrot.lane.b32.xlu1 %v14095_v28, %s18484_s30  ;;  %14370 = vrot.lane.b32.xlu0 %v14367_v3, %s18485_s12 }
0x1f9a   :  { %14630 = vrot.lane.b32.xlu1 %v14627_v8, %s18479_s20  ;;  %14540 = vrot.lane.b32.xlu0 %v14537_v47, %s18486_s10 }
0x1f9e   :  { %14810 = vrot.lane.b32.xlu1 %v14807_v51, %s18480_s23  ;;  %14720 = vrot.lane.b32.xlu0 %v14717_v49, %s18478_s4 }
0x2004   :  { %v14281_v4 = vpop.permute.xlu1 %14280  ;;  %v14116_v29 = vpop.permute.xlu0 %14115 }
0x2005   :  { %17569 = vmatpush3.msk.msra.mxu1 %vm501_vm2, %v14116_v29 }
0x2006   :  { %17571 = vmatmul.mubr.msk.f32.vlgmr.msra.gmra.mxu1 %vm595_vm9, %v14113_v5  ;;  %17573 = vmatprep.subr.mxu1 %v19363_v41  ;;  %v14901_v5 = vld [vmem:[%s21380_s11] sm:$0xf] }
0x2007   :  { %17574 = vmatpush3.msk.msra.mxu1 %vm501_vm2, %v14101_v16  ;;  %17575 = vmatprep.mubr.msk.f32.mxu1 %vm18477_vm12, %v19363_v41 }
0x2008   :  { %v14451_v52 = vpop.permute.xlu1 %14450  ;;  %17578 = vmatprep.subr.mxu1 %v19363_v41  ;;  %v14371_v42 = vpop.permute.xlu0 %14370 }
0x200a   :  { %17576 = vmatmul.mubr.msk.f32.vlgmr.msra.gmra.mxu1 %vm595_vm9, %v14102_v1 }
0x200b   :  { %17579 = vmatpush3.msk.msra.mxu1 %vm501_vm2, %v14281_v4  ;;  %17580 = vmatprep.mubr.msk.f32.mxu1 %vm18477_vm12, %v19363_v41 }
0x200c   :  { %v14631_v21 = vpop.permute.xlu1 %14630  ;;  %17583 = vmatprep.subr.mxu1 %v19363_v41  ;;  %v14541_v11 = vpop.permute.xlu0 %14540 }
0x200e   :  { %17581 = vmatmul.mubr.msk.f32.vlgmr.msra.gmra.mxu1 %vm595_vm9, %v14278_v44 }
0x200f   :  { %17584 = vmatpush3.msk.msra.mxu1 %vm501_vm2, %v14371_v42  ;;  %17585 = vmatprep.mubr.msk.f32.mxu1 %vm18477_vm12, %v19363_v41 }
0x2010   :  { %v14811_v37 = vpop.permute.xlu1 %14810  ;;  %17588 = vmatprep.subr.mxu1 %v19363_v41  ;;  %v14721_v59 = vpop.permute.xlu0 %14720 }
0x2011   :  { %17609 = vmatpush3.msk.msra.mxu0 %vm501_vm2, %v14811_v37  ;;  %v14921_v37 = vrot.slane %v20925_v9, 4 }
0x2012   :  { %17611 = vmatmul.mubr.msk.f32.vlgmr.msra.gmra.mxu0 %vm595_vm9, %v14808_v43  ;;  %17618 = vmatprep.subr.mxu0 %v19363_v41 }
0x2013   :  { %17586 = vmatmul.mubr.msk.f32.vlgmr.msra.gmra.mxu1 %vm595_vm9, %v14368_v6  ;;  %17620 = vmatprep.mubr.msk.f32.mxu0 %vm18477_vm12, %v19363_v41 }
0x2014   :  { %17589 = vmatpush3.msk.msra.mxu1 %vm501_vm2, %v14451_v52  ;;  %17590 = vmatprep.mubr.msk.f32.mxu1 %vm18477_vm12, %v19363_v41  ;;  %v14905_v52 = vld [vmem:[%s21381_s17] sm:$0xf] }
0x2015   :  { %17593 = vmatprep.subr.mxu1 %v19363_v41 }
0x2017   :  { %17591 = vmatmul.mubr.msk.f32.vlgmr.msra.gmra.mxu1 %vm595_vm9, %v14448_v7 }
0x2018   :  { %17594 = vmatpush3.msk.msra.mxu1 %vm501_vm2, %v14541_v11  ;;  %17595 = vmatprep.mubr.msk.f32.mxu1 %vm18477_vm12, %v19363_v41 }
0x2019   :  { %17598 = vmatprep.subr.mxu1 %v19363_v41 }
0x201b   :  { %17596 = vmatmul.mubr.msk.f32.vlgmr.msra.gmra.mxu1 %vm595_vm9, %v14538_v23 }
0x201c   :  { %17599 = vmatpush3.msk.msra.mxu1 %vm501_vm2, %v14631_v21  ;;  %17600 = vmatprep.mubr.msk.f32.mxu1 %vm18477_vm12, %v19363_v41 }
0x201d   :  { %17603 = vmatprep.subr.mxu1 %v19363_v41 }
0x201f   :  { %17601 = vmatmul.mubr.msk.f32.vlgmr.msra.gmra.mxu1 %vm595_vm9, %v14628_v24 }
0x2020   :  { %17604 = vmatpush3.msk.msra.mxu1 %vm501_vm2, %v14721_v59  ;;  %17605 = vmatprep.mubr.msk.f32.mxu1 %vm18477_vm12, %v19363_v41 }
0x2021   :  { %17613 = vmatprep.subr.mxu1 %v19363_v41 }
0x2023   :  { %17606 = vmatmul.mubr.msk.f32.vlgmr.msra.gmra.mxu1 %vm595_vm9, %v14718_v36 }
0x2024   :  { %17615 = vmatprep.mubr.msk.f32.mxu1 %vm18477_vm12, %v19363_v41 }
0x20c6   :  { %v14188_v61 = vpop.f32.mrf.mxu1 }
0x20c8   :  { %v17572_v12 = vpop.f32.mrf.mxu1 }
0x20ca   :  { %v14264_v58 = vpop.f32.mrf.mxu1 }
0x20cb   :  { %v14265_v53 = vadd.f32 %v14264_v58, %v14188_v61 }
0x20cc   :  { %v17577_v31 = vpop.f32.mrf.mxu1 }
0x20ce   :  { %v14353_v34 = vpop.f32.mrf.mxu1 }
0x20cf   :  { %v14357_v60 = vadd.f32 %v14353_v34, %v14265_v53  ;;  %v14939_v34 = vld [vmem:[%s21382_s27] sm:$0xf] }
0x20d0   :  { %v17582_v57 = vpop.f32.mrf.mxu1 }
0x20d2   :  { %v14883_v22 = vpop.f32.mrf.mxu0 }
0x20d3   :  { %v14443_v13 = vpop.f32.mrf.mxu1 }
0x20d4   :  { %v17612_v63 = vpop.f32.mrf.mxu0  ;;  %v14447_v30 = vadd.f32 %v14443_v13, %v14357_v60 }
0x20d5   :  { %v17587_v50 = vpop.f32.mrf.mxu1 }
0x20d7   :  { %v14523_v38 = vpop.f32.mrf.mxu1 }
0x20d8   :  { %v14527_v15 = vadd.f32 %v14523_v38, %v14447_v30  ;;  %v14950_v30 = vld [vmem:[%s21382_s27 + $0x4] sm:$0xf] }
0x20d9   :  { %v17592_v19 = vpop.f32.mrf.mxu1 }
0x20db   :  { %v14613_v20 = vpop.f32.mrf.mxu1 }
0x20dc   :  { %v14617_v35 = vadd.f32 %v14613_v20, %v14527_v15 }
0x20dd   :  { %v17597_v33 = vpop.f32.mrf.mxu1 }
0x20df   :  { %v14703_v27 = vpop.f32.mrf.mxu1 }
0x20e0   :  { %v14707_v0 = vadd.f32 %v14703_v27, %v14617_v35  ;;  %v15115_v27 = vld [vmem:[%s21382_s27 + $0x8] sm:$0xf]  ;;  %v15205_v35 = vld [vmem:[%s21382_s27 + $0xc] sm:$0xf] }
0x20e1   :  { %v17602_v40 = vpop.f32.mrf.mxu1 }
0x20e3   :  { %v14793_v54 = vpop.f32.mrf.mxu1 }
0x20e4   :  { %v14797_v45 = vadd.f32 %v14793_v54, %v14707_v0  ;;  %v15285_v54 = vld [vmem:[%s21382_s27 + $0x10] sm:$0xf] }
0x20e5   :  { %v17607_v28 = vpop.f32.mrf.mxu1 }
0x20e6   :  { %v14887_v55 = vadd.f32 %v14883_v22, %v14797_v45  ;;  %v15375_v45 = vld [vmem:[%s21382_s27 + $0x14] sm:$0xf] }
0x20e8   :  { %v14889_v25 = vsel %vm14888_vm8, %v14887_v55, 0.0  ;;  %v14893_v14 = vmul.f32 %v14887_v55, %v14887_v55 }
0x20e9   :  { %14890 = vadd.xlane.f32.xlu0 %v14889_v25  ;;  %v15555_v25 = vld [vmem:[%s21382_s27 + $0x1c] sm:$0xf] }
0x20ea   :  { %v14894_v2 = vsel %vm14888_vm8, %v14893_v14, 0.0 }
0x20eb   :  { %14895 = vadd.xlane.f32.xlu1 %v14894_v2 }
0x2172   :  { %v14891_v3 = vpop.xlane.xlu0 %14890 }
0x2173   :  { %v14892_v8 = vmul.f32 0.03125, %v14891_v3  ;;  %v15645_v3 = vld [vmem:[%s21382_s27 + $0x20] sm:$0xf] }
0x2174   :  { %v14896_v47 = vpop.xlane.xlu1 %14895 }
0x2175   :  { %v14898_v26 = vmul.f32 %v14892_v8, %v14892_v8  ;;  %v14897_v48 = vmul.f32 0.03125, %v14896_v47 }
0x2177   :  { %v14899_v51 = vsub.f32 %v14897_v48, %v14898_v26 }
0x2179   :  { %v14900_v49 = vmax.f32 %v14899_v51, 0.0 }
0x217b   :  { %v14902_v4 = vadd.f32 1e-05, %v14900_v49 }
0x217d   :  { %17832 = vrsqrt.f32 %v14902_v4 }
0x218a   :  { %v17833_v29 = vpop.eup %17832 }
0x218b   :  { %v14904_v16 = vmul.f32 %v17833_v29, %v14901_v5 }
0x218d   :  { %14910 = vperm.xlu0 %17803, %v14904_v16   ;;  %v14906_v1 = vmul.f32 %v14904_v16, %v14892_v8 }
0x218f   :  { %v14907_v21 = vsub.f32 %v14905_v52, %v14906_v1 }
0x2191   :  { %14916 = vperm.xlu1 %17804, %v14907_v21  }
0x2195   :  { %14946 = vrot.lane.b32.xlu1 %v20907_v39, %s18458_s6 }
0x2199   :  { %15201 = vrot.lane.b32.xlu1 %v20911_v62, %s18481_s28 }
0x219d   :  { %15461 = vrot.lane.b32.xlu1 %v20915_v46, %s18432_s26 }
0x21a1   :  { %15641 = vrot.lane.b32.xlu1 %v20919_v17, %s18476_s18 }
0x2208   :  { %v14911_v44 = vpop.permute.xlu0 %14910 }
0x2209   :  { %v14913_v42 = vmul.f32 %v14911_v44, %v14887_v55  ;;  %v15465_v55 = vld [vmem:[%s21382_s27 + $0x18] sm:$0xf] }
0x220c   :  { %v14917_v43 = vpop.permute.xlu1 %14916 }
0x220d   :  { %v14919_v6 = vadd.f32 %v14917_v43, %v14913_v42 }
0x220f   :  { %v14923_v7 = vadd.f32 %v14921_v37, %v14919_v6 }
0x2210   :  { %v14947_v9 = vpop.permute.xlu1 %14946 }
0x2211   :  { %v14925_v11 = vmul.f32 0.2, %v14923_v7  ;;  %vm14924_vm14 = vcmp.gt.f32.partialorder %v14923_v7, 0.0 }
0x2213   :  { %v21022_v23 = vsel %vm14924_vm14, %v14923_v7, %v14925_v11 }
0x2214   :  { %14928 = vrot.lane.b32.xlu0 %v21022_v23, %s18482_s1  ;;  %v15202_v59 = vpop.permute.xlu1 %15201 }
0x2218   :  { %15111 = vrot.lane.b32.xlu0 %v20931_v32, %s18457_s0  ;;  %v15462_v57 = vpop.permute.xlu1 %15461 }
0x221c   :  { %15371 = vrot.lane.b32.xlu0 %v20935_v18, %s18483_s2  ;;  %v15642_v38 = vpop.permute.xlu1 %15641 }
0x2220   :  { %15551 = vrot.lane.b32.xlu0 %v20939_v10, %s18475_s16 }
0x2286   :  { %v14929_v24 = vpop.permute.xlu0 %14928 }
0x2287   :  { %14931 = vst.msk [vmem:[#allocation6] sm:$0xf] %vm14093_vm15, %v14929_v24 }
0x228a   :  { %v15112_v36 = vpop.permute.xlu0 %15111 }
0x228e   :  { %v14932_v61 = vld [vmem:[#allocation6] sm:$0xf]  ;;  %v15372_v22 = vpop.permute.xlu0 %15371 }
0x228f   :  { %v15114_v12 = vmul.f32 %v15112_v36, %v14932_v61  ;;  %v14938_v58 = vmul.f32 %v20952_v56, %v14932_v61  ;;  %v14949_v31 = vmul.f32 %v14947_v9, %v14932_v61  ;;  %v15204_v13 = vmul.f32 %v15202_v59, %v14932_v61 }
0x2290   :  { %v15464_v63 = vmul.f32 %v15462_v57, %v14932_v61  ;;  %v15374_v50 = vmul.f32 %v15372_v22, %v14932_v61  ;;  %v15644_v19 = vmul.f32 %v15642_v38, %v14932_v61 }
0x2291   :  { %15117 = vrot.lane.b32.xlu1 %v15114_v12, %s18466_s7  ;;  %17619 = vmatpush3.msk.msra.mxu0 %vm501_vm2, %v14938_v58 }
0x2292   :  { %14952 = vrot.lane.b32.xlu0 %v14949_v31, %s18465_s21  ;;  %17621 = vmatmul.mubr.msk.f32.vlgmr.msra.gmra.mxu0 %vm595_vm9, %v14939_v34  ;;  %v15552_v53 = vpop.permute.xlu0 %15551 }
0x2293   :  { %17628 = vmatprep.subr.mxu0 %v19363_v41  ;;  %17630 = vmatprep.mubr.msk.f32.mxu0 %vm18477_vm12, %v19363_v41  ;;  %v15554_v60 = vmul.f32 %v15552_v53, %v14932_v61 }
0x2295   :  { %15287 = vrot.lane.b32.xlu1 %v14932_v61, %s18484_s30 }
0x2296   :  { %15207 = vrot.lane.b32.xlu0 %v15204_v13, %s18485_s12 }
0x2299   :  { %15467 = vrot.lane.b32.xlu1 %v15464_v63, %s18479_s20 }
0x229a   :  { %15377 = vrot.lane.b32.xlu0 %v15374_v50, %s18486_s10 }
0x229d   :  { %15647 = vrot.lane.b32.xlu1 %v15644_v19, %s18480_s23 }
0x229e   :  { %15557 = vrot.lane.b32.xlu0 %v15554_v60, %s18478_s4  ;;  %v15737_v60 = vld [vmem:[%s21383_s5] sm:$0xf] }
0x2303   :  { %v15118_v20 = vpop.permute.xlu1 %15117 }
0x2304   :  { %v14953_v33 = vpop.permute.xlu0 %14952 }
0x2305   :  { %17614 = vmatpush3.msk.msra.mxu1 %vm501_vm2, %v14953_v33  ;;  %v15741_v33 = vld [vmem:[%s21384_s29] sm:$0xf] }
0x2306   :  { %17616 = vmatmul.mubr.msk.f32.vlgmr.msra.gmra.mxu1 %vm595_vm9, %v14950_v30  ;;  %17623 = vmatprep.subr.mxu1 %v19363_v41 }
0x2307   :  { %17624 = vmatpush3.msk.msra.mxu1 %vm501_vm2, %v15118_v20  ;;  %v15288_v15 = vpop.permute.xlu1 %15287  ;;  %17625 = vmatprep.mubr.msk.f32.mxu1 %vm18477_vm12, %v19363_v41 }
0x2308   :  { %v15208_v40 = vpop.permute.xlu0 %15207  ;;  %17633 = vmatprep.subr.mxu1 %v19363_v41 }
0x2309   :  { %17629 = vmatpush3.msk.msra.mxu0 %vm501_vm2, %v15208_v40 }
0x230a   :  { %17626 = vmatmul.mubr.msk.f32.vlgmr.msra.gmra.mxu1 %vm595_vm9, %v15115_v27  ;;  %17631 = vmatmul.mubr.msk.f32.vlgmr.msra.gmra.mxu0 %vm595_vm9, %v15205_v35 }
0x230b   :  { %17634 = vmatpush3.msk.msra.mxu1 %vm501_vm2, %v15288_v15  ;;  %17638 = vmatprep.subr.mxu0 %v19363_v41  ;;  %v15468_v0 = vpop.permute.xlu1 %15467 }
0x230c   :  { %v15378_v28 = vpop.permute.xlu0 %15377  ;;  %17635 = vmatprep.mubr.msk.f32.mxu1 %vm18477_vm12, %v19363_v41  ;;  %17640 = vmatprep.mubr.msk.f32.mxu0 %vm18477_vm12, %v19363_v41 }
0x230d   :  { %17639 = vmatpush3.msk.msra.mxu0 %vm501_vm2, %v15378_v28  ;;  %17643 = vmatprep.subr.mxu1 %v19363_v41 }
0x230e   :  { %17636 = vmatmul.mubr.msk.f32.vlgmr.msra.gmra.mxu1 %vm595_vm9, %v15285_v54  ;;  %17641 = vmatmul.mubr.msk.f32.vlgmr.msra.gmra.mxu0 %vm595_vm9, %v15375_v45 }
0x230f   :  { %17644 = vmatpush3.msk.msra.mxu1 %vm501_vm2, %v15468_v0  ;;  %17648 = vmatprep.subr.mxu0 %v19363_v41  ;;  %v15648_v2 = vpop.permute.xlu1 %15647 }
0x2310   :  { %v15558_v14 = vpop.permute.xlu0 %15557  ;;  %17645 = vmatprep.mubr.msk.f32.mxu1 %vm18477_vm12, %v19363_v41  ;;  %17650 = vmatprep.mubr.msk.f32.mxu0 %vm18477_vm12, %v19363_v41 }
0x2311   :  { %17649 = vmatpush3.msk.msra.mxu0 %vm501_vm2, %v15558_v14  ;;  %17653 = vmatprep.subr.mxu1 %v19363_v41 }
0x2312   :  { %17646 = vmatmul.mubr.msk.f32.vlgmr.msra.gmra.mxu1 %vm595_vm9, %v15465_v55  ;;  %17651 = vmatmul.mubr.msk.f32.vlgmr.msra.gmra.mxu0 %vm595_vm9, %v15555_v25 }
0x2313   :  { %17654 = vmatpush3.msk.msra.mxu1 %vm501_vm2, %v15648_v2  ;;  %17655 = vmatprep.mubr.msk.f32.mxu1 %vm18477_vm12, %v19363_v41 }
0x2314   :  { %17663 = vmatprep.subr.mxu1 %v19363_v41  ;;  %17658 = vmatprep.subr.mxu0 %v19363_v41 }
0x2315   :  { %17660 = vmatprep.mubr.msk.f32.mxu0 %vm18477_vm12, %v19363_v41 }
0x2316   :  { %17656 = vmatmul.mubr.msk.f32.vlgmr.msra.gmra.mxu1 %vm595_vm9, %v15645_v3  ;;  %v15771_v3 = vld [vmem:[%s18690_s3] sm:$0xf] }
0x2317   :  { %17665 = vmatprep.mubr.msk.f32.mxu1 %vm18477_vm12, %v19363_v41 }
0x2352   :  { %v15101_v8 = vpop.f32.mrf.mxu0 }
0x2354   :  { %v17622_v47 = vpop.f32.mrf.mxu0 }
0x23c6   :  { %v15025_v26 = vpop.f32.mrf.mxu1 }
0x23c7   :  { %v15102_v51 = vadd.f32 %v15101_v8, %v15025_v26 }
0x23c8   :  { %v17617_v48 = vpop.f32.mrf.mxu1 }
0x23ca   :  { %v15190_v49 = vpop.f32.mrf.mxu1  ;;  %v15280_v4 = vpop.f32.mrf.mxu0 }
0x23cb   :  { %v15194_v5 = vadd.f32 %v15190_v49, %v15102_v51 }
0x23cc   :  { %v17627_v29 = vpop.f32.mrf.mxu1  ;;  %v17632_v16 = vpop.f32.mrf.mxu0 }
0x23cd   :  { %v15284_v52 = vadd.f32 %v15280_v4, %v15194_v5  ;;  %v15782_v4 = vld [vmem:[%s18690_s3 + $0x4] sm:$0xf]  ;;  %v15947_v16 = vld [vmem:[%s18690_s3 + $0x8] sm:$0xf] }
0x23ce   :  { %v15360_v1 = vpop.f32.mrf.mxu1  ;;  %v15450_v21 = vpop.f32.mrf.mxu0 }
0x23cf   :  { %v15364_v44 = vadd.f32 %v15360_v1, %v15284_v52  ;;  %v16037_v52 = vld [vmem:[%s18690_s3 + $0xc] sm:$0xf] }
0x23d0   :  { %v17637_v42 = vpop.f32.mrf.mxu1  ;;  %v17642_v43 = vpop.f32.mrf.mxu0 }
0x23d1   :  { %v15454_v37 = vadd.f32 %v15450_v21, %v15364_v44  ;;  %v16117_v44 = vld [vmem:[%s18690_s3 + $0x10] sm:$0xf]  ;;  %v16207_v42 = vld [vmem:[%s18690_s3 + $0x14] sm:$0xf] }
0x23d2   :  { %v15540_v6 = vpop.f32.mrf.mxu1  ;;  %v15630_v7 = vpop.f32.mrf.mxu0 }
0x23d3   :  { %v15544_v11 = vadd.f32 %v15540_v6, %v15454_v37  ;;  %v16297_v37 = vld [vmem:[%s18690_s3 + $0x18] sm:$0xf]  ;;  %v16387_v6 = vld [vmem:[%s18690_s3 + $0x1c] sm:$0xf] }
0x23d4   :  { %v17647_v9 = vpop.f32.mrf.mxu1  ;;  %v17652_v24 = vpop.f32.mrf.mxu0 }
0x23d5   :  { %v15634_v59 = vadd.f32 %v15630_v7, %v15544_v11  ;;  %v16477_v9 = vld [vmem:[%s18690_s3 + $0x20] sm:$0xf] }
0x23d6   :  { %v15720_v36 = vpop.f32.mrf.mxu1 }
0x23d7   :  { %v15724_v61 = vadd.f32 %v15720_v36, %v15634_v59 }
0x23d8   :  { %v17657_v12 = vpop.f32.mrf.mxu1 }
0x23d9   :  { %v15725_v58 = vsel %vm14888_vm8, %v15724_v61, 0.0  ;;  %v15729_v31 = vmul.f32 %v15724_v61, %v15724_v61 }
0x23da   :  { %15726 = vadd.xlane.f32.xlu0 %v15725_v58 }
0x23db   :  { %v15730_v34 = vsel %vm14888_vm8, %v15729_v31, 0.0 }
0x23dc   :  { %15731 = vadd.xlane.f32.xlu1 %v15730_v34 }
0x2463   :  { %v15727_v57 = vpop.xlane.xlu0 %15726 }
0x2464   :  { %v15728_v22 = vmul.f32 0.03125, %v15727_v57 }
0x2465   :  { %v15732_v13 = vpop.xlane.xlu1 %15731 }
0x2466   :  { %v15734_v63 = vmul.f32 %v15728_v22, %v15728_v22  ;;  %v15733_v50 = vmul.f32 0.03125, %v15732_v13 }
0x2468   :  { %v15735_v38 = vsub.f32 %v15733_v50, %v15734_v63 }
0x246a   :  { %v15736_v53 = vmax.f32 %v15735_v38, 0.0 }
0x246c   :  { %v15738_v19 = vadd.f32 1e-05, %v15736_v53 }
0x246e   :  { %17834 = vrsqrt.f32 %v15738_v19 }
0x247b   :  { %v17835_v20 = vpop.eup %17834 }
0x247c   :  { %v15740_v30 = vmul.f32 %v17835_v20, %v15737_v60 }
0x247e   :  { %15746 = vperm.xlu0 %17803, %v15740_v30   ;;  %v15742_v15 = vmul.f32 %v15740_v30, %v15728_v22 }
0x2480   :  { %v15743_v27 = vsub.f32 %v15741_v33, %v15742_v15 }
0x2482   :  { %15752 = vperm.xlu1 %17804, %v15743_v27  }
0x2486   :  { %15778 = vrot.lane.b32.xlu1 %v20907_v39, %s18458_s6 }
0x248a   :  { %16033 = vrot.lane.b32.xlu1 %v20911_v62, %s18481_s28 }
0x248e   :  { %16293 = vrot.lane.b32.xlu1 %v20915_v46, %s18432_s26 }
0x2492   :  { %16473 = vrot.lane.b32.xlu1 %v20919_v17, %s18476_s18 }
0x24f9   :  { %v15747_v35 = vpop.permute.xlu0 %15746 }
0x24fa   :  { %v15749_v40 = vmul.f32 %v15747_v35, %v15724_v61 }
0x24fd   :  { %v15753_v0 = vpop.permute.xlu1 %15752 }
0x24fe   :  { %v15755_v54 = vadd.f32 %v15753_v0, %v15749_v40 }
0x2500   :  { %vm15756_vm0 = vcmp.gt.f32.partialorder %v15755_v54, 0.0  ;;  %v15757_v45 = vmul.f32 0.2, %v15755_v54 }
0x2501   :  { %v15779_v39 = vpop.permute.xlu1 %15778 }
0x2502   :  { %v15758_v28 = vsel %vm15756_vm0, %v15755_v54, %v15757_v45 }
0x2503   :  { %15760 = vrot.lane.b32.xlu0 %v15758_v28, %s18482_s1 }
0x2505   :  { %v16034_v46 = vpop.permute.xlu1 %16033 }
0x2507   :  { %15943 = vrot.lane.b32.xlu0 %v20931_v32, %s18457_s0 }
0x2509   :  { %v16294_v32 = vpop.permute.xlu1 %16293 }
0x250b   :  { %16203 = vrot.lane.b32.xlu0 %v20935_v18, %s18483_s2 }
0x250d   :  { %v16474_v47 = vpop.permute.xlu1 %16473 }
0x250f   :  { %16383 = vrot.lane.b32.xlu0 %v20939_v10, %s18475_s16 }
0x2575   :  { %v15761_v62 = vpop.permute.xlu0 %15760 }
0x2576   :  { %15763 = vst.msk [vmem:[#allocation7] sm:$0xf] %vm14093_vm15, %v15761_v62 }
0x2579   :  { %v15944_v17 = vpop.permute.xlu0 %15943 }
0x257d   :  { %v15764_v55 = vld [vmem:[#allocation7] sm:$0xf]  ;;  %v16204_v18 = vpop.permute.xlu0 %16203 }
0x257e   :  { %v15946_v25 = vmul.f32 %v15944_v17, %v15764_v55  ;;  %v15770_v14 = vmul.f32 %v20952_v56, %v15764_v55  ;;  %v15781_v2 = vmul.f32 %v15779_v39, %v15764_v55  ;;  %v16036_v10 = vmul.f32 %v16034_v46, %v15764_v55 }
0x257f   :  { %v16296_v56 = vmul.f32 %v16294_v32, %v15764_v55  ;;  %v16206_v8 = vmul.f32 %v16204_v18, %v15764_v55  ;;  %v16476_v48 = vmul.f32 %v16474_v47, %v15764_v55 }
0x2580   :  { %15949 = vrot.lane.b32.xlu1 %v15946_v25, %s18466_s7  ;;  %17664 = vmatpush3.msk.msra.mxu1 %vm501_vm2, %v15770_v14 }
0x2581   :  { %15784 = vrot.lane.b32.xlu0 %v15781_v2, %s18465_s21  ;;  %17666 = vmatmul.mubr.msk.f32.vlgmr.msra.gmra.mxu1 %vm595_vm9, %v15771_v3  ;;  %v16384_v26 = vpop.permute.xlu0 %16383  ;;  %v16569_v3 = vld [vmem:[%s18695_s9] sm:$0xf] }
0x2582   :  { %17673 = vmatprep.subr.mxu1 %v19363_v41  ;;  %17675 = vmatprep.mubr.msk.f32.mxu1 %vm18477_vm12, %v19363_v41  ;;  %v16386_v51 = vmul.f32 %v16384_v26, %v15764_v55 }
0x2584   :  { %16119 = vrot.lane.b32.xlu1 %v15764_v55, %s18484_s30 }
0x2585   :  { %16039 = vrot.lane.b32.xlu0 %v16036_v10, %s18485_s12  ;;  %v16573_v10 = vld [vmem:[%s18700_s14] sm:$0xf] }
0x2588   :  { %16299 = vrot.lane.b32.xlu1 %v16296_v56, %s18479_s20 }
0x2589   :  { %16209 = vrot.lane.b32.xlu0 %v16206_v8, %s18486_s10 }
0x258c   :  { %16479 = vrot.lane.b32.xlu1 %v16476_v48, %s18480_s23 }
0x258d   :  { %16389 = vrot.lane.b32.xlu0 %v16386_v51, %s18478_s4 }
0x25f2   :  { %v15950_v49 = vpop.permute.xlu1 %15949 }
0x25f3   :  { %v15785_v5 = vpop.permute.xlu0 %15784 }
0x25f4   :  { %17659 = vmatpush3.msk.msra.mxu0 %vm501_vm2, %v15785_v5 }
0x25f5   :  { %17661 = vmatmul.mubr.msk.f32.vlgmr.msra.gmra.mxu0 %vm595_vm9, %v15782_v4  ;;  %17668 = vmatprep.subr.mxu0 %v19363_v41 }
0x25f6   :  { %17669 = vmatpush3.msk.msra.mxu0 %vm501_vm2, %v15950_v49  ;;  %v16120_v29 = vpop.permute.xlu1 %16119  ;;  %17670 = vmatprep.mubr.msk.f32.mxu0 %vm18477_vm12, %v19363_v41 }
0x25f7   :  { %v16040_v1 = vpop.permute.xlu0 %16039  ;;  %17678 = vmatprep.subr.mxu0 %v19363_v41 }
0x25f8   :  { %17674 = vmatpush3.msk.msra.mxu1 %vm501_vm2, %v16040_v1 }
0x25f9   :  { %17671 = vmatmul.mubr.msk.f32.vlgmr.msra.gmra.mxu0 %vm595_vm9, %v15947_v16  ;;  %17676 = vmatmul.mubr.msk.f32.vlgmr.msra.gmra.mxu1 %vm595_vm9, %v16037_v52 }
0x25fa   :  { %17679 = vmatpush3.msk.msra.mxu0 %vm501_vm2, %v16120_v29  ;;  %17683 = vmatprep.subr.mxu1 %v19363_v41  ;;  %v16300_v21 = vpop.permute.xlu1 %16299 }
0x25fb   :  { %v16210_v43 = vpop.permute.xlu0 %16209  ;;  %17680 = vmatprep.mubr.msk.f32.mxu0 %vm18477_vm12, %v19363_v41  ;;  %17688 = vmatprep.subr.mxu0 %v19363_v41 }
0x25fc   :  { %17684 = vmatpush3.msk.msra.mxu1 %vm501_vm2, %v16210_v43  ;;  %17685 = vmatprep.mubr.msk.f32.mxu1 %vm18477_vm12, %v19363_v41 }
0x25fd   :  { %17681 = vmatmul.mubr.msk.f32.vlgmr.msra.gmra.mxu0 %vm595_vm9, %v16117_v44  ;;  %17686 = vmatmul.mubr.msk.f32.vlgmr.msra.gmra.mxu1 %vm595_vm9, %v16207_v42 }
0x25fe   :  { %17689 = vmatpush3.msk.msra.mxu0 %vm501_vm2, %v16300_v21  ;;  %17693 = vmatprep.subr.mxu1 %v19363_v41  ;;  %v16480_v11 = vpop.permute.xlu1 %16479 }
0x25ff   :  { %v16390_v7 = vpop.permute.xlu0 %16389  ;;  %17690 = vmatprep.mubr.msk.f32.mxu0 %vm18477_vm12, %v19363_v41  ;;  %17698 = vmatprep.subr.mxu0 %v19363_v41 }
0x2600   :  { %17694 = vmatpush3.msk.msra.mxu1 %vm501_vm2, %v16390_v7  ;;  %17695 = vmatprep.mubr.msk.f32.mxu1 %vm18477_vm12, %v19363_v41 }
0x2601   :  { %17691 = vmatmul.mubr.msk.f32.vlgmr.msra.gmra.mxu0 %vm595_vm9, %v16297_v37  ;;  %17696 = vmatmul.mubr.msk.f32.vlgmr.msra.gmra.mxu1 %vm595_vm9, %v16387_v6 }
0x2602   :  { %17699 = vmatpush3.msk.msra.mxu0 %vm501_vm2, %v16480_v11  ;;  %17700 = vmatprep.mubr.msk.f32.mxu0 %vm18477_vm12, %v19363_v41 }
0x2605   :  { %17701 = vmatmul.mubr.msk.f32.vlgmr.msra.gmra.mxu0 %vm595_vm9, %v16477_v9 }
0x2641   :  { %v15933_v24 = vpop.f32.mrf.mxu1 }
0x2643   :  { %v17667_v59 = vpop.f32.mrf.mxu1 }
0x26b5   :  { %v15857_v36 = vpop.f32.mrf.mxu0 }
0x26b6   :  { %v15934_v12 = vadd.f32 %v15933_v24, %v15857_v36 }
0x26b7   :  { %v17662_v61 = vpop.f32.mrf.mxu0 }
0x26b9   :  { %v16022_v58 = vpop.f32.mrf.mxu0  ;;  %v16112_v31 = vpop.f32.mrf.mxu1 }
0x26ba   :  { %v16026_v34 = vadd.f32 %v16022_v58, %v15934_v12 }
0x26bb   :  { %v17672_v57 = vpop.f32.mrf.mxu0  ;;  %v17677_v22 = vpop.f32.mrf.mxu1 }
0x26bc   :  { %v16116_v13 = vadd.f32 %v16112_v31, %v16026_v34 }
0x26bd   :  { %v16192_v63 = vpop.f32.mrf.mxu0  ;;  %v16282_v50 = vpop.f32.mrf.mxu1 }
0x26be   :  { %v16196_v38 = vadd.f32 %v16192_v63, %v16116_v13 }
0x26bf   :  { %v17682_v53 = vpop.f32.mrf.mxu0  ;;  %v17687_v19 = vpop.f32.mrf.mxu1 }
0x26c0   :  { %v16286_v41 = vadd.f32 %v16282_v50, %v16196_v38 }
0x26c1   :  { %v16372_v60 = vpop.f32.mrf.mxu0  ;;  %v16462_v20 = vpop.f32.mrf.mxu1 }
0x26c2   :  { %v16376_v30 = vadd.f32 %v16372_v60, %v16286_v41 }
0x26c3   :  { %v17692_v33 = vpop.f32.mrf.mxu0  ;;  %v17697_v15 = vpop.f32.mrf.mxu1 }
0x26c4   :  { %v16466_v27 = vadd.f32 %v16462_v20, %v16376_v30 }
0x26c5   :  { %v16552_v35 = vpop.f32.mrf.mxu0 }
0x26c6   :  { %v16556_v40 = vadd.f32 %v16552_v35, %v16466_v27 }
0x26c7   :  { %v17702_v0 = vpop.f32.mrf.mxu0 }
0x26c8   :  { %v16557_v54 = vsel %vm14888_vm8, %v16556_v40, 0.0  ;;  %v16561_v45 = vmul.f32 %v16556_v40, %v16556_v40 }
0x26c9   :  { %16558 = vadd.xlane.f32.xlu0 %v16557_v54 }
0x26ca   :  { %v16562_v28 = vsel %vm14888_vm8, %v16561_v45, 0.0 }
0x26cb   :  { %16563 = vadd.xlane.f32.xlu1 %v16562_v28 }
0x2752   :  { %v16559_v39 = vpop.xlane.xlu0 %16558 }
0x2753   :  { %v16560_v62 = vmul.f32 0.03125, %v16559_v39 }
0x2754   :  { %v16564_v46 = vpop.xlane.xlu1 %16563 }
0x2755   :  { %v16566_v17 = vmul.f32 %v16560_v62, %v16560_v62  ;;  %v16565_v55 = vmul.f32 0.03125, %v16564_v46 }
0x2757   :  { %v16567_v25 = vsub.f32 %v16565_v55, %v16566_v17 }
0x2759   :  { %v16568_v14 = vmax.f32 %v16567_v25, 0.0 }
0x275b   :  { %v16570_v2 = vadd.f32 1e-05, %v16568_v14 }
0x275d   :  { %17836 = vrsqrt.f32 %v16570_v2 }
0x276a   :  { %v17837_v32 = vpop.eup %17836 }
0x276b   :  { %v16572_v18 = vmul.f32 %v17837_v32, %v16569_v3 }
0x276d   :  { %16578 = vperm.xlu0 %17803, %v16572_v18   ;;  %v16574_v56 = vmul.f32 %v16572_v18, %v16560_v62 }
0x276f   :  { %v16575_v8 = vsub.f32 %v16573_v10, %v16574_v56 }
0x2771   :  { %16584 = vperm.xlu1 %17804, %v16575_v8  }
0x27e8   :  { %v16579_v47 = vpop.permute.xlu0 %16578 }
0x27e9   :  { %v16581_v26 = vmul.f32 %v16579_v47, %v16556_v40 }
0x27ec   :  { %v16585_v48 = vpop.permute.xlu1 %16584 }
0x27ed   :  { %v16587_v51 = vadd.f32 %v16585_v48, %v16581_v26 }
0x27ef   :  { %v16588_v49 = vadd.f32 %v16587_v51, %v21022_v23 }
0x27f1   :  { %vm16589_vm2 = vcmp.gt.f32.partialorder %v16588_v49, 0.0  ;;  %v16590_v4 = vmul.f32 0.2, %v16588_v49 }
0x27f3   :  { %v16591_v5 = vsel %vm16589_vm2, %v16588_v49, %v16590_v4 }
0x27f4   :  { %16592 = vst.msk [vmem:[%s18705_s25] sm:$0xf] %vm14888_vm8, %v16591_v5 }
0x27f5   :  { %16597 = vsyncpa [#allocation9], 1 }
0x27f6   :  { %16598 = vsyncpa [#allocation11], 1 }
0x27f7   :  { %16599 = vsyncpa [#allocation14], 1 }
0x27f8   :  { %16600 = vsyncpa [#allocation17], 1 }
0x27f9   :  { %16601 = vsyncpa [#allocation20], 1 }
0x27fa   :  { %16602 = vsyncpa [#allocation23], 1 }
0x27fb   :  { %16603 = vsyncpa [#allocation26], 1 }
0x27fc   :  { %16604 = vsyncpa [#allocation29], 1 }
0x27fd   :  { %16605 = vsyncpa [#allocation32], 1 }
0x27fe   :  { %16606 = vsyncpa [#allocation35], 1 }
0x27ff   :  { %16607 = vsyncpa [#allocation38], 1 }
0x2800   :  { %16608 = vsyncpa [#allocation41], 1 }
0x2801   :  { %16609 = vsyncpa [#allocation44], 1 }
0x2802   :  { %16610 = vsyncpa [#allocation47], 1 }

</bundles_post_ra>
